<compile_context>
chip_gen: v7x
topology: tpu7x:2x2x1
jax: 0.10.0
libtpu: 0.0.40
codegen_flags: <defaults>
</compile_context>

<pallas_src>
import functools
from collections import OrderedDict

import jax
import jax.numpy as jnp
from jax.experimental import pallas as pl
from jax.experimental.pallas import tpu as pltpu

_INV_SQRT2 = 0.7071067811865476
_ERF_OK = False    # set by _probe_erf(); False -> tanh-approx GELU (known-good lowering)
_ROLL_OK = False   # set by _probe_roll(); False -> fall back to sublane slice loads


def _probe_erf():
    """Check whether lax.erf lowers inside a Pallas TPU kernel (for exact GELU)."""
    global _ERF_OK
    try:
        def k(x_ref, o_ref):
            o_ref[...] = jax.lax.erf(x_ref[...])
        f = pl.pallas_call(k, out_shape=jax.ShapeDtypeStruct((8, 128), jnp.float32))
        jax.block_until_ready(f(jnp.zeros((8, 128), jnp.float32)))
        _ERF_OK = True
    except Exception:
        # TODO(synk): this jax/Mosaic build lacks an erf lowering; tanh-approx GELU differs from
        # torch.nn.GELU() default by ~1e-3 relative.
        _ERF_OK = False


def _probe_roll():
    """Check pltpu.roll lowers on a 3-D value along the sublane axis AND matches jnp.roll."""
    global _ROLL_OK
    try:
        def k(x_ref, o_ref):
            o_ref[...] = pltpu.roll(x_ref[...], shift=5, axis=1)
        x = jnp.arange(12 * 12 * 16, dtype=jnp.float32).reshape(12, 12, 16)
        y = pl.pallas_call(k, out_shape=jax.ShapeDtypeStruct((12, 12, 16), jnp.float32))(x)
        _ROLL_OK = bool(jnp.allclose(y, jnp.roll(x, 5, axis=1)))
    except Exception:
        _ROLL_OK = False


def _gelu(x):
    if _ERF_OK:
        return 0.5 * x * (1.0 + jax.lax.erf(x * _INV_SQRT2))   # exact GELU (torch default)
    return jax.nn.gelu(x, approximate=True)


def _round_up(x, m):
    return ((x + m - 1) // m) * m


def _pick_m_tile(m, cap=512):
    """Pick a 16-aligned M tile (bf16-safe sublane) and the padded M it divides, minimizing waste."""
    cap = max(16, (cap // 16) * 16)
    mp = _round_up(m, 16)
    if mp <= cap:
        return mp, mp
    div = max(t for t in range(16, cap + 1, 16) if mp % t == 0)
    if div >= 128:
        return div, mp                       # exact divisor -> zero pad waste
    cands = sorted({cap, max(128, (cap // 2 // 16) * 16), 128})
    pad, negt = min((_round_up(mp, t), -t) for t in cands)
    return -negt, pad


def _pick_lane_tile(n_padded):
    """n_padded is a multiple of 128 (weights pre-padded at pack time)."""
    if n_padded <= 512:
        return n_padded
    return 256 if n_padded % 256 == 0 else 128


def _pick_k_tile(k):
    """Full-extent K block when small/unaligned (no activation K-padding), else 128/256 tiles."""
    if k % 128 != 0 or k <= 512:
        return k
    return 256 if k % 256 == 0 else 128


# ----------------------------- Pallas kernels -----------------------------

def _make_linear_kernel(act, has_residual):
    def kernel(*refs):
        if has_residual:
            x_ref, w_ref, b_ref, r_ref, o_ref, acc_ref = refs
        else:
            x_ref, w_ref, b_ref, o_ref, acc_ref = refs

        @pl.when(pl.program_id(2) == 0)
        def _():
            acc_ref[...] = jnp.zeros_like(acc_ref)

        x = x_ref[...]
        if x.dtype != jnp.bfloat16:          # all call sites pass bf16; kept as a static fallback
            x = x.astype(jnp.bfloat16)
        acc_ref[...] += jnp.dot(x, w_ref[...], preferred_element_type=jnp.float32)

        @pl.when(pl.program_id(2) == pl.num_programs(2) - 1)
        def _():
            y = acc_ref[...] + b_ref[...]
            if act == "gelu":
                y = _gelu(y)
            if has_residual:
                y = y + r_ref[...].astype(jnp.float32)
            o_ref[...] = y.astype(o_ref.dtype)

    return kernel


def linear_pallas(x, lin, act=None, residual=None, out_dtype=jnp.float32, n_out=None):
    """(M, K) @ packed (K, Np) + b, optional fused GELU / residual. Equivalent to a 1x1 conv.

    Weights are pre-padded (N -> multiple of 128) and pre-cast to bf16 at pack time.  K is never
    padded: small / unaligned K uses a single full-extent block.  Output is trimmed to n_out cols
    (None keeps the zero-padded columns, useful for chaining into a K-padded next matmul).
    """
    w, b = lin['w'], lin['b']                 # (K, Np) bf16, (1, Np) f32
    M, K = x.shape
    assert w.shape[0] == K, (w.shape, x.shape)
    Np = w.shape[1]

    tm, Mp = _pick_m_tile(M, 512)
    tn = _pick_lane_tile(Np)
    tk = _pick_k_tile(K)

    xp = jnp.pad(x, ((0, Mp - M), (0, 0))) if Mp != M else x
    inputs = [xp, w, b]
    in_specs = [pl.BlockSpec((tm, tk), lambda i, j, k: (i, k)),
                pl.BlockSpec((tk, tn), lambda i, j, k: (k, j)),
                pl.BlockSpec((1, tn), lambda i, j, k: (0, j))]
    if residual is not None:
        rp = residual
        if rp.shape != (Mp, Np):
            rp = jnp.pad(rp, ((0, Mp - rp.shape[0]), (0, Np - rp.shape[1])))
        inputs.append(rp)
        in_specs.append(pl.BlockSpec((tm, tn), lambda i, j, k: (i, j)))

    out = pl.pallas_call(
        _make_linear_kernel(act, residual is not None),
        out_shape=jax.ShapeDtypeStruct((Mp, Np), out_dtype),
        grid=(Mp // tm, Np // tn, K // tk),
        in_specs=in_specs,
        out_specs=pl.BlockSpec((tm, tn), lambda i, j, k: (i, j)),
        scratch_shapes=[pltpu.VMEM((tm, tn), jnp.float32)],
        compiler_params=pltpu.CompilerParams(
            dimension_semantics=("parallel", "parallel", "arbitrary")),
    )(*inputs)

    if n_out is None:
        return out[:M] if Mp != M else out
    if Mp != M or Np != n_out:
        out = out[:M, :n_out]
    return out


def _ln_kernel(x_ref, g_ref, b_ref, o_ref, *, eps):
    x = x_ref[...].astype(jnp.float32)
    mu = jnp.mean(x, axis=-1, keepdims=True)
    xc = x - mu
    var = jnp.mean(xc * xc, axis=-1, keepdims=True)
    y = xc * jax.lax.rsqrt(var + eps)
    o_ref[...] = (y * g_ref[...] + b_ref[...]).astype(o_ref.dtype)


def layernorm_pallas(x, gamma, beta, eps=1e-5, out_dtype=jnp.float32):
    """LayerNorm over the channel (last) dim == timm LayerNorm2d on NCHW. Tiled over tokens."""
    M, C = x.shape
    cap = min(1024, max(16, (2 << 20) // (4 * C)))      # ~2 MiB f32 per block
    tm, Mp = _pick_m_tile(M, cap)
    xp = jnp.pad(x, ((0, Mp - M), (0, 0))) if Mp != M else x
    out = pl.pallas_call(
        functools.partial(_ln_kernel, eps=eps),
        out_shape=jax.ShapeDtypeStruct((Mp, C), out_dtype),
        grid=(Mp // tm,),
        in_specs=[pl.BlockSpec((tm, C), lambda i: (i, 0)),
                  pl.BlockSpec((1, C), lambda i: (0, 0)),
                  pl.BlockSpec((1, C), lambda i: (0, 0))],
        out_specs=pl.BlockSpec((tm, C), lambda i: (i, 0)),
        compiler_params=pltpu.CompilerParams(dimension_semantics=("parallel",)),
    )(xp, gamma, beta)
    return out[:M] if Mp != M else out


def _make_focal_ctx_kernel(H, W, C, kernel_sizes):
    L = len(kernel_sizes)
    pmax = max(k // 2 for k in kernel_sizes)
    Hp2, Wp2 = H + 2 * pmax, W + 2 * pmax

    def shift_w(pv, xoff):
        """Shifted (Hp2, W, C) view of the padded value starting at column xoff."""
        if xoff == 0:
            return pv[:, :W, :]
        if _ROLL_OK:
            # XLU sublane rotation (no wrap contamination: xoff + W <= Wp2).
            return pltpu.roll(pv, shift=(Wp2 - xoff) % Wp2, axis=1)[:, :W, :]
        return pv[:, xoff:xoff + W, :]

    def kernel(*refs):
        q_ref, ctx_ref, g_ref = refs[:3]
        w_refs = refs[3:3 + L]
        hw_ref, hb_ref, o_ref, pad_ref = refs[3 + L:]

        q = q_ref[0]                  # (H, W, C)
        ctx = ctx_ref[0]              # (H, W, C)
        gates = g_ref[0]              # (H, W, L+1)

        # zero only the pmax-wide halo strips; the interior is fully rewritten every focal level.
        if pmax:
            pad_ref[:pmax, :, :] = jnp.zeros((pmax, Wp2, C), jnp.float32)
            pad_ref[pmax + H:, :, :] = jnp.zeros((pmax, Wp2, C), jnp.float32)
            pad_ref[pmax:pmax + H, :pmax, :] = jnp.zeros((H, pmax, C), jnp.float32)
            pad_ref[pmax:pmax + H, pmax + W:, :] = jnp.zeros((H, pmax, C), jnp.float32)

        ctx_all = None
        for l, k in enumerate(kernel_sizes):
            p = k // 2
            pad_ref[pmax:pmax + H, pmax:pmax + W, :] = ctx   # 'same' zero-padded depthwise conv
            pv = pad_ref[...]
            w = w_refs[l][...]                               # (k, k, C) depthwise taps
            acc = None
            for dx in range(k):
                shx = shift_w(pv, pmax - p + dx)             # one W-shift per dx, reused over dy
                for dy in range(k):
                    yoff = pmax - p + dy                     # leading-dim offset: cheap
                    term = shx[yoff:yoff + H] * w[dy, dx, :]
                    acc = term if acc is None else acc + term
            ctx = _gelu(acc)                                 # focal_layers[l](ctx)
            gl = ctx * gates[:, :, l:l + 1]                  # gated accumulation
            ctx_all = gl if ctx_all is None else ctx_all + gl

        ctx_global = _gelu(jnp.mean(ctx, axis=(0, 1), keepdims=True))
        ctx_all = ctx_all + ctx_global * gates[:, :, L:L + 1]

        # h: 1x1 conv C->C on the aggregated context (bf16 MXU, f32 acc), then modulate q
        h = jnp.dot(ctx_all.reshape(H * W, C).astype(jnp.bfloat16), hw_ref[...],
                    preferred_element_type=jnp.float32) + hb_ref[...]
        o_ref[0] = (q * h.reshape(H, W, C)).astype(o_ref.dtype)

    return kernel


def focal_ctx_pallas(q, ctx, gates, dw_weights, h_w, h_b):
    """Focal modulation context aggregation, fused per image (grid over batch)."""
    # TODO(synk): tile spatially (row halo + two-pass global mean) for a non-batch parallel axis
    # and to bound VMEM at high resolutions on v7x / v5e-scoped limits.
    B, H, W, C = q.shape
    L = len(dw_weights)
    G = gates.shape[-1]
    kernel_sizes = [int(w.shape[0]) for w in dw_weights]
    pmax = max(k // 2 for k in kernel_sizes)

    in_specs = [pl.BlockSpec((1, H, W, C), lambda b: (b, 0, 0, 0)),
                pl.BlockSpec((1, H, W, C), lambda b: (b, 0, 0, 0)),
                pl.BlockSpec((1, H, W, G), lambda b: (b, 0, 0, 0))]
    for k in kernel_sizes:
        in_specs.append(pl.BlockSpec((k, k, C), lambda b: (0, 0, 0)))
    in_specs.append(pl.BlockSpec((C, C), lambda b: (0, 0)))
    in_specs.append(pl.BlockSpec((1, C), lambda b: (0, 0)))

    return pl.pallas_call(
        _make_focal_ctx_kernel(H, W, C, kernel_sizes),
        out_shape=jax.ShapeDtypeStruct((B, H, W, C), jnp.bfloat16),
        grid=(B,),
        in_specs=in_specs,
        out_specs=pl.BlockSpec((1, H, W, C), lambda b: (b, 0, 0, 0)),
        scratch_shapes=[pltpu.VMEM((H + 2 * pmax, W + 2 * pmax, C), jnp.float32)],
        compiler_params=pltpu.CompilerParams(dimension_semantics=("parallel",)),
    )(q, ctx, gates, *dw_weights, h_w, h_b)


# ----------------------------- model glue (plain JAX) -----------------------------

def patchify(x, p):
    """Non-overlapping patch extraction == Conv2d(kernel=p, stride=p, pad=0) im2col (bf16)."""
    B, H, W, C = x.shape
    x = x.astype(jnp.bfloat16)            # fuse the downcast with the relayout: half the bytes
    x = x.reshape(B, H // p, p, W // p, p, C)
    x = x.transpose(0, 1, 3, 2, 4, 5)
    return x.reshape(B, H // p, W // p, p * p * C)


def _embed(x, pdict, patch):
    """Downsample(conv kxk stride k) + LayerNorm2d (stem patch=4, stage downsample patch=2)."""
    xp = patchify(x, patch)
    B, Hs, Ws, K = xp.shape
    C = pdict['ln_g'].shape[1]
    y = linear_pallas(xp.reshape(-1, K), pdict, n_out=C)
    y = layernorm_pallas(y, pdict['ln_g'], pdict['ln_b'])
    return y.reshape(B, Hs, Ws, C)


def focalnet_block(x, blk):
    B, H, W, C = x.shape
    L = len(blk['dw_ws'])
    shortcut = x.reshape(-1, C)                                   # f32 residual stream

    # --- focal modulation branch ---
    xn = layernorm_pallas(shortcut, blk['norm1_g'], blk['norm1_b'], out_dtype=jnp.bfloat16)
    # fused f-projection (q | ctx | gates): xn is read from HBM once, one pallas_call
    f = linear_pallas(xn, blk['f'], n_out=2 * C + L + 1)
    q = f[:, :C].reshape(B, H, W, C)
    ctx = f[:, C:2 * C].reshape(B, H, W, C)
    gates = f[:, 2 * C:].reshape(B, H, W, L + 1)
    mod = focal_ctx_pallas(q, ctx, gates, blk['dw_ws'], blk['h_w'], blk['h_b'])
    x2 = linear_pallas(mod.reshape(-1, C), blk['proj'], residual=shortcut, n_out=C)

    # --- MLP branch ---
    y = layernorm_pallas(x2, blk['norm2_g'], blk['norm2_b'], out_dtype=jnp.bfloat16)
    # fc1 output keeps its zero-padded hidden columns (fc2's K rows are padded to match)
    y = linear_pallas(y, blk['fc1'], act='gelu', out_dtype=jnp.bfloat16)
    x2 = linear_pallas(y, blk['fc2'], residual=x2, n_out=C)
    return x2.reshape(B, H, W, C)


def focalnet_forward(x_nchw, params, fork_feat):
    x = jnp.transpose(x_nchw, (0, 2, 3, 1)).astype(jnp.float32)   # NCHW -> NHWC
    x = _embed(x, params['stem'], 4)                              # stem: 4x4 stride-4 conv + LN
    out = OrderedDict()
    for i, stage in enumerate(params['stages']):
        if 'down' in stage:
            x = _embed(x, stage['down'], 2)                       # 2x2 stride-2 conv + LN
        for blk in stage['blocks']:
            x = focalnet_block(x, blk)
        if i + 2 in fork_feat:
            out[f'p{i + 2}'] = jnp.transpose(x, (0, 3, 1, 2))     # back to NCHW
    return out


# ----------------------------- params: natural init + one-time packing -----------------------------

def init_params(key, in_chans, embed_dims, depths, focal_level, focal_window,
                focal_factor=2, mlp_ratio=4):
    keys = iter(jax.random.split(key, 1024))

    def nrm(shape, std=0.02):
        return jax.random.normal(next(keys), shape, jnp.float32) * std

    c0 = embed_dims[0]
    params = {'stem': {'w': nrm((4 * 4 * in_chans, c0)),
                       'b': jnp.zeros((c0,), jnp.float32),
                       'ln_g': jnp.ones((c0,), jnp.float32),
                       'ln_b': jnp.zeros((c0,), jnp.float32)}}
    stages = []
    in_dim = embed_dims[0]
    for si, (out_dim, depth) in enumerate(zip(embed_dims, depths)):
        stage = {}
        if si > 0:
            stage['down'] = {'w': nrm((2 * 2 * in_dim, out_dim)),
                             'b': jnp.zeros((out_dim,), jnp.float32),
                             'ln_g': jnp.ones((out_dim,), jnp.float32),
                             'ln_b': jnp.zeros((out_dim,), jnp.float32)}
        hidden = int(out_dim * mlp_ratio)
        blocks = []
        for _ in range(depth):
            blocks.append({
                'norm1_g': jnp.ones((out_dim,), jnp.float32),
                'norm1_b': jnp.zeros((out_dim,), jnp.float32),
                # column splits of the original f-projection Conv1x1 (q | ctx | gates)
                'q_w': nrm((out_dim, out_dim)), 'q_b': jnp.zeros((out_dim,), jnp.float32),
                'ctx_w': nrm((out_dim, out_dim)), 'ctx_b': jnp.zeros((out_dim,), jnp.float32),
                'g_w': nrm((out_dim, focal_level + 1)),
                'g_b': jnp.zeros((focal_level + 1,), jnp.float32),
                'dw_ws': [nrm((focal_factor * l + focal_window,
                               focal_factor * l + focal_window, out_dim))
                          for l in range(focal_level)],
                'h_w': nrm((out_dim, out_dim)), 'h_b': jnp.zeros((out_dim,), jnp.float32),
                'proj_w': nrm((out_dim, out_dim)), 'proj_b': jnp.zeros((out_dim,), jnp.float32),
                'norm2_g': jnp.ones((out_dim,), jnp.float32),
                'norm2_b': jnp.zeros((out_dim,), jnp.float32),
                'fc1_w': nrm((out_dim, hidden)), 'fc1_b': jnp.zeros((hidden,), jnp.float32),
                'fc2_w': nrm((hidden, out_dim)), 'fc2_b': jnp.zeros((out_dim,), jnp.float32),
            })
        stage['blocks'] = blocks
        stages.append(stage)
        in_dim = out_dim
    params['stages'] = stages
    return params


def pack_params(params):
    """One-time packing: pad weight N to 128 multiples, cast matmul weights to bf16, fuse q|ctx|gates."""
    def pack_lin(w, b, k_pad=None):
        if k_pad is not None and k_pad != w.shape[0]:
            w = jnp.pad(w, ((0, k_pad - w.shape[0]), (0, 0)))
        n = w.shape[1]
        npad = _round_up(n, 128)
        wp = jnp.pad(w, ((0, 0), (0, npad - n))).astype(jnp.bfloat16)
        bp = jnp.pad(b, (0, npad - n)).astype(jnp.float32).reshape(1, npad)
        return {'w': wp, 'b': bp}

    def pack_embed(p):
        d = pack_lin(p['w'], p['b'])
        d['ln_g'] = p['ln_g'].reshape(1, -1)
        d['ln_b'] = p['ln_b'].reshape(1, -1)
        return d

    packed = {'stem': pack_embed(params['stem']), 'stages': []}
    for stage in params['stages']:
        s = {}
        if 'down' in stage:
            s['down'] = pack_embed(stage['down'])
        blocks = []
        for blk in stage['blocks']:
            C = blk['q_w'].shape[0]
            hidden = blk['fc1_w'].shape[1]
            f_w = jnp.concatenate([blk['q_w'], blk['ctx_w'], blk['g_w']], axis=1)
            f_b = jnp.concatenate([blk['q_b'], blk['ctx_b'], blk['g_b']])
            blocks.append({
                'norm1_g': blk['norm1_g'].reshape(1, C), 'norm1_b': blk['norm1_b'].reshape(1, C),
                'f': pack_lin(f_w, f_b),
                'dw_ws': list(blk['dw_ws']),
                'h_w': blk['h_w'].astype(jnp.bfloat16),
                'h_b': blk['h_b'].reshape(1, C),
                'proj': pack_lin(blk['proj_w'], blk['proj_b']),
                'norm2_g': blk['norm2_g'].reshape(1, C), 'norm2_b': blk['norm2_b'].reshape(1, C),
                'fc1': pack_lin(blk['fc1_w'], blk['fc1_b']),
                'fc2': pack_lin(blk['fc2_w'], blk['fc2_b'], k_pad=_round_up(hidden, 128)),
            })
        s['blocks'] = blocks
        packed['stages'].append(s)
    return packed


# Pick exact-erf GELU / XLU roll if Mosaic supports them (runs at import so library users get it too).
_probe_erf()
_probe_roll()


if __name__ == "__main__":
    key = jax.random.PRNGKey(0)
    k_param, k_x = jax.random.split(key)

    # small synthetic FocalNet config (focalnet_*_srf-style semantics, reduced width/depth)
    in_chans = 3
    embed_dims = (16, 32)              # stage widths
    depths = (1, 1)                    # blocks per stage
    focal_level, focal_window = 2, 3   # depthwise kernel sizes 3, 5
    fork_feat = [2, 3]                 # -> outputs p2, p3

    params = init_params(k_param, in_chans, embed_dims, depths, focal_level, focal_window)
    packed = pack_params(params)       # one-time pad + bf16 cast, outside the forward path
    x = jax.random.normal(k_x, (2, in_chans, 32, 32), jnp.float32)   # NCHW, like PyTorch

    fwd = jax.jit(functools.partial(focalnet_forward, fork_feat=fork_feat))
    out = fwd(x, packed)
    for v in out.values():
        jax.block_until_ready(v)

    assert list(out.keys()) == ['p2', 'p3']
    assert out['p2'].shape == (2, 16, 8, 8)    # /4 stem
    assert out['p3'].shape == (2, 32, 4, 4)    # /8 after stage-1 downsample
    print("KERNEL_OK")
</pallas_src>

<mosaic_0001>
module attributes {stable_mosaic.version = 11 : i64} {
  func.func @k(%arg0: memref<8x128xf32, #tpu.memory_space<vmem>>, %arg1: memref<8x128xf32, #tpu.memory_space<vmem>>) attributes {dimension_semantics = [], scalar_prefetch = 0 : i64, scratch_operands = 0 : i64, tpu.core_type = #tpu.core_type<tc>} {
    %c0 = arith.constant 0 : index
    %c0_0 = arith.constant 0 : index
    %0 = vector.load %arg0[%c0, %c0_0] : memref<8x128xf32, #tpu.memory_space<vmem>>, vector<8x128xf32>
    %1 = math.erf %0 : vector<8x128xf32>
    %c0_1 = arith.constant 0 : index
    %c0_2 = arith.constant 0 : index
    %2 = vector.load %arg1[%c0_1, %c0_2] : memref<8x128xf32, #tpu.memory_space<vmem>>, vector<8x128xf32>
    tpu.vector_store %arg1[%c0_1, %c0_2], %1 {strides = array<i32>} : memref<8x128xf32, #tpu.memory_space<vmem>>, vector<8x128xf32>,
    return
  }
}

module attributes {stable_mosaic.version = 11 : i64} {
  func.func @k(%arg0: memref<12x12x16xf32, #tpu.memory_space<vmem>>, %arg1: memref<12x12x16xf32, #tpu.memory_space<vmem>>) attributes {dimension_semantics = [], scalar_prefetch = 0 : i64, scratch_operands = 0 : i64, tpu.core_type = #tpu.core_type<tc>} {
    %c0 = arith.constant 0 : index
    %c0_0 = arith.constant 0 : index
    %c0_1 = arith.constant 0 : index
    %0 = vector.load %arg0[%c0, %c0_0, %c0_1] : memref<12x12x16xf32, #tpu.memory_space<vmem>>, vector<12x12x16xf32>
    %c5_i32 = arith.constant 5 : i32
    %1 = tpu.dynamic_rotate %0 by %c5_i32 dim 1 : vector<12x12x16xf32>, i32 -> vector<12x12x16xf32>
    %c0_2 = arith.constant 0 : index
    %c0_3 = arith.constant 0 : index
    %c0_4 = arith.constant 0 : index
    %2 = vector.load %arg1[%c0_2, %c0_3, %c0_4] : memref<12x12x16xf32, #tpu.memory_space<vmem>>, vector<12x12x16xf32>
    tpu.vector_store %arg1[%c0_2, %c0_3, %c0_4], %1 {strides = array<i32>} : memref<12x12x16xf32, #tpu.memory_space<vmem>>, vector<12x12x16xf32>,
    return
  }
}

module attributes {stable_mosaic.version = 11 : i64} {
  func.func @kernel(%arg0: i32, %arg1: i32, %arg2: i32, %arg3: memref<128x48xbf16, #tpu.memory_space<vmem>>, %arg4: memref<48x128xbf16, #tpu.memory_space<vmem>>, %arg5: memref<1x128xf32, #tpu.memory_space<vmem>>, %arg6: memref<128x128xf32, #tpu.memory_space<vmem>>, %arg7: memref<128x128xf32, #tpu.memory_space<vmem>>) attributes {dimension_semantics = [#tpu.dimension_semantics<parallel>, #tpu.dimension_semantics<parallel>, #tpu.dimension_semantics<arbitrary>], iteration_bounds = array<i64: 1, 1, 1>, scalar_prefetch = 0 : i64, scratch_operands = 1 : i64, tpu.core_type = #tpu.core_type<tc>, window_params = [{transform_indices = @transform_0, window_bounds = array<i64: 128, 48>}, {transform_indices = @transform_1, window_bounds = array<i64: 48, 128>}, {transform_indices = @transform_2, window_bounds = array<i64: 1, 128>}, {transform_indices = @transform_3, window_bounds = array<i64: 128, 128>}]} {
    %c0_i32 = arith.constant 0 : i32
    %0 = arith.cmpi eq, %arg2, %c0_i32 : i32
    %1 = arith.extui %0 : i1 to i32
    %c0_i32_0 = arith.constant 0 : i32
    %2 = arith.cmpi ne, %1, %c0_i32_0 : i32
    scf.if %2 {
      %cst_10 = arith.constant 0.000000e+00 : f32
      %12 = vector.broadcast %cst_10 : f32 to vector<128x128xf32>
      %c0_11 = arith.constant 0 : index
      %c0_12 = arith.constant 0 : index
      %13 = vector.load %arg7[%c0_11, %c0_12] : memref<128x128xf32, #tpu.memory_space<vmem>>, vector<128x128xf32>
      tpu.vector_store %arg7[%c0_11, %c0_12], %12 {strides = array<i32>} : memref<128x128xf32, #tpu.memory_space<vmem>>, vector<128x128xf32>,
    } else {
    }
    %c0 = arith.constant 0 : index
    %c0_1 = arith.constant 0 : index
    %3 = vector.load %arg3[%c0, %c0_1] : memref<128x48xbf16, #tpu.memory_space<vmem>>, vector<128x48xbf16>
    %c0_2 = arith.constant 0 : index
    %c0_3 = arith.constant 0 : index
    %4 = vector.load %arg7[%c0_2, %c0_3] : memref<128x128xf32, #tpu.memory_space<vmem>>, vector<128x128xf32>
    %c0_4 = arith.constant 0 : index
    %c0_5 = arith.constant 0 : index
    %5 = vector.load %arg4[%c0_4, %c0_5] : memref<48x128xbf16, #tpu.memory_space<vmem>>, vector<48x128xbf16>
    %cst = arith.constant dense<0.000000e+00> : vector<128x128xf32>
    %6 = tpu.matmul %3, %5, %cst {dimension_numbers = #tpu.dot_dimension_numbers<[1], [0], [0], [1], [0, 0, 1, 1], [], []>} : vector<128x48xbf16>, vector<48x128xbf16>, vector<128x128xf32> -> vector<128x128xf32>
    %7 = arith.addf %4, %6 : vector<128x128xf32>
    %c0_6 = arith.constant 0 : index
    %c0_7 = arith.constant 0 : index
    %8 = vector.load %arg7[%c0_6, %c0_7] : memref<128x128xf32, #tpu.memory_space<vmem>>, vector<128x128xf32>
    tpu.vector_store %arg7[%c0_6, %c0_7], %7 {strides = array<i32>} : memref<128x128xf32, #tpu.memory_space<vmem>>, vector<128x128xf32>,
    %c0_i32_8 = arith.constant 0 : i32
    %9 = arith.cmpi eq, %arg2, %c0_i32_8 : i32
    %10 = arith.extui %9 : i1 to i32
    %c0_i32_9 = arith.constant 0 : i32
    %11 = arith.cmpi ne, %10, %c0_i32_9 : i32
    scf.if %11 {
      %c0_10 = arith.constant 0 : index
      %c0_11 = arith.constant 0 : index
      %12 = vector.load %arg7[%c0_10, %c0_11] : memref<128x128xf32, #tpu.memory_space<vmem>>, vector<128x128xf32>
      %c0_12 = arith.constant 0 : index
      %c0_13 = arith.constant 0 : index
      %13 = vector.load %arg5[%c0_12, %c0_13] : memref<1x128xf32, #tpu.memory_space<vmem>>, vector<1x128xf32>
      %14 = vector.broadcast %13 : vector<1x128xf32> to vector<128x128xf32>
      %15 = arith.addf %12, %14 : vector<128x128xf32>
      %c0_14 = arith.constant 0 : index
      %c0_15 = arith.constant 0 : index
      %16 = vector.load %arg6[%c0_14, %c0_15] : memref<128x128xf32, #tpu.memory_space<vmem>>, vector<128x128xf32>
      tpu.vector_store %arg6[%c0_14, %c0_15], %15 {strides = array<i32>} : memref<128x128xf32, #tpu.memory_space<vmem>>, vector<128x128xf32>,
    } else {
    }
    return
  }
  func.func @transform_0(%arg0: i32, %arg1: i32, %arg2: i32) -> (i32, i32) {
    %c0_i32 = arith.constant 0 : i32
    return %arg0, %arg2 : i32, i32
  }
  func.func @transform_1(%arg0: i32, %arg1: i32, %arg2: i32) -> (i32, i32) {
    %c0_i32 = arith.constant 0 : i32
    return %arg2, %arg1 : i32, i32
  }
  func.func @transform_2(%arg0: i32, %arg1: i32, %arg2: i32) -> (i32, i32) {
    %c0_i32 = arith.constant 0 : i32
    %c0_i32_0 = arith.constant 0 : i32
    return %c0_i32, %arg1 : i32, i32
  }
  func.func @transform_3(%arg0: i32, %arg1: i32, %arg2: i32) -> (i32, i32) {
    %c0_i32 = arith.constant 0 : i32
    return %arg0, %arg1 : i32, i32
  }
}

module attributes {stable_mosaic.version = 11 : i64} {
  func.func @_ln_kernel(%arg0: i32, %arg1: memref<128x16xf32, #tpu.memory_space<vmem>>, %arg2: memref<1x16xf32, #tpu.memory_space<vmem>>, %arg3: memref<1x16xf32, #tpu.memory_space<vmem>>, %arg4: memref<128x16xf32, #tpu.memory_space<vmem>>) attributes {dimension_semantics = [#tpu.dimension_semantics<parallel>], iteration_bounds = array<i64: 1>, scalar_prefetch = 0 : i64, scratch_operands = 0 : i64, tpu.core_type = #tpu.core_type<tc>, window_params = [{transform_indices = @transform_0, window_bounds = array<i64: 128, 16>}, {pipeline_mode = #tpu.pipeline_mode<synchronous>, transform_indices = @transform_1, window_bounds = array<i64: 1, 16>}, {pipeline_mode = #tpu.pipeline_mode<synchronous>, transform_indices = @transform_2, window_bounds = array<i64: 1, 16>}, {transform_indices = @transform_3, window_bounds = array<i64: 128, 16>}]} {
    %c0 = arith.constant 0 : index
    %c0_0 = arith.constant 0 : index
    %0 = vector.load %arg1[%c0, %c0_0] : memref<128x16xf32, #tpu.memory_space<vmem>>, vector<128x16xf32>
    %cst = arith.constant dense<0.000000e+00> : vector<128xf32>
    %1 = vector.multi_reduction <add>, %0, %cst [1] : vector<128x16xf32> to vector<128xf32>
    %2 = vector.shape_cast %1 : vector<128xf32> to vector<128x1xf32>
    %cst_1 = arith.constant 1.600000e+01 : f32
    %3 = vector.broadcast %cst_1 : f32 to vector<128x1xf32>
    %4 = arith.divf %2, %3 : vector<128x1xf32>
    %5 = vector.broadcast %4 : vector<128x1xf32> to vector<128x16xf32>
    %6 = arith.subf %0, %5 : vector<128x16xf32>
    %7 = arith.mulf %6, %6 : vector<128x16xf32>
    %cst_2 = arith.constant dense<0.000000e+00> : vector<128xf32>
    %8 = vector.multi_reduction <add>, %7, %cst_2 [1] : vector<128x16xf32> to vector<128xf32>
    %9 = vector.shape_cast %8 : vector<128xf32> to vector<128x1xf32>
    %cst_3 = arith.constant 1.600000e+01 : f32
    %10 = vector.broadcast %cst_3 : f32 to vector<128x1xf32>
    %11 = arith.divf %9, %10 : vector<128x1xf32>
    %cst_4 = arith.constant 9.99999974E-6 : f32
    %12 = vector.broadcast %cst_4 : f32 to vector<128x1xf32>
    %13 = arith.addf %11, %12 : vector<128x1xf32>
    %14 = math.rsqrt %13 : vector<128x1xf32>
    %15 = vector.broadcast %14 : vector<128x1xf32> to vector<128x16xf32>
    %16 = arith.mulf %6, %15 : vector<128x16xf32>
    %c0_5 = arith.constant 0 : index
    %c0_6 = arith.constant 0 : index
    %17 = vector.load %arg2[%c0_5, %c0_6] : memref<1x16xf32, #tpu.memory_space<vmem>>, vector<1x16xf32>
    %18 = vector.broadcast %17 : vector<1x16xf32> to vector<128x16xf32>
    %19 = arith.mulf %16, %18 : vector<128x16xf32>
    %c0_7 = arith.constant 0 : index
    %c0_8 = arith.constant 0 : index
    %20 = vector.load %arg3[%c0_7, %c0_8] : memref<1x16xf32, #tpu.memory_space<vmem>>, vector<1x16xf32>
    %21 = vector.broadcast %20 : vector<1x16xf32> to vector<128x16xf32>
    %22 = arith.addf %19, %21 : vector<128x16xf32>
    %c0_9 = arith.constant 0 : index
    %c0_10 = arith.constant 0 : index
    %23 = vector.load %arg4[%c0_9, %c0_10] : memref<128x16xf32, #tpu.memory_space<vmem>>, vector<128x16xf32>
    tpu.vector_store %arg4[%c0_9, %c0_10], %22 {strides = array<i32>} : memref<128x16xf32, #tpu.memory_space<vmem>>, vector<128x16xf32>,
    return
  }
  func.func @transform_0(%arg0: i32) -> (i32, i32) {
    %c0_i32 = arith.constant 0 : i32
    %c0_i32_0 = arith.constant 0 : i32
    return %arg0, %c0_i32 : i32, i32
  }
  func.func @transform_1(%arg0: i32) -> (i32, i32) {
    %c0_i32 = arith.constant 0 : i32
    %c0_i32_0 = arith.constant 0 : i32
    %c0_i32_1 = arith.constant 0 : i32
    return %c0_i32, %c0_i32_0 : i32, i32
  }
  func.func @transform_2(%arg0: i32) -> (i32, i32) {
    %c0_i32 = arith.constant 0 : i32
    %c0_i32_0 = arith.constant 0 : i32
    %c0_i32_1 = arith.constant 0 : i32
    return %c0_i32, %c0_i32_0 : i32, i32
  }
  func.func @transform_3(%arg0: i32) -> (i32, i32) {
    %c0_i32 = arith.constant 0 : i32
    %c0_i32_0 = arith.constant 0 : i32
    return %arg0, %c0_i32 : i32, i32
  }
}

module attributes {stable_mosaic.version = 11 : i64} {
  func.func @_ln_kernel(%arg0: i32, %arg1: memref<128x16xf32, #tpu.memory_space<vmem>>, %arg2: memref<1x16xf32, #tpu.memory_space<vmem>>, %arg3: memref<1x16xf32, #tpu.memory_space<vmem>>, %arg4: memref<128x16xbf16, #tpu.memory_space<vmem>>) attributes {dimension_semantics = [#tpu.dimension_semantics<parallel>], iteration_bounds = array<i64: 1>, scalar_prefetch = 0 : i64, scratch_operands = 0 : i64, tpu.core_type = #tpu.core_type<tc>, window_params = [{transform_indices = @transform_0, window_bounds = array<i64: 128, 16>}, {pipeline_mode = #tpu.pipeline_mode<synchronous>, transform_indices = @transform_1, window_bounds = array<i64: 1, 16>}, {pipeline_mode = #tpu.pipeline_mode<synchronous>, transform_indices = @transform_2, window_bounds = array<i64: 1, 16>}, {transform_indices = @transform_3, window_bounds = array<i64: 128, 16>}]} {
    %c0 = arith.constant 0 : index
    %c0_0 = arith.constant 0 : index
    %0 = vector.load %arg1[%c0, %c0_0] : memref<128x16xf32, #tpu.memory_space<vmem>>, vector<128x16xf32>
    %cst = arith.constant dense<0.000000e+00> : vector<128xf32>
    %1 = vector.multi_reduction <add>, %0, %cst [1] : vector<128x16xf32> to vector<128xf32>
    %2 = vector.shape_cast %1 : vector<128xf32> to vector<128x1xf32>
    %cst_1 = arith.constant 1.600000e+01 : f32
    %3 = vector.broadcast %cst_1 : f32 to vector<128x1xf32>
    %4 = arith.divf %2, %3 : vector<128x1xf32>
    %5 = vector.broadcast %4 : vector<128x1xf32> to vector<128x16xf32>
    %6 = arith.subf %0, %5 : vector<128x16xf32>
    %7 = arith.mulf %6, %6 : vector<128x16xf32>
    %cst_2 = arith.constant dense<0.000000e+00> : vector<128xf32>
    %8 = vector.multi_reduction <add>, %7, %cst_2 [1] : vector<128x16xf32> to vector<128xf32>
    %9 = vector.shape_cast %8 : vector<128xf32> to vector<128x1xf32>
    %cst_3 = arith.constant 1.600000e+01 : f32
    %10 = vector.broadcast %cst_3 : f32 to vector<128x1xf32>
    %11 = arith.divf %9, %10 : vector<128x1xf32>
    %cst_4 = arith.constant 9.99999974E-6 : f32
    %12 = vector.broadcast %cst_4 : f32 to vector<128x1xf32>
    %13 = arith.addf %11, %12 : vector<128x1xf32>
    %14 = math.rsqrt %13 : vector<128x1xf32>
    %15 = vector.broadcast %14 : vector<128x1xf32> to vector<128x16xf32>
    %16 = arith.mulf %6, %15 : vector<128x16xf32>
    %c0_5 = arith.constant 0 : index
    %c0_6 = arith.constant 0 : index
    %17 = vector.load %arg2[%c0_5, %c0_6] : memref<1x16xf32, #tpu.memory_space<vmem>>, vector<1x16xf32>
    %18 = vector.broadcast %17 : vector<1x16xf32> to vector<128x16xf32>
    %19 = arith.mulf %16, %18 : vector<128x16xf32>
    %c0_7 = arith.constant 0 : index
    %c0_8 = arith.constant 0 : index
    %20 = vector.load %arg3[%c0_7, %c0_8] : memref<1x16xf32, #tpu.memory_space<vmem>>, vector<1x16xf32>
    %21 = vector.broadcast %20 : vector<1x16xf32> to vector<128x16xf32>
    %22 = arith.addf %19, %21 : vector<128x16xf32>
    %23 = arith.truncf %22 : vector<128x16xf32> to vector<128x16xbf16>
    %c0_9 = arith.constant 0 : index
    %c0_10 = arith.constant 0 : index
    %24 = vector.load %arg4[%c0_9, %c0_10] : memref<128x16xbf16, #tpu.memory_space<vmem>>, vector<128x16xbf16>
    tpu.vector_store %arg4[%c0_9, %c0_10], %23 {strides = array<i32>} : memref<128x16xbf16, #tpu.memory_space<vmem>>, vector<128x16xbf16>,
    return
  }
  func.func @transform_0(%arg0: i32) -> (i32, i32) {
    %c0_i32 = arith.constant 0 : i32
    %c0_i32_0 = arith.constant 0 : i32
    return %arg0, %c0_i32 : i32, i32
  }
  func.func @transform_1(%arg0: i32) -> (i32, i32) {
    %c0_i32 = arith.constant 0 : i32
    %c0_i32_0 = arith.constant 0 : i32
    %c0_i32_1 = arith.constant 0 : i32
    return %c0_i32, %c0_i32_0 : i32, i32
  }
  func.func @transform_2(%arg0: i32) -> (i32, i32) {
    %c0_i32 = arith.constant 0 : i32
    %c0_i32_0 = arith.constant 0 : i32
    %c0_i32_1 = arith.constant 0 : i32
    return %c0_i32, %c0_i32_0 : i32, i32
  }
  func.func @transform_3(%arg0: i32) -> (i32, i32) {
    %c0_i32 = arith.constant 0 : i32
    %c0_i32_0 = arith.constant 0 : i32
    return %arg0, %c0_i32 : i32, i32
  }
}

module attributes {stable_mosaic.version = 11 : i64} {
  func.func @kernel(%arg0: i32, %arg1: i32, %arg2: i32, %arg3: memref<128x16xbf16, #tpu.memory_space<vmem>>, %arg4: memref<16x128xbf16, #tpu.memory_space<vmem>>, %arg5: memref<1x128xf32, #tpu.memory_space<vmem>>, %arg6: memref<128x128xf32, #tpu.memory_space<vmem>>, %arg7: memref<128x128xf32, #tpu.memory_space<vmem>>) attributes {dimension_semantics = [#tpu.dimension_semantics<parallel>, #tpu.dimension_semantics<parallel>, #tpu.dimension_semantics<arbitrary>], iteration_bounds = array<i64: 1, 1, 1>, scalar_prefetch = 0 : i64, scratch_operands = 1 : i64, tpu.core_type = #tpu.core_type<tc>, window_params = [{transform_indices = @transform_0, window_bounds = array<i64: 128, 16>}, {transform_indices = @transform_1, window_bounds = array<i64: 16, 128>}, {transform_indices = @transform_2, window_bounds = array<i64: 1, 128>}, {transform_indices = @transform_3, window_bounds = array<i64: 128, 128>}]} {
    %c0_i32 = arith.constant 0 : i32
    %0 = arith.cmpi eq, %arg2, %c0_i32 : i32
    %1 = arith.extui %0 : i1 to i32
    %c0_i32_0 = arith.constant 0 : i32
    %2 = arith.cmpi ne, %1, %c0_i32_0 : i32
    scf.if %2 {
      %cst_10 = arith.constant 0.000000e+00 : f32
      %12 = vector.broadcast %cst_10 : f32 to vector<128x128xf32>
      %c0_11 = arith.constant 0 : index
      %c0_12 = arith.constant 0 : index
      %13 = vector.load %arg7[%c0_11, %c0_12] : memref<128x128xf32, #tpu.memory_space<vmem>>, vector<128x128xf32>
      tpu.vector_store %arg7[%c0_11, %c0_12], %12 {strides = array<i32>} : memref<128x128xf32, #tpu.memory_space<vmem>>, vector<128x128xf32>,
    } else {
    }
    %c0 = arith.constant 0 : index
    %c0_1 = arith.constant 0 : index
    %3 = vector.load %arg3[%c0, %c0_1] : memref<128x16xbf16, #tpu.memory_space<vmem>>, vector<128x16xbf16>
    %c0_2 = arith.constant 0 : index
    %c0_3 = arith.constant 0 : index
    %4 = vector.load %arg7[%c0_2, %c0_3] : memref<128x128xf32, #tpu.memory_space<vmem>>, vector<128x128xf32>
    %c0_4 = arith.constant 0 : index
    %c0_5 = arith.constant 0 : index
    %5 = vector.load %arg4[%c0_4, %c0_5] : memref<16x128xbf16, #tpu.memory_space<vmem>>, vector<16x128xbf16>
    %cst = arith.constant dense<0.000000e+00> : vector<128x128xf32>
    %6 = tpu.matmul %3, %5, %cst {dimension_numbers = #tpu.dot_dimension_numbers<[1], [0], [0], [1], [0, 0, 1, 1], [], []>} : vector<128x16xbf16>, vector<16x128xbf16>, vector<128x128xf32> -> vector<128x128xf32>
    %7 = arith.addf %4, %6 : vector<128x128xf32>
    %c0_6 = arith.constant 0 : index
    %c0_7 = arith.constant 0 : index
    %8 = vector.load %arg7[%c0_6, %c0_7] : memref<128x128xf32, #tpu.memory_space<vmem>>, vector<128x128xf32>
    tpu.vector_store %arg7[%c0_6, %c0_7], %7 {strides = array<i32>} : memref<128x128xf32, #tpu.memory_space<vmem>>, vector<128x128xf32>,
    %c0_i32_8 = arith.constant 0 : i32
    %9 = arith.cmpi eq, %arg2, %c0_i32_8 : i32
    %10 = arith.extui %9 : i1 to i32
    %c0_i32_9 = arith.constant 0 : i32
    %11 = arith.cmpi ne, %10, %c0_i32_9 : i32
    scf.if %11 {
      %c0_10 = arith.constant 0 : index
      %c0_11 = arith.constant 0 : index
      %12 = vector.load %arg7[%c0_10, %c0_11] : memref<128x128xf32, #tpu.memory_space<vmem>>, vector<128x128xf32>
      %c0_12 = arith.constant 0 : index
      %c0_13 = arith.constant 0 : index
      %13 = vector.load %arg5[%c0_12, %c0_13] : memref<1x128xf32, #tpu.memory_space<vmem>>, vector<1x128xf32>
      %14 = vector.broadcast %13 : vector<1x128xf32> to vector<128x128xf32>
      %15 = arith.addf %12, %14 : vector<128x128xf32>
      %c0_14 = arith.constant 0 : index
      %c0_15 = arith.constant 0 : index
      %16 = vector.load %arg6[%c0_14, %c0_15] : memref<128x128xf32, #tpu.memory_space<vmem>>, vector<128x128xf32>
      tpu.vector_store %arg6[%c0_14, %c0_15], %15 {strides = array<i32>} : memref<128x128xf32, #tpu.memory_space<vmem>>, vector<128x128xf32>,
    } else {
    }
    return
  }
  func.func @transform_0(%arg0: i32, %arg1: i32, %arg2: i32) -> (i32, i32) {
    %c0_i32 = arith.constant 0 : i32
    return %arg0, %arg2 : i32, i32
  }
  func.func @transform_1(%arg0: i32, %arg1: i32, %arg2: i32) -> (i32, i32) {
    %c0_i32 = arith.constant 0 : i32
    return %arg2, %arg1 : i32, i32
  }
  func.func @transform_2(%arg0: i32, %arg1: i32, %arg2: i32) -> (i32, i32) {
    %c0_i32 = arith.constant 0 : i32
    %c0_i32_0 = arith.constant 0 : i32
    return %c0_i32, %arg1 : i32, i32
  }
  func.func @transform_3(%arg0: i32, %arg1: i32, %arg2: i32) -> (i32, i32) {
    %c0_i32 = arith.constant 0 : i32
    return %arg0, %arg1 : i32, i32
  }
}

module attributes {stable_mosaic.version = 11 : i64} {
  func.func @kernel(%arg0: i32, %arg1: i32, %arg2: i32, %arg3: memref<128x16xbf16, #tpu.memory_space<vmem>>, %arg4: memref<16x128xbf16, #tpu.memory_space<vmem>>, %arg5: memref<1x128xf32, #tpu.memory_space<vmem>>, %arg6: memref<128x128xbf16, #tpu.memory_space<vmem>>, %arg7: memref<128x128xf32, #tpu.memory_space<vmem>>) attributes {dimension_semantics = [#tpu.dimension_semantics<parallel>, #tpu.dimension_semantics<parallel>, #tpu.dimension_semantics<arbitrary>], iteration_bounds = array<i64: 1, 1, 1>, scalar_prefetch = 0 : i64, scratch_operands = 1 : i64, tpu.core_type = #tpu.core_type<tc>, window_params = [{transform_indices = @transform_0, window_bounds = array<i64: 128, 16>}, {transform_indices = @transform_1, window_bounds = array<i64: 16, 128>}, {transform_indices = @transform_2, window_bounds = array<i64: 1, 128>}, {transform_indices = @transform_3, window_bounds = array<i64: 128, 128>}]} {
    %c0_i32 = arith.constant 0 : i32
    %0 = arith.cmpi eq, %arg2, %c0_i32 : i32
    %1 = arith.extui %0 : i1 to i32
    %c0_i32_0 = arith.constant 0 : i32
    %2 = arith.cmpi ne, %1, %c0_i32_0 : i32
    scf.if %2 {
      %cst_10 = arith.constant 0.000000e+00 : f32
      %12 = vector.broadcast %cst_10 : f32 to vector<128x128xf32>
      %c0_11 = arith.constant 0 : index
      %c0_12 = arith.constant 0 : index
      %13 = vector.load %arg7[%c0_11, %c0_12] : memref<128x128xf32, #tpu.memory_space<vmem>>, vector<128x128xf32>
      tpu.vector_store %arg7[%c0_11, %c0_12], %12 {strides = array<i32>} : memref<128x128xf32, #tpu.memory_space<vmem>>, vector<128x128xf32>,
    } else {
    }
    %c0 = arith.constant 0 : index
    %c0_1 = arith.constant 0 : index
    %3 = vector.load %arg3[%c0, %c0_1] : memref<128x16xbf16, #tpu.memory_space<vmem>>, vector<128x16xbf16>
    %c0_2 = arith.constant 0 : index
    %c0_3 = arith.constant 0 : index
    %4 = vector.load %arg7[%c0_2, %c0_3] : memref<128x128xf32, #tpu.memory_space<vmem>>, vector<128x128xf32>
    %c0_4 = arith.constant 0 : index
    %c0_5 = arith.constant 0 : index
    %5 = vector.load %arg4[%c0_4, %c0_5] : memref<16x128xbf16, #tpu.memory_space<vmem>>, vector<16x128xbf16>
    %cst = arith.constant dense<0.000000e+00> : vector<128x128xf32>
    %6 = tpu.matmul %3, %5, %cst {dimension_numbers = #tpu.dot_dimension_numbers<[1], [0], [0], [1], [0, 0, 1, 1], [], []>} : vector<128x16xbf16>, vector<16x128xbf16>, vector<128x128xf32> -> vector<128x128xf32>
    %7 = arith.addf %4, %6 : vector<128x128xf32>
    %c0_6 = arith.constant 0 : index
    %c0_7 = arith.constant 0 : index
    %8 = vector.load %arg7[%c0_6, %c0_7] : memref<128x128xf32, #tpu.memory_space<vmem>>, vector<128x128xf32>
    tpu.vector_store %arg7[%c0_6, %c0_7], %7 {strides = array<i32>} : memref<128x128xf32, #tpu.memory_space<vmem>>, vector<128x128xf32>,
    %c0_i32_8 = arith.constant 0 : i32
    %9 = arith.cmpi eq, %arg2, %c0_i32_8 : i32
    %10 = arith.extui %9 : i1 to i32
    %c0_i32_9 = arith.constant 0 : i32
    %11 = arith.cmpi ne, %10, %c0_i32_9 : i32
    scf.if %11 {
      %c0_10 = arith.constant 0 : index
      %c0_11 = arith.constant 0 : index
      %12 = vector.load %arg7[%c0_10, %c0_11] : memref<128x128xf32, #tpu.memory_space<vmem>>, vector<128x128xf32>
      %c0_12 = arith.constant 0 : index
      %c0_13 = arith.constant 0 : index
      %13 = vector.load %arg5[%c0_12, %c0_13] : memref<1x128xf32, #tpu.memory_space<vmem>>, vector<1x128xf32>
      %14 = vector.broadcast %13 : vector<1x128xf32> to vector<128x128xf32>
      %15 = arith.addf %12, %14 : vector<128x128xf32>
      %16 = arith.mulf %15, %15 : vector<128x128xf32>
      %17 = arith.mulf %15, %16 : vector<128x128xf32>
      %cst_14 = arith.constant 4.471500e-02 : f32
      %18 = vector.broadcast %cst_14 : f32 to vector<128x128xf32>
      %19 = arith.mulf %18, %17 : vector<128x128xf32>
      %20 = arith.addf %15, %19 : vector<128x128xf32>
      %cst_15 = arith.constant 0.797884583 : f32
      %21 = vector.broadcast %cst_15 : f32 to vector<128x128xf32>
      %22 = arith.mulf %21, %20 : vector<128x128xf32>
      %23 = math.tanh %22 : vector<128x128xf32>
      %cst_16 = arith.constant 1.000000e+00 : f32
      %24 = vector.broadcast %cst_16 : f32 to vector<128x128xf32>
      %25 = arith.addf %24, %23 : vector<128x128xf32>
      %cst_17 = arith.constant 5.000000e-01 : f32
      %26 = vector.broadcast %cst_17 : f32 to vector<128x128xf32>
      %27 = arith.mulf %26, %25 : vector<128x128xf32>
      %28 = arith.mulf %15, %27 : vector<128x128xf32>
      %29 = arith.truncf %28 : vector<128x128xf32> to vector<128x128xbf16>
      %c0_18 = arith.constant 0 : index
      %c0_19 = arith.constant 0 : index
      %30 = vector.load %arg6[%c0_18, %c0_19] : memref<128x128xbf16, #tpu.memory_space<vmem>>, vector<128x128xbf16>
      tpu.vector_store %arg6[%c0_18, %c0_19], %29 {strides = array<i32>} : memref<128x128xbf16, #tpu.memory_space<vmem>>, vector<128x128xbf16>,
    } else {
    }
    return
  }
  func.func @transform_0(%arg0: i32, %arg1: i32, %arg2: i32) -> (i32, i32) {
    %c0_i32 = arith.constant 0 : i32
    return %arg0, %arg2 : i32, i32
  }
  func.func @transform_1(%arg0: i32, %arg1: i32, %arg2: i32) -> (i32, i32) {
    %c0_i32 = arith.constant 0 : i32
    return %arg2, %arg1 : i32, i32
  }
  func.func @transform_2(%arg0: i32, %arg1: i32, %arg2: i32) -> (i32, i32) {
    %c0_i32 = arith.constant 0 : i32
    %c0_i32_0 = arith.constant 0 : i32
    return %c0_i32, %arg1 : i32, i32
  }
  func.func @transform_3(%arg0: i32, %arg1: i32, %arg2: i32) -> (i32, i32) {
    %c0_i32 = arith.constant 0 : i32
    return %arg0, %arg1 : i32, i32
  }
}

module attributes {stable_mosaic.version = 11 : i64} {
  func.func @kernel(%arg0: i32, %arg1: memref<1x8x8x16xf32, #tpu.memory_space<vmem>>, %arg2: memref<1x8x8x16xf32, #tpu.memory_space<vmem>>, %arg3: memref<1x8x8x3xf32, #tpu.memory_space<vmem>>, %arg4: memref<3x3x16xf32, #tpu.memory_space<vmem>>, %arg5: memref<5x5x16xf32, #tpu.memory_space<vmem>>, %arg6: memref<16x16xbf16, #tpu.memory_space<vmem>>, %arg7: memref<1x16xf32, #tpu.memory_space<vmem>>, %arg8: memref<1x8x8x16xbf16, #tpu.memory_space<vmem>>, %arg9: memref<12x12x16xf32, #tpu.memory_space<vmem>>) attributes {dimension_semantics = [#tpu.dimension_semantics<parallel>], iteration_bounds = array<i64: 2>, scalar_prefetch = 0 : i64, scratch_operands = 1 : i64, tpu.core_type = #tpu.core_type<tc>, window_params = [{transform_indices = @transform_0, window_bounds = array<i64: 1, 8, 8, 16>}, {transform_indices = @transform_1, window_bounds = array<i64: 1, 8, 8, 16>}, {transform_indices = @transform_2, window_bounds = array<i64: 1, 8, 8, 3>}, {pipeline_mode = #tpu.pipeline_mode<synchronous>, transform_indices = @transform_3, window_bounds = array<i64: 3, 3, 16>}, {pipeline_mode = #tpu.pipeline_mode<synchronous>, transform_indices = @transform_4, window_bounds = array<i64: 5, 5, 16>}, {pipeline_mode = #tpu.pipeline_mode<synchronous>, transform_indices = @transform_5, window_bounds = array<i64: 16, 16>}, {pipeline_mode = #tpu.pipeline_mode<synchronous>, transform_indices = @transform_6, window_bounds = array<i64: 1, 16>}, {transform_indices = @transform_7, window_bounds = array<i64: 1, 8, 8, 16>}]} {
    %c0 = arith.constant 0 : index
    %c0_0 = arith.constant 0 : index
    %c0_1 = arith.constant 0 : index
    %c0_2 = arith.constant 0 : index
    %0 = vector.load %arg1[%c0, %c0_0, %c0_1, %c0_2] : memref<1x8x8x16xf32, #tpu.memory_space<vmem>>, vector<1x8x8x16xf32>
    %1 = vector.shape_cast %0 : vector<1x8x8x16xf32> to vector<8x8x16xf32>
    %c0_3 = arith.constant 0 : index
    %c0_4 = arith.constant 0 : index
    %c0_5 = arith.constant 0 : index
    %c0_6 = arith.constant 0 : index
    %2 = vector.load %arg2[%c0_3, %c0_4, %c0_5, %c0_6] : memref<1x8x8x16xf32, #tpu.memory_space<vmem>>, vector<1x8x8x16xf32>
    %3 = vector.shape_cast %2 : vector<1x8x8x16xf32> to vector<8x8x16xf32>
    %c0_7 = arith.constant 0 : index
    %c0_8 = arith.constant 0 : index
    %c0_9 = arith.constant 0 : index
    %c0_10 = arith.constant 0 : index
    %4 = vector.load %arg3[%c0_7, %c0_8, %c0_9, %c0_10] : memref<1x8x8x3xf32, #tpu.memory_space<vmem>>, vector<1x8x8x3xf32>
    %5 = vector.shape_cast %4 : vector<1x8x8x3xf32> to vector<8x8x3xf32>
    %cst = arith.constant 0.000000e+00 : f32
    %6 = vector.broadcast %cst : f32 to vector<2x12x16xf32>
    %c0_11 = arith.constant 0 : index
    %c0_12 = arith.constant 0 : index
    %c0_13 = arith.constant 0 : index
    %7 = vector.load %arg9[%c0_11, %c0_12, %c0_13] : memref<12x12x16xf32, #tpu.memory_space<vmem>>, vector<2x12x16xf32>
    tpu.vector_store %arg9[%c0_11, %c0_12, %c0_13], %6 {strides = array<i32>} : memref<12x12x16xf32, #tpu.memory_space<vmem>>, vector<2x12x16xf32>,
    %cst_14 = arith.constant 0.000000e+00 : f32
    %8 = vector.broadcast %cst_14 : f32 to vector<2x12x16xf32>
    %c10 = arith.constant 10 : index
    %c0_15 = arith.constant 0 : index
    %c0_16 = arith.constant 0 : index
    %9 = vector.load %arg9[%c10, %c0_15, %c0_16] : memref<12x12x16xf32, #tpu.memory_space<vmem>>, vector<2x12x16xf32>
    tpu.vector_store %arg9[%c10, %c0_15, %c0_16], %8 {strides = array<i32>} : memref<12x12x16xf32, #tpu.memory_space<vmem>>, vector<2x12x16xf32>,
    %cst_17 = arith.constant 0.000000e+00 : f32
    %10 = vector.broadcast %cst_17 : f32 to vector<8x2x16xf32>
    %c2 = arith.constant 2 : index
    %c0_18 = arith.constant 0 : index
    %c0_19 = arith.constant 0 : index
    %11 = vector.load %arg9[%c2, %c0_18, %c0_19] : memref<12x12x16xf32, #tpu.memory_space<vmem>>, vector<8x2x16xf32>
    tpu.vector_store %arg9[%c2, %c0_18, %c0_19], %10 {strides = array<i32>} : memref<12x12x16xf32, #tpu.memory_space<vmem>>, vector<8x2x16xf32>,
    %cst_20 = arith.constant 0.000000e+00 : f32
    %12 = vector.broadcast %cst_20 : f32 to vector<8x2x16xf32>
    %c2_21 = arith.constant 2 : index
    %c10_22 = arith.constant 10 : index
    %c0_23 = arith.constant 0 : index
    %13 = vector.load %arg9[%c2_21, %c10_22, %c0_23] : memref<12x12x16xf32, #tpu.memory_space<vmem>>, vector<8x2x16xf32>
    tpu.vector_store %arg9[%c2_21, %c10_22, %c0_23], %12 {strides = array<i32>} : memref<12x12x16xf32, #tpu.memory_space<vmem>>, vector<8x2x16xf32>,
    %c2_24 = arith.constant 2 : index
    %c2_25 = arith.constant 2 : index
    %c0_26 = arith.constant 0 : index
    %14 = vector.load %arg9[%c2_24, %c2_25, %c0_26] : memref<12x12x16xf32, #tpu.memory_space<vmem>>, vector<8x8x16xf32>
    tpu.vector_store %arg9[%c2_24, %c2_25, %c0_26], %3 {strides = array<i32>} : memref<12x12x16xf32, #tpu.memory_space<vmem>>, vector<8x8x16xf32>,
    %c0_27 = arith.constant 0 : index
    %c0_28 = arith.constant 0 : index
    %c0_29 = arith.constant 0 : index
    %15 = vector.load %arg9[%c0_27, %c0_28, %c0_29] : memref<12x12x16xf32, #tpu.memory_space<vmem>>, vector<12x12x16xf32>
    %c0_30 = arith.constant 0 : index
    %c0_31 = arith.constant 0 : index
    %c0_32 = arith.constant 0 : index
    %16 = vector.load %arg4[%c0_30, %c0_31, %c0_32] : memref<3x3x16xf32, #tpu.memory_space<vmem>>, vector<3x3x16xf32>
    %17 = vector.extract_strided_slice %15 {offsets = [0, 1, 0], sizes = [12, 8, 16], strides = [1, 1, 1]} : vector<12x12x16xf32> to vector<12x8x16xf32>
    %18 = vector.extract_strided_slice %17 {offsets = [1, 0, 0], sizes = [8, 8, 16], strides = [1, 1, 1]} : vector<12x8x16xf32> to vector<8x8x16xf32>
    %19 = vector.extract_strided_slice %16 {offsets = [0, 0, 0], sizes = [1, 1, 16], strides = [1, 1, 1]} : vector<3x3x16xf32> to vector<1x1x16xf32>
    %20 = vector.shape_cast %19 : vector<1x1x16xf32> to vector<16xf32>
    %21 = vector.shape_cast %20 : vector<16xf32> to vector<1x1x16xf32>
    %22 = vector.broadcast %21 : vector<1x1x16xf32> to vector<8x8x16xf32>
    %23 = arith.mulf %18, %22 : vector<8x8x16xf32>
    %24 = vector.extract_strided_slice %17 {offsets = [2, 0, 0], sizes = [8, 8, 16], strides = [1, 1, 1]} : vector<12x8x16xf32> to vector<8x8x16xf32>
    %25 = vector.extract_strided_slice %16 {offsets = [1, 0, 0], sizes = [1, 1, 16], strides = [1, 1, 1]} : vector<3x3x16xf32> to vector<1x1x16xf32>
    %26 = vector.shape_cast %25 : vector<1x1x16xf32> to vector<16xf32>
    %27 = vector.shape_cast %26 : vector<16xf32> to vector<1x1x16xf32>
    %28 = vector.broadcast %27 : vector<1x1x16xf32> to vector<8x8x16xf32>
    %29 = arith.mulf %24, %28 : vector<8x8x16xf32>
    %30 = arith.addf %23, %29 : vector<8x8x16xf32>
    %31 = vector.extract_strided_slice %17 {offsets = [3, 0, 0], sizes = [8, 8, 16], strides = [1, 1, 1]} : vector<12x8x16xf32> to vector<8x8x16xf32>
    %32 = vector.extract_strided_slice %16 {offsets = [2, 0, 0], sizes = [1, 1, 16], strides = [1, 1, 1]} : vector<3x3x16xf32> to vector<1x1x16xf32>
    %33 = vector.shape_cast %32 : vector<1x1x16xf32> to vector<16xf32>
    %34 = vector.shape_cast %33 : vector<16xf32> to vector<1x1x16xf32>
    %35 = vector.broadcast %34 : vector<1x1x16xf32> to vector<8x8x16xf32>
    %36 = arith.mulf %31, %35 : vector<8x8x16xf32>
    %37 = arith.addf %30, %36 : vector<8x8x16xf32>
    %38 = vector.extract_strided_slice %15 {offsets = [0, 2, 0], sizes = [12, 8, 16], strides = [1, 1, 1]} : vector<12x12x16xf32> to vector<12x8x16xf32>
    %39 = vector.extract_strided_slice %38 {offsets = [1, 0, 0], sizes = [8, 8, 16], strides = [1, 1, 1]} : vector<12x8x16xf32> to vector<8x8x16xf32>
    %40 = vector.extract_strided_slice %16 {offsets = [0, 1, 0], sizes = [1, 1, 16], strides = [1, 1, 1]} : vector<3x3x16xf32> to vector<1x1x16xf32>
    %41 = vector.shape_cast %40 : vector<1x1x16xf32> to vector<16xf32>
    %42 = vector.shape_cast %41 : vector<16xf32> to vector<1x1x16xf32>
    %43 = vector.broadcast %42 : vector<1x1x16xf32> to vector<8x8x16xf32>
    %44 = arith.mulf %39, %43 : vector<8x8x16xf32>
    %45 = arith.addf %37, %44 : vector<8x8x16xf32>
    %46 = vector.extract_strided_slice %38 {offsets = [2, 0, 0], sizes = [8, 8, 16], strides = [1, 1, 1]} : vector<12x8x16xf32> to vector<8x8x16xf32>
    %47 = vector.extract_strided_slice %16 {offsets = [1, 1, 0], sizes = [1, 1, 16], strides = [1, 1, 1]} : vector<3x3x16xf32> to vector<1x1x16xf32>
    %48 = vector.shape_cast %47 : vector<1x1x16xf32> to vector<16xf32>
    %49 = vector.shape_cast %48 : vector<16xf32> to vector<1x1x16xf32>
    %50 = vector.broadcast %49 : vector<1x1x16xf32> to vector<8x8x16xf32>
    %51 = arith.mulf %46, %50 : vector<8x8x16xf32>
    %52 = arith.addf %45, %51 : vector<8x8x16xf32>
    %53 = vector.extract_strided_slice %38 {offsets = [3, 0, 0], sizes = [8, 8, 16], strides = [1, 1, 1]} : vector<12x8x16xf32> to vector<8x8x16xf32>
    %54 = vector.extract_strided_slice %16 {offsets = [2, 1, 0], sizes = [1, 1, 16], strides = [1, 1, 1]} : vector<3x3x16xf32> to vector<1x1x16xf32>
    %55 = vector.shape_cast %54 : vector<1x1x16xf32> to vector<16xf32>
    %56 = vector.shape_cast %55 : vector<16xf32> to vector<1x1x16xf32>
    %57 = vector.broadcast %56 : vector<1x1x16xf32> to vector<8x8x16xf32>
    %58 = arith.mulf %53, %57 : vector<8x8x16xf32>
    %59 = arith.addf %52, %58 : vector<8x8x16xf32>
    %60 = vector.extract_strided_slice %15 {offsets = [0, 3, 0], sizes = [12, 8, 16], strides = [1, 1, 1]} : vector<12x12x16xf32> to vector<12x8x16xf32>
    %61 = vector.extract_strided_slice %60 {offsets = [1, 0, 0], sizes = [8, 8, 16], strides = [1, 1, 1]} : vector<12x8x16xf32> to vector<8x8x16xf32>
    %62 = vector.extract_strided_slice %16 {offsets = [0, 2, 0], sizes = [1, 1, 16], strides = [1, 1, 1]} : vector<3x3x16xf32> to vector<1x1x16xf32>
    %63 = vector.shape_cast %62 : vector<1x1x16xf32> to vector<16xf32>
    %64 = vector.shape_cast %63 : vector<16xf32> to vector<1x1x16xf32>
    %65 = vector.broadcast %64 : vector<1x1x16xf32> to vector<8x8x16xf32>
    %66 = arith.mulf %61, %65 : vector<8x8x16xf32>
    %67 = arith.addf %59, %66 : vector<8x8x16xf32>
    %68 = vector.extract_strided_slice %60 {offsets = [2, 0, 0], sizes = [8, 8, 16], strides = [1, 1, 1]} : vector<12x8x16xf32> to vector<8x8x16xf32>
    %69 = vector.extract_strided_slice %16 {offsets = [1, 2, 0], sizes = [1, 1, 16], strides = [1, 1, 1]} : vector<3x3x16xf32> to vector<1x1x16xf32>
    %70 = vector.shape_cast %69 : vector<1x1x16xf32> to vector<16xf32>
    %71 = vector.shape_cast %70 : vector<16xf32> to vector<1x1x16xf32>
    %72 = vector.broadcast %71 : vector<1x1x16xf32> to vector<8x8x16xf32>
    %73 = arith.mulf %68, %72 : vector<8x8x16xf32>
    %74 = arith.addf %67, %73 : vector<8x8x16xf32>
    %75 = vector.extract_strided_slice %60 {offsets = [3, 0, 0], sizes = [8, 8, 16], strides = [1, 1, 1]} : vector<12x8x16xf32> to vector<8x8x16xf32>
    %76 = vector.extract_strided_slice %16 {offsets = [2, 2, 0], sizes = [1, 1, 16], strides = [1, 1, 1]} : vector<3x3x16xf32> to vector<1x1x16xf32>
    %77 = vector.shape_cast %76 : vector<1x1x16xf32> to vector<16xf32>
    %78 = vector.shape_cast %77 : vector<16xf32> to vector<1x1x16xf32>
    %79 = vector.broadcast %78 : vector<1x1x16xf32> to vector<8x8x16xf32>
    %80 = arith.mulf %75, %79 : vector<8x8x16xf32>
    %81 = arith.addf %74, %80 : vector<8x8x16xf32>
    %82 = arith.mulf %81, %81 : vector<8x8x16xf32>
    %83 = arith.mulf %81, %82 : vector<8x8x16xf32>
    %cst_33 = arith.constant 4.471500e-02 : f32
    %84 = vector.broadcast %cst_33 : f32 to vector<8x8x16xf32>
    %85 = arith.mulf %84, %83 : vector<8x8x16xf32>
    %86 = arith.addf %81, %85 : vector<8x8x16xf32>
    %cst_34 = arith.constant 0.797884583 : f32
    %87 = vector.broadcast %cst_34 : f32 to vector<8x8x16xf32>
    %88 = arith.mulf %87, %86 : vector<8x8x16xf32>
    %89 = math.tanh %88 : vector<8x8x16xf32>
    %cst_35 = arith.constant 1.000000e+00 : f32
    %90 = vector.broadcast %cst_35 : f32 to vector<8x8x16xf32>
    %91 = arith.addf %90, %89 : vector<8x8x16xf32>
    %cst_36 = arith.constant 5.000000e-01 : f32
    %92 = vector.broadcast %cst_36 : f32 to vector<8x8x16xf32>
    %93 = arith.mulf %92, %91 : vector<8x8x16xf32>
    %94 = arith.mulf %81, %93 : vector<8x8x16xf32>
    %95 = vector.extract_strided_slice %5 {offsets = [0, 0, 0], sizes = [8, 8, 1], strides = [1, 1, 1]} : vector<8x8x3xf32> to vector<8x8x1xf32>
    %96 = vector.broadcast %95 : vector<8x8x1xf32> to vector<8x8x16xf32>
    %97 = arith.mulf %94, %96 : vector<8x8x16xf32>
    %c2_37 = arith.constant 2 : index
    %c2_38 = arith.constant 2 : index
    %c0_39 = arith.constant 0 : index
    %98 = vector.load %arg9[%c2_37, %c2_38, %c0_39] : memref<12x12x16xf32, #tpu.memory_space<vmem>>, vector<8x8x16xf32>
    tpu.vector_store %arg9[%c2_37, %c2_38, %c0_39], %94 {strides = array<i32>} : memref<12x12x16xf32, #tpu.memory_space<vmem>>, vector<8x8x16xf32>,
    %c0_40 = arith.constant 0 : index
    %c0_41 = arith.constant 0 : index
    %c0_42 = arith.constant 0 : index
    %99 = vector.load %arg9[%c0_40, %c0_41, %c0_42] : memref<12x12x16xf32, #tpu.memory_space<vmem>>, vector<12x12x16xf32>
    %c0_43 = arith.constant 0 : index
    %c0_44 = arith.constant 0 : index
    %c0_45 = arith.constant 0 : index
    %100 = vector.load %arg5[%c0_43, %c0_44, %c0_45] : memref<5x5x16xf32, #tpu.memory_space<vmem>>, vector<5x5x16xf32>
    %101 = vector.extract_strided_slice %99 {offsets = [0, 0, 0], sizes = [12, 8, 16], strides = [1, 1, 1]} : vector<12x12x16xf32> to vector<12x8x16xf32>
    %102 = vector.extract_strided_slice %101 {offsets = [0, 0, 0], sizes = [8, 8, 16], strides = [1, 1, 1]} : vector<12x8x16xf32> to vector<8x8x16xf32>
    %103 = vector.extract_strided_slice %100 {offsets = [0, 0, 0], sizes = [1, 1, 16], strides = [1, 1, 1]} : vector<5x5x16xf32> to vector<1x1x16xf32>
    %104 = vector.shape_cast %103 : vector<1x1x16xf32> to vector<16xf32>
    %105 = vector.shape_cast %104 : vector<16xf32> to vector<1x1x16xf32>
    %106 = vector.broadcast %105 : vector<1x1x16xf32> to vector<8x8x16xf32>
    %107 = arith.mulf %102, %106 : vector<8x8x16xf32>
    %108 = vector.extract_strided_slice %101 {offsets = [1, 0, 0], sizes = [8, 8, 16], strides = [1, 1, 1]} : vector<12x8x16xf32> to vector<8x8x16xf32>
    %109 = vector.extract_strided_slice %100 {offsets = [1, 0, 0], sizes = [1, 1, 16], strides = [1, 1, 1]} : vector<5x5x16xf32> to vector<1x1x16xf32>
    %110 = vector.shape_cast %109 : vector<1x1x16xf32> to vector<16xf32>
    %111 = vector.shape_cast %110 : vector<16xf32> to vector<1x1x16xf32>
    %112 = vector.broadcast %111 : vector<1x1x16xf32> to vector<8x8x16xf32>
    %113 = arith.mulf %108, %112 : vector<8x8x16xf32>
    %114 = arith.addf %107, %113 : vector<8x8x16xf32>
    %115 = vector.extract_strided_slice %101 {offsets = [2, 0, 0], sizes = [8, 8, 16], strides = [1, 1, 1]} : vector<12x8x16xf32> to vector<8x8x16xf32>
    %116 = vector.extract_strided_slice %100 {offsets = [2, 0, 0], sizes = [1, 1, 16], strides = [1, 1, 1]} : vector<5x5x16xf32> to vector<1x1x16xf32>
    %117 = vector.shape_cast %116 : vector<1x1x16xf32> to vector<16xf32>
    %118 = vector.shape_cast %117 : vector<16xf32> to vector<1x1x16xf32>
    %119 = vector.broadcast %118 : vector<1x1x16xf32> to vector<8x8x16xf32>
    %120 = arith.mulf %115, %119 : vector<8x8x16xf32>
    %121 = arith.addf %114, %120 : vector<8x8x16xf32>
    %122 = vector.extract_strided_slice %101 {offsets = [3, 0, 0], sizes = [8, 8, 16], strides = [1, 1, 1]} : vector<12x8x16xf32> to vector<8x8x16xf32>
    %123 = vector.extract_strided_slice %100 {offsets = [3, 0, 0], sizes = [1, 1, 16], strides = [1, 1, 1]} : vector<5x5x16xf32> to vector<1x1x16xf32>
    %124 = vector.shape_cast %123 : vector<1x1x16xf32> to vector<16xf32>
    %125 = vector.shape_cast %124 : vector<16xf32> to vector<1x1x16xf32>
    %126 = vector.broadcast %125 : vector<1x1x16xf32> to vector<8x8x16xf32>
    %127 = arith.mulf %122, %126 : vector<8x8x16xf32>
    %128 = arith.addf %121, %127 : vector<8x8x16xf32>
    %129 = vector.extract_strided_slice %101 {offsets = [4, 0, 0], sizes = [8, 8, 16], strides = [1, 1, 1]} : vector<12x8x16xf32> to vector<8x8x16xf32>
    %130 = vector.extract_strided_slice %100 {offsets = [4, 0, 0], sizes = [1, 1, 16], strides = [1, 1, 1]} : vector<5x5x16xf32> to vector<1x1x16xf32>
    %131 = vector.shape_cast %130 : vector<1x1x16xf32> to vector<16xf32>
    %132 = vector.shape_cast %131 : vector<16xf32> to vector<1x1x16xf32>
    %133 = vector.broadcast %132 : vector<1x1x16xf32> to vector<8x8x16xf32>
    %134 = arith.mulf %129, %133 : vector<8x8x16xf32>
    %135 = arith.addf %128, %134 : vector<8x8x16xf32>
    %136 = vector.extract_strided_slice %99 {offsets = [0, 1, 0], sizes = [12, 8, 16], strides = [1, 1, 1]} : vector<12x12x16xf32> to vector<12x8x16xf32>
    %137 = vector.extract_strided_slice %136 {offsets = [0, 0, 0], sizes = [8, 8, 16], strides = [1, 1, 1]} : vector<12x8x16xf32> to vector<8x8x16xf32>
    %138 = vector.extract_strided_slice %100 {offsets = [0, 1, 0], sizes = [1, 1, 16], strides = [1, 1, 1]} : vector<5x5x16xf32> to vector<1x1x16xf32>
    %139 = vector.shape_cast %138 : vector<1x1x16xf32> to vector<16xf32>
    %140 = vector.shape_cast %139 : vector<16xf32> to vector<1x1x16xf32>
    %141 = vector.broadcast %140 : vector<1x1x16xf32> to vector<8x8x16xf32>
    %142 = arith.mulf %137, %141 : vector<8x8x16xf32>
    %143 = arith.addf %135, %142 : vector<8x8x16xf32>
    %144 = vector.extract_strided_slice %136 {offsets = [1, 0, 0], sizes = [8, 8, 16], strides = [1, 1, 1]} : vector<12x8x16xf32> to vector<8x8x16xf32>
    %145 = vector.extract_strided_slice %100 {offsets = [1, 1, 0], sizes = [1, 1, 16], strides = [1, 1, 1]} : vector<5x5x16xf32> to vector<1x1x16xf32>
    %146 = vector.shape_cast %145 : vector<1x1x16xf32> to vector<16xf32>
    %147 = vector.shape_cast %146 : vector<16xf32> to vector<1x1x16xf32>
    %148 = vector.broadcast %147 : vector<1x1x16xf32> to vector<8x8x16xf32>
    %149 = arith.mulf %144, %148 : vector<8x8x16xf32>
    %150 = arith.addf %143, %149 : vector<8x8x16xf32>
    %151 = vector.extract_strided_slice %136 {offsets = [2, 0, 0], sizes = [8, 8, 16], strides = [1, 1, 1]} : vector<12x8x16xf32> to vector<8x8x16xf32>
    %152 = vector.extract_strided_slice %100 {offsets = [2, 1, 0], sizes = [1, 1, 16], strides = [1, 1, 1]} : vector<5x5x16xf32> to vector<1x1x16xf32>
    %153 = vector.shape_cast %152 : vector<1x1x16xf32> to vector<16xf32>
    %154 = vector.shape_cast %153 : vector<16xf32> to vector<1x1x16xf32>
    %155 = vector.broadcast %154 : vector<1x1x16xf32> to vector<8x8x16xf32>
    %156 = arith.mulf %151, %155 : vector<8x8x16xf32>
    %157 = arith.addf %150, %156 : vector<8x8x16xf32>
    %158 = vector.extract_strided_slice %136 {offsets = [3, 0, 0], sizes = [8, 8, 16], strides = [1, 1, 1]} : vector<12x8x16xf32> to vector<8x8x16xf32>
    %159 = vector.extract_strided_slice %100 {offsets = [3, 1, 0], sizes = [1, 1, 16], strides = [1, 1, 1]} : vector<5x5x16xf32> to vector<1x1x16xf32>
    %160 = vector.shape_cast %159 : vector<1x1x16xf32> to vector<16xf32>
    %161 = vector.shape_cast %160 : vector<16xf32> to vector<1x1x16xf32>
    %162 = vector.broadcast %161 : vector<1x1x16xf32> to vector<8x8x16xf32>
    %163 = arith.mulf %158, %162 : vector<8x8x16xf32>
    %164 = arith.addf %157, %163 : vector<8x8x16xf32>
    %165 = vector.extract_strided_slice %136 {offsets = [4, 0, 0], sizes = [8, 8, 16], strides = [1, 1, 1]} : vector<12x8x16xf32> to vector<8x8x16xf32>
    %166 = vector.extract_strided_slice %100 {offsets = [4, 1, 0], sizes = [1, 1, 16], strides = [1, 1, 1]} : vector<5x5x16xf32> to vector<1x1x16xf32>
    %167 = vector.shape_cast %166 : vector<1x1x16xf32> to vector<16xf32>
    %168 = vector.shape_cast %167 : vector<16xf32> to vector<1x1x16xf32>
    %169 = vector.broadcast %168 : vector<1x1x16xf32> to vector<8x8x16xf32>
    %170 = arith.mulf %165, %169 : vector<8x8x16xf32>
    %171 = arith.addf %164, %170 : vector<8x8x16xf32>
    %172 = vector.extract_strided_slice %99 {offsets = [0, 2, 0], sizes = [12, 8, 16], strides = [1, 1, 1]} : vector<12x12x16xf32> to vector<12x8x16xf32>
    %173 = vector.extract_strided_slice %172 {offsets = [0, 0, 0], sizes = [8, 8, 16], strides = [1, 1, 1]} : vector<12x8x16xf32> to vector<8x8x16xf32>
    %174 = vector.extract_strided_slice %100 {offsets = [0, 2, 0], sizes = [1, 1, 16], strides = [1, 1, 1]} : vector<5x5x16xf32> to vector<1x1x16xf32>
    %175 = vector.shape_cast %174 : vector<1x1x16xf32> to vector<16xf32>
    %176 = vector.shape_cast %175 : vector<16xf32> to vector<1x1x16xf32>
    %177 = vector.broadcast %176 : vector<1x1x16xf32> to vector<8x8x16xf32>
    %178 = arith.mulf %173, %177 : vector<8x8x16xf32>
    %179 = arith.addf %171, %178 : vector<8x8x16xf32>
    %180 = vector.extract_strided_slice %172 {offsets = [1, 0, 0], sizes = [8, 8, 16], strides = [1, 1, 1]} : vector<12x8x16xf32> to vector<8x8x16xf32>
    %181 = vector.extract_strided_slice %100 {offsets = [1, 2, 0], sizes = [1, 1, 16], strides = [1, 1, 1]} : vector<5x5x16xf32> to vector<1x1x16xf32>
    %182 = vector.shape_cast %181 : vector<1x1x16xf32> to vector<16xf32>
    %183 = vector.shape_cast %182 : vector<16xf32> to vector<1x1x16xf32>
    %184 = vector.broadcast %183 : vector<1x1x16xf32> to vector<8x8x16xf32>
    %185 = arith.mulf %180, %184 : vector<8x8x16xf32>
    %186 = arith.addf %179, %185 : vector<8x8x16xf32>
    %187 = vector.extract_strided_slice %172 {offsets = [2, 0, 0], sizes = [8, 8, 16], strides = [1, 1, 1]} : vector<12x8x16xf32> to vector<8x8x16xf32>
    %188 = vector.extract_strided_slice %100 {offsets = [2, 2, 0], sizes = [1, 1, 16], strides = [1, 1, 1]} : vector<5x5x16xf32> to vector<1x1x16xf32>
    %189 = vector.shape_cast %188 : vector<1x1x16xf32> to vector<16xf32>
    %190 = vector.shape_cast %189 : vector<16xf32> to vector<1x1x16xf32>
    %191 = vector.broadcast %190 : vector<1x1x16xf32> to vector<8x8x16xf32>
    %192 = arith.mulf %187, %191 : vector<8x8x16xf32>
    %193 = arith.addf %186, %192 : vector<8x8x16xf32>
    %194 = vector.extract_strided_slice %172 {offsets = [3, 0, 0], sizes = [8, 8, 16], strides = [1, 1, 1]} : vector<12x8x16xf32> to vector<8x8x16xf32>
    %195 = vector.extract_strided_slice %100 {offsets = [3, 2, 0], sizes = [1, 1, 16], strides = [1, 1, 1]} : vector<5x5x16xf32> to vector<1x1x16xf32>
    %196 = vector.shape_cast %195 : vector<1x1x16xf32> to vector<16xf32>
    %197 = vector.shape_cast %196 : vector<16xf32> to vector<1x1x16xf32>
    %198 = vector.broadcast %197 : vector<1x1x16xf32> to vector<8x8x16xf32>
    %199 = arith.mulf %194, %198 : vector<8x8x16xf32>
    %200 = arith.addf %193, %199 : vector<8x8x16xf32>
    %201 = vector.extract_strided_slice %172 {offsets = [4, 0, 0], sizes = [8, 8, 16], strides = [1, 1, 1]} : vector<12x8x16xf32> to vector<8x8x16xf32>
    %202 = vector.extract_strided_slice %100 {offsets = [4, 2, 0], sizes = [1, 1, 16], strides = [1, 1, 1]} : vector<5x5x16xf32> to vector<1x1x16xf32>
    %203 = vector.shape_cast %202 : vector<1x1x16xf32> to vector<16xf32>
    %204 = vector.shape_cast %203 : vector<16xf32> to vector<1x1x16xf32>
    %205 = vector.broadcast %204 : vector<1x1x16xf32> to vector<8x8x16xf32>
    %206 = arith.mulf %201, %205 : vector<8x8x16xf32>
    %207 = arith.addf %200, %206 : vector<8x8x16xf32>
    %208 = vector.extract_strided_slice %99 {offsets = [0, 3, 0], sizes = [12, 8, 16], strides = [1, 1, 1]} : vector<12x12x16xf32> to vector<12x8x16xf32>
    %209 = vector.extract_strided_slice %208 {offsets = [0, 0, 0], sizes = [8, 8, 16], strides = [1, 1, 1]} : vector<12x8x16xf32> to vector<8x8x16xf32>
    %210 = vector.extract_strided_slice %100 {offsets = [0, 3, 0], sizes = [1, 1, 16], strides = [1, 1, 1]} : vector<5x5x16xf32> to vector<1x1x16xf32>
    %211 = vector.shape_cast %210 : vector<1x1x16xf32> to vector<16xf32>
    %212 = vector.shape_cast %211 : vector<16xf32> to vector<1x1x16xf32>
    %213 = vector.broadcast %212 : vector<1x1x16xf32> to vector<8x8x16xf32>
    %214 = arith.mulf %209, %213 : vector<8x8x16xf32>
    %215 = arith.addf %207, %214 : vector<8x8x16xf32>
    %216 = vector.extract_strided_slice %208 {offsets = [1, 0, 0], sizes = [8, 8, 16], strides = [1, 1, 1]} : vector<12x8x16xf32> to vector<8x8x16xf32>
    %217 = vector.extract_strided_slice %100 {offsets = [1, 3, 0], sizes = [1, 1, 16], strides = [1, 1, 1]} : vector<5x5x16xf32> to vector<1x1x16xf32>
    %218 = vector.shape_cast %217 : vector<1x1x16xf32> to vector<16xf32>
    %219 = vector.shape_cast %218 : vector<16xf32> to vector<1x1x16xf32>
    %220 = vector.broadcast %219 : vector<1x1x16xf32> to vector<8x8x16xf32>
    %221 = arith.mulf %216, %220 : vector<8x8x16xf32>
    %222 = arith.addf %215, %221 : vector<8x8x16xf32>
    %223 = vector.extract_strided_slice %208 {offsets = [2, 0, 0], sizes = [8, 8, 16], strides = [1, 1, 1]} : vector<12x8x16xf32> to vector<8x8x16xf32>
    %224 = vector.extract_strided_slice %100 {offsets = [2, 3, 0], sizes = [1, 1, 16], strides = [1, 1, 1]} : vector<5x5x16xf32> to vector<1x1x16xf32>
    %225 = vector.shape_cast %224 : vector<1x1x16xf32> to vector<16xf32>
    %226 = vector.shape_cast %225 : vector<16xf32> to vector<1x1x16xf32>
    %227 = vector.broadcast %226 : vector<1x1x16xf32> to vector<8x8x16xf32>
    %228 = arith.mulf %223, %227 : vector<8x8x16xf32>
    %229 = arith.addf %222, %228 : vector<8x8x16xf32>
    %230 = vector.extract_strided_slice %208 {offsets = [3, 0, 0], sizes = [8, 8, 16], strides = [1, 1, 1]} : vector<12x8x16xf32> to vector<8x8x16xf32>
    %231 = vector.extract_strided_slice %100 {offsets = [3, 3, 0], sizes = [1, 1, 16], strides = [1, 1, 1]} : vector<5x5x16xf32> to vector<1x1x16xf32>
    %232 = vector.shape_cast %231 : vector<1x1x16xf32> to vector<16xf32>
    %233 = vector.shape_cast %232 : vector<16xf32> to vector<1x1x16xf32>
    %234 = vector.broadcast %233 : vector<1x1x16xf32> to vector<8x8x16xf32>
    %235 = arith.mulf %230, %234 : vector<8x8x16xf32>
    %236 = arith.addf %229, %235 : vector<8x8x16xf32>
    %237 = vector.extract_strided_slice %208 {offsets = [4, 0, 0], sizes = [8, 8, 16], strides = [1, 1, 1]} : vector<12x8x16xf32> to vector<8x8x16xf32>
    %238 = vector.extract_strided_slice %100 {offsets = [4, 3, 0], sizes = [1, 1, 16], strides = [1, 1, 1]} : vector<5x5x16xf32> to vector<1x1x16xf32>
    %239 = vector.shape_cast %238 : vector<1x1x16xf32> to vector<16xf32>
    %240 = vector.shape_cast %239 : vector<16xf32> to vector<1x1x16xf32>
    %241 = vector.broadcast %240 : vector<1x1x16xf32> to vector<8x8x16xf32>
    %242 = arith.mulf %237, %241 : vector<8x8x16xf32>
    %243 = arith.addf %236, %242 : vector<8x8x16xf32>
    %244 = vector.extract_strided_slice %99 {offsets = [0, 4, 0], sizes = [12, 8, 16], strides = [1, 1, 1]} : vector<12x12x16xf32> to vector<12x8x16xf32>
    %245 = vector.extract_strided_slice %244 {offsets = [0, 0, 0], sizes = [8, 8, 16], strides = [1, 1, 1]} : vector<12x8x16xf32> to vector<8x8x16xf32>
    %246 = vector.extract_strided_slice %100 {offsets = [0, 4, 0], sizes = [1, 1, 16], strides = [1, 1, 1]} : vector<5x5x16xf32> to vector<1x1x16xf32>
    %247 = vector.shape_cast %246 : vector<1x1x16xf32> to vector<16xf32>
    %248 = vector.shape_cast %247 : vector<16xf32> to vector<1x1x16xf32>
    %249 = vector.broadcast %248 : vector<1x1x16xf32> to vector<8x8x16xf32>
    %250 = arith.mulf %245, %249 : vector<8x8x16xf32>
    %251 = arith.addf %243, %250 : vector<8x8x16xf32>
    %252 = vector.extract_strided_slice %244 {offsets = [1, 0, 0], sizes = [8, 8, 16], strides = [1, 1, 1]} : vector<12x8x16xf32> to vector<8x8x16xf32>
    %253 = vector.extract_strided_slice %100 {offsets = [1, 4, 0], sizes = [1, 1, 16], strides = [1, 1, 1]} : vector<5x5x16xf32> to vector<1x1x16xf32>
    %254 = vector.shape_cast %253 : vector<1x1x16xf32> to vector<16xf32>
    %255 = vector.shape_cast %254 : vector<16xf32> to vector<1x1x16xf32>
    %256 = vector.broadcast %255 : vector<1x1x16xf32> to vector<8x8x16xf32>
    %257 = arith.mulf %252, %256 : vector<8x8x16xf32>
    %258 = arith.addf %251, %257 : vector<8x8x16xf32>
    %259 = vector.extract_strided_slice %244 {offsets = [2, 0, 0], sizes = [8, 8, 16], strides = [1, 1, 1]} : vector<12x8x16xf32> to vector<8x8x16xf32>
    %260 = vector.extract_strided_slice %100 {offsets = [2, 4, 0], sizes = [1, 1, 16], strides = [1, 1, 1]} : vector<5x5x16xf32> to vector<1x1x16xf32>
    %261 = vector.shape_cast %260 : vector<1x1x16xf32> to vector<16xf32>
    %262 = vector.shape_cast %261 : vector<16xf32> to vector<1x1x16xf32>
    %263 = vector.broadcast %262 : vector<1x1x16xf32> to vector<8x8x16xf32>
    %264 = arith.mulf %259, %263 : vector<8x8x16xf32>
    %265 = arith.addf %258, %264 : vector<8x8x16xf32>
    %266 = vector.extract_strided_slice %244 {offsets = [3, 0, 0], sizes = [8, 8, 16], strides = [1, 1, 1]} : vector<12x8x16xf32> to vector<8x8x16xf32>
    %267 = vector.extract_strided_slice %100 {offsets = [3, 4, 0], sizes = [1, 1, 16], strides = [1, 1, 1]} : vector<5x5x16xf32> to vector<1x1x16xf32>
    %268 = vector.shape_cast %267 : vector<1x1x16xf32> to vector<16xf32>
    %269 = vector.shape_cast %268 : vector<16xf32> to vector<1x1x16xf32>
    %270 = vector.broadcast %269 : vector<1x1x16xf32> to vector<8x8x16xf32>
    %271 = arith.mulf %266, %270 : vector<8x8x16xf32>
    %272 = arith.addf %265, %271 : vector<8x8x16xf32>
    %273 = vector.extract_strided_slice %244 {offsets = [4, 0, 0], sizes = [8, 8, 16], strides = [1, 1, 1]} : vector<12x8x16xf32> to vector<8x8x16xf32>
    %274 = vector.extract_strided_slice %100 {offsets = [4, 4, 0], sizes = [1, 1, 16], strides = [1, 1, 1]} : vector<5x5x16xf32> to vector<1x1x16xf32>
    %275 = vector.shape_cast %274 : vector<1x1x16xf32> to vector<16xf32>
    %276 = vector.shape_cast %275 : vector<16xf32> to vector<1x1x16xf32>
    %277 = vector.broadcast %276 : vector<1x1x16xf32> to vector<8x8x16xf32>
    %278 = arith.mulf %273, %277 : vector<8x8x16xf32>
    %279 = arith.addf %272, %278 : vector<8x8x16xf32>
    %280 = arith.mulf %279, %279 : vector<8x8x16xf32>
    %281 = arith.mulf %279, %280 : vector<8x8x16xf32>
    %cst_46 = arith.constant 4.471500e-02 : f32
    %282 = vector.broadcast %cst_46 : f32 to vector<8x8x16xf32>
    %283 = arith.mulf %282, %281 : vector<8x8x16xf32>
    %284 = arith.addf %279, %283 : vector<8x8x16xf32>
    %cst_47 = arith.constant 0.797884583 : f32
    %285 = vector.broadcast %cst_47 : f32 to vector<8x8x16xf32>
    %286 = arith.mulf %285, %284 : vector<8x8x16xf32>
    %287 = math.tanh %286 : vector<8x8x16xf32>
    %cst_48 = arith.constant 1.000000e+00 : f32
    %288 = vector.broadcast %cst_48 : f32 to vector<8x8x16xf32>
    %289 = arith.addf %288, %287 : vector<8x8x16xf32>
    %cst_49 = arith.constant 5.000000e-01 : f32
    %290 = vector.broadcast %cst_49 : f32 to vector<8x8x16xf32>
    %291 = arith.mulf %290, %289 : vector<8x8x16xf32>
    %292 = arith.mulf %279, %291 : vector<8x8x16xf32>
    %293 = vector.extract_strided_slice %5 {offsets = [0, 0, 1], sizes = [8, 8, 1], strides = [1, 1, 1]} : vector<8x8x3xf32> to vector<8x8x1xf32>
    %294 = vector.broadcast %293 : vector<8x8x1xf32> to vector<8x8x16xf32>
    %295 = arith.mulf %292, %294 : vector<8x8x16xf32>
    %296 = arith.addf %97, %295 : vector<8x8x16xf32>
    %cst_50 = arith.constant dense<0.000000e+00> : vector<16xf32>
    %297 = vector.multi_reduction <add>, %292, %cst_50 [0, 1] : vector<8x8x16xf32> to vector<16xf32>
    %298 = vector.shape_cast %297 : vector<16xf32> to vector<1x1x16xf32>
    %cst_51 = arith.constant 6.400000e+01 : f32
    %299 = vector.broadcast %cst_51 : f32 to vector<1x1x16xf32>
    %300 = arith.divf %298, %299 : vector<1x1x16xf32>
    %301 = arith.mulf %300, %300 : vector<1x1x16xf32>
    %302 = arith.mulf %300, %301 : vector<1x1x16xf32>
    %cst_52 = arith.constant 4.471500e-02 : f32
    %303 = vector.broadcast %cst_52 : f32 to vector<1x1x16xf32>
    %304 = arith.mulf %303, %302 : vector<1x1x16xf32>
    %305 = arith.addf %300, %304 : vector<1x1x16xf32>
    %cst_53 = arith.constant 0.797884583 : f32
    %306 = vector.broadcast %cst_53 : f32 to vector<1x1x16xf32>
    %307 = arith.mulf %306, %305 : vector<1x1x16xf32>
    %308 = math.tanh %307 : vector<1x1x16xf32>
    %cst_54 = arith.constant 1.000000e+00 : f32
    %309 = vector.broadcast %cst_54 : f32 to vector<1x1x16xf32>
    %310 = arith.addf %309, %308 : vector<1x1x16xf32>
    %cst_55 = arith.constant 5.000000e-01 : f32
    %311 = vector.broadcast %cst_55 : f32 to vector<1x1x16xf32>
    %312 = arith.mulf %311, %310 : vector<1x1x16xf32>
    %313 = arith.mulf %300, %312 : vector<1x1x16xf32>
    %314 = vector.extract_strided_slice %5 {offsets = [0, 0, 2], sizes = [8, 8, 1], strides = [1, 1, 1]} : vector<8x8x3xf32> to vector<8x8x1xf32>
    %315 = vector.broadcast %313 : vector<1x1x16xf32> to vector<8x8x16xf32>
    %316 = vector.broadcast %314 : vector<8x8x1xf32> to vector<8x8x16xf32>
    %317 = arith.mulf %315, %316 : vector<8x8x16xf32>
    %318 = arith.addf %296, %317 : vector<8x8x16xf32>
    %319 = vector.shape_cast %318 : vector<8x8x16xf32> to vector<64x16xf32>
    %320 = arith.truncf %319 : vector<64x16xf32> to vector<64x16xbf16>
    %c0_56 = arith.constant 0 : index
    %c0_57 = arith.constant 0 : index
    %321 = vector.load %arg6[%c0_56, %c0_57] : memref<16x16xbf16, #tpu.memory_space<vmem>>, vector<16x16xbf16>
    %cst_58 = arith.constant dense<0.000000e+00> : vector<64x16xf32>
    %322 = tpu.matmul %320, %321, %cst_58 {dimension_numbers = #tpu.dot_dimension_numbers<[1], [0], [0], [1], [0, 0, 1, 1], [], []>} : vector<64x16xbf16>, vector<16x16xbf16>, vector<64x16xf32> -> vector<64x16xf32>
    %c0_59 = arith.constant 0 : index
    %c0_60 = arith.constant 0 : index
    %323 = vector.load %arg7[%c0_59, %c0_60] : memref<1x16xf32, #tpu.memory_space<vmem>>, vector<1x16xf32>
    %324 = vector.broadcast %323 : vector<1x16xf32> to vector<64x16xf32>
    %325 = arith.addf %322, %324 : vector<64x16xf32>
    %326 = vector.shape_cast %325 : vector<64x16xf32> to vector<8x8x16xf32>
    %327 = arith.mulf %1, %326 : vector<8x8x16xf32>
    %328 = arith.truncf %327 : vector<8x8x16xf32> to vector<8x8x16xbf16>
    %c0_61 = arith.constant 0 : index
    %c0_62 = arith.constant 0 : index
    %c0_63 = arith.constant 0 : index
    %c0_64 = arith.constant 0 : index
    %329 = vector.load %arg8[%c0_61, %c0_62, %c0_63, %c0_64] : memref<1x8x8x16xbf16, #tpu.memory_space<vmem>>, vector<1x8x8x16xbf16>
    %330 = vector.shape_cast %329 : vector<1x8x8x16xbf16> to vector<8x8x16xbf16>
    %331 = vector.shape_cast %328 : vector<8x8x16xbf16> to vector<1x8x8x16xbf16>
    tpu.vector_store %arg8[%c0_61, %c0_62, %c0_63, %c0_64], %331 {strides = array<i32>} : memref<1x8x8x16xbf16, #tpu.memory_space<vmem>>, vector<1x8x8x16xbf16>,
    return
  }
  func.func @transform_0(%arg0: i32) -> (i32, i32, i32, i32) {
    %c0_i32 = arith.constant 0 : i32
    %c0_i32_0 = arith.constant 0 : i32
    %c0_i32_1 = arith.constant 0 : i32
    %c0_i32_2 = arith.constant 0 : i32
    return %arg0, %c0_i32, %c0_i32_0, %c0_i32_1 : i32, i32, i32, i32
  }
  func.func @transform_1(%arg0: i32) -> (i32, i32, i32, i32) {
    %c0_i32 = arith.constant 0 : i32
    %c0_i32_0 = arith.constant 0 : i32
    %c0_i32_1 = arith.constant 0 : i32
    %c0_i32_2 = arith.constant 0 : i32
    return %arg0, %c0_i32, %c0_i32_0, %c0_i32_1 : i32, i32, i32, i32
  }
  func.func @transform_2(%arg0: i32) -> (i32, i32, i32, i32) {
    %c0_i32 = arith.constant 0 : i32
    %c0_i32_0 = arith.constant 0 : i32
    %c0_i32_1 = arith.constant 0 : i32
    %c0_i32_2 = arith.constant 0 : i32
    return %arg0, %c0_i32, %c0_i32_0, %c0_i32_1 : i32, i32, i32, i32
  }
  func.func @transform_3(%arg0: i32) -> (i32, i32, i32) {
    %c0_i32 = arith.constant 0 : i32
    %c0_i32_0 = arith.constant 0 : i32
    %c0_i32_1 = arith.constant 0 : i32
    %c0_i32_2 = arith.constant 0 : i32
    return %c0_i32, %c0_i32_0, %c0_i32_1 : i32, i32, i32
  }
  func.func @transform_4(%arg0: i32) -> (i32, i32, i32) {
    %c0_i32 = arith.constant 0 : i32
    %c0_i32_0 = arith.constant 0 : i32
    %c0_i32_1 = arith.constant 0 : i32
    %c0_i32_2 = arith.constant 0 : i32
    return %c0_i32, %c0_i32_0, %c0_i32_1 : i32, i32, i32
  }
  func.func @transform_5(%arg0: i32) -> (i32, i32) {
    %c0_i32 = arith.constant 0 : i32
    %c0_i32_0 = arith.constant 0 : i32
    %c0_i32_1 = arith.constant 0 : i32
    return %c0_i32, %c0_i32_0 : i32, i32
  }
  func.func @transform_6(%arg0: i32) -> (i32, i32) {
    %c0_i32 = arith.constant 0 : i32
    %c0_i32_0 = arith.constant 0 : i32
    %c0_i32_1 = arith.constant 0 : i32
    return %c0_i32, %c0_i32_0 : i32, i32
  }
  func.func @transform_7(%arg0: i32) -> (i32, i32, i32, i32) {
    %c0_i32 = arith.constant 0 : i32
    %c0_i32_0 = arith.constant 0 : i32
    %c0_i32_1 = arith.constant 0 : i32
    %c0_i32_2 = arith.constant 0 : i32
    return %arg0, %c0_i32, %c0_i32_0, %c0_i32_1 : i32, i32, i32, i32
  }
}

module attributes {stable_mosaic.version = 11 : i64} {
  func.func @kernel(%arg0: i32, %arg1: i32, %arg2: i32, %arg3: memref<128x128xbf16, #tpu.memory_space<vmem>>, %arg4: memref<128x128xbf16, #tpu.memory_space<vmem>>, %arg5: memref<1x128xf32, #tpu.memory_space<vmem>>, %arg6: memref<128x128xf32, #tpu.memory_space<vmem>>, %arg7: memref<128x128xf32, #tpu.memory_space<vmem>>, %arg8: memref<128x128xf32, #tpu.memory_space<vmem>>) attributes {dimension_semantics = [#tpu.dimension_semantics<parallel>, #tpu.dimension_semantics<parallel>, #tpu.dimension_semantics<arbitrary>], iteration_bounds = array<i64: 1, 1, 1>, scalar_prefetch = 0 : i64, scratch_operands = 1 : i64, tpu.core_type = #tpu.core_type<tc>, window_params = [{transform_indices = @transform_0, window_bounds = array<i64: 128, 128>}, {transform_indices = @transform_1, window_bounds = array<i64: 128, 128>}, {transform_indices = @transform_2, window_bounds = array<i64: 1, 128>}, {transform_indices = @transform_3, window_bounds = array<i64: 128, 128>}, {transform_indices = @transform_4, window_bounds = array<i64: 128, 128>}]} {
    %c0_i32 = arith.constant 0 : i32
    %0 = arith.cmpi eq, %arg2, %c0_i32 : i32
    %1 = arith.extui %0 : i1 to i32
    %c0_i32_0 = arith.constant 0 : i32
    %2 = arith.cmpi ne, %1, %c0_i32_0 : i32
    scf.if %2 {
      %cst_10 = arith.constant 0.000000e+00 : f32
      %12 = vector.broadcast %cst_10 : f32 to vector<128x128xf32>
      %c0_11 = arith.constant 0 : index
      %c0_12 = arith.constant 0 : index
      %13 = vector.load %arg8[%c0_11, %c0_12] : memref<128x128xf32, #tpu.memory_space<vmem>>, vector<128x128xf32>
      tpu.vector_store %arg8[%c0_11, %c0_12], %12 {strides = array<i32>} : memref<128x128xf32, #tpu.memory_space<vmem>>, vector<128x128xf32>,
    } else {
    }
    %c0 = arith.constant 0 : index
    %c0_1 = arith.constant 0 : index
    %3 = vector.load %arg3[%c0, %c0_1] : memref<128x128xbf16, #tpu.memory_space<vmem>>, vector<128x128xbf16>
    %c0_2 = arith.constant 0 : index
    %c0_3 = arith.constant 0 : index
    %4 = vector.load %arg8[%c0_2, %c0_3] : memref<128x128xf32, #tpu.memory_space<vmem>>, vector<128x128xf32>
    %c0_4 = arith.constant 0 : index
    %c0_5 = arith.constant 0 : index
    %5 = vector.load %arg4[%c0_4, %c0_5] : memref<128x128xbf16, #tpu.memory_space<vmem>>, vector<128x128xbf16>
    %cst = arith.constant dense<0.000000e+00> : vector<128x128xf32>
    %6 = tpu.matmul %3, %5, %cst {dimension_numbers = #tpu.dot_dimension_numbers<[1], [0], [0], [1], [0, 0, 1, 1], [], []>} : vector<128x128xbf16>, vector<128x128xbf16>, vector<128x128xf32> -> vector<128x128xf32>
    %7 = arith.addf %4, %6 : vector<128x128xf32>
    %c0_6 = arith.constant 0 : index
    %c0_7 = arith.constant 0 : index
    %8 = vector.load %arg8[%c0_6, %c0_7] : memref<128x128xf32, #tpu.memory_space<vmem>>, vector<128x128xf32>
    tpu.vector_store %arg8[%c0_6, %c0_7], %7 {strides = array<i32>} : memref<128x128xf32, #tpu.memory_space<vmem>>, vector<128x128xf32>,
    %c0_i32_8 = arith.constant 0 : i32
    %9 = arith.cmpi eq, %arg2, %c0_i32_8 : i32
    %10 = arith.extui %9 : i1 to i32
    %c0_i32_9 = arith.constant 0 : i32
    %11 = arith.cmpi ne, %10, %c0_i32_9 : i32
    scf.if %11 {
      %c0_10 = arith.constant 0 : index
      %c0_11 = arith.constant 0 : index
      %12 = vector.load %arg8[%c0_10, %c0_11] : memref<128x128xf32, #tpu.memory_space<vmem>>, vector<128x128xf32>
      %c0_12 = arith.constant 0 : index
      %c0_13 = arith.constant 0 : index
      %13 = vector.load %arg5[%c0_12, %c0_13] : memref<1x128xf32, #tpu.memory_space<vmem>>, vector<1x128xf32>
      %14 = vector.broadcast %13 : vector<1x128xf32> to vector<128x128xf32>
      %15 = arith.addf %12, %14 : vector<128x128xf32>
      %c0_14 = arith.constant 0 : index
      %c0_15 = arith.constant 0 : index
      %16 = vector.load %arg6[%c0_14, %c0_15] : memref<128x128xf32, #tpu.memory_space<vmem>>, vector<128x128xf32>
      %17 = arith.addf %15, %16 : vector<128x128xf32>
      %c0_16 = arith.constant 0 : index
      %c0_17 = arith.constant 0 : index
      %18 = vector.load %arg7[%c0_16, %c0_17] : memref<128x128xf32, #tpu.memory_space<vmem>>, vector<128x128xf32>
      tpu.vector_store %arg7[%c0_16, %c0_17], %17 {strides = array<i32>} : memref<128x128xf32, #tpu.memory_space<vmem>>, vector<128x128xf32>,
    } else {
    }
    return
  }
  func.func @transform_0(%arg0: i32, %arg1: i32, %arg2: i32) -> (i32, i32) {
    %c0_i32 = arith.constant 0 : i32
    return %arg0, %arg2 : i32, i32
  }
  func.func @transform_1(%arg0: i32, %arg1: i32, %arg2: i32) -> (i32, i32) {
    %c0_i32 = arith.constant 0 : i32
    return %arg2, %arg1 : i32, i32
  }
  func.func @transform_2(%arg0: i32, %arg1: i32, %arg2: i32) -> (i32, i32) {
    %c0_i32 = arith.constant 0 : i32
    %c0_i32_0 = arith.constant 0 : i32
    return %c0_i32, %arg1 : i32, i32
  }
  func.func @transform_3(%arg0: i32, %arg1: i32, %arg2: i32) -> (i32, i32) {
    %c0_i32 = arith.constant 0 : i32
    return %arg0, %arg1 : i32, i32
  }
  func.func @transform_4(%arg0: i32, %arg1: i32, %arg2: i32) -> (i32, i32) {
    %c0_i32 = arith.constant 0 : i32
    return %arg0, %arg1 : i32, i32
  }
}

module attributes {stable_mosaic.version = 11 : i64} {
  func.func @kernel(%arg0: i32, %arg1: i32, %arg2: i32, %arg3: memref<128x16xbf16, #tpu.memory_space<vmem>>, %arg4: memref<16x128xbf16, #tpu.memory_space<vmem>>, %arg5: memref<1x128xf32, #tpu.memory_space<vmem>>, %arg6: memref<128x128xf32, #tpu.memory_space<vmem>>, %arg7: memref<128x128xf32, #tpu.memory_space<vmem>>, %arg8: memref<128x128xf32, #tpu.memory_space<vmem>>) attributes {dimension_semantics = [#tpu.dimension_semantics<parallel>, #tpu.dimension_semantics<parallel>, #tpu.dimension_semantics<arbitrary>], iteration_bounds = array<i64: 1, 1, 1>, scalar_prefetch = 0 : i64, scratch_operands = 1 : i64, tpu.core_type = #tpu.core_type<tc>, window_params = [{transform_indices = @transform_0, window_bounds = array<i64: 128, 16>}, {transform_indices = @transform_1, window_bounds = array<i64: 16, 128>}, {transform_indices = @transform_2, window_bounds = array<i64: 1, 128>}, {transform_indices = @transform_3, window_bounds = array<i64: 128, 128>}, {transform_indices = @transform_4, window_bounds = array<i64: 128, 128>}]} {
    %c0_i32 = arith.constant 0 : i32
    %0 = arith.cmpi eq, %arg2, %c0_i32 : i32
    %1 = arith.extui %0 : i1 to i32
    %c0_i32_0 = arith.constant 0 : i32
    %2 = arith.cmpi ne, %1, %c0_i32_0 : i32
    scf.if %2 {
      %cst_10 = arith.constant 0.000000e+00 : f32
      %12 = vector.broadcast %cst_10 : f32 to vector<128x128xf32>
      %c0_11 = arith.constant 0 : index
      %c0_12 = arith.constant 0 : index
      %13 = vector.load %arg8[%c0_11, %c0_12] : memref<128x128xf32, #tpu.memory_space<vmem>>, vector<128x128xf32>
      tpu.vector_store %arg8[%c0_11, %c0_12], %12 {strides = array<i32>} : memref<128x128xf32, #tpu.memory_space<vmem>>, vector<128x128xf32>,
    } else {
    }
    %c0 = arith.constant 0 : index
    %c0_1 = arith.constant 0 : index
    %3 = vector.load %arg3[%c0, %c0_1] : memref<128x16xbf16, #tpu.memory_space<vmem>>, vector<128x16xbf16>
    %c0_2 = arith.constant 0 : index
    %c0_3 = arith.constant 0 : index
    %4 = vector.load %arg8[%c0_2, %c0_3] : memref<128x128xf32, #tpu.memory_space<vmem>>, vector<128x128xf32>
    %c0_4 = arith.constant 0 : index
    %c0_5 = arith.constant 0 : index
    %5 = vector.load %arg4[%c0_4, %c0_5] : memref<16x128xbf16, #tpu.memory_space<vmem>>, vector<16x128xbf16>
    %cst = arith.constant dense<0.000000e+00> : vector<128x128xf32>
    %6 = tpu.matmul %3, %5, %cst {dimension_numbers = #tpu.dot_dimension_numbers<[1], [0], [0], [1], [0, 0, 1, 1], [], []>} : vector<128x16xbf16>, vector<16x128xbf16>, vector<128x128xf32> -> vector<128x128xf32>
    %7 = arith.addf %4, %6 : vector<128x128xf32>
    %c0_6 = arith.constant 0 : index
    %c0_7 = arith.constant 0 : index
    %8 = vector.load %arg8[%c0_6, %c0_7] : memref<128x128xf32, #tpu.memory_space<vmem>>, vector<128x128xf32>
    tpu.vector_store %arg8[%c0_6, %c0_7], %7 {strides = array<i32>} : memref<128x128xf32, #tpu.memory_space<vmem>>, vector<128x128xf32>,
    %c0_i32_8 = arith.constant 0 : i32
    %9 = arith.cmpi eq, %arg2, %c0_i32_8 : i32
    %10 = arith.extui %9 : i1 to i32
    %c0_i32_9 = arith.constant 0 : i32
    %11 = arith.cmpi ne, %10, %c0_i32_9 : i32
    scf.if %11 {
      %c0_10 = arith.constant 0 : index
      %c0_11 = arith.constant 0 : index
      %12 = vector.load %arg8[%c0_10, %c0_11] : memref<128x128xf32, #tpu.memory_space<vmem>>, vector<128x128xf32>
      %c0_12 = arith.constant 0 : index
      %c0_13 = arith.constant 0 : index
      %13 = vector.load %arg5[%c0_12, %c0_13] : memref<1x128xf32, #tpu.memory_space<vmem>>, vector<1x128xf32>
      %14 = vector.broadcast %13 : vector<1x128xf32> to vector<128x128xf32>
      %15 = arith.addf %12, %14 : vector<128x128xf32>
      %c0_14 = arith.constant 0 : index
      %c0_15 = arith.constant 0 : index
      %16 = vector.load %arg6[%c0_14, %c0_15] : memref<128x128xf32, #tpu.memory_space<vmem>>, vector<128x128xf32>
      %17 = arith.addf %15, %16 : vector<128x128xf32>
      %c0_16 = arith.constant 0 : index
      %c0_17 = arith.constant 0 : index
      %18 = vector.load %arg7[%c0_16, %c0_17] : memref<128x128xf32, #tpu.memory_space<vmem>>, vector<128x128xf32>
      tpu.vector_store %arg7[%c0_16, %c0_17], %17 {strides = array<i32>} : memref<128x128xf32, #tpu.memory_space<vmem>>, vector<128x128xf32>,
    } else {
    }
    return
  }
  func.func @transform_0(%arg0: i32, %arg1: i32, %arg2: i32) -> (i32, i32) {
    %c0_i32 = arith.constant 0 : i32
    return %arg0, %arg2 : i32, i32
  }
  func.func @transform_1(%arg0: i32, %arg1: i32, %arg2: i32) -> (i32, i32) {
    %c0_i32 = arith.constant 0 : i32
    return %arg2, %arg1 : i32, i32
  }
  func.func @transform_2(%arg0: i32, %arg1: i32, %arg2: i32) -> (i32, i32) {
    %c0_i32 = arith.constant 0 : i32
    %c0_i32_0 = arith.constant 0 : i32
    return %c0_i32, %arg1 : i32, i32
  }
  func.func @transform_3(%arg0: i32, %arg1: i32, %arg2: i32) -> (i32, i32) {
    %c0_i32 = arith.constant 0 : i32
    return %arg0, %arg1 : i32, i32
  }
  func.func @transform_4(%arg0: i32, %arg1: i32, %arg2: i32) -> (i32, i32) {
    %c0_i32 = arith.constant 0 : i32
    return %arg0, %arg1 : i32, i32
  }
}

module attributes {stable_mosaic.version = 11 : i64} {
  func.func @kernel(%arg0: i32, %arg1: i32, %arg2: i32, %arg3: memref<32x64xbf16, #tpu.memory_space<vmem>>, %arg4: memref<64x128xbf16, #tpu.memory_space<vmem>>, %arg5: memref<1x128xf32, #tpu.memory_space<vmem>>, %arg6: memref<32x128xf32, #tpu.memory_space<vmem>>, %arg7: memref<32x128xf32, #tpu.memory_space<vmem>>) attributes {dimension_semantics = [#tpu.dimension_semantics<parallel>, #tpu.dimension_semantics<parallel>, #tpu.dimension_semantics<arbitrary>], iteration_bounds = array<i64: 1, 1, 1>, scalar_prefetch = 0 : i64, scratch_operands = 1 : i64, tpu.core_type = #tpu.core_type<tc>, window_params = [{transform_indices = @transform_0, window_bounds = array<i64: 32, 64>}, {transform_indices = @transform_1, window_bounds = array<i64: 64, 128>}, {transform_indices = @transform_2, window_bounds = array<i64: 1, 128>}, {transform_indices = @transform_3, window_bounds = array<i64: 32, 128>}]} {
    %c0_i32 = arith.constant 0 : i32
    %0 = arith.cmpi eq, %arg2, %c0_i32 : i32
    %1 = arith.extui %0 : i1 to i32
    %c0_i32_0 = arith.constant 0 : i32
    %2 = arith.cmpi ne, %1, %c0_i32_0 : i32
    scf.if %2 {
      %cst_10 = arith.constant 0.000000e+00 : f32
      %12 = vector.broadcast %cst_10 : f32 to vector<32x128xf32>
      %c0_11 = arith.constant 0 : index
      %c0_12 = arith.constant 0 : index
      %13 = vector.load %arg7[%c0_11, %c0_12] : memref<32x128xf32, #tpu.memory_space<vmem>>, vector<32x128xf32>
      tpu.vector_store %arg7[%c0_11, %c0_12], %12 {strides = array<i32>} : memref<32x128xf32, #tpu.memory_space<vmem>>, vector<32x128xf32>,
    } else {
    }
    %c0 = arith.constant 0 : index
    %c0_1 = arith.constant 0 : index
    %3 = vector.load %arg3[%c0, %c0_1] : memref<32x64xbf16, #tpu.memory_space<vmem>>, vector<32x64xbf16>
    %c0_2 = arith.constant 0 : index
    %c0_3 = arith.constant 0 : index
    %4 = vector.load %arg7[%c0_2, %c0_3] : memref<32x128xf32, #tpu.memory_space<vmem>>, vector<32x128xf32>
    %c0_4 = arith.constant 0 : index
    %c0_5 = arith.constant 0 : index
    %5 = vector.load %arg4[%c0_4, %c0_5] : memref<64x128xbf16, #tpu.memory_space<vmem>>, vector<64x128xbf16>
    %cst = arith.constant dense<0.000000e+00> : vector<32x128xf32>
    %6 = tpu.matmul %3, %5, %cst {dimension_numbers = #tpu.dot_dimension_numbers<[1], [0], [0], [1], [0, 0, 1, 1], [], []>} : vector<32x64xbf16>, vector<64x128xbf16>, vector<32x128xf32> -> vector<32x128xf32>
    %7 = arith.addf %4, %6 : vector<32x128xf32>
    %c0_6 = arith.constant 0 : index
    %c0_7 = arith.constant 0 : index
    %8 = vector.load %arg7[%c0_6, %c0_7] : memref<32x128xf32, #tpu.memory_space<vmem>>, vector<32x128xf32>
    tpu.vector_store %arg7[%c0_6, %c0_7], %7 {strides = array<i32>} : memref<32x128xf32, #tpu.memory_space<vmem>>, vector<32x128xf32>,
    %c0_i32_8 = arith.constant 0 : i32
    %9 = arith.cmpi eq, %arg2, %c0_i32_8 : i32
    %10 = arith.extui %9 : i1 to i32
    %c0_i32_9 = arith.constant 0 : i32
    %11 = arith.cmpi ne, %10, %c0_i32_9 : i32
    scf.if %11 {
      %c0_10 = arith.constant 0 : index
      %c0_11 = arith.constant 0 : index
      %12 = vector.load %arg7[%c0_10, %c0_11] : memref<32x128xf32, #tpu.memory_space<vmem>>, vector<32x128xf32>
      %c0_12 = arith.constant 0 : index
      %c0_13 = arith.constant 0 : index
      %13 = vector.load %arg5[%c0_12, %c0_13] : memref<1x128xf32, #tpu.memory_space<vmem>>, vector<1x128xf32>
      %14 = vector.broadcast %13 : vector<1x128xf32> to vector<32x128xf32>
      %15 = arith.addf %12, %14 : vector<32x128xf32>
      %c0_14 = arith.constant 0 : index
      %c0_15 = arith.constant 0 : index
      %16 = vector.load %arg6[%c0_14, %c0_15] : memref<32x128xf32, #tpu.memory_space<vmem>>, vector<32x128xf32>
      tpu.vector_store %arg6[%c0_14, %c0_15], %15 {strides = array<i32>} : memref<32x128xf32, #tpu.memory_space<vmem>>, vector<32x128xf32>,
    } else {
    }
    return
  }
  func.func @transform_0(%arg0: i32, %arg1: i32, %arg2: i32) -> (i32, i32) {
    %c0_i32 = arith.constant 0 : i32
    return %arg0, %arg2 : i32, i32
  }
  func.func @transform_1(%arg0: i32, %arg1: i32, %arg2: i32) -> (i32, i32) {
    %c0_i32 = arith.constant 0 : i32
    return %arg2, %arg1 : i32, i32
  }
  func.func @transform_2(%arg0: i32, %arg1: i32, %arg2: i32) -> (i32, i32) {
    %c0_i32 = arith.constant 0 : i32
    %c0_i32_0 = arith.constant 0 : i32
    return %c0_i32, %arg1 : i32, i32
  }
  func.func @transform_3(%arg0: i32, %arg1: i32, %arg2: i32) -> (i32, i32) {
    %c0_i32 = arith.constant 0 : i32
    return %arg0, %arg1 : i32, i32
  }
}

module attributes {stable_mosaic.version = 11 : i64} {
  func.func @_ln_kernel(%arg0: i32, %arg1: memref<32x32xf32, #tpu.memory_space<vmem>>, %arg2: memref<1x32xf32, #tpu.memory_space<vmem>>, %arg3: memref<1x32xf32, #tpu.memory_space<vmem>>, %arg4: memref<32x32xbf16, #tpu.memory_space<vmem>>) attributes {dimension_semantics = [#tpu.dimension_semantics<parallel>], iteration_bounds = array<i64: 1>, scalar_prefetch = 0 : i64, scratch_operands = 0 : i64, tpu.core_type = #tpu.core_type<tc>, window_params = [{transform_indices = @transform_0, window_bounds = array<i64: 32, 32>}, {pipeline_mode = #tpu.pipeline_mode<synchronous>, transform_indices = @transform_1, window_bounds = array<i64: 1, 32>}, {pipeline_mode = #tpu.pipeline_mode<synchronous>, transform_indices = @transform_2, window_bounds = array<i64: 1, 32>}, {transform_indices = @transform_3, window_bounds = array<i64: 32, 32>}]} {
    %c0 = arith.constant 0 : index
    %c0_0 = arith.constant 0 : index
    %0 = vector.load %arg1[%c0, %c0_0] : memref<32x32xf32, #tpu.memory_space<vmem>>, vector<32x32xf32>
    %cst = arith.constant dense<0.000000e+00> : vector<32xf32>
    %1 = vector.multi_reduction <add>, %0, %cst [1] : vector<32x32xf32> to vector<32xf32>
    %2 = vector.shape_cast %1 : vector<32xf32> to vector<32x1xf32>
    %cst_1 = arith.constant 3.200000e+01 : f32
    %3 = vector.broadcast %cst_1 : f32 to vector<32x1xf32>
    %4 = arith.divf %2, %3 : vector<32x1xf32>
    %5 = vector.broadcast %4 : vector<32x1xf32> to vector<32x32xf32>
    %6 = arith.subf %0, %5 : vector<32x32xf32>
    %7 = arith.mulf %6, %6 : vector<32x32xf32>
    %cst_2 = arith.constant dense<0.000000e+00> : vector<32xf32>
    %8 = vector.multi_reduction <add>, %7, %cst_2 [1] : vector<32x32xf32> to vector<32xf32>
    %9 = vector.shape_cast %8 : vector<32xf32> to vector<32x1xf32>
    %cst_3 = arith.constant 3.200000e+01 : f32
    %10 = vector.broadcast %cst_3 : f32 to vector<32x1xf32>
    %11 = arith.divf %9, %10 : vector<32x1xf32>
    %cst_4 = arith.constant 9.99999974E-6 : f32
    %12 = vector.broadcast %cst_4 : f32 to vector<32x1xf32>
    %13 = arith.addf %11, %12 : vector<32x1xf32>
    %14 = math.rsqrt %13 : vector<32x1xf32>
    %15 = vector.broadcast %14 : vector<32x1xf32> to vector<32x32xf32>
    %16 = arith.mulf %6, %15 : vector<32x32xf32>
    %c0_5 = arith.constant 0 : index
    %c0_6 = arith.constant 0 : index
    %17 = vector.load %arg2[%c0_5, %c0_6] : memref<1x32xf32, #tpu.memory_space<vmem>>, vector<1x32xf32>
    %18 = vector.broadcast %17 : vector<1x32xf32> to vector<32x32xf32>
    %19 = arith.mulf %16, %18 : vector<32x32xf32>
    %c0_7 = arith.constant 0 : index
    %c0_8 = arith.constant 0 : index
    %20 = vector.load %arg3[%c0_7, %c0_8] : memref<1x32xf32, #tpu.memory_space<vmem>>, vector<1x32xf32>
    %21 = vector.broadcast %20 : vector<1x32xf32> to vector<32x32xf32>
    %22 = arith.addf %19, %21 : vector<32x32xf32>
    %23 = arith.truncf %22 : vector<32x32xf32> to vector<32x32xbf16>
    %c0_9 = arith.constant 0 : index
    %c0_10 = arith.constant 0 : index
    %24 = vector.load %arg4[%c0_9, %c0_10] : memref<32x32xbf16, #tpu.memory_space<vmem>>, vector<32x32xbf16>
    tpu.vector_store %arg4[%c0_9, %c0_10], %23 {strides = array<i32>} : memref<32x32xbf16, #tpu.memory_space<vmem>>, vector<32x32xbf16>,
    return
  }
  func.func @transform_0(%arg0: i32) -> (i32, i32) {
    %c0_i32 = arith.constant 0 : i32
    %c0_i32_0 = arith.constant 0 : i32
    return %arg0, %c0_i32 : i32, i32
  }
  func.func @transform_1(%arg0: i32) -> (i32, i32) {
    %c0_i32 = arith.constant 0 : i32
    %c0_i32_0 = arith.constant 0 : i32
    %c0_i32_1 = arith.constant 0 : i32
    return %c0_i32, %c0_i32_0 : i32, i32
  }
  func.func @transform_2(%arg0: i32) -> (i32, i32) {
    %c0_i32 = arith.constant 0 : i32
    %c0_i32_0 = arith.constant 0 : i32
    %c0_i32_1 = arith.constant 0 : i32
    return %c0_i32, %c0_i32_0 : i32, i32
  }
  func.func @transform_3(%arg0: i32) -> (i32, i32) {
    %c0_i32 = arith.constant 0 : i32
    %c0_i32_0 = arith.constant 0 : i32
    return %arg0, %c0_i32 : i32, i32
  }
}

module attributes {stable_mosaic.version = 11 : i64} {
  func.func @_ln_kernel(%arg0: i32, %arg1: memref<32x32xf32, #tpu.memory_space<vmem>>, %arg2: memref<1x32xf32, #tpu.memory_space<vmem>>, %arg3: memref<1x32xf32, #tpu.memory_space<vmem>>, %arg4: memref<32x32xf32, #tpu.memory_space<vmem>>) attributes {dimension_semantics = [#tpu.dimension_semantics<parallel>], iteration_bounds = array<i64: 1>, scalar_prefetch = 0 : i64, scratch_operands = 0 : i64, tpu.core_type = #tpu.core_type<tc>, window_params = [{transform_indices = @transform_0, window_bounds = array<i64: 32, 32>}, {pipeline_mode = #tpu.pipeline_mode<synchronous>, transform_indices = @transform_1, window_bounds = array<i64: 1, 32>}, {pipeline_mode = #tpu.pipeline_mode<synchronous>, transform_indices = @transform_2, window_bounds = array<i64: 1, 32>}, {transform_indices = @transform_3, window_bounds = array<i64: 32, 32>}]} {
    %c0 = arith.constant 0 : index
    %c0_0 = arith.constant 0 : index
    %0 = vector.load %arg1[%c0, %c0_0] : memref<32x32xf32, #tpu.memory_space<vmem>>, vector<32x32xf32>
    %cst = arith.constant dense<0.000000e+00> : vector<32xf32>
    %1 = vector.multi_reduction <add>, %0, %cst [1] : vector<32x32xf32> to vector<32xf32>
    %2 = vector.shape_cast %1 : vector<32xf32> to vector<32x1xf32>
    %cst_1 = arith.constant 3.200000e+01 : f32
    %3 = vector.broadcast %cst_1 : f32 to vector<32x1xf32>
    %4 = arith.divf %2, %3 : vector<32x1xf32>
    %5 = vector.broadcast %4 : vector<32x1xf32> to vector<32x32xf32>
    %6 = arith.subf %0, %5 : vector<32x32xf32>
    %7 = arith.mulf %6, %6 : vector<32x32xf32>
    %cst_2 = arith.constant dense<0.000000e+00> : vector<32xf32>
    %8 = vector.multi_reduction <add>, %7, %cst_2 [1] : vector<32x32xf32> to vector<32xf32>
    %9 = vector.shape_cast %8 : vector<32xf32> to vector<32x1xf32>
    %cst_3 = arith.constant 3.200000e+01 : f32
    %10 = vector.broadcast %cst_3 : f32 to vector<32x1xf32>
    %11 = arith.divf %9, %10 : vector<32x1xf32>
    %cst_4 = arith.constant 9.99999974E-6 : f32
    %12 = vector.broadcast %cst_4 : f32 to vector<32x1xf32>
    %13 = arith.addf %11, %12 : vector<32x1xf32>
    %14 = math.rsqrt %13 : vector<32x1xf32>
    %15 = vector.broadcast %14 : vector<32x1xf32> to vector<32x32xf32>
    %16 = arith.mulf %6, %15 : vector<32x32xf32>
    %c0_5 = arith.constant 0 : index
    %c0_6 = arith.constant 0 : index
    %17 = vector.load %arg2[%c0_5, %c0_6] : memref<1x32xf32, #tpu.memory_space<vmem>>, vector<1x32xf32>
    %18 = vector.broadcast %17 : vector<1x32xf32> to vector<32x32xf32>
    %19 = arith.mulf %16, %18 : vector<32x32xf32>
    %c0_7 = arith.constant 0 : index
    %c0_8 = arith.constant 0 : index
    %20 = vector.load %arg3[%c0_7, %c0_8] : memref<1x32xf32, #tpu.memory_space<vmem>>, vector<1x32xf32>
    %21 = vector.broadcast %20 : vector<1x32xf32> to vector<32x32xf32>
    %22 = arith.addf %19, %21 : vector<32x32xf32>
    %c0_9 = arith.constant 0 : index
    %c0_10 = arith.constant 0 : index
    %23 = vector.load %arg4[%c0_9, %c0_10] : memref<32x32xf32, #tpu.memory_space<vmem>>, vector<32x32xf32>
    tpu.vector_store %arg4[%c0_9, %c0_10], %22 {strides = array<i32>} : memref<32x32xf32, #tpu.memory_space<vmem>>, vector<32x32xf32>,
    return
  }
  func.func @transform_0(%arg0: i32) -> (i32, i32) {
    %c0_i32 = arith.constant 0 : i32
    %c0_i32_0 = arith.constant 0 : i32
    return %arg0, %c0_i32 : i32, i32
  }
  func.func @transform_1(%arg0: i32) -> (i32, i32) {
    %c0_i32 = arith.constant 0 : i32
    %c0_i32_0 = arith.constant 0 : i32
    %c0_i32_1 = arith.constant 0 : i32
    return %c0_i32, %c0_i32_0 : i32, i32
  }
  func.func @transform_2(%arg0: i32) -> (i32, i32) {
    %c0_i32 = arith.constant 0 : i32
    %c0_i32_0 = arith.constant 0 : i32
    %c0_i32_1 = arith.constant 0 : i32
    return %c0_i32, %c0_i32_0 : i32, i32
  }
  func.func @transform_3(%arg0: i32) -> (i32, i32) {
    %c0_i32 = arith.constant 0 : i32
    %c0_i32_0 = arith.constant 0 : i32
    return %arg0, %c0_i32 : i32, i32
  }
}

module attributes {stable_mosaic.version = 11 : i64} {
  func.func @kernel(%arg0: i32, %arg1: i32, %arg2: i32, %arg3: memref<32x32xbf16, #tpu.memory_space<vmem>>, %arg4: memref<32x128xbf16, #tpu.memory_space<vmem>>, %arg5: memref<1x128xf32, #tpu.memory_space<vmem>>, %arg6: memref<32x128xf32, #tpu.memory_space<vmem>>, %arg7: memref<32x128xf32, #tpu.memory_space<vmem>>) attributes {dimension_semantics = [#tpu.dimension_semantics<parallel>, #tpu.dimension_semantics<parallel>, #tpu.dimension_semantics<arbitrary>], iteration_bounds = array<i64: 1, 1, 1>, scalar_prefetch = 0 : i64, scratch_operands = 1 : i64, tpu.core_type = #tpu.core_type<tc>, window_params = [{transform_indices = @transform_0, window_bounds = array<i64: 32, 32>}, {transform_indices = @transform_1, window_bounds = array<i64: 32, 128>}, {transform_indices = @transform_2, window_bounds = array<i64: 1, 128>}, {transform_indices = @transform_3, window_bounds = array<i64: 32, 128>}]} {
    %c0_i32 = arith.constant 0 : i32
    %0 = arith.cmpi eq, %arg2, %c0_i32 : i32
    %1 = arith.extui %0 : i1 to i32
    %c0_i32_0 = arith.constant 0 : i32
    %2 = arith.cmpi ne, %1, %c0_i32_0 : i32
    scf.if %2 {
      %cst_10 = arith.constant 0.000000e+00 : f32
      %12 = vector.broadcast %cst_10 : f32 to vector<32x128xf32>
      %c0_11 = arith.constant 0 : index
      %c0_12 = arith.constant 0 : index
      %13 = vector.load %arg7[%c0_11, %c0_12] : memref<32x128xf32, #tpu.memory_space<vmem>>, vector<32x128xf32>
      tpu.vector_store %arg7[%c0_11, %c0_12], %12 {strides = array<i32>} : memref<32x128xf32, #tpu.memory_space<vmem>>, vector<32x128xf32>,
    } else {
    }
    %c0 = arith.constant 0 : index
    %c0_1 = arith.constant 0 : index
    %3 = vector.load %arg3[%c0, %c0_1] : memref<32x32xbf16, #tpu.memory_space<vmem>>, vector<32x32xbf16>
    %c0_2 = arith.constant 0 : index
    %c0_3 = arith.constant 0 : index
    %4 = vector.load %arg7[%c0_2, %c0_3] : memref<32x128xf32, #tpu.memory_space<vmem>>, vector<32x128xf32>
    %c0_4 = arith.constant 0 : index
    %c0_5 = arith.constant 0 : index
    %5 = vector.load %arg4[%c0_4, %c0_5] : memref<32x128xbf16, #tpu.memory_space<vmem>>, vector<32x128xbf16>
    %cst = arith.constant dense<0.000000e+00> : vector<32x128xf32>
    %6 = tpu.matmul %3, %5, %cst {dimension_numbers = #tpu.dot_dimension_numbers<[1], [0], [0], [1], [0, 0, 1, 1], [], []>} : vector<32x32xbf16>, vector<32x128xbf16>, vector<32x128xf32> -> vector<32x128xf32>
    %7 = arith.addf %4, %6 : vector<32x128xf32>
    %c0_6 = arith.constant 0 : index
    %c0_7 = arith.constant 0 : index
    %8 = vector.load %arg7[%c0_6, %c0_7] : memref<32x128xf32, #tpu.memory_space<vmem>>, vector<32x128xf32>
    tpu.vector_store %arg7[%c0_6, %c0_7], %7 {strides = array<i32>} : memref<32x128xf32, #tpu.memory_space<vmem>>, vector<32x128xf32>,
    %c0_i32_8 = arith.constant 0 : i32
    %9 = arith.cmpi eq, %arg2, %c0_i32_8 : i32
    %10 = arith.extui %9 : i1 to i32
    %c0_i32_9 = arith.constant 0 : i32
    %11 = arith.cmpi ne, %10, %c0_i32_9 : i32
    scf.if %11 {
      %c0_10 = arith.constant 0 : index
      %c0_11 = arith.constant 0 : index
      %12 = vector.load %arg7[%c0_10, %c0_11] : memref<32x128xf32, #tpu.memory_space<vmem>>, vector<32x128xf32>
      %c0_12 = arith.constant 0 : index
      %c0_13 = arith.constant 0 : index
      %13 = vector.load %arg5[%c0_12, %c0_13] : memref<1x128xf32, #tpu.memory_space<vmem>>, vector<1x128xf32>
      %14 = vector.broadcast %13 : vector<1x128xf32> to vector<32x128xf32>
      %15 = arith.addf %12, %14 : vector<32x128xf32>
      %c0_14 = arith.constant 0 : index
      %c0_15 = arith.constant 0 : index
      %16 = vector.load %arg6[%c0_14, %c0_15] : memref<32x128xf32, #tpu.memory_space<vmem>>, vector<32x128xf32>
      tpu.vector_store %arg6[%c0_14, %c0_15], %15 {strides = array<i32>} : memref<32x128xf32, #tpu.memory_space<vmem>>, vector<32x128xf32>,
    } else {
    }
    return
  }
  func.func @transform_0(%arg0: i32, %arg1: i32, %arg2: i32) -> (i32, i32) {
    %c0_i32 = arith.constant 0 : i32
    return %arg0, %arg2 : i32, i32
  }
  func.func @transform_1(%arg0: i32, %arg1: i32, %arg2: i32) -> (i32, i32) {
    %c0_i32 = arith.constant 0 : i32
    return %arg2, %arg1 : i32, i32
  }
  func.func @transform_2(%arg0: i32, %arg1: i32, %arg2: i32) -> (i32, i32) {
    %c0_i32 = arith.constant 0 : i32
    %c0_i32_0 = arith.constant 0 : i32
    return %c0_i32, %arg1 : i32, i32
  }
  func.func @transform_3(%arg0: i32, %arg1: i32, %arg2: i32) -> (i32, i32) {
    %c0_i32 = arith.constant 0 : i32
    return %arg0, %arg1 : i32, i32
  }
}

module attributes {stable_mosaic.version = 11 : i64} {
  func.func @kernel(%arg0: i32, %arg1: i32, %arg2: i32, %arg3: memref<32x32xbf16, #tpu.memory_space<vmem>>, %arg4: memref<32x128xbf16, #tpu.memory_space<vmem>>, %arg5: memref<1x128xf32, #tpu.memory_space<vmem>>, %arg6: memref<32x128xf32, #tpu.memory_space<vmem>>, %arg7: memref<32x128xf32, #tpu.memory_space<vmem>>, %arg8: memref<32x128xf32, #tpu.memory_space<vmem>>) attributes {dimension_semantics = [#tpu.dimension_semantics<parallel>, #tpu.dimension_semantics<parallel>, #tpu.dimension_semantics<arbitrary>], iteration_bounds = array<i64: 1, 1, 1>, scalar_prefetch = 0 : i64, scratch_operands = 1 : i64, tpu.core_type = #tpu.core_type<tc>, window_params = [{transform_indices = @transform_0, window_bounds = array<i64: 32, 32>}, {transform_indices = @transform_1, window_bounds = array<i64: 32, 128>}, {transform_indices = @transform_2, window_bounds = array<i64: 1, 128>}, {transform_indices = @transform_3, window_bounds = array<i64: 32, 128>}, {transform_indices = @transform_4, window_bounds = array<i64: 32, 128>}]} {
    %c0_i32 = arith.constant 0 : i32
    %0 = arith.cmpi eq, %arg2, %c0_i32 : i32
    %1 = arith.extui %0 : i1 to i32
    %c0_i32_0 = arith.constant 0 : i32
    %2 = arith.cmpi ne, %1, %c0_i32_0 : i32
    scf.if %2 {
      %cst_10 = arith.constant 0.000000e+00 : f32
      %12 = vector.broadcast %cst_10 : f32 to vector<32x128xf32>
      %c0_11 = arith.constant 0 : index
      %c0_12 = arith.constant 0 : index
      %13 = vector.load %arg8[%c0_11, %c0_12] : memref<32x128xf32, #tpu.memory_space<vmem>>, vector<32x128xf32>
      tpu.vector_store %arg8[%c0_11, %c0_12], %12 {strides = array<i32>} : memref<32x128xf32, #tpu.memory_space<vmem>>, vector<32x128xf32>,
    } else {
    }
    %c0 = arith.constant 0 : index
    %c0_1 = arith.constant 0 : index
    %3 = vector.load %arg3[%c0, %c0_1] : memref<32x32xbf16, #tpu.memory_space<vmem>>, vector<32x32xbf16>
    %c0_2 = arith.constant 0 : index
    %c0_3 = arith.constant 0 : index
    %4 = vector.load %arg8[%c0_2, %c0_3] : memref<32x128xf32, #tpu.memory_space<vmem>>, vector<32x128xf32>
    %c0_4 = arith.constant 0 : index
    %c0_5 = arith.constant 0 : index
    %5 = vector.load %arg4[%c0_4, %c0_5] : memref<32x128xbf16, #tpu.memory_space<vmem>>, vector<32x128xbf16>
    %cst = arith.constant dense<0.000000e+00> : vector<32x128xf32>
    %6 = tpu.matmul %3, %5, %cst {dimension_numbers = #tpu.dot_dimension_numbers<[1], [0], [0], [1], [0, 0, 1, 1], [], []>} : vector<32x32xbf16>, vector<32x128xbf16>, vector<32x128xf32> -> vector<32x128xf32>
    %7 = arith.addf %4, %6 : vector<32x128xf32>
    %c0_6 = arith.constant 0 : index
    %c0_7 = arith.constant 0 : index
    %8 = vector.load %arg8[%c0_6, %c0_7] : memref<32x128xf32, #tpu.memory_space<vmem>>, vector<32x128xf32>
    tpu.vector_store %arg8[%c0_6, %c0_7], %7 {strides = array<i32>} : memref<32x128xf32, #tpu.memory_space<vmem>>, vector<32x128xf32>,
    %c0_i32_8 = arith.constant 0 : i32
    %9 = arith.cmpi eq, %arg2, %c0_i32_8 : i32
    %10 = arith.extui %9 : i1 to i32
    %c0_i32_9 = arith.constant 0 : i32
    %11 = arith.cmpi ne, %10, %c0_i32_9 : i32
    scf.if %11 {
      %c0_10 = arith.constant 0 : index
      %c0_11 = arith.constant 0 : index
      %12 = vector.load %arg8[%c0_10, %c0_11] : memref<32x128xf32, #tpu.memory_space<vmem>>, vector<32x128xf32>
      %c0_12 = arith.constant 0 : index
      %c0_13 = arith.constant 0 : index
      %13 = vector.load %arg5[%c0_12, %c0_13] : memref<1x128xf32, #tpu.memory_space<vmem>>, vector<1x128xf32>
      %14 = vector.broadcast %13 : vector<1x128xf32> to vector<32x128xf32>
      %15 = arith.addf %12, %14 : vector<32x128xf32>
      %c0_14 = arith.constant 0 : index
      %c0_15 = arith.constant 0 : index
      %16 = vector.load %arg6[%c0_14, %c0_15] : memref<32x128xf32, #tpu.memory_space<vmem>>, vector<32x128xf32>
      %17 = arith.addf %15, %16 : vector<32x128xf32>
      %c0_16 = arith.constant 0 : index
      %c0_17 = arith.constant 0 : index
      %18 = vector.load %arg7[%c0_16, %c0_17] : memref<32x128xf32, #tpu.memory_space<vmem>>, vector<32x128xf32>
      tpu.vector_store %arg7[%c0_16, %c0_17], %17 {strides = array<i32>} : memref<32x128xf32, #tpu.memory_space<vmem>>, vector<32x128xf32>,
    } else {
    }
    return
  }
  func.func @transform_0(%arg0: i32, %arg1: i32, %arg2: i32) -> (i32, i32) {
    %c0_i32 = arith.constant 0 : i32
    return %arg0, %arg2 : i32, i32
  }
  func.func @transform_1(%arg0: i32, %arg1: i32, %arg2: i32) -> (i32, i32) {
    %c0_i32 = arith.constant 0 : i32
    return %arg2, %arg1 : i32, i32
  }
  func.func @transform_2(%arg0: i32, %arg1: i32, %arg2: i32) -> (i32, i32) {
    %c0_i32 = arith.constant 0 : i32
    %c0_i32_0 = arith.constant 0 : i32
    return %c0_i32, %arg1 : i32, i32
  }
  func.func @transform_3(%arg0: i32, %arg1: i32, %arg2: i32) -> (i32, i32) {
    %c0_i32 = arith.constant 0 : i32
    return %arg0, %arg1 : i32, i32
  }
  func.func @transform_4(%arg0: i32, %arg1: i32, %arg2: i32) -> (i32, i32) {
    %c0_i32 = arith.constant 0 : i32
    return %arg0, %arg1 : i32, i32
  }
}

module attributes {stable_mosaic.version = 11 : i64} {
  func.func @kernel(%arg0: i32, %arg1: memref<1x4x4x32xf32, #tpu.memory_space<vmem>>, %arg2: memref<1x4x4x32xf32, #tpu.memory_space<vmem>>, %arg3: memref<1x4x4x3xf32, #tpu.memory_space<vmem>>, %arg4: memref<3x3x32xf32, #tpu.memory_space<vmem>>, %arg5: memref<5x5x32xf32, #tpu.memory_space<vmem>>, %arg6: memref<32x32xbf16, #tpu.memory_space<vmem>>, %arg7: memref<1x32xf32, #tpu.memory_space<vmem>>, %arg8: memref<1x4x4x32xbf16, #tpu.memory_space<vmem>>, %arg9: memref<8x8x32xf32, #tpu.memory_space<vmem>>) attributes {dimension_semantics = [#tpu.dimension_semantics<parallel>], iteration_bounds = array<i64: 2>, scalar_prefetch = 0 : i64, scratch_operands = 1 : i64, tpu.core_type = #tpu.core_type<tc>, window_params = [{transform_indices = @transform_0, window_bounds = array<i64: 1, 4, 4, 32>}, {transform_indices = @transform_1, window_bounds = array<i64: 1, 4, 4, 32>}, {transform_indices = @transform_2, window_bounds = array<i64: 1, 4, 4, 3>}, {pipeline_mode = #tpu.pipeline_mode<synchronous>, transform_indices = @transform_3, window_bounds = array<i64: 3, 3, 32>}, {pipeline_mode = #tpu.pipeline_mode<synchronous>, transform_indices = @transform_4, window_bounds = array<i64: 5, 5, 32>}, {pipeline_mode = #tpu.pipeline_mode<synchronous>, transform_indices = @transform_5, window_bounds = array<i64: 32, 32>}, {pipeline_mode = #tpu.pipeline_mode<synchronous>, transform_indices = @transform_6, window_bounds = array<i64: 1, 32>}, {transform_indices = @transform_7, window_bounds = array<i64: 1, 4, 4, 32>}]} {
    %c0 = arith.constant 0 : index
    %c0_0 = arith.constant 0 : index
    %c0_1 = arith.constant 0 : index
    %c0_2 = arith.constant 0 : index
    %0 = vector.load %arg1[%c0, %c0_0, %c0_1, %c0_2] : memref<1x4x4x32xf32, #tpu.memory_space<vmem>>, vector<1x4x4x32xf32>
    %1 = vector.shape_cast %0 : vector<1x4x4x32xf32> to vector<4x4x32xf32>
    %c0_3 = arith.constant 0 : index
    %c0_4 = arith.constant 0 : index
    %c0_5 = arith.constant 0 : index
    %c0_6 = arith.constant 0 : index
    %2 = vector.load %arg2[%c0_3, %c0_4, %c0_5, %c0_6] : memref<1x4x4x32xf32, #tpu.memory_space<vmem>>, vector<1x4x4x32xf32>
    %3 = vector.shape_cast %2 : vector<1x4x4x32xf32> to vector<4x4x32xf32>
    %c0_7 = arith.constant 0 : index
    %c0_8 = arith.constant 0 : index
    %c0_9 = arith.constant 0 : index
    %c0_10 = arith.constant 0 : index
    %4 = vector.load %arg3[%c0_7, %c0_8, %c0_9, %c0_10] : memref<1x4x4x3xf32, #tpu.memory_space<vmem>>, vector<1x4x4x3xf32>
    %5 = vector.shape_cast %4 : vector<1x4x4x3xf32> to vector<4x4x3xf32>
    %cst = arith.constant 0.000000e+00 : f32
    %6 = vector.broadcast %cst : f32 to vector<2x8x32xf32>
    %c0_11 = arith.constant 0 : index
    %c0_12 = arith.constant 0 : index
    %c0_13 = arith.constant 0 : index
    %7 = vector.load %arg9[%c0_11, %c0_12, %c0_13] : memref<8x8x32xf32, #tpu.memory_space<vmem>>, vector<2x8x32xf32>
    tpu.vector_store %arg9[%c0_11, %c0_12, %c0_13], %6 {strides = array<i32>} : memref<8x8x32xf32, #tpu.memory_space<vmem>>, vector<2x8x32xf32>,
    %cst_14 = arith.constant 0.000000e+00 : f32
    %8 = vector.broadcast %cst_14 : f32 to vector<2x8x32xf32>
    %c6 = arith.constant 6 : index
    %c0_15 = arith.constant 0 : index
    %c0_16 = arith.constant 0 : index
    %9 = vector.load %arg9[%c6, %c0_15, %c0_16] : memref<8x8x32xf32, #tpu.memory_space<vmem>>, vector<2x8x32xf32>
    tpu.vector_store %arg9[%c6, %c0_15, %c0_16], %8 {strides = array<i32>} : memref<8x8x32xf32, #tpu.memory_space<vmem>>, vector<2x8x32xf32>,
    %cst_17 = arith.constant 0.000000e+00 : f32
    %10 = vector.broadcast %cst_17 : f32 to vector<4x2x32xf32>
    %c2 = arith.constant 2 : index
    %c0_18 = arith.constant 0 : index
    %c0_19 = arith.constant 0 : index
    %11 = vector.load %arg9[%c2, %c0_18, %c0_19] : memref<8x8x32xf32, #tpu.memory_space<vmem>>, vector<4x2x32xf32>
    tpu.vector_store %arg9[%c2, %c0_18, %c0_19], %10 {strides = array<i32>} : memref<8x8x32xf32, #tpu.memory_space<vmem>>, vector<4x2x32xf32>,
    %cst_20 = arith.constant 0.000000e+00 : f32
    %12 = vector.broadcast %cst_20 : f32 to vector<4x2x32xf32>
    %c2_21 = arith.constant 2 : index
    %c6_22 = arith.constant 6 : index
    %c0_23 = arith.constant 0 : index
    %13 = vector.load %arg9[%c2_21, %c6_22, %c0_23] : memref<8x8x32xf32, #tpu.memory_space<vmem>>, vector<4x2x32xf32>
    tpu.vector_store %arg9[%c2_21, %c6_22, %c0_23], %12 {strides = array<i32>} : memref<8x8x32xf32, #tpu.memory_space<vmem>>, vector<4x2x32xf32>,
    %c2_24 = arith.constant 2 : index
    %c2_25 = arith.constant 2 : index
    %c0_26 = arith.constant 0 : index
    %14 = vector.load %arg9[%c2_24, %c2_25, %c0_26] : memref<8x8x32xf32, #tpu.memory_space<vmem>>, vector<4x4x32xf32>
    tpu.vector_store %arg9[%c2_24, %c2_25, %c0_26], %3 {strides = array<i32>} : memref<8x8x32xf32, #tpu.memory_space<vmem>>, vector<4x4x32xf32>,
    %c0_27 = arith.constant 0 : index
    %c0_28 = arith.constant 0 : index
    %c0_29 = arith.constant 0 : index
    %15 = vector.load %arg9[%c0_27, %c0_28, %c0_29] : memref<8x8x32xf32, #tpu.memory_space<vmem>>, vector<8x8x32xf32>
    %c0_30 = arith.constant 0 : index
    %c0_31 = arith.constant 0 : index
    %c0_32 = arith.constant 0 : index
    %16 = vector.load %arg4[%c0_30, %c0_31, %c0_32] : memref<3x3x32xf32, #tpu.memory_space<vmem>>, vector<3x3x32xf32>
    %17 = vector.extract_strided_slice %15 {offsets = [0, 1, 0], sizes = [8, 4, 32], strides = [1, 1, 1]} : vector<8x8x32xf32> to vector<8x4x32xf32>
    %18 = vector.extract_strided_slice %17 {offsets = [1, 0, 0], sizes = [4, 4, 32], strides = [1, 1, 1]} : vector<8x4x32xf32> to vector<4x4x32xf32>
    %19 = vector.extract_strided_slice %16 {offsets = [0, 0, 0], sizes = [1, 1, 32], strides = [1, 1, 1]} : vector<3x3x32xf32> to vector<1x1x32xf32>
    %20 = vector.shape_cast %19 : vector<1x1x32xf32> to vector<32xf32>
    %21 = vector.shape_cast %20 : vector<32xf32> to vector<1x1x32xf32>
    %22 = vector.broadcast %21 : vector<1x1x32xf32> to vector<4x4x32xf32>
    %23 = arith.mulf %18, %22 : vector<4x4x32xf32>
    %24 = vector.extract_strided_slice %17 {offsets = [2, 0, 0], sizes = [4, 4, 32], strides = [1, 1, 1]} : vector<8x4x32xf32> to vector<4x4x32xf32>
    %25 = vector.extract_strided_slice %16 {offsets = [1, 0, 0], sizes = [1, 1, 32], strides = [1, 1, 1]} : vector<3x3x32xf32> to vector<1x1x32xf32>
    %26 = vector.shape_cast %25 : vector<1x1x32xf32> to vector<32xf32>
    %27 = vector.shape_cast %26 : vector<32xf32> to vector<1x1x32xf32>
    %28 = vector.broadcast %27 : vector<1x1x32xf32> to vector<4x4x32xf32>
    %29 = arith.mulf %24, %28 : vector<4x4x32xf32>
    %30 = arith.addf %23, %29 : vector<4x4x32xf32>
    %31 = vector.extract_strided_slice %17 {offsets = [3, 0, 0], sizes = [4, 4, 32], strides = [1, 1, 1]} : vector<8x4x32xf32> to vector<4x4x32xf32>
    %32 = vector.extract_strided_slice %16 {offsets = [2, 0, 0], sizes = [1, 1, 32], strides = [1, 1, 1]} : vector<3x3x32xf32> to vector<1x1x32xf32>
    %33 = vector.shape_cast %32 : vector<1x1x32xf32> to vector<32xf32>
    %34 = vector.shape_cast %33 : vector<32xf32> to vector<1x1x32xf32>
    %35 = vector.broadcast %34 : vector<1x1x32xf32> to vector<4x4x32xf32>
    %36 = arith.mulf %31, %35 : vector<4x4x32xf32>
    %37 = arith.addf %30, %36 : vector<4x4x32xf32>
    %38 = vector.extract_strided_slice %15 {offsets = [0, 2, 0], sizes = [8, 4, 32], strides = [1, 1, 1]} : vector<8x8x32xf32> to vector<8x4x32xf32>
    %39 = vector.extract_strided_slice %38 {offsets = [1, 0, 0], sizes = [4, 4, 32], strides = [1, 1, 1]} : vector<8x4x32xf32> to vector<4x4x32xf32>
    %40 = vector.extract_strided_slice %16 {offsets = [0, 1, 0], sizes = [1, 1, 32], strides = [1, 1, 1]} : vector<3x3x32xf32> to vector<1x1x32xf32>
    %41 = vector.shape_cast %40 : vector<1x1x32xf32> to vector<32xf32>
    %42 = vector.shape_cast %41 : vector<32xf32> to vector<1x1x32xf32>
    %43 = vector.broadcast %42 : vector<1x1x32xf32> to vector<4x4x32xf32>
    %44 = arith.mulf %39, %43 : vector<4x4x32xf32>
    %45 = arith.addf %37, %44 : vector<4x4x32xf32>
    %46 = vector.extract_strided_slice %38 {offsets = [2, 0, 0], sizes = [4, 4, 32], strides = [1, 1, 1]} : vector<8x4x32xf32> to vector<4x4x32xf32>
    %47 = vector.extract_strided_slice %16 {offsets = [1, 1, 0], sizes = [1, 1, 32], strides = [1, 1, 1]} : vector<3x3x32xf32> to vector<1x1x32xf32>
    %48 = vector.shape_cast %47 : vector<1x1x32xf32> to vector<32xf32>
    %49 = vector.shape_cast %48 : vector<32xf32> to vector<1x1x32xf32>
    %50 = vector.broadcast %49 : vector<1x1x32xf32> to vector<4x4x32xf32>
    %51 = arith.mulf %46, %50 : vector<4x4x32xf32>
    %52 = arith.addf %45, %51 : vector<4x4x32xf32>
    %53 = vector.extract_strided_slice %38 {offsets = [3, 0, 0], sizes = [4, 4, 32], strides = [1, 1, 1]} : vector<8x4x32xf32> to vector<4x4x32xf32>
    %54 = vector.extract_strided_slice %16 {offsets = [2, 1, 0], sizes = [1, 1, 32], strides = [1, 1, 1]} : vector<3x3x32xf32> to vector<1x1x32xf32>
    %55 = vector.shape_cast %54 : vector<1x1x32xf32> to vector<32xf32>
    %56 = vector.shape_cast %55 : vector<32xf32> to vector<1x1x32xf32>
    %57 = vector.broadcast %56 : vector<1x1x32xf32> to vector<4x4x32xf32>
    %58 = arith.mulf %53, %57 : vector<4x4x32xf32>
    %59 = arith.addf %52, %58 : vector<4x4x32xf32>
    %60 = vector.extract_strided_slice %15 {offsets = [0, 3, 0], sizes = [8, 4, 32], strides = [1, 1, 1]} : vector<8x8x32xf32> to vector<8x4x32xf32>
    %61 = vector.extract_strided_slice %60 {offsets = [1, 0, 0], sizes = [4, 4, 32], strides = [1, 1, 1]} : vector<8x4x32xf32> to vector<4x4x32xf32>
    %62 = vector.extract_strided_slice %16 {offsets = [0, 2, 0], sizes = [1, 1, 32], strides = [1, 1, 1]} : vector<3x3x32xf32> to vector<1x1x32xf32>
    %63 = vector.shape_cast %62 : vector<1x1x32xf32> to vector<32xf32>
    %64 = vector.shape_cast %63 : vector<32xf32> to vector<1x1x32xf32>
    %65 = vector.broadcast %64 : vector<1x1x32xf32> to vector<4x4x32xf32>
    %66 = arith.mulf %61, %65 : vector<4x4x32xf32>
    %67 = arith.addf %59, %66 : vector<4x4x32xf32>
    %68 = vector.extract_strided_slice %60 {offsets = [2, 0, 0], sizes = [4, 4, 32], strides = [1, 1, 1]} : vector<8x4x32xf32> to vector<4x4x32xf32>
    %69 = vector.extract_strided_slice %16 {offsets = [1, 2, 0], sizes = [1, 1, 32], strides = [1, 1, 1]} : vector<3x3x32xf32> to vector<1x1x32xf32>
    %70 = vector.shape_cast %69 : vector<1x1x32xf32> to vector<32xf32>
    %71 = vector.shape_cast %70 : vector<32xf32> to vector<1x1x32xf32>
    %72 = vector.broadcast %71 : vector<1x1x32xf32> to vector<4x4x32xf32>
    %73 = arith.mulf %68, %72 : vector<4x4x32xf32>
    %74 = arith.addf %67, %73 : vector<4x4x32xf32>
    %75 = vector.extract_strided_slice %60 {offsets = [3, 0, 0], sizes = [4, 4, 32], strides = [1, 1, 1]} : vector<8x4x32xf32> to vector<4x4x32xf32>
    %76 = vector.extract_strided_slice %16 {offsets = [2, 2, 0], sizes = [1, 1, 32], strides = [1, 1, 1]} : vector<3x3x32xf32> to vector<1x1x32xf32>
    %77 = vector.shape_cast %76 : vector<1x1x32xf32> to vector<32xf32>
    %78 = vector.shape_cast %77 : vector<32xf32> to vector<1x1x32xf32>
    %79 = vector.broadcast %78 : vector<1x1x32xf32> to vector<4x4x32xf32>
    %80 = arith.mulf %75, %79 : vector<4x4x32xf32>
    %81 = arith.addf %74, %80 : vector<4x4x32xf32>
    %82 = arith.mulf %81, %81 : vector<4x4x32xf32>
    %83 = arith.mulf %81, %82 : vector<4x4x32xf32>
    %cst_33 = arith.constant 4.471500e-02 : f32
    %84 = vector.broadcast %cst_33 : f32 to vector<4x4x32xf32>
    %85 = arith.mulf %84, %83 : vector<4x4x32xf32>
    %86 = arith.addf %81, %85 : vector<4x4x32xf32>
    %cst_34 = arith.constant 0.797884583 : f32
    %87 = vector.broadcast %cst_34 : f32 to vector<4x4x32xf32>
    %88 = arith.mulf %87, %86 : vector<4x4x32xf32>
    %89 = math.tanh %88 : vector<4x4x32xf32>
    %cst_35 = arith.constant 1.000000e+00 : f32
    %90 = vector.broadcast %cst_35 : f32 to vector<4x4x32xf32>
    %91 = arith.addf %90, %89 : vector<4x4x32xf32>
    %cst_36 = arith.constant 5.000000e-01 : f32
    %92 = vector.broadcast %cst_36 : f32 to vector<4x4x32xf32>
    %93 = arith.mulf %92, %91 : vector<4x4x32xf32>
    %94 = arith.mulf %81, %93 : vector<4x4x32xf32>
    %95 = vector.extract_strided_slice %5 {offsets = [0, 0, 0], sizes = [4, 4, 1], strides = [1, 1, 1]} : vector<4x4x3xf32> to vector<4x4x1xf32>
    %96 = vector.broadcast %95 : vector<4x4x1xf32> to vector<4x4x32xf32>
    %97 = arith.mulf %94, %96 : vector<4x4x32xf32>
    %c2_37 = arith.constant 2 : index
    %c2_38 = arith.constant 2 : index
    %c0_39 = arith.constant 0 : index
    %98 = vector.load %arg9[%c2_37, %c2_38, %c0_39] : memref<8x8x32xf32, #tpu.memory_space<vmem>>, vector<4x4x32xf32>
    tpu.vector_store %arg9[%c2_37, %c2_38, %c0_39], %94 {strides = array<i32>} : memref<8x8x32xf32, #tpu.memory_space<vmem>>, vector<4x4x32xf32>,
    %c0_40 = arith.constant 0 : index
    %c0_41 = arith.constant 0 : index
    %c0_42 = arith.constant 0 : index
    %99 = vector.load %arg9[%c0_40, %c0_41, %c0_42] : memref<8x8x32xf32, #tpu.memory_space<vmem>>, vector<8x8x32xf32>
    %c0_43 = arith.constant 0 : index
    %c0_44 = arith.constant 0 : index
    %c0_45 = arith.constant 0 : index
    %100 = vector.load %arg5[%c0_43, %c0_44, %c0_45] : memref<5x5x32xf32, #tpu.memory_space<vmem>>, vector<5x5x32xf32>
    %101 = vector.extract_strided_slice %99 {offsets = [0, 0, 0], sizes = [8, 4, 32], strides = [1, 1, 1]} : vector<8x8x32xf32> to vector<8x4x32xf32>
    %102 = vector.extract_strided_slice %101 {offsets = [0, 0, 0], sizes = [4, 4, 32], strides = [1, 1, 1]} : vector<8x4x32xf32> to vector<4x4x32xf32>
    %103 = vector.extract_strided_slice %100 {offsets = [0, 0, 0], sizes = [1, 1, 32], strides = [1, 1, 1]} : vector<5x5x32xf32> to vector<1x1x32xf32>
    %104 = vector.shape_cast %103 : vector<1x1x32xf32> to vector<32xf32>
    %105 = vector.shape_cast %104 : vector<32xf32> to vector<1x1x32xf32>
    %106 = vector.broadcast %105 : vector<1x1x32xf32> to vector<4x4x32xf32>
    %107 = arith.mulf %102, %106 : vector<4x4x32xf32>
    %108 = vector.extract_strided_slice %101 {offsets = [1, 0, 0], sizes = [4, 4, 32], strides = [1, 1, 1]} : vector<8x4x32xf32> to vector<4x4x32xf32>
    %109 = vector.extract_strided_slice %100 {offsets = [1, 0, 0], sizes = [1, 1, 32], strides = [1, 1, 1]} : vector<5x5x32xf32> to vector<1x1x32xf32>
    %110 = vector.shape_cast %109 : vector<1x1x32xf32> to vector<32xf32>
    %111 = vector.shape_cast %110 : vector<32xf32> to vector<1x1x32xf32>
    %112 = vector.broadcast %111 : vector<1x1x32xf32> to vector<4x4x32xf32>
    %113 = arith.mulf %108, %112 : vector<4x4x32xf32>
    %114 = arith.addf %107, %113 : vector<4x4x32xf32>
    %115 = vector.extract_strided_slice %101 {offsets = [2, 0, 0], sizes = [4, 4, 32], strides = [1, 1, 1]} : vector<8x4x32xf32> to vector<4x4x32xf32>
    %116 = vector.extract_strided_slice %100 {offsets = [2, 0, 0], sizes = [1, 1, 32], strides = [1, 1, 1]} : vector<5x5x32xf32> to vector<1x1x32xf32>
    %117 = vector.shape_cast %116 : vector<1x1x32xf32> to vector<32xf32>
    %118 = vector.shape_cast %117 : vector<32xf32> to vector<1x1x32xf32>
    %119 = vector.broadcast %118 : vector<1x1x32xf32> to vector<4x4x32xf32>
    %120 = arith.mulf %115, %119 : vector<4x4x32xf32>
    %121 = arith.addf %114, %120 : vector<4x4x32xf32>
    %122 = vector.extract_strided_slice %101 {offsets = [3, 0, 0], sizes = [4, 4, 32], strides = [1, 1, 1]} : vector<8x4x32xf32> to vector<4x4x32xf32>
    %123 = vector.extract_strided_slice %100 {offsets = [3, 0, 0], sizes = [1, 1, 32], strides = [1, 1, 1]} : vector<5x5x32xf32> to vector<1x1x32xf32>
    %124 = vector.shape_cast %123 : vector<1x1x32xf32> to vector<32xf32>
    %125 = vector.shape_cast %124 : vector<32xf32> to vector<1x1x32xf32>
    %126 = vector.broadcast %125 : vector<1x1x32xf32> to vector<4x4x32xf32>
    %127 = arith.mulf %122, %126 : vector<4x4x32xf32>
    %128 = arith.addf %121, %127 : vector<4x4x32xf32>
    %129 = vector.extract_strided_slice %101 {offsets = [4, 0, 0], sizes = [4, 4, 32], strides = [1, 1, 1]} : vector<8x4x32xf32> to vector<4x4x32xf32>
    %130 = vector.extract_strided_slice %100 {offsets = [4, 0, 0], sizes = [1, 1, 32], strides = [1, 1, 1]} : vector<5x5x32xf32> to vector<1x1x32xf32>
    %131 = vector.shape_cast %130 : vector<1x1x32xf32> to vector<32xf32>
    %132 = vector.shape_cast %131 : vector<32xf32> to vector<1x1x32xf32>
    %133 = vector.broadcast %132 : vector<1x1x32xf32> to vector<4x4x32xf32>
    %134 = arith.mulf %129, %133 : vector<4x4x32xf32>
    %135 = arith.addf %128, %134 : vector<4x4x32xf32>
    %136 = vector.extract_strided_slice %99 {offsets = [0, 1, 0], sizes = [8, 4, 32], strides = [1, 1, 1]} : vector<8x8x32xf32> to vector<8x4x32xf32>
    %137 = vector.extract_strided_slice %136 {offsets = [0, 0, 0], sizes = [4, 4, 32], strides = [1, 1, 1]} : vector<8x4x32xf32> to vector<4x4x32xf32>
    %138 = vector.extract_strided_slice %100 {offsets = [0, 1, 0], sizes = [1, 1, 32], strides = [1, 1, 1]} : vector<5x5x32xf32> to vector<1x1x32xf32>
    %139 = vector.shape_cast %138 : vector<1x1x32xf32> to vector<32xf32>
    %140 = vector.shape_cast %139 : vector<32xf32> to vector<1x1x32xf32>
    %141 = vector.broadcast %140 : vector<1x1x32xf32> to vector<4x4x32xf32>
    %142 = arith.mulf %137, %141 : vector<4x4x32xf32>
    %143 = arith.addf %135, %142 : vector<4x4x32xf32>
    %144 = vector.extract_strided_slice %136 {offsets = [1, 0, 0], sizes = [4, 4, 32], strides = [1, 1, 1]} : vector<8x4x32xf32> to vector<4x4x32xf32>
    %145 = vector.extract_strided_slice %100 {offsets = [1, 1, 0], sizes = [1, 1, 32], strides = [1, 1, 1]} : vector<5x5x32xf32> to vector<1x1x32xf32>
    %146 = vector.shape_cast %145 : vector<1x1x32xf32> to vector<32xf32>
    %147 = vector.shape_cast %146 : vector<32xf32> to vector<1x1x32xf32>
    %148 = vector.broadcast %147 : vector<1x1x32xf32> to vector<4x4x32xf32>
    %149 = arith.mulf %144, %148 : vector<4x4x32xf32>
    %150 = arith.addf %143, %149 : vector<4x4x32xf32>
    %151 = vector.extract_strided_slice %136 {offsets = [2, 0, 0], sizes = [4, 4, 32], strides = [1, 1, 1]} : vector<8x4x32xf32> to vector<4x4x32xf32>
    %152 = vector.extract_strided_slice %100 {offsets = [2, 1, 0], sizes = [1, 1, 32], strides = [1, 1, 1]} : vector<5x5x32xf32> to vector<1x1x32xf32>
    %153 = vector.shape_cast %152 : vector<1x1x32xf32> to vector<32xf32>
    %154 = vector.shape_cast %153 : vector<32xf32> to vector<1x1x32xf32>
    %155 = vector.broadcast %154 : vector<1x1x32xf32> to vector<4x4x32xf32>
    %156 = arith.mulf %151, %155 : vector<4x4x32xf32>
    %157 = arith.addf %150, %156 : vector<4x4x32xf32>
    %158 = vector.extract_strided_slice %136 {offsets = [3, 0, 0], sizes = [4, 4, 32], strides = [1, 1, 1]} : vector<8x4x32xf32> to vector<4x4x32xf32>
    %159 = vector.extract_strided_slice %100 {offsets = [3, 1, 0], sizes = [1, 1, 32], strides = [1, 1, 1]} : vector<5x5x32xf32> to vector<1x1x32xf32>
    %160 = vector.shape_cast %159 : vector<1x1x32xf32> to vector<32xf32>
    %161 = vector.shape_cast %160 : vector<32xf32> to vector<1x1x32xf32>
    %162 = vector.broadcast %161 : vector<1x1x32xf32> to vector<4x4x32xf32>
    %163 = arith.mulf %158, %162 : vector<4x4x32xf32>
    %164 = arith.addf %157, %163 : vector<4x4x32xf32>
    %165 = vector.extract_strided_slice %136 {offsets = [4, 0, 0], sizes = [4, 4, 32], strides = [1, 1, 1]} : vector<8x4x32xf32> to vector<4x4x32xf32>
    %166 = vector.extract_strided_slice %100 {offsets = [4, 1, 0], sizes = [1, 1, 32], strides = [1, 1, 1]} : vector<5x5x32xf32> to vector<1x1x32xf32>
    %167 = vector.shape_cast %166 : vector<1x1x32xf32> to vector<32xf32>
    %168 = vector.shape_cast %167 : vector<32xf32> to vector<1x1x32xf32>
    %169 = vector.broadcast %168 : vector<1x1x32xf32> to vector<4x4x32xf32>
    %170 = arith.mulf %165, %169 : vector<4x4x32xf32>
    %171 = arith.addf %164, %170 : vector<4x4x32xf32>
    %172 = vector.extract_strided_slice %99 {offsets = [0, 2, 0], sizes = [8, 4, 32], strides = [1, 1, 1]} : vector<8x8x32xf32> to vector<8x4x32xf32>
    %173 = vector.extract_strided_slice %172 {offsets = [0, 0, 0], sizes = [4, 4, 32], strides = [1, 1, 1]} : vector<8x4x32xf32> to vector<4x4x32xf32>
    %174 = vector.extract_strided_slice %100 {offsets = [0, 2, 0], sizes = [1, 1, 32], strides = [1, 1, 1]} : vector<5x5x32xf32> to vector<1x1x32xf32>
    %175 = vector.shape_cast %174 : vector<1x1x32xf32> to vector<32xf32>
    %176 = vector.shape_cast %175 : vector<32xf32> to vector<1x1x32xf32>
    %177 = vector.broadcast %176 : vector<1x1x32xf32> to vector<4x4x32xf32>
    %178 = arith.mulf %173, %177 : vector<4x4x32xf32>
    %179 = arith.addf %171, %178 : vector<4x4x32xf32>
    %180 = vector.extract_strided_slice %172 {offsets = [1, 0, 0], sizes = [4, 4, 32], strides = [1, 1, 1]} : vector<8x4x32xf32> to vector<4x4x32xf32>
    %181 = vector.extract_strided_slice %100 {offsets = [1, 2, 0], sizes = [1, 1, 32], strides = [1, 1, 1]} : vector<5x5x32xf32> to vector<1x1x32xf32>
    %182 = vector.shape_cast %181 : vector<1x1x32xf32> to vector<32xf32>
    %183 = vector.shape_cast %182 : vector<32xf32> to vector<1x1x32xf32>
    %184 = vector.broadcast %183 : vector<1x1x32xf32> to vector<4x4x32xf32>
    %185 = arith.mulf %180, %184 : vector<4x4x32xf32>
    %186 = arith.addf %179, %185 : vector<4x4x32xf32>
    %187 = vector.extract_strided_slice %172 {offsets = [2, 0, 0], sizes = [4, 4, 32], strides = [1, 1, 1]} : vector<8x4x32xf32> to vector<4x4x32xf32>
    %188 = vector.extract_strided_slice %100 {offsets = [2, 2, 0], sizes = [1, 1, 32], strides = [1, 1, 1]} : vector<5x5x32xf32> to vector<1x1x32xf32>
    %189 = vector.shape_cast %188 : vector<1x1x32xf32> to vector<32xf32>
    %190 = vector.shape_cast %189 : vector<32xf32> to vector<1x1x32xf32>
    %191 = vector.broadcast %190 : vector<1x1x32xf32> to vector<4x4x32xf32>
    %192 = arith.mulf %187, %191 : vector<4x4x32xf32>
    %193 = arith.addf %186, %192 : vector<4x4x32xf32>
    %194 = vector.extract_strided_slice %172 {offsets = [3, 0, 0], sizes = [4, 4, 32], strides = [1, 1, 1]} : vector<8x4x32xf32> to vector<4x4x32xf32>
    %195 = vector.extract_strided_slice %100 {offsets = [3, 2, 0], sizes = [1, 1, 32], strides = [1, 1, 1]} : vector<5x5x32xf32> to vector<1x1x32xf32>
    %196 = vector.shape_cast %195 : vector<1x1x32xf32> to vector<32xf32>
    %197 = vector.shape_cast %196 : vector<32xf32> to vector<1x1x32xf32>
    %198 = vector.broadcast %197 : vector<1x1x32xf32> to vector<4x4x32xf32>
    %199 = arith.mulf %194, %198 : vector<4x4x32xf32>
    %200 = arith.addf %193, %199 : vector<4x4x32xf32>
    %201 = vector.extract_strided_slice %172 {offsets = [4, 0, 0], sizes = [4, 4, 32], strides = [1, 1, 1]} : vector<8x4x32xf32> to vector<4x4x32xf32>
    %202 = vector.extract_strided_slice %100 {offsets = [4, 2, 0], sizes = [1, 1, 32], strides = [1, 1, 1]} : vector<5x5x32xf32> to vector<1x1x32xf32>
    %203 = vector.shape_cast %202 : vector<1x1x32xf32> to vector<32xf32>
    %204 = vector.shape_cast %203 : vector<32xf32> to vector<1x1x32xf32>
    %205 = vector.broadcast %204 : vector<1x1x32xf32> to vector<4x4x32xf32>
    %206 = arith.mulf %201, %205 : vector<4x4x32xf32>
    %207 = arith.addf %200, %206 : vector<4x4x32xf32>
    %208 = vector.extract_strided_slice %99 {offsets = [0, 3, 0], sizes = [8, 4, 32], strides = [1, 1, 1]} : vector<8x8x32xf32> to vector<8x4x32xf32>
    %209 = vector.extract_strided_slice %208 {offsets = [0, 0, 0], sizes = [4, 4, 32], strides = [1, 1, 1]} : vector<8x4x32xf32> to vector<4x4x32xf32>
    %210 = vector.extract_strided_slice %100 {offsets = [0, 3, 0], sizes = [1, 1, 32], strides = [1, 1, 1]} : vector<5x5x32xf32> to vector<1x1x32xf32>
    %211 = vector.shape_cast %210 : vector<1x1x32xf32> to vector<32xf32>
    %212 = vector.shape_cast %211 : vector<32xf32> to vector<1x1x32xf32>
    %213 = vector.broadcast %212 : vector<1x1x32xf32> to vector<4x4x32xf32>
    %214 = arith.mulf %209, %213 : vector<4x4x32xf32>
    %215 = arith.addf %207, %214 : vector<4x4x32xf32>
    %216 = vector.extract_strided_slice %208 {offsets = [1, 0, 0], sizes = [4, 4, 32], strides = [1, 1, 1]} : vector<8x4x32xf32> to vector<4x4x32xf32>
    %217 = vector.extract_strided_slice %100 {offsets = [1, 3, 0], sizes = [1, 1, 32], strides = [1, 1, 1]} : vector<5x5x32xf32> to vector<1x1x32xf32>
    %218 = vector.shape_cast %217 : vector<1x1x32xf32> to vector<32xf32>
    %219 = vector.shape_cast %218 : vector<32xf32> to vector<1x1x32xf32>
    %220 = vector.broadcast %219 : vector<1x1x32xf32> to vector<4x4x32xf32>
    %221 = arith.mulf %216, %220 : vector<4x4x32xf32>
    %222 = arith.addf %215, %221 : vector<4x4x32xf32>
    %223 = vector.extract_strided_slice %208 {offsets = [2, 0, 0], sizes = [4, 4, 32], strides = [1, 1, 1]} : vector<8x4x32xf32> to vector<4x4x32xf32>
    %224 = vector.extract_strided_slice %100 {offsets = [2, 3, 0], sizes = [1, 1, 32], strides = [1, 1, 1]} : vector<5x5x32xf32> to vector<1x1x32xf32>
    %225 = vector.shape_cast %224 : vector<1x1x32xf32> to vector<32xf32>
    %226 = vector.shape_cast %225 : vector<32xf32> to vector<1x1x32xf32>
    %227 = vector.broadcast %226 : vector<1x1x32xf32> to vector<4x4x32xf32>
    %228 = arith.mulf %223, %227 : vector<4x4x32xf32>
    %229 = arith.addf %222, %228 : vector<4x4x32xf32>
    %230 = vector.extract_strided_slice %208 {offsets = [3, 0, 0], sizes = [4, 4, 32], strides = [1, 1, 1]} : vector<8x4x32xf32> to vector<4x4x32xf32>
    %231 = vector.extract_strided_slice %100 {offsets = [3, 3, 0], sizes = [1, 1, 32], strides = [1, 1, 1]} : vector<5x5x32xf32> to vector<1x1x32xf32>
    %232 = vector.shape_cast %231 : vector<1x1x32xf32> to vector<32xf32>
    %233 = vector.shape_cast %232 : vector<32xf32> to vector<1x1x32xf32>
    %234 = vector.broadcast %233 : vector<1x1x32xf32> to vector<4x4x32xf32>
    %235 = arith.mulf %230, %234 : vector<4x4x32xf32>
    %236 = arith.addf %229, %235 : vector<4x4x32xf32>
    %237 = vector.extract_strided_slice %208 {offsets = [4, 0, 0], sizes = [4, 4, 32], strides = [1, 1, 1]} : vector<8x4x32xf32> to vector<4x4x32xf32>
    %238 = vector.extract_strided_slice %100 {offsets = [4, 3, 0], sizes = [1, 1, 32], strides = [1, 1, 1]} : vector<5x5x32xf32> to vector<1x1x32xf32>
    %239 = vector.shape_cast %238 : vector<1x1x32xf32> to vector<32xf32>
    %240 = vector.shape_cast %239 : vector<32xf32> to vector<1x1x32xf32>
    %241 = vector.broadcast %240 : vector<1x1x32xf32> to vector<4x4x32xf32>
    %242 = arith.mulf %237, %241 : vector<4x4x32xf32>
    %243 = arith.addf %236, %242 : vector<4x4x32xf32>
    %244 = vector.extract_strided_slice %99 {offsets = [0, 4, 0], sizes = [8, 4, 32], strides = [1, 1, 1]} : vector<8x8x32xf32> to vector<8x4x32xf32>
    %245 = vector.extract_strided_slice %244 {offsets = [0, 0, 0], sizes = [4, 4, 32], strides = [1, 1, 1]} : vector<8x4x32xf32> to vector<4x4x32xf32>
    %246 = vector.extract_strided_slice %100 {offsets = [0, 4, 0], sizes = [1, 1, 32], strides = [1, 1, 1]} : vector<5x5x32xf32> to vector<1x1x32xf32>
    %247 = vector.shape_cast %246 : vector<1x1x32xf32> to vector<32xf32>
    %248 = vector.shape_cast %247 : vector<32xf32> to vector<1x1x32xf32>
    %249 = vector.broadcast %248 : vector<1x1x32xf32> to vector<4x4x32xf32>
    %250 = arith.mulf %245, %249 : vector<4x4x32xf32>
    %251 = arith.addf %243, %250 : vector<4x4x32xf32>
    %252 = vector.extract_strided_slice %244 {offsets = [1, 0, 0], sizes = [4, 4, 32], strides = [1, 1, 1]} : vector<8x4x32xf32> to vector<4x4x32xf32>
    %253 = vector.extract_strided_slice %100 {offsets = [1, 4, 0], sizes = [1, 1, 32], strides = [1, 1, 1]} : vector<5x5x32xf32> to vector<1x1x32xf32>
    %254 = vector.shape_cast %253 : vector<1x1x32xf32> to vector<32xf32>
    %255 = vector.shape_cast %254 : vector<32xf32> to vector<1x1x32xf32>
    %256 = vector.broadcast %255 : vector<1x1x32xf32> to vector<4x4x32xf32>
    %257 = arith.mulf %252, %256 : vector<4x4x32xf32>
    %258 = arith.addf %251, %257 : vector<4x4x32xf32>
    %259 = vector.extract_strided_slice %244 {offsets = [2, 0, 0], sizes = [4, 4, 32], strides = [1, 1, 1]} : vector<8x4x32xf32> to vector<4x4x32xf32>
    %260 = vector.extract_strided_slice %100 {offsets = [2, 4, 0], sizes = [1, 1, 32], strides = [1, 1, 1]} : vector<5x5x32xf32> to vector<1x1x32xf32>
    %261 = vector.shape_cast %260 : vector<1x1x32xf32> to vector<32xf32>
    %262 = vector.shape_cast %261 : vector<32xf32> to vector<1x1x32xf32>
    %263 = vector.broadcast %262 : vector<1x1x32xf32> to vector<4x4x32xf32>
    %264 = arith.mulf %259, %263 : vector<4x4x32xf32>
    %265 = arith.addf %258, %264 : vector<4x4x32xf32>
    %266 = vector.extract_strided_slice %244 {offsets = [3, 0, 0], sizes = [4, 4, 32], strides = [1, 1, 1]} : vector<8x4x32xf32> to vector<4x4x32xf32>
    %267 = vector.extract_strided_slice %100 {offsets = [3, 4, 0], sizes = [1, 1, 32], strides = [1, 1, 1]} : vector<5x5x32xf32> to vector<1x1x32xf32>
    %268 = vector.shape_cast %267 : vector<1x1x32xf32> to vector<32xf32>
    %269 = vector.shape_cast %268 : vector<32xf32> to vector<1x1x32xf32>
    %270 = vector.broadcast %269 : vector<1x1x32xf32> to vector<4x4x32xf32>
    %271 = arith.mulf %266, %270 : vector<4x4x32xf32>
    %272 = arith.addf %265, %271 : vector<4x4x32xf32>
    %273 = vector.extract_strided_slice %244 {offsets = [4, 0, 0], sizes = [4, 4, 32], strides = [1, 1, 1]} : vector<8x4x32xf32> to vector<4x4x32xf32>
    %274 = vector.extract_strided_slice %100 {offsets = [4, 4, 0], sizes = [1, 1, 32], strides = [1, 1, 1]} : vector<5x5x32xf32> to vector<1x1x32xf32>
    %275 = vector.shape_cast %274 : vector<1x1x32xf32> to vector<32xf32>
    %276 = vector.shape_cast %275 : vector<32xf32> to vector<1x1x32xf32>
    %277 = vector.broadcast %276 : vector<1x1x32xf32> to vector<4x4x32xf32>
    %278 = arith.mulf %273, %277 : vector<4x4x32xf32>
    %279 = arith.addf %272, %278 : vector<4x4x32xf32>
    %280 = arith.mulf %279, %279 : vector<4x4x32xf32>
    %281 = arith.mulf %279, %280 : vector<4x4x32xf32>
    %cst_46 = arith.constant 4.471500e-02 : f32
    %282 = vector.broadcast %cst_46 : f32 to vector<4x4x32xf32>
    %283 = arith.mulf %282, %281 : vector<4x4x32xf32>
    %284 = arith.addf %279, %283 : vector<4x4x32xf32>
    %cst_47 = arith.constant 0.797884583 : f32
    %285 = vector.broadcast %cst_47 : f32 to vector<4x4x32xf32>
    %286 = arith.mulf %285, %284 : vector<4x4x32xf32>
    %287 = math.tanh %286 : vector<4x4x32xf32>
    %cst_48 = arith.constant 1.000000e+00 : f32
    %288 = vector.broadcast %cst_48 : f32 to vector<4x4x32xf32>
    %289 = arith.addf %288, %287 : vector<4x4x32xf32>
    %cst_49 = arith.constant 5.000000e-01 : f32
    %290 = vector.broadcast %cst_49 : f32 to vector<4x4x32xf32>
    %291 = arith.mulf %290, %289 : vector<4x4x32xf32>
    %292 = arith.mulf %279, %291 : vector<4x4x32xf32>
    %293 = vector.extract_strided_slice %5 {offsets = [0, 0, 1], sizes = [4, 4, 1], strides = [1, 1, 1]} : vector<4x4x3xf32> to vector<4x4x1xf32>
    %294 = vector.broadcast %293 : vector<4x4x1xf32> to vector<4x4x32xf32>
    %295 = arith.mulf %292, %294 : vector<4x4x32xf32>
    %296 = arith.addf %97, %295 : vector<4x4x32xf32>
    %cst_50 = arith.constant dense<0.000000e+00> : vector<32xf32>
    %297 = vector.multi_reduction <add>, %292, %cst_50 [0, 1] : vector<4x4x32xf32> to vector<32xf32>
    %298 = vector.shape_cast %297 : vector<32xf32> to vector<1x1x32xf32>
    %cst_51 = arith.constant 1.600000e+01 : f32
    %299 = vector.broadcast %cst_51 : f32 to vector<1x1x32xf32>
    %300 = arith.divf %298, %299 : vector<1x1x32xf32>
    %301 = arith.mulf %300, %300 : vector<1x1x32xf32>
    %302 = arith.mulf %300, %301 : vector<1x1x32xf32>
    %cst_52 = arith.constant 4.471500e-02 : f32
    %303 = vector.broadcast %cst_52 : f32 to vector<1x1x32xf32>
    %304 = arith.mulf %303, %302 : vector<1x1x32xf32>
    %305 = arith.addf %300, %304 : vector<1x1x32xf32>
    %cst_53 = arith.constant 0.797884583 : f32
    %306 = vector.broadcast %cst_53 : f32 to vector<1x1x32xf32>
    %307 = arith.mulf %306, %305 : vector<1x1x32xf32>
    %308 = math.tanh %307 : vector<1x1x32xf32>
    %cst_54 = arith.constant 1.000000e+00 : f32
    %309 = vector.broadcast %cst_54 : f32 to vector<1x1x32xf32>
    %310 = arith.addf %309, %308 : vector<1x1x32xf32>
    %cst_55 = arith.constant 5.000000e-01 : f32
    %311 = vector.broadcast %cst_55 : f32 to vector<1x1x32xf32>
    %312 = arith.mulf %311, %310 : vector<1x1x32xf32>
    %313 = arith.mulf %300, %312 : vector<1x1x32xf32>
    %314 = vector.extract_strided_slice %5 {offsets = [0, 0, 2], sizes = [4, 4, 1], strides = [1, 1, 1]} : vector<4x4x3xf32> to vector<4x4x1xf32>
    %315 = vector.broadcast %313 : vector<1x1x32xf32> to vector<4x4x32xf32>
    %316 = vector.broadcast %314 : vector<4x4x1xf32> to vector<4x4x32xf32>
    %317 = arith.mulf %315, %316 : vector<4x4x32xf32>
    %318 = arith.addf %296, %317 : vector<4x4x32xf32>
    %319 = vector.shape_cast %318 : vector<4x4x32xf32> to vector<16x32xf32>
    %320 = arith.truncf %319 : vector<16x32xf32> to vector<16x32xbf16>
    %c0_56 = arith.constant 0 : index
    %c0_57 = arith.constant 0 : index
    %321 = vector.load %arg6[%c0_56, %c0_57] : memref<32x32xbf16, #tpu.memory_space<vmem>>, vector<32x32xbf16>
    %cst_58 = arith.constant dense<0.000000e+00> : vector<16x32xf32>
    %322 = tpu.matmul %320, %321, %cst_58 {dimension_numbers = #tpu.dot_dimension_numbers<[1], [0], [0], [1], [0, 0, 1, 1], [], []>} : vector<16x32xbf16>, vector<32x32xbf16>, vector<16x32xf32> -> vector<16x32xf32>
    %c0_59 = arith.constant 0 : index
    %c0_60 = arith.constant 0 : index
    %323 = vector.load %arg7[%c0_59, %c0_60] : memref<1x32xf32, #tpu.memory_space<vmem>>, vector<1x32xf32>
    %324 = vector.broadcast %323 : vector<1x32xf32> to vector<16x32xf32>
    %325 = arith.addf %322, %324 : vector<16x32xf32>
    %326 = vector.shape_cast %325 : vector<16x32xf32> to vector<4x4x32xf32>
    %327 = arith.mulf %1, %326 : vector<4x4x32xf32>
    %328 = arith.truncf %327 : vector<4x4x32xf32> to vector<4x4x32xbf16>
    %c0_61 = arith.constant 0 : index
    %c0_62 = arith.constant 0 : index
    %c0_63 = arith.constant 0 : index
    %c0_64 = arith.constant 0 : index
    %329 = vector.load %arg8[%c0_61, %c0_62, %c0_63, %c0_64] : memref<1x4x4x32xbf16, #tpu.memory_space<vmem>>, vector<1x4x4x32xbf16>
    %330 = vector.shape_cast %329 : vector<1x4x4x32xbf16> to vector<4x4x32xbf16>
    %331 = vector.shape_cast %328 : vector<4x4x32xbf16> to vector<1x4x4x32xbf16>
    tpu.vector_store %arg8[%c0_61, %c0_62, %c0_63, %c0_64], %331 {strides = array<i32>} : memref<1x4x4x32xbf16, #tpu.memory_space<vmem>>, vector<1x4x4x32xbf16>,
    return
  }
  func.func @transform_0(%arg0: i32) -> (i32, i32, i32, i32) {
    %c0_i32 = arith.constant 0 : i32
    %c0_i32_0 = arith.constant 0 : i32
    %c0_i32_1 = arith.constant 0 : i32
    %c0_i32_2 = arith.constant 0 : i32
    return %arg0, %c0_i32, %c0_i32_0, %c0_i32_1 : i32, i32, i32, i32
  }
  func.func @transform_1(%arg0: i32) -> (i32, i32, i32, i32) {
    %c0_i32 = arith.constant 0 : i32
    %c0_i32_0 = arith.constant 0 : i32
    %c0_i32_1 = arith.constant 0 : i32
    %c0_i32_2 = arith.constant 0 : i32
    return %arg0, %c0_i32, %c0_i32_0, %c0_i32_1 : i32, i32, i32, i32
  }
  func.func @transform_2(%arg0: i32) -> (i32, i32, i32, i32) {
    %c0_i32 = arith.constant 0 : i32
    %c0_i32_0 = arith.constant 0 : i32
    %c0_i32_1 = arith.constant 0 : i32
    %c0_i32_2 = arith.constant 0 : i32
    return %arg0, %c0_i32, %c0_i32_0, %c0_i32_1 : i32, i32, i32, i32
  }
  func.func @transform_3(%arg0: i32) -> (i32, i32, i32) {
    %c0_i32 = arith.constant 0 : i32
    %c0_i32_0 = arith.constant 0 : i32
    %c0_i32_1 = arith.constant 0 : i32
    %c0_i32_2 = arith.constant 0 : i32
    return %c0_i32, %c0_i32_0, %c0_i32_1 : i32, i32, i32
  }
  func.func @transform_4(%arg0: i32) -> (i32, i32, i32) {
    %c0_i32 = arith.constant 0 : i32
    %c0_i32_0 = arith.constant 0 : i32
    %c0_i32_1 = arith.constant 0 : i32
    %c0_i32_2 = arith.constant 0 : i32
    return %c0_i32, %c0_i32_0, %c0_i32_1 : i32, i32, i32
  }
  func.func @transform_5(%arg0: i32) -> (i32, i32) {
    %c0_i32 = arith.constant 0 : i32
    %c0_i32_0 = arith.constant 0 : i32
    %c0_i32_1 = arith.constant 0 : i32
    return %c0_i32, %c0_i32_0 : i32, i32
  }
  func.func @transform_6(%arg0: i32) -> (i32, i32) {
    %c0_i32 = arith.constant 0 : i32
    %c0_i32_0 = arith.constant 0 : i32
    %c0_i32_1 = arith.constant 0 : i32
    return %c0_i32, %c0_i32_0 : i32, i32
  }
  func.func @transform_7(%arg0: i32) -> (i32, i32, i32, i32) {
    %c0_i32 = arith.constant 0 : i32
    %c0_i32_0 = arith.constant 0 : i32
    %c0_i32_1 = arith.constant 0 : i32
    %c0_i32_2 = arith.constant 0 : i32
    return %arg0, %c0_i32, %c0_i32_0, %c0_i32_1 : i32, i32, i32, i32
  }
}

module attributes {stable_mosaic.version = 11 : i64} {
  func.func @kernel(%arg0: i32, %arg1: i32, %arg2: i32, %arg3: memref<32x32xbf16, #tpu.memory_space<vmem>>, %arg4: memref<32x128xbf16, #tpu.memory_space<vmem>>, %arg5: memref<1x128xf32, #tpu.memory_space<vmem>>, %arg6: memref<32x128xbf16, #tpu.memory_space<vmem>>, %arg7: memref<32x128xf32, #tpu.memory_space<vmem>>) attributes {dimension_semantics = [#tpu.dimension_semantics<parallel>, #tpu.dimension_semantics<parallel>, #tpu.dimension_semantics<arbitrary>], iteration_bounds = array<i64: 1, 1, 1>, scalar_prefetch = 0 : i64, scratch_operands = 1 : i64, tpu.core_type = #tpu.core_type<tc>, window_params = [{transform_indices = @transform_0, window_bounds = array<i64: 32, 32>}, {transform_indices = @transform_1, window_bounds = array<i64: 32, 128>}, {transform_indices = @transform_2, window_bounds = array<i64: 1, 128>}, {transform_indices = @transform_3, window_bounds = array<i64: 32, 128>}]} {
    %c0_i32 = arith.constant 0 : i32
    %0 = arith.cmpi eq, %arg2, %c0_i32 : i32
    %1 = arith.extui %0 : i1 to i32
    %c0_i32_0 = arith.constant 0 : i32
    %2 = arith.cmpi ne, %1, %c0_i32_0 : i32
    scf.if %2 {
      %cst_10 = arith.constant 0.000000e+00 : f32
      %12 = vector.broadcast %cst_10 : f32 to vector<32x128xf32>
      %c0_11 = arith.constant 0 : index
      %c0_12 = arith.constant 0 : index
      %13 = vector.load %arg7[%c0_11, %c0_12] : memref<32x128xf32, #tpu.memory_space<vmem>>, vector<32x128xf32>
      tpu.vector_store %arg7[%c0_11, %c0_12], %12 {strides = array<i32>} : memref<32x128xf32, #tpu.memory_space<vmem>>, vector<32x128xf32>,
    } else {
    }
    %c0 = arith.constant 0 : index
    %c0_1 = arith.constant 0 : index
    %3 = vector.load %arg3[%c0, %c0_1] : memref<32x32xbf16, #tpu.memory_space<vmem>>, vector<32x32xbf16>
    %c0_2 = arith.constant 0 : index
    %c0_3 = arith.constant 0 : index
    %4 = vector.load %arg7[%c0_2, %c0_3] : memref<32x128xf32, #tpu.memory_space<vmem>>, vector<32x128xf32>
    %c0_4 = arith.constant 0 : index
    %c0_5 = arith.constant 0 : index
    %5 = vector.load %arg4[%c0_4, %c0_5] : memref<32x128xbf16, #tpu.memory_space<vmem>>, vector<32x128xbf16>
    %cst = arith.constant dense<0.000000e+00> : vector<32x128xf32>
    %6 = tpu.matmul %3, %5, %cst {dimension_numbers = #tpu.dot_dimension_numbers<[1], [0], [0], [1], [0, 0, 1, 1], [], []>} : vector<32x32xbf16>, vector<32x128xbf16>, vector<32x128xf32> -> vector<32x128xf32>
    %7 = arith.addf %4, %6 : vector<32x128xf32>
    %c0_6 = arith.constant 0 : index
    %c0_7 = arith.constant 0 : index
    %8 = vector.load %arg7[%c0_6, %c0_7] : memref<32x128xf32, #tpu.memory_space<vmem>>, vector<32x128xf32>
    tpu.vector_store %arg7[%c0_6, %c0_7], %7 {strides = array<i32>} : memref<32x128xf32, #tpu.memory_space<vmem>>, vector<32x128xf32>,
    %c0_i32_8 = arith.constant 0 : i32
    %9 = arith.cmpi eq, %arg2, %c0_i32_8 : i32
    %10 = arith.extui %9 : i1 to i32
    %c0_i32_9 = arith.constant 0 : i32
    %11 = arith.cmpi ne, %10, %c0_i32_9 : i32
    scf.if %11 {
      %c0_10 = arith.constant 0 : index
      %c0_11 = arith.constant 0 : index
      %12 = vector.load %arg7[%c0_10, %c0_11] : memref<32x128xf32, #tpu.memory_space<vmem>>, vector<32x128xf32>
      %c0_12 = arith.constant 0 : index
      %c0_13 = arith.constant 0 : index
      %13 = vector.load %arg5[%c0_12, %c0_13] : memref<1x128xf32, #tpu.memory_space<vmem>>, vector<1x128xf32>
      %14 = vector.broadcast %13 : vector<1x128xf32> to vector<32x128xf32>
      %15 = arith.addf %12, %14 : vector<32x128xf32>
      %16 = arith.mulf %15, %15 : vector<32x128xf32>
      %17 = arith.mulf %15, %16 : vector<32x128xf32>
      %cst_14 = arith.constant 4.471500e-02 : f32
      %18 = vector.broadcast %cst_14 : f32 to vector<32x128xf32>
      %19 = arith.mulf %18, %17 : vector<32x128xf32>
      %20 = arith.addf %15, %19 : vector<32x128xf32>
      %cst_15 = arith.constant 0.797884583 : f32
      %21 = vector.broadcast %cst_15 : f32 to vector<32x128xf32>
      %22 = arith.mulf %21, %20 : vector<32x128xf32>
      %23 = math.tanh %22 : vector<32x128xf32>
      %cst_16 = arith.constant 1.000000e+00 : f32
      %24 = vector.broadcast %cst_16 : f32 to vector<32x128xf32>
      %25 = arith.addf %24, %23 : vector<32x128xf32>
      %cst_17 = arith.constant 5.000000e-01 : f32
      %26 = vector.broadcast %cst_17 : f32 to vector<32x128xf32>
      %27 = arith.mulf %26, %25 : vector<32x128xf32>
      %28 = arith.mulf %15, %27 : vector<32x128xf32>
      %29 = arith.truncf %28 : vector<32x128xf32> to vector<32x128xbf16>
      %c0_18 = arith.constant 0 : index
      %c0_19 = arith.constant 0 : index
      %30 = vector.load %arg6[%c0_18, %c0_19] : memref<32x128xbf16, #tpu.memory_space<vmem>>, vector<32x128xbf16>
      tpu.vector_store %arg6[%c0_18, %c0_19], %29 {strides = array<i32>} : memref<32x128xbf16, #tpu.memory_space<vmem>>, vector<32x128xbf16>,
    } else {
    }
    return
  }
  func.func @transform_0(%arg0: i32, %arg1: i32, %arg2: i32) -> (i32, i32) {
    %c0_i32 = arith.constant 0 : i32
    return %arg0, %arg2 : i32, i32
  }
  func.func @transform_1(%arg0: i32, %arg1: i32, %arg2: i32) -> (i32, i32) {
    %c0_i32 = arith.constant 0 : i32
    return %arg2, %arg1 : i32, i32
  }
  func.func @transform_2(%arg0: i32, %arg1: i32, %arg2: i32) -> (i32, i32) {
    %c0_i32 = arith.constant 0 : i32
    %c0_i32_0 = arith.constant 0 : i32
    return %c0_i32, %arg1 : i32, i32
  }
  func.func @transform_3(%arg0: i32, %arg1: i32, %arg2: i32) -> (i32, i32) {
    %c0_i32 = arith.constant 0 : i32
    return %arg0, %arg1 : i32, i32
  }
}

module attributes {stable_mosaic.version = 11 : i64} {
  func.func @kernel(%arg0: i32, %arg1: i32, %arg2: i32, %arg3: memref<32x128xbf16, #tpu.memory_space<vmem>>, %arg4: memref<128x128xbf16, #tpu.memory_space<vmem>>, %arg5: memref<1x128xf32, #tpu.memory_space<vmem>>, %arg6: memref<32x128xf32, #tpu.memory_space<vmem>>, %arg7: memref<32x128xf32, #tpu.memory_space<vmem>>, %arg8: memref<32x128xf32, #tpu.memory_space<vmem>>) attributes {dimension_semantics = [#tpu.dimension_semantics<parallel>, #tpu.dimension_semantics<parallel>, #tpu.dimension_semantics<arbitrary>], iteration_bounds = array<i64: 1, 1, 1>, scalar_prefetch = 0 : i64, scratch_operands = 1 : i64, tpu.core_type = #tpu.core_type<tc>, window_params = [{transform_indices = @transform_0, window_bounds = array<i64: 32, 128>}, {transform_indices = @transform_1, window_bounds = array<i64: 128, 128>}, {transform_indices = @transform_2, window_bounds = array<i64: 1, 128>}, {transform_indices = @transform_3, window_bounds = array<i64: 32, 128>}, {transform_indices = @transform_4, window_bounds = array<i64: 32, 128>}]} {
    %c0_i32 = arith.constant 0 : i32
    %0 = arith.cmpi eq, %arg2, %c0_i32 : i32
    %1 = arith.extui %0 : i1 to i32
    %c0_i32_0 = arith.constant 0 : i32
    %2 = arith.cmpi ne, %1, %c0_i32_0 : i32
    scf.if %2 {
      %cst_10 = arith.constant 0.000000e+00 : f32
      %12 = vector.broadcast %cst_10 : f32 to vector<32x128xf32>
      %c0_11 = arith.constant 0 : index
      %c0_12 = arith.constant 0 : index
      %13 = vector.load %arg8[%c0_11, %c0_12] : memref<32x128xf32, #tpu.memory_space<vmem>>, vector<32x128xf32>
      tpu.vector_store %arg8[%c0_11, %c0_12], %12 {strides = array<i32>} : memref<32x128xf32, #tpu.memory_space<vmem>>, vector<32x128xf32>,
    } else {
    }
    %c0 = arith.constant 0 : index
    %c0_1 = arith.constant 0 : index
    %3 = vector.load %arg3[%c0, %c0_1] : memref<32x128xbf16, #tpu.memory_space<vmem>>, vector<32x128xbf16>
    %c0_2 = arith.constant 0 : index
    %c0_3 = arith.constant 0 : index
    %4 = vector.load %arg8[%c0_2, %c0_3] : memref<32x128xf32, #tpu.memory_space<vmem>>, vector<32x128xf32>
    %c0_4 = arith.constant 0 : index
    %c0_5 = arith.constant 0 : index
    %5 = vector.load %arg4[%c0_4, %c0_5] : memref<128x128xbf16, #tpu.memory_space<vmem>>, vector<128x128xbf16>
    %cst = arith.constant dense<0.000000e+00> : vector<32x128xf32>
    %6 = tpu.matmul %3, %5, %cst {dimension_numbers = #tpu.dot_dimension_numbers<[1], [0], [0], [1], [0, 0, 1, 1], [], []>} : vector<32x128xbf16>, vector<128x128xbf16>, vector<32x128xf32> -> vector<32x128xf32>
    %7 = arith.addf %4, %6 : vector<32x128xf32>
    %c0_6 = arith.constant 0 : index
    %c0_7 = arith.constant 0 : index
    %8 = vector.load %arg8[%c0_6, %c0_7] : memref<32x128xf32, #tpu.memory_space<vmem>>, vector<32x128xf32>
    tpu.vector_store %arg8[%c0_6, %c0_7], %7 {strides = array<i32>} : memref<32x128xf32, #tpu.memory_space<vmem>>, vector<32x128xf32>,
    %c0_i32_8 = arith.constant 0 : i32
    %9 = arith.cmpi eq, %arg2, %c0_i32_8 : i32
    %10 = arith.extui %9 : i1 to i32
    %c0_i32_9 = arith.constant 0 : i32
    %11 = arith.cmpi ne, %10, %c0_i32_9 : i32
    scf.if %11 {
      %c0_10 = arith.constant 0 : index
      %c0_11 = arith.constant 0 : index
      %12 = vector.load %arg8[%c0_10, %c0_11] : memref<32x128xf32, #tpu.memory_space<vmem>>, vector<32x128xf32>
      %c0_12 = arith.constant 0 : index
      %c0_13 = arith.constant 0 : index
      %13 = vector.load %arg5[%c0_12, %c0_13] : memref<1x128xf32, #tpu.memory_space<vmem>>, vector<1x128xf32>
      %14 = vector.broadcast %13 : vector<1x128xf32> to vector<32x128xf32>
      %15 = arith.addf %12, %14 : vector<32x128xf32>
      %c0_14 = arith.constant 0 : index
      %c0_15 = arith.constant 0 : index
      %16 = vector.load %arg6[%c0_14, %c0_15] : memref<32x128xf32, #tpu.memory_space<vmem>>, vector<32x128xf32>
      %17 = arith.addf %15, %16 : vector<32x128xf32>
      %c0_16 = arith.constant 0 : index
      %c0_17 = arith.constant 0 : index
      %18 = vector.load %arg7[%c0_16, %c0_17] : memref<32x128xf32, #tpu.memory_space<vmem>>, vector<32x128xf32>
      tpu.vector_store %arg7[%c0_16, %c0_17], %17 {strides = array<i32>} : memref<32x128xf32, #tpu.memory_space<vmem>>, vector<32x128xf32>,
    } else {
    }
    return
  }
  func.func @transform_0(%arg0: i32, %arg1: i32, %arg2: i32) -> (i32, i32) {
    %c0_i32 = arith.constant 0 : i32
    return %arg0, %arg2 : i32, i32
  }
  func.func @transform_1(%arg0: i32, %arg1: i32, %arg2: i32) -> (i32, i32) {
    %c0_i32 = arith.constant 0 : i32
    return %arg2, %arg1 : i32, i32
  }
  func.func @transform_2(%arg0: i32, %arg1: i32, %arg2: i32) -> (i32, i32) {
    %c0_i32 = arith.constant 0 : i32
    %c0_i32_0 = arith.constant 0 : i32
    return %c0_i32, %arg1 : i32, i32
  }
  func.func @transform_3(%arg0: i32, %arg1: i32, %arg2: i32) -> (i32, i32) {
    %c0_i32 = arith.constant 0 : i32
    return %arg0, %arg1 : i32, i32
  }
  func.func @transform_4(%arg0: i32, %arg1: i32, %arg2: i32) -> (i32, i32) {
    %c0_i32 = arith.constant 0 : i32
    return %arg0, %arg1 : i32, i32
  }
}

</mosaic_0001>

<bundles_post_ra>
// kernel: tpu_custom_call.1
= control target key start
LH: loop header
LB: loop body
LE: loop exit
PB: predicated region body
PF: predicated region fallthrough
CT: control target
= control target key end

     0   :  { %6 = vsyncpa [#allocation3], 0  ;;  %s127_s0 = inlined_call_operand.hbm [shape: f32[8,128], index: 0, kind: input, shape index: {}]   ;;  %s128_s1 = inlined_call_operand.hbm [shape: f32[8,128], index: 1, kind: output, shape index: {}]  }
   0x1   :  { %7 = vsyncpa [#allocation4], 0  ;;  %s91_s6 = smov [#allocation2]   ;;  %s43_s10 = scalar_lea.hbm %s127_s0, 128 }
   0x2   :  { %s14_s7 = sshll.u32 %s91_s6, 4  ;;  %p44_p0 = scmp.ne.s32.totalorder %s127_s0, %s43_s10  ;;  %s15_s7 = int_to_ptr.vmem [resolvable:$true] %s14_s7 }
   0x3   :  { %p47_p1 = scmp.lt.u32.totalorder %s43_s10, %s127_s0 }
   0x5   :  { %p49_p2 = pnand %p47_p1, %p44_p0 }
   0x7   :  { %52 = shalt.err (!%p49_p2)
}
   0x8   :  { %s53_s15 = scalar_lea.vmem %s15_s7, 128  ;;  %p58_p4 = scmp.lt.s32.totalorder %s15_s7, %s15_s7 }
   0x9   :  { %p54_p3 = scmp.ne.s32.totalorder %s15_s7, %s53_s15  ;;  %p59_p5 = scmp.lt.s32.totalorder %s53_s15, %s53_s15 }
   0xb   :  { %p60_p6 = por %p59_p5, %p58_p4 }
   0xd   :  { %p61_p7 = pnand %p60_p6, %p54_p3 }
   0xf   :  { %64 = shalt.err (!%p61_p7)
}
  0x10   :  { %17 = dma.hbm_to_vmem [thread:$0]  %s127_s0, 128, %s15_s7, [#allocation3]  }
  0x11   :  { %87 = dma.done.wait [#allocation3], 128  }
  0x12   :  { %88 = vsyncadd [#allocation3], 4294967168  ;;  %v21_v0 = vld [vmem:[#allocation2] sm:$0xff]  ;;  %s92_s18 = smov [#allocation5]  }
  0x13   :  { %41 = verf.f32 %v21_v0  ;;  %s30_s19 = sshll.u32 %s92_s18, 4  ;;  %s31_s19 = int_to_ptr.vmem [resolvable:$true] %s30_s19 }
  0x14   :  { %s65_s20 = scalar_lea.vmem %s31_s19, 128  ;;  %p70_p9 = scmp.lt.s32.totalorder %s31_s19, %s31_s19 }
  0x15   :  { %p66_p8 = scmp.ne.s32.totalorder %s31_s19, %s65_s20  ;;  %p71_p10 = scmp.lt.s32.totalorder %s65_s20, %s65_s20 }
  0x17   :  { %p72_p11 = por %p71_p10, %p70_p9 }
  0x19   :  { %p73_p12 = pnand %p72_p11, %p66_p8 }
  0x1d   :  { %v42_v1 = vpop.eup %41 }
  0x1e   :  { %23 = vst [vmem:[#allocation5] sm:$0xff] %v42_v1 }
  0x1f   :  { %76 = shalt.err (!%p73_p12)
}
  0x20   :  { %s77_s0 = scalar_lea.hbm %s128_s1, 128 }
  0x21   :  { %p78_p13 = scmp.ne.s32.totalorder %s128_s1, %s77_s0  ;;  %p81_p0 = scmp.lt.u32.totalorder %s77_s0, %s128_s1 }
  0x23   :  { %p83_p1 = pnand %p81_p0, %p78_p13 }
  0x25   :  { %86 = shalt.err (!%p83_p1)
}
  0x26   :  { %33 = dma.vmem_to_hbm [thread:$0]  %s31_s19, 128, %s128_s1, [#allocation4]  }
  0x27   :  { %89 = dma.done.wait [#allocation4], 128  }
  0x28   :  { %90 = vsyncadd [#allocation4], 4294967168 }
  0x29   :  { %37 = vsyncpa [#allocation3], 1 }
  0x2a   :  { %38 = vsyncpa [#allocation4], 1 }

// kernel: tpu_custom_call.1
= control target key start
LH: loop header
LB: loop body
LE: loop exit
PB: predicated region body
PF: predicated region fallthrough
CT: control target
= control target key end

     0   :  { %6 = vsyncpa [#allocation3], 0  ;;  %s308_s0 = inlined_call_operand.hbm [shape: f32[12,12,16], index: 0, kind: input, shape index: {}]   ;;  %s309_s1 = inlined_call_operand.hbm [shape: f32[12,12,16], index: 1, kind: output, shape index: {}]  }
   0x1   :  { %7 = vsyncpa [#allocation4], 0  ;;  %s204_s6 = smov [#allocation2]   ;;  %s156_s10 = scalar_lea.hbm %s308_s0, 3072 }
   0x2   :  { %s13_s7 = sshll.u32 %s204_s6, 4  ;;  %p157_p0 = scmp.ne.s32.totalorder %s308_s0, %s156_s10  ;;  %s14_s7 = int_to_ptr.vmem [resolvable:$true] %s13_s7 }
   0x3   :  { %p160_p1 = scmp.lt.u32.totalorder %s156_s10, %s308_s0 }
   0x5   :  { %p162_p2 = pnand %p160_p1, %p157_p0 }
   0x7   :  { %165 = shalt.err (!%p162_p2)
}
   0x8   :  { %s166_s15 = scalar_lea.vmem %s14_s7, 3072  ;;  %p171_p4 = scmp.lt.s32.totalorder %s14_s7, %s14_s7 }
   0x9   :  { %p167_p3 = scmp.ne.s32.totalorder %s14_s7, %s166_s15  ;;  %p172_p5 = scmp.lt.s32.totalorder %s166_s15, %s166_s15 }
   0xb   :  { %p173_p6 = por %p172_p5, %p171_p4 }
   0xd   :  { %p174_p7 = pnand %p173_p6, %p167_p3 }
   0xf   :  { %177 = shalt.err (!%p174_p7)
}
  0x10   :  { %s205_s16 = smov 128   ;;  %s206_s17 = smov 8  }
  0x11   :  { %19 = dma.hbm_to_vmem [thread:$0]  %s308_s0, 3072, %s14_s7, [#allocation3], %s205_s16, %s205_s16, %s206_s17  }
  0x12   :  { %200 = dma.done.wait [#allocation3], 3072  }
  0x13   :  { %201 = vsyncadd [#allocation3], 4294964224  ;;  %vm96_vm0 = vcmask 130055   ;;  %v23_v0 = vld [vmem:[#allocation2] sm:$0xff]  ;;  %v24_v1 = vld [vmem:[#allocation2 + $0x8] sm:$0xf] }
  0x14   :  { %vm47_vm1 = vcmask 1047556   ;;  %vm98_vm2 = vcmask 130048   ;;  %v25_v2 = vld [vmem:[#allocation2 + $0x10] sm:$0xff]  ;;  %v48_v3 = vrot.slane %v23_v0, 4  ;;  %97 = vst.msk [vmem:[#allocation5 - $0x7] sm:$0x80] %vm96_vm0, %v23_v0 }
  0x15   :  { %v50_v4 = vrot.slane %v25_v2, 4  ;;  %102 = vst.msk [vmem:[#allocation5 + $0x9] sm:$0x80] %vm96_vm0, %v25_v2  ;;  %v26_v5 = vld [vmem:[#allocation2 + $0x18] sm:$0xf]  ;;  %v27_v6 = vld [vmem:[#allocation2 + $0x20] sm:$0xff] }
  0x16   :  { %v29_v7 = vld [vmem:[#allocation2 + $0x30] sm:$0xff]  ;;  %v52_v8 = vrot.slane %v27_v6, 4  ;;  %105 = vst.msk [vmem:[#allocation5 + $0x19] sm:$0x80] %vm96_vm0, %v27_v6  ;;  %v28_v9 = vld [vmem:[#allocation2 + $0x28] sm:$0xf]  ;;  %v49_v12 = vsel %vm47_vm1, %v48_v3, %v24_v1 }
  0x17   :  { %v54_v10 = vrot.slane %v29_v7, 4  ;;  %108 = vst.msk [vmem:[#allocation5 + $0x29] sm:$0x80] %vm96_vm0, %v29_v7  ;;  %v30_v11 = vld [vmem:[#allocation2 + $0x38] sm:$0xf]  ;;  %vm100_vm3 = vcmask 124928   ;;  %v51_v13 = vsel %vm47_vm1, %v50_v4, %v26_v5 }
  0x18   :  { %v31_v14 = vld [vmem:[#allocation2 + $0x40] sm:$0xff]  ;;  %v32_v15 = vld [vmem:[#allocation2 + $0x48] sm:$0xf]  ;;  %v33_v16 = vld [vmem:[#allocation2 + $0x50] sm:$0xff]  ;;  %v72_v17 = vrot.slane %v49_v12, 4  ;;  %99 = vst.msk [vmem:[#allocation5 + $0x1] sm:$0xff] %vm98_vm2, %v49_v12  ;;  %v53_v19 = vsel %vm47_vm1, %v52_v8, %v28_v9 }
  0x19   :  { %v73_v18 = vrot.slane %v51_v13, 4  ;;  %103 = vst.msk [vmem:[#allocation5 + $0x11] sm:$0xff] %vm98_vm2, %v51_v13  ;;  %v55_v20 = vsel %vm47_vm1, %v54_v10, %v30_v11  ;;  %v34_v21 = vld [vmem:[#allocation2 + $0x58] sm:$0xf]  ;;  %v35_v22 = vld [vmem:[#allocation2 + $0x60] sm:$0xff]  ;;  %v37_v23 = vld [vmem:[#allocation2 + $0x70] sm:$0xff] }
  0x1a   :  { %111 = vst.msk [vmem:[#allocation5 + $0x39] sm:$0x80] %vm96_vm0, %v31_v14  ;;  %114 = vst.msk [vmem:[#allocation5 + $0x49] sm:$0x80] %vm96_vm0, %v33_v16  ;;  %v74_v24 = vrot.slane %v53_v19, 4  ;;  %v75_v25 = vrot.slane %v55_v20, 4  ;;  %v84_v29 = vsel %vm47_vm1, %v72_v17, %v48_v3 }
  0x1b   :  { %106 = vst.msk [vmem:[#allocation5 + $0x21] sm:$0xff] %vm98_vm2, %v53_v19  ;;  %109 = vst.msk [vmem:[#allocation5 + $0x31] sm:$0xff] %vm98_vm2, %v55_v20  ;;  %v56_v26 = vrot.slane %v31_v14, 4  ;;  %v58_v27 = vrot.slane %v33_v16, 4  ;;  %v36_v28 = vld [vmem:[#allocation2 + $0x68] sm:$0xf]  ;;  %v85_v30 = vsel %vm47_vm1, %v73_v18, %v50_v4 }
  0x1c   :  { %117 = vst.msk [vmem:[#allocation5 + $0x59] sm:$0x80] %vm96_vm0, %v35_v22  ;;  %120 = vst.msk [vmem:[#allocation5 + $0x69] sm:$0x80] %vm96_vm0, %v37_v23  ;;  %v60_v31 = vrot.slane %v35_v22, 4  ;;  %v62_v32 = vrot.slane %v37_v23, 4  ;;  %v86_v36 = vsel %vm47_vm1, %v74_v24, %v52_v8  ;;  %v87_v37 = vsel %vm47_vm1, %v75_v25, %v54_v10 }
  0x1d   :  { %v38_v33 = vld [vmem:[#allocation2 + $0x78] sm:$0xf]  ;;  %v39_v34 = vld [vmem:[#allocation2 + $0x80] sm:$0xff]  ;;  %v41_v35 = vld [vmem:[#allocation2 + $0x90] sm:$0xff]  ;;  %101 = vst.msk [vmem:[#allocation5 + $0x9] sm:$0x7] %vm100_vm3, %v84_v29  ;;  %v57_v38 = vsel %vm47_vm1, %v56_v26, %v32_v15  ;;  %v59_v39 = vsel %vm47_vm1, %v58_v27, %v34_v21 }
  0x1e   :  { %104 = vst.msk [vmem:[#allocation5 + $0x19] sm:$0x7] %vm100_vm3, %v85_v30  ;;  %v40_v40 = vld [vmem:[#allocation2 + $0x88] sm:$0xf]  ;;  %v42_v41 = vld [vmem:[#allocation2 + $0x98] sm:$0xf]  ;;  %v61_v45 = vsel %vm47_vm1, %v60_v31, %v36_v28  ;;  %v63_v46 = vsel %vm47_vm1, %v62_v32, %v38_v33 }
  0x1f   :  { %123 = vst.msk [vmem:[#allocation5 + $0x79] sm:$0x80] %vm96_vm0, %v39_v34  ;;  %126 = vst.msk [vmem:[#allocation5 + $0x89] sm:$0x80] %vm96_vm0, %v41_v35  ;;  %v43_v42 = vld [vmem:[#allocation2 + $0xa0] sm:$0xff]  ;;  %v76_v43 = vrot.slane %v57_v38, 4 }
  0x20   :  { %107 = vst.msk [vmem:[#allocation5 + $0x29] sm:$0x7] %vm100_vm3, %v86_v36  ;;  %110 = vst.msk [vmem:[#allocation5 + $0x39] sm:$0x7] %vm100_vm3, %v87_v37  ;;  %v77_v44 = vrot.slane %v59_v39, 4  ;;  %v45_v48 = vld [vmem:[#allocation2 + $0xb0] sm:$0xff] }
  0x21   :  { %112 = vst.msk [vmem:[#allocation5 + $0x41] sm:$0xff] %vm98_vm2, %v57_v38  ;;  %115 = vst.msk [vmem:[#allocation5 + $0x51] sm:$0xff] %vm98_vm2, %v59_v39  ;;  %v44_v47 = vld [vmem:[#allocation2 + $0xa8] sm:$0xf]  ;;  %v78_v49 = vrot.slane %v61_v45, 4  ;;  %v79_v50 = vrot.slane %v63_v46, 4  ;;  %v88_v54 = vsel %vm47_vm1, %v76_v43, %v56_v26 }
  0x22   :  { %129 = vst.msk [vmem:[#allocation5 + $0x99] sm:$0x80] %vm96_vm0, %v43_v42  ;;  %v64_v51 = vrot.slane %v39_v34, 4  ;;  %v66_v52 = vrot.slane %v41_v35, 4  ;;  %132 = vst.msk [vmem:[#allocation5 + $0xa9] sm:$0x80] %vm96_vm0, %v45_v48  ;;  %v89_v55 = vsel %vm47_vm1, %v77_v44, %v58_v27 }
  0x23   :  { %118 = vst.msk [vmem:[#allocation5 + $0x61] sm:$0xff] %vm98_vm2, %v61_v45  ;;  %121 = vst.msk [vmem:[#allocation5 + $0x71] sm:$0xff] %vm98_vm2, %v63_v46  ;;  %v46_v53 = vld [vmem:[#allocation2 + $0xb8] sm:$0xf]  ;;  %v68_v56 = vrot.slane %v43_v42, 4  ;;  %v70_v57 = vrot.slane %v45_v48, 4  ;;  %v90_v58 = vsel %vm47_vm1, %v78_v49, %v60_v31  ;;  %v91_v59 = vsel %vm47_vm1, %v79_v50, %v62_v32 }
  0x24   :  { %113 = vst.msk [vmem:[#allocation5 + $0x49] sm:$0x7] %vm100_vm3, %v88_v54  ;;  %116 = vst.msk [vmem:[#allocation5 + $0x59] sm:$0x7] %vm100_vm3, %v89_v55  ;;  %v65_v60 = vsel %vm47_vm1, %v64_v51, %v40_v40  ;;  %v67_v61 = vsel %vm47_vm1, %v66_v52, %v42_v41  ;;  %s207_s0 = smov [#allocation5]  }
  0x25   :  { %s140_s20 = sshll.u32 %s207_s0, 4  ;;  %119 = vst.msk [vmem:[#allocation5 + $0x69] sm:$0x7] %vm100_vm3, %v90_v58  ;;  %122 = vst.msk [vmem:[#allocation5 + $0x79] sm:$0x7] %vm100_vm3, %v91_v59  ;;  %v80_v62 = vrot.slane %v65_v60, 4  ;;  %v69_v0 = vsel %vm47_vm1, %v68_v56, %v44_v47  ;;  %v71_v1 = vsel %vm47_vm1, %v70_v57, %v46_v53  ;;  %s141_s20 = int_to_ptr.vmem [resolvable:$true] %s140_s20 }
  0x26   :  { %124 = vst.msk [vmem:[#allocation5 + $0x81] sm:$0xff] %vm98_vm2, %v65_v60  ;;  %v81_v63 = vrot.slane %v67_v61, 4  ;;  %127 = vst.msk [vmem:[#allocation5 + $0x91] sm:$0xff] %vm98_vm2, %v67_v61  ;;  %v82_v2 = vrot.slane %v69_v0, 4  ;;  %v83_v3 = vrot.slane %v71_v1, 4  ;;  %s178_s21 = scalar_lea.vmem %s141_s20, 3072  ;;  %p183_p9 = scmp.lt.s32.totalorder %s141_s20, %s141_s20 }
  0x27   :  { %130 = vst.msk [vmem:[#allocation5 + $0xa1] sm:$0xff] %vm98_vm2, %v69_v0  ;;  %133 = vst.msk [vmem:[#allocation5 + $0xb1] sm:$0xff] %vm98_vm2, %v71_v1  ;;  %v92_v4 = vsel %vm47_vm1, %v80_v62, %v64_v51  ;;  %p179_p8 = scmp.ne.s32.totalorder %s141_s20, %s178_s21  ;;  %p184_p10 = scmp.lt.s32.totalorder %s178_s21, %s178_s21 }
  0x28   :  { %v93_v5 = vsel %vm47_vm1, %v81_v63, %v66_v52  ;;  %125 = vst.msk [vmem:[#allocation5 + $0x89] sm:$0x7] %vm100_vm3, %v92_v4  ;;  %v94_v6 = vsel %vm47_vm1, %v82_v2, %v68_v56  ;;  %v95_v7 = vsel %vm47_vm1, %v83_v3, %v70_v57 }
  0x29   :  { %128 = vst.msk [vmem:[#allocation5 + $0x99] sm:$0x7] %vm100_vm3, %v93_v5  ;;  %131 = vst.msk [vmem:[#allocation5 + $0xa9] sm:$0x7] %vm100_vm3, %v94_v6  ;;  %p185_p11 = por %p184_p10, %p183_p9 }
  0x2a   :  { %134 = vst.msk [vmem:[#allocation5 + $0xb9] sm:$0x7] %vm100_vm3, %v95_v7 }
  0x2b   :  { %p186_p12 = pnand %p185_p11, %p179_p8 }
  0x2d   :  { %189 = shalt.err (!%p186_p12)
}
  0x2e   :  { %s190_s24 = scalar_lea.hbm %s309_s1, 3072 }
  0x2f   :  { %p191_p13 = scmp.ne.s32.totalorder %s309_s1, %s190_s24  ;;  %p194_p0 = scmp.lt.u32.totalorder %s190_s24, %s309_s1 }
  0x31   :  { %p196_p1 = pnand %p194_p0, %p191_p13 }
  0x33   :  { %199 = shalt.err (!%p196_p1)
}
  0x34   :  { %146 = dma.vmem_to_hbm [thread:$0]  %s141_s20, 3072, %s309_s1, [#allocation4], %s205_s16, %s205_s16, %s206_s17  }
  0x35   :  { %202 = dma.done.wait [#allocation4], 3072  }
  0x36   :  { %203 = vsyncadd [#allocation4], 4294964224 }
  0x37   :  { %150 = vsyncpa [#allocation3], 1 }
  0x38   :  { %151 = vsyncpa [#allocation4], 1 }

// kernel: focalnet_forward.18
= control target key start
LH: loop header
LB: loop body
LE: loop exit
PB: predicated region body
PF: predicated region fallthrough
CT: control target
= control target key end

     0   :  { %vm131_vm0 = vcmask 392192   ;;  %s529_s1 = inlined_call_operand.vmem [shape: bf16[48,128], index: 1, kind: input, shape index: {}]   ;;  %s530_s0 = inlined_call_operand.vmem [shape: bf16[128,48], index: 0, kind: input, shape index: {}]   ;;  %s531_s2 = inlined_call_operand.vmem [shape: f32[1,128], index: 2, kind: input, shape index: {}]   ;;  %s532_s3 = inlined_call_operand.vmem [shape: f32[128,128], index: 3, kind: output, shape index: {}]  }
   0x1   :  { %v406_v0 = vld [vmem:[%s529_s1] sm:$0xff]   ;;  %v407_v1 = vld [vmem:[%s529_s1 + $0x8] sm:$0xff]   ;;  %v408_v2 = vld [vmem:[%s529_s1 + $0x10] sm:$0xff]  }
   0x2   :  { %378 = vmatprep.subr.bf16.mxu0 %v406_v0  ;;  %400 = vmatprep.subr.bf16.mxu1 %v406_v0  ;;  %v409_v3 = vld [vmem:[%s530_s0] sm:$0xff]   ;;  %v411_v5 = vld [vmem:[%s530_s0 + $0x8] sm:$0xff]   ;;  %v413_v7 = vld [vmem:[%s530_s0 + $0x10] sm:$0xff]  }
   0x3   :  { %379 = vmatpush3.bf16.msra.mxu0 %v406_v0  ;;  %403 = vmatpush3.bf16.msra.mxu1 %v406_v0  ;;  %v410_v4 = vld [vmem:[%s530_s0 + $0x20] sm:$0xff]   ;;  %v412_v6 = vld [vmem:[%s530_s0 + $0x28] sm:$0xff]   ;;  %v414_v8 = vld [vmem:[%s530_s0 + $0x30] sm:$0xff]  }
   0x4   :  { %380 = vmatprep.subr.bf16.mxu0 %v407_v1  ;;  %401 = vmatprep.subr.bf16.mxu1 %v407_v1  ;;  %v415_v9 = vld [vmem:[%s530_s0 + $0x18] sm:$0xff]   ;;  %v366_v11 = vld [vmem:[%s531_s2] ss:$0 sm:$0xff] }
   0x5   :  { %384 = vmatprep.mubr.msk.bf16.mxu0 %vm131_vm0, %v409_v3  ;;  %392 = vmatprep.mubr.msk.bf16.mxu1 %vm131_vm0, %v410_v4  ;;  %v416_v10 = vld [vmem:[%s530_s0 + $0x38] sm:$0xff]  }
   0x7   :  { %381 = vmatpush3.bf16.msra.mxu0 %v407_v1  ;;  %404 = vmatpush3.bf16.msra.mxu1 %v407_v1 }
   0x8   :  { %382 = vmatprep.subr.bf16.mxu0 %v408_v2  ;;  %402 = vmatprep.subr.bf16.mxu1 %v408_v2 }
   0xb   :  { %383 = vmatpush3.bf16.msra.mxu0 %v408_v2  ;;  %405 = vmatpush3.bf16.msra.mxu1 %v408_v2 }
   0xe   :  { %385 = vmatmul.mubr.msk.bf16.vlgmr.msra.gmra.mrb[0].mxu0 %vm131_vm0, %v411_v5  ;;  %393 = vmatmul.mubr.msk.bf16.vlgmr.msra.gmra.mrb[0].mxu1 %vm131_vm0, %v412_v6 }
   0xf   :  { %388 = vmatprep.mubr.msk.bf16.mxu0 %vm131_vm0, %v413_v7  ;;  %396 = vmatprep.mubr.msk.bf16.mxu1 %vm131_vm0, %v414_v8 }
  0x16   :  { %389 = vmatmul.mubr.msk.bf16.gmra.mrb[4].mxu0 %vm131_vm0, %v415_v9  ;;  %397 = vmatmul.mubr.msk.bf16.gmra.mrb[4].mxu1 %vm131_vm0, %v416_v10 }
  0xe1   :  { %v386_v12 = vpop.f32.mrb[0].mxu0  ;;  %v394_v13 = vpop.f32.mrb[0].mxu1 }
  0xe2   :  { %v313_v14 = vadd.f32 %v386_v12, %v366_v11  ;;  %v321_v15 = vadd.f32 %v394_v13, %v366_v11  ;;  %v190_v16 = vpop.f32.mrb[1].mxu0  ;;  %v222_v17 = vpop.f32.mrb[1].mxu1 }
  0xe3   :  { %v311_v18 = vadd.f32 %v366_v11, %v190_v16  ;;  %v319_v19 = vadd.f32 %v366_v11, %v222_v17  ;;  %v387_v20 = vpop.f32.mrb[2].mxu0  ;;  %v395_v21 = vpop.f32.mrb[2].mxu1 }
  0xe4   :  { %329 = vst [vmem:[%s532_s3 + $0x10] sm:$0xff] %v313_v14  ;;  %337 = vst [vmem:[%s532_s3 + $0x50] sm:$0xff] %v321_v15  ;;  %v314_v22 = vadd.f32 %v387_v20, %v366_v11  ;;  %v322_v23 = vadd.f32 %v395_v21, %v366_v11  ;;  %v193_v24 = vpop.f32.mrb[3].mxu0  ;;  %v225_v25 = vpop.f32.mrb[3].mxu1 }
  0xe5   :  { %327 = vst [vmem:[%s532_s3] sm:$0xff] %v311_v18  ;;  %335 = vst [vmem:[%s532_s3 + $0x40] sm:$0xff] %v319_v19  ;;  %v312_v26 = vadd.f32 %v366_v11, %v193_v24  ;;  %v320_v27 = vadd.f32 %v366_v11, %v225_v25 }
  0xe6   :  { %330 = vst [vmem:[%s532_s3 + $0x18] sm:$0xff] %v314_v22  ;;  %338 = vst [vmem:[%s532_s3 + $0x58] sm:$0xff] %v322_v23 }
  0xe7   :  { %328 = vst [vmem:[%s532_s3 + $0x8] sm:$0xff] %v312_v26  ;;  %336 = vst [vmem:[%s532_s3 + $0x48] sm:$0xff] %v320_v27 }
  0xe9   :  { %v390_v28 = vpop.f32.mrb[4].mxu0  ;;  %v398_v29 = vpop.f32.mrb[4].mxu1 }
  0xea   :  { %v317_v30 = vadd.f32 %v390_v28, %v366_v11  ;;  %v325_v31 = vadd.f32 %v398_v29, %v366_v11  ;;  %v206_v32 = vpop.f32.mrb[5].mxu0  ;;  %v238_v33 = vpop.f32.mrb[5].mxu1 }
  0xeb   :  { %v315_v34 = vadd.f32 %v366_v11, %v206_v32  ;;  %v323_v35 = vadd.f32 %v366_v11, %v238_v33  ;;  %v391_v36 = vpop.f32.mrb[6].mxu0  ;;  %v399_v37 = vpop.f32.mrb[6].mxu1 }
  0xec   :  { %333 = vst [vmem:[%s532_s3 + $0x30] sm:$0xff] %v317_v30  ;;  %341 = vst [vmem:[%s532_s3 + $0x70] sm:$0xff] %v325_v31  ;;  %v318_v38 = vadd.f32 %v391_v36, %v366_v11  ;;  %v326_v39 = vadd.f32 %v399_v37, %v366_v11  ;;  %v209_v40 = vpop.f32.mrb[7].mxu0  ;;  %v241_v41 = vpop.f32.mrb[7].mxu1 }
  0xed   :  { %331 = vst [vmem:[%s532_s3 + $0x20] sm:$0xff] %v315_v34  ;;  %339 = vst [vmem:[%s532_s3 + $0x60] sm:$0xff] %v323_v35  ;;  %v316_v42 = vadd.f32 %v366_v11, %v209_v40  ;;  %v324_v43 = vadd.f32 %v366_v11, %v241_v41 }
  0xee   :  { %334 = vst [vmem:[%s532_s3 + $0x38] sm:$0xff] %v318_v38  ;;  %342 = vst [vmem:[%s532_s3 + $0x78] sm:$0xff] %v326_v39 }
  0xef   :  { %332 = vst [vmem:[%s532_s3 + $0x28] sm:$0xff] %v316_v42  ;;  %340 = vst [vmem:[%s532_s3 + $0x68] sm:$0xff] %v324_v43 }

// kernel: focalnet_forward.19
= control target key start
LH: loop header
LB: loop body
LE: loop exit
PB: predicated region body
PF: predicated region fallthrough
CT: control target
= control target key end

     0   :  { %vm30_vm0 = vcmask 130048   ;;  %s666_s0 = inlined_call_operand.vmem [shape: f32[128,16], index: 0, kind: input, shape index: {}]   ;;  %s667_s1 = inlined_call_operand.vmem [shape: f32[1,16], index: 1, kind: input, shape index: {}]   ;;  %s668_s2 = inlined_call_operand.vmem [shape: f32[1,16], index: 2, kind: input, shape index: {}]   ;;  %s669_s3 = inlined_call_operand.vmem [shape: f32[128,16], index: 3, kind: output, shape index: {}]  }
   0x1   :  { %v14_v0 = vld [vmem:[%s666_s0] sm:$0xff]  ;;  %v16_v1 = vld [vmem:[%s666_s0 + $0x10] sm:$0xff]  ;;  %v15_v2 = vld [vmem:[%s666_s0 + $0x8] sm:$0xff] }
   0x2   :  { %v31_v3 = vsel %vm30_vm0, %v14_v0, 0.0  ;;  %v37_v4 = vsel %vm30_vm0, %v16_v1, 0.0  ;;  %v17_v5 = vld [vmem:[%s666_s0 + $0x18] sm:$0xff]  ;;  %v34_v6 = vsel %vm30_vm0, %v15_v2, 0.0  ;;  %v18_v8 = vld [vmem:[%s666_s0 + $0x20] sm:$0xff]  ;;  %v19_v9 = vld [vmem:[%s666_s0 + $0x28] sm:$0xff] }
   0x3   :  { %32 = vadd.xlane.f32.xlu0 %v31_v3  ;;  %38 = vadd.xlane.f32.xlu1 %v37_v4  ;;  %v40_v7 = vsel %vm30_vm0, %v17_v5, 0.0  ;;  %v43_v10 = vsel %vm30_vm0, %v18_v8, 0.0  ;;  %v46_v11 = vsel %vm30_vm0, %v19_v9, 0.0  ;;  %v387_v12 = vld [vmem:[%s666_s0 + $0x30] sm:$0xff]  ;;  %v392_v13 = vld [vmem:[%s666_s0 + $0x38] sm:$0xff]  ;;  %v401_v16 = vld [vmem:[%s666_s0 + $0x40] sm:$0xff] }
   0x4   :  { %v49_v14 = vsel %vm30_vm0, %v387_v12, 0.0  ;;  %v52_v15 = vsel %vm30_vm0, %v392_v13, 0.0  ;;  %v406_v17 = vld [vmem:[%s666_s0 + $0x48] sm:$0xff]  ;;  %v55_v18 = vsel %vm30_vm0, %v401_v16, 0.0  ;;  %v415_v20 = vld [vmem:[%s666_s0 + $0x50] sm:$0xff]  ;;  %v420_v21 = vld [vmem:[%s666_s0 + $0x58] sm:$0xff] }
   0x5   :  { %v58_v19 = vsel %vm30_vm0, %v406_v17, 0.0  ;;  %v61_v22 = vsel %vm30_vm0, %v415_v20, 0.0  ;;  %v64_v23 = vsel %vm30_vm0, %v420_v21, 0.0  ;;  %v429_v24 = vld [vmem:[%s666_s0 + $0x60] sm:$0xff]  ;;  %v434_v25 = vld [vmem:[%s666_s0 + $0x68] sm:$0xff]  ;;  %v443_v28 = vld [vmem:[%s666_s0 + $0x70] sm:$0xff] }
   0x6   :  { %v67_v26 = vsel %vm30_vm0, %v429_v24, 0.0  ;;  %v70_v27 = vsel %vm30_vm0, %v434_v25, 0.0  ;;  %v448_v29 = vld [vmem:[%s666_s0 + $0x78] sm:$0xff]  ;;  %v73_v30 = vsel %vm30_vm0, %v443_v28, 0.0 }
   0x7   :  { %35 = vadd.xlane.f32.xlu0 %v34_v6  ;;  %41 = vadd.xlane.f32.xlu1 %v40_v7  ;;  %v76_v31 = vsel %vm30_vm0, %v448_v29, 0.0 }
   0xb   :  { %44 = vadd.xlane.f32.xlu0 %v43_v10  ;;  %47 = vadd.xlane.f32.xlu1 %v46_v11 }
   0xf   :  { %50 = vadd.xlane.f32.xlu0 %v49_v14  ;;  %53 = vadd.xlane.f32.xlu1 %v52_v15 }
  0x13   :  { %56 = vadd.xlane.f32.xlu0 %v55_v18  ;;  %59 = vadd.xlane.f32.xlu1 %v58_v19 }
  0x17   :  { %62 = vadd.xlane.f32.xlu0 %v61_v22  ;;  %65 = vadd.xlane.f32.xlu1 %v64_v23 }
  0x1b   :  { %68 = vadd.xlane.f32.xlu0 %v67_v26  ;;  %71 = vadd.xlane.f32.xlu1 %v70_v27 }
  0x1f   :  { %74 = vadd.xlane.f32.xlu0 %v73_v30  ;;  %77 = vadd.xlane.f32.xlu1 %v76_v31 }
  0x90   :  { %v33_v32 = vpop.xlane.xlu0 %32  ;;  %v39_v33 = vpop.xlane.xlu1 %38 }
  0x91   :  { %v80_v34 = vmul.f32 0.0625, %v33_v32  ;;  %v82_v35 = vmul.f32 0.0625, %v39_v33 }
  0x93   :  { %v454_v36 = vsub.f32 %v14_v0, %v80_v34  ;;  %v456_v37 = vsub.f32 %v16_v1, %v82_v35 }
  0x94   :  { %v36_v38 = vpop.xlane.xlu0 %35  ;;  %v42_v39 = vpop.xlane.xlu1 %41 }
  0x95   :  { %v81_v40 = vmul.f32 0.0625, %v36_v38  ;;  %v83_v41 = vmul.f32 0.0625, %v42_v39  ;;  %v112_v42 = vmul.f32 %v454_v36, %v454_v36  ;;  %v114_v43 = vmul.f32 %v456_v37, %v456_v37 }
  0x97   :  { %v462_v44 = vsub.f32 %v15_v2, %v81_v40  ;;  %v464_v45 = vsub.f32 %v17_v5, %v83_v41  ;;  %v128_v46 = vsel %vm30_vm0, %v112_v42, 0.0  ;;  %v134_v49 = vsel %vm30_vm0, %v114_v43, 0.0 }
  0x98   :  { %129 = vadd.xlane.f32.xlu0 %v128_v46  ;;  %v45_v47 = vpop.xlane.xlu0 %44  ;;  %v48_v48 = vpop.xlane.xlu1 %47 }
  0x99   :  { %v84_v50 = vmul.f32 0.0625, %v45_v47  ;;  %v85_v51 = vmul.f32 0.0625, %v48_v48  ;;  %v113_v52 = vmul.f32 %v462_v44, %v462_v44  ;;  %v115_v53 = vmul.f32 %v464_v45, %v464_v45 }
  0x9b   :  { %v472_v54 = vsub.f32 %v18_v8, %v84_v50  ;;  %v474_v55 = vsub.f32 %v19_v9, %v85_v51  ;;  %v131_v56 = vsel %vm30_vm0, %v113_v52, 0.0  ;;  %v137_v59 = vsel %vm30_vm0, %v115_v53, 0.0 }
  0x9c   :  { %135 = vadd.xlane.f32.xlu0 %v134_v49  ;;  %132 = vadd.xlane.f32.xlu1 %v131_v56  ;;  %v51_v57 = vpop.xlane.xlu0 %50  ;;  %v54_v58 = vpop.xlane.xlu1 %53 }
  0x9d   :  { %v86_v60 = vmul.f32 0.0625, %v51_v57  ;;  %v87_v61 = vmul.f32 0.0625, %v54_v58  ;;  %v116_v62 = vmul.f32 %v472_v54, %v472_v54  ;;  %v117_v63 = vmul.f32 %v474_v55, %v474_v55 }
  0x9f   :  { %v483_v0 = vsub.f32 %v387_v12, %v86_v60  ;;  %v486_v1 = vsub.f32 %v392_v13, %v87_v61  ;;  %v140_v2 = vsel %vm30_vm0, %v116_v62, 0.0  ;;  %v143_v5 = vsel %vm30_vm0, %v117_v63, 0.0 }
  0xa0   :  { %138 = vadd.xlane.f32.xlu1 %v137_v59  ;;  %141 = vadd.xlane.f32.xlu0 %v140_v2  ;;  %v57_v3 = vpop.xlane.xlu0 %56  ;;  %v60_v4 = vpop.xlane.xlu1 %59 }
  0xa1   :  { %v88_v6 = vmul.f32 0.0625, %v57_v3  ;;  %v89_v7 = vmul.f32 0.0625, %v60_v4  ;;  %v118_v8 = vmul.f32 %v483_v0, %v483_v0  ;;  %v119_v9 = vmul.f32 %v486_v1, %v486_v1 }
  0xa3   :  { %v495_v10 = vsub.f32 %v401_v16, %v88_v6  ;;  %v498_v11 = vsub.f32 %v406_v17, %v89_v7  ;;  %v146_v12 = vsel %vm30_vm0, %v118_v8, 0.0  ;;  %v149_v15 = vsel %vm30_vm0, %v119_v9, 0.0 }
  0xa4   :  { %144 = vadd.xlane.f32.xlu1 %v143_v5  ;;  %147 = vadd.xlane.f32.xlu0 %v146_v12  ;;  %v63_v13 = vpop.xlane.xlu0 %62  ;;  %v66_v14 = vpop.xlane.xlu1 %65 }
  0xa5   :  { %v90_v18 = vmul.f32 0.0625, %v63_v13  ;;  %v91_v19 = vmul.f32 0.0625, %v66_v14  ;;  %v120_v22 = vmul.f32 %v495_v10, %v495_v10  ;;  %v121_v16 = vmul.f32 %v498_v11, %v498_v11  ;;  %v547_v14 = vld [vmem:[%s667_s1] ss:$0 sm:$0xff] }
  0xa7   :  { %v507_v23 = vsub.f32 %v415_v20, %v90_v18  ;;  %v510_v17 = vsub.f32 %v420_v21, %v91_v19  ;;  %v152_v26 = vsel %vm30_vm0, %v120_v22, 0.0  ;;  %v155_v31 = vsel %vm30_vm0, %v121_v16, 0.0 }
  0xa8   :  { %150 = vadd.xlane.f32.xlu1 %v149_v15  ;;  %153 = vadd.xlane.f32.xlu0 %v152_v26  ;;  %v69_v27 = vpop.xlane.xlu0 %68  ;;  %v72_v30 = vpop.xlane.xlu1 %71  ;;  %v553_v26 = vld [vmem:[%s668_s2] ss:$0 sm:$0xff] }
  0xa9   :  { %v92_v32 = vmul.f32 0.0625, %v69_v27  ;;  %v93_v33 = vmul.f32 0.0625, %v72_v30  ;;  %v122_v34 = vmul.f32 %v507_v23, %v507_v23  ;;  %v123_v20 = vmul.f32 %v510_v17, %v510_v17 }
  0xab   :  { %v519_v35 = vsub.f32 %v429_v24, %v92_v32  ;;  %v522_v21 = vsub.f32 %v434_v25, %v93_v33  ;;  %v158_v38 = vsel %vm30_vm0, %v122_v34, 0.0  ;;  %v161_v41 = vsel %vm30_vm0, %v123_v20, 0.0 }
  0xac   :  { %156 = vadd.xlane.f32.xlu1 %v155_v31  ;;  %159 = vadd.xlane.f32.xlu0 %v158_v38  ;;  %v75_v39 = vpop.xlane.xlu0 %74  ;;  %v78_v40 = vpop.xlane.xlu1 %77 }
  0xad   :  { %v94_v42 = vmul.f32 0.0625, %v75_v39  ;;  %v95_v43 = vmul.f32 0.0625, %v78_v40  ;;  %v124_v46 = vmul.f32 %v519_v35, %v519_v35  ;;  %v125_v24 = vmul.f32 %v522_v21, %v522_v21 }
  0xaf   :  { %v531_v47 = vsub.f32 %v443_v28, %v94_v42  ;;  %v534_v25 = vsub.f32 %v448_v29, %v95_v43  ;;  %v164_v48 = vsel %vm30_vm0, %v124_v46, 0.0  ;;  %v167_v49 = vsel %vm30_vm0, %v125_v24, 0.0 }
  0xb0   :  { %162 = vadd.xlane.f32.xlu1 %v161_v41  ;;  %165 = vadd.xlane.f32.xlu0 %v164_v48 }
  0xb1   :  { %v126_v50 = vmul.f32 %v531_v47, %v531_v47  ;;  %v127_v51 = vmul.f32 %v534_v25, %v534_v25 }
  0xb3   :  { %v170_v52 = vsel %vm30_vm0, %v126_v50, 0.0  ;;  %v173_v28 = vsel %vm30_vm0, %v127_v51, 0.0 }
  0xb4   :  { %168 = vadd.xlane.f32.xlu1 %v167_v49  ;;  %171 = vadd.xlane.f32.xlu0 %v170_v52 }
  0xb8   :  { %174 = vadd.xlane.f32.xlu1 %v173_v28 }
 0x125   :  { %v130_v29 = vpop.xlane.xlu0 %129 }
 0x126   :  { %v176_v53 = vmul.f32 0.0625, %v130_v29 }
 0x128   :  { %v192_v56 = vadd.f32 1e-05, %v176_v53 }
 0x129   :  { %v133_v57 = vpop.xlane.xlu1 %132  ;;  %v136_v58 = vpop.xlane.xlu0 %135 }
 0x12a   :  { %308 = vrsqrt.f32 %v192_v56  ;;  %v177_v59 = vmul.f32 0.0625, %v133_v57  ;;  %v178_v60 = vmul.f32 0.0625, %v136_v58 }
 0x12c   :  { %v193_v61 = vadd.f32 1e-05, %v177_v59  ;;  %v194_v62 = vadd.f32 1e-05, %v178_v60 }
 0x12d   :  { %v139_v63 = vpop.xlane.xlu1 %138  ;;  %v142_v2 = vpop.xlane.xlu0 %141 }
 0x12e   :  { %310 = vrsqrt.f32 %v193_v61  ;;  %v179_v3 = vmul.f32 0.0625, %v139_v63  ;;  %v180_v4 = vmul.f32 0.0625, %v142_v2 }
 0x12f   :  { %312 = vrsqrt.f32 %v194_v62 }
 0x130   :  { %v195_v5 = vadd.f32 1e-05, %v179_v3  ;;  %v196_v6 = vadd.f32 1e-05, %v180_v4 }
 0x131   :  { %v145_v7 = vpop.xlane.xlu1 %144  ;;  %v148_v8 = vpop.xlane.xlu0 %147 }
 0x132   :  { %314 = vrsqrt.f32 %v195_v5  ;;  %v181_v9 = vmul.f32 0.0625, %v145_v7  ;;  %v182_v12 = vmul.f32 0.0625, %v148_v8 }
 0x133   :  { %316 = vrsqrt.f32 %v196_v6 }
 0x134   :  { %v309_v13 = vpop.eup %308  ;;  %v197_v15 = vadd.f32 1e-05, %v181_v9  ;;  %v198_v18 = vadd.f32 1e-05, %v182_v12 }
 0x135   :  { %v224_v19 = vmul.f32 %v309_v13, %v454_v36  ;;  %v151_v22 = vpop.xlane.xlu1 %150  ;;  %v154_v16 = vpop.xlane.xlu0 %153 }
 0x136   :  { %318 = vrsqrt.f32 %v197_v15  ;;  %v183_v27 = vmul.f32 0.0625, %v151_v22  ;;  %v184_v30 = vmul.f32 0.0625, %v154_v16 }
 0x137   :  { %v247_v31 = vmul.f32 %v547_v14, %v224_v19  ;;  %320 = vrsqrt.f32 %v198_v18 }
 0x138   :  { %v311_v32 = vpop.eup %310  ;;  %v199_v33 = vadd.f32 1e-05, %v183_v27  ;;  %v200_v34 = vadd.f32 1e-05, %v184_v30 }
 0x139   :  { %v313_v20 = vpop.eup %312  ;;  %v270_v38 = vadd.f32 %v553_v26, %v247_v31  ;;  %v225_v36 = vmul.f32 %v311_v32, %v462_v44  ;;  %v157_v39 = vpop.xlane.xlu1 %156 }
 0x13a   :  { %v160_v40 = vpop.xlane.xlu0 %159  ;;  %v226_v41 = vmul.f32 %v313_v20, %v456_v37  ;;  %322 = vrsqrt.f32 %v199_v33  ;;  %v185_v42 = vmul.f32 0.0625, %v157_v39 }
 0x13b   :  { %v186_v43 = vmul.f32 0.0625, %v160_v40  ;;  %286 = vst.msk [vmem:[%s669_s3] sm:$0xff] %vm30_vm0, %v270_v38  ;;  %v248_v46 = vmul.f32 %v547_v14, %v225_v36  ;;  %324 = vrsqrt.f32 %v200_v34 }
 0x13c   :  { %v315_v24 = vpop.eup %314  ;;  %v249_v48 = vmul.f32 %v547_v14, %v226_v41  ;;  %v201_v49 = vadd.f32 1e-05, %v185_v42 }
 0x13d   :  { %v202_v44 = vadd.f32 1e-05, %v186_v43  ;;  %v317_v50 = vpop.eup %316  ;;  %v271_v51 = vadd.f32 %v553_v26, %v248_v46  ;;  %v227_v37 = vmul.f32 %v315_v24, %v464_v45  ;;  %v163_v52 = vpop.xlane.xlu1 %162 }
 0x13e   :  { %v166_v28 = vpop.xlane.xlu0 %165  ;;  %v272_v29 = vadd.f32 %v553_v26, %v249_v48  ;;  %v228_v53 = vmul.f32 %v317_v50, %v472_v54  ;;  %326 = vrsqrt.f32 %v201_v49  ;;  %v187_v56 = vmul.f32 0.0625, %v163_v52 }
 0x13f   :  { %287 = vst.msk [vmem:[%s669_s3 + $0x8] sm:$0xff] %vm30_vm0, %v271_v51  ;;  %v250_v57 = vmul.f32 %v547_v14, %v227_v37  ;;  %328 = vrsqrt.f32 %v202_v44  ;;  %v188_v58 = vmul.f32 0.0625, %v166_v28 }
 0x140   :  { %v319_v59 = vpop.eup %318  ;;  %288 = vst.msk [vmem:[%s669_s3 + $0x10] sm:$0xff] %vm30_vm0, %v272_v29  ;;  %v251_v45 = vmul.f32 %v547_v14, %v228_v53  ;;  %v203_v54 = vadd.f32 1e-05, %v187_v56 }
 0x141   :  { %v321_v60 = vpop.eup %320  ;;  %v273_v61 = vadd.f32 %v553_v26, %v250_v57  ;;  %v229_v62 = vmul.f32 %v319_v59, %v474_v55  ;;  %v204_v63 = vadd.f32 1e-05, %v188_v58  ;;  %v169_v2 = vpop.xlane.xlu1 %168 }
 0x142   :  { %v172_v3 = vpop.xlane.xlu0 %171  ;;  %v274_v4 = vadd.f32 %v553_v26, %v251_v45  ;;  %v230_v5 = vmul.f32 %v321_v60, %v483_v0  ;;  %330 = vrsqrt.f32 %v203_v54  ;;  %v189_v6 = vmul.f32 0.0625, %v169_v2 }
 0x143   :  { %289 = vst.msk [vmem:[%s669_s3 + $0x18] sm:$0xff] %vm30_vm0, %v273_v61  ;;  %v252_v7 = vmul.f32 %v547_v14, %v229_v62  ;;  %332 = vrsqrt.f32 %v204_v63  ;;  %v190_v8 = vmul.f32 0.0625, %v172_v3 }
 0x144   :  { %v323_v9 = vpop.eup %322  ;;  %290 = vst.msk [vmem:[%s669_s3 + $0x20] sm:$0xff] %vm30_vm0, %v274_v4  ;;  %v253_v55 = vmul.f32 %v547_v14, %v230_v5  ;;  %v205_v0 = vadd.f32 1e-05, %v189_v6 }
 0x145   :  { %v325_v12 = vpop.eup %324  ;;  %v275_v13 = vadd.f32 %v553_v26, %v252_v7  ;;  %v231_v15 = vmul.f32 %v323_v9, %v486_v1  ;;  %v206_v18 = vadd.f32 1e-05, %v190_v8  ;;  %v175_v19 = vpop.xlane.xlu1 %174 }
 0x146   :  { %v276_v22 = vadd.f32 %v553_v26, %v253_v55  ;;  %v232_v16 = vmul.f32 %v325_v12, %v495_v10  ;;  %334 = vrsqrt.f32 %v205_v0  ;;  %v191_v27 = vmul.f32 0.0625, %v175_v19 }
 0x147   :  { %291 = vst.msk [vmem:[%s669_s3 + $0x28] sm:$0xff] %vm30_vm0, %v275_v13  ;;  %v254_v30 = vmul.f32 %v547_v14, %v231_v15  ;;  %336 = vrsqrt.f32 %v206_v18 }
 0x148   :  { %v327_v31 = vpop.eup %326  ;;  %292 = vst.msk [vmem:[%s669_s3 + $0x30] sm:$0xff] %vm30_vm0, %v276_v22  ;;  %v255_v1 = vmul.f32 %v547_v14, %v232_v16  ;;  %v207_v32 = vadd.f32 1e-05, %v191_v27 }
 0x149   :  { %v329_v10 = vpop.eup %328  ;;  %v277_v33 = vadd.f32 %v553_v26, %v254_v30  ;;  %v233_v34 = vmul.f32 %v327_v31, %v498_v11 }
 0x14a   :  { %v278_v20 = vadd.f32 %v553_v26, %v255_v1  ;;  %v234_v38 = vmul.f32 %v329_v10, %v507_v23  ;;  %338 = vrsqrt.f32 %v207_v32 }
 0x14b   :  { %293 = vst.msk [vmem:[%s669_s3 + $0x38] sm:$0xff] %vm30_vm0, %v277_v33  ;;  %v256_v36 = vmul.f32 %v547_v14, %v233_v34 }
 0x14c   :  { %v331_v39 = vpop.eup %330  ;;  %294 = vst.msk [vmem:[%s669_s3 + $0x40] sm:$0xff] %vm30_vm0, %v278_v20  ;;  %v257_v11 = vmul.f32 %v547_v14, %v234_v38 }
 0x14d   :  { %v333_v40 = vpop.eup %332  ;;  %v279_v41 = vadd.f32 %v553_v26, %v256_v36  ;;  %v235_v23 = vmul.f32 %v331_v39, %v510_v17 }
 0x14e   :  { %v280_v42 = vadd.f32 %v553_v26, %v257_v11  ;;  %v236_v43 = vmul.f32 %v333_v40, %v519_v35 }
 0x14f   :  { %295 = vst.msk [vmem:[%s669_s3 + $0x48] sm:$0xff] %vm30_vm0, %v279_v41  ;;  %v258_v46 = vmul.f32 %v547_v14, %v235_v23 }
 0x150   :  { %v335_v24 = vpop.eup %334  ;;  %296 = vst.msk [vmem:[%s669_s3 + $0x50] sm:$0xff] %vm30_vm0, %v280_v42  ;;  %v259_v48 = vmul.f32 %v547_v14, %v236_v43 }
 0x151   :  { %v337_v17 = vpop.eup %336  ;;  %v281_v49 = vadd.f32 %v553_v26, %v258_v46  ;;  %v237_v35 = vmul.f32 %v335_v24, %v522_v21 }
 0x152   :  { %v282_v44 = vadd.f32 %v553_v26, %v259_v48  ;;  %v238_v50 = vmul.f32 %v337_v17, %v531_v47 }
 0x153   :  { %297 = vst.msk [vmem:[%s669_s3 + $0x58] sm:$0xff] %vm30_vm0, %v281_v49  ;;  %v260_v51 = vmul.f32 %v547_v14, %v237_v35 }
 0x154   :  { %v339_v37 = vpop.eup %338  ;;  %298 = vst.msk [vmem:[%s669_s3 + $0x60] sm:$0xff] %vm30_vm0, %v282_v44  ;;  %v261_v52 = vmul.f32 %v547_v14, %v238_v50 }
 0x155   :  { %v283_v21 = vadd.f32 %v553_v26, %v260_v51  ;;  %v239_v28 = vmul.f32 %v339_v37, %v534_v25 }
 0x156   :  { %v284_v47 = vadd.f32 %v553_v26, %v261_v52 }
 0x157   :  { %299 = vst.msk [vmem:[%s669_s3 + $0x68] sm:$0xff] %vm30_vm0, %v283_v21  ;;  %v262_v29 = vmul.f32 %v547_v14, %v239_v28 }
 0x158   :  { %300 = vst.msk [vmem:[%s669_s3 + $0x70] sm:$0xff] %vm30_vm0, %v284_v47 }
 0x159   :  { %v285_v53 = vadd.f32 %v553_v26, %v262_v29 }
 0x15b   :  { %301 = vst.msk [vmem:[%s669_s3 + $0x78] sm:$0xff] %vm30_vm0, %v285_v53 }

// kernel: focalnet_forward.20
= control target key start
LH: loop header
LB: loop body
LE: loop exit
PB: predicated region body
PF: predicated region fallthrough
CT: control target
= control target key end

     0   :  { %vm30_vm0 = vcmask 130048   ;;  %vm350_vm1 = vcmask 125952   ;;  %s763_s0 = inlined_call_operand.vmem [shape: f32[128,16], index: 0, kind: input, shape index: {}]   ;;  %s764_s1 = inlined_call_operand.vmem [shape: f32[1,16], index: 1, kind: input, shape index: {}]   ;;  %s765_s2 = inlined_call_operand.vmem [shape: f32[1,16], index: 2, kind: input, shape index: {}]   ;;  %s766_s3 = inlined_call_operand.vmem [shape: bf16[128,16], index: 3, kind: output, shape index: {}]  }
   0x1   :  { %v14_v0 = vld [vmem:[%s763_s0] sm:$0xff]  ;;  %v16_v1 = vld [vmem:[%s763_s0 + $0x10] sm:$0xff]  ;;  %v15_v2 = vld [vmem:[%s763_s0 + $0x8] sm:$0xff] }
   0x2   :  { %v31_v3 = vsel %vm30_vm0, %v14_v0, 0.0  ;;  %v37_v4 = vsel %vm30_vm0, %v16_v1, 0.0  ;;  %v17_v5 = vld [vmem:[%s763_s0 + $0x18] sm:$0xff]  ;;  %v34_v6 = vsel %vm30_vm0, %v15_v2, 0.0  ;;  %v18_v8 = vld [vmem:[%s763_s0 + $0x20] sm:$0xff]  ;;  %v19_v9 = vld [vmem:[%s763_s0 + $0x28] sm:$0xff] }
   0x3   :  { %32 = vadd.xlane.f32.xlu0 %v31_v3  ;;  %38 = vadd.xlane.f32.xlu1 %v37_v4  ;;  %v40_v7 = vsel %vm30_vm0, %v17_v5, 0.0  ;;  %v43_v10 = vsel %vm30_vm0, %v18_v8, 0.0  ;;  %v46_v11 = vsel %vm30_vm0, %v19_v9, 0.0  ;;  %v484_v12 = vld [vmem:[%s763_s0 + $0x30] sm:$0xff]  ;;  %v489_v13 = vld [vmem:[%s763_s0 + $0x38] sm:$0xff]  ;;  %v498_v16 = vld [vmem:[%s763_s0 + $0x40] sm:$0xff] }
   0x4   :  { %v49_v14 = vsel %vm30_vm0, %v484_v12, 0.0  ;;  %v52_v15 = vsel %vm30_vm0, %v489_v13, 0.0  ;;  %v503_v17 = vld [vmem:[%s763_s0 + $0x48] sm:$0xff]  ;;  %v55_v18 = vsel %vm30_vm0, %v498_v16, 0.0  ;;  %v512_v20 = vld [vmem:[%s763_s0 + $0x50] sm:$0xff]  ;;  %v517_v21 = vld [vmem:[%s763_s0 + $0x58] sm:$0xff] }
   0x5   :  { %v58_v19 = vsel %vm30_vm0, %v503_v17, 0.0  ;;  %v61_v22 = vsel %vm30_vm0, %v512_v20, 0.0  ;;  %v64_v23 = vsel %vm30_vm0, %v517_v21, 0.0  ;;  %v526_v24 = vld [vmem:[%s763_s0 + $0x60] sm:$0xff]  ;;  %v531_v25 = vld [vmem:[%s763_s0 + $0x68] sm:$0xff]  ;;  %v540_v28 = vld [vmem:[%s763_s0 + $0x70] sm:$0xff] }
   0x6   :  { %v67_v26 = vsel %vm30_vm0, %v526_v24, 0.0  ;;  %v70_v27 = vsel %vm30_vm0, %v531_v25, 0.0  ;;  %v545_v29 = vld [vmem:[%s763_s0 + $0x78] sm:$0xff]  ;;  %v73_v30 = vsel %vm30_vm0, %v540_v28, 0.0 }
   0x7   :  { %35 = vadd.xlane.f32.xlu0 %v34_v6  ;;  %41 = vadd.xlane.f32.xlu1 %v40_v7  ;;  %v76_v31 = vsel %vm30_vm0, %v545_v29, 0.0 }
   0xb   :  { %44 = vadd.xlane.f32.xlu0 %v43_v10  ;;  %47 = vadd.xlane.f32.xlu1 %v46_v11 }
   0xf   :  { %50 = vadd.xlane.f32.xlu0 %v49_v14  ;;  %53 = vadd.xlane.f32.xlu1 %v52_v15 }
  0x13   :  { %56 = vadd.xlane.f32.xlu0 %v55_v18  ;;  %59 = vadd.xlane.f32.xlu1 %v58_v19 }
  0x17   :  { %62 = vadd.xlane.f32.xlu0 %v61_v22  ;;  %65 = vadd.xlane.f32.xlu1 %v64_v23 }
  0x1b   :  { %68 = vadd.xlane.f32.xlu0 %v67_v26  ;;  %71 = vadd.xlane.f32.xlu1 %v70_v27 }
  0x1f   :  { %74 = vadd.xlane.f32.xlu0 %v73_v30  ;;  %77 = vadd.xlane.f32.xlu1 %v76_v31 }
  0x90   :  { %v33_v32 = vpop.xlane.xlu0 %32  ;;  %v39_v33 = vpop.xlane.xlu1 %38 }
  0x91   :  { %v80_v34 = vmul.f32 0.0625, %v33_v32  ;;  %v82_v35 = vmul.f32 0.0625, %v39_v33 }
  0x93   :  { %v551_v36 = vsub.f32 %v14_v0, %v80_v34  ;;  %v553_v37 = vsub.f32 %v16_v1, %v82_v35 }
  0x94   :  { %v36_v38 = vpop.xlane.xlu0 %35  ;;  %v42_v39 = vpop.xlane.xlu1 %41 }
  0x95   :  { %v81_v40 = vmul.f32 0.0625, %v36_v38  ;;  %v83_v41 = vmul.f32 0.0625, %v42_v39  ;;  %v112_v42 = vmul.f32 %v551_v36, %v551_v36  ;;  %v114_v43 = vmul.f32 %v553_v37, %v553_v37 }
  0x97   :  { %v559_v44 = vsub.f32 %v15_v2, %v81_v40  ;;  %v561_v45 = vsub.f32 %v17_v5, %v83_v41  ;;  %v128_v46 = vsel %vm30_vm0, %v112_v42, 0.0  ;;  %v134_v49 = vsel %vm30_vm0, %v114_v43, 0.0 }
  0x98   :  { %129 = vadd.xlane.f32.xlu0 %v128_v46  ;;  %v45_v47 = vpop.xlane.xlu0 %44  ;;  %v48_v48 = vpop.xlane.xlu1 %47 }
  0x99   :  { %v84_v50 = vmul.f32 0.0625, %v45_v47  ;;  %v85_v51 = vmul.f32 0.0625, %v48_v48  ;;  %v113_v52 = vmul.f32 %v559_v44, %v559_v44  ;;  %v115_v53 = vmul.f32 %v561_v45, %v561_v45 }
  0x9b   :  { %v569_v54 = vsub.f32 %v18_v8, %v84_v50  ;;  %v571_v55 = vsub.f32 %v19_v9, %v85_v51  ;;  %v131_v56 = vsel %vm30_vm0, %v113_v52, 0.0  ;;  %v137_v59 = vsel %vm30_vm0, %v115_v53, 0.0 }
  0x9c   :  { %135 = vadd.xlane.f32.xlu0 %v134_v49  ;;  %132 = vadd.xlane.f32.xlu1 %v131_v56  ;;  %v51_v57 = vpop.xlane.xlu0 %50  ;;  %v54_v58 = vpop.xlane.xlu1 %53 }
  0x9d   :  { %v86_v60 = vmul.f32 0.0625, %v51_v57  ;;  %v87_v61 = vmul.f32 0.0625, %v54_v58  ;;  %v116_v62 = vmul.f32 %v569_v54, %v569_v54  ;;  %v117_v63 = vmul.f32 %v571_v55, %v571_v55 }
  0x9f   :  { %v580_v0 = vsub.f32 %v484_v12, %v86_v60  ;;  %v583_v1 = vsub.f32 %v489_v13, %v87_v61  ;;  %v140_v2 = vsel %vm30_vm0, %v116_v62, 0.0  ;;  %v143_v5 = vsel %vm30_vm0, %v117_v63, 0.0 }
  0xa0   :  { %138 = vadd.xlane.f32.xlu1 %v137_v59  ;;  %141 = vadd.xlane.f32.xlu0 %v140_v2  ;;  %v57_v3 = vpop.xlane.xlu0 %56  ;;  %v60_v4 = vpop.xlane.xlu1 %59 }
  0xa1   :  { %v88_v6 = vmul.f32 0.0625, %v57_v3  ;;  %v89_v7 = vmul.f32 0.0625, %v60_v4  ;;  %v118_v8 = vmul.f32 %v580_v0, %v580_v0  ;;  %v119_v9 = vmul.f32 %v583_v1, %v583_v1 }
  0xa3   :  { %v592_v10 = vsub.f32 %v498_v16, %v88_v6  ;;  %v595_v11 = vsub.f32 %v503_v17, %v89_v7  ;;  %v146_v12 = vsel %vm30_vm0, %v118_v8, 0.0  ;;  %v149_v15 = vsel %vm30_vm0, %v119_v9, 0.0 }
  0xa4   :  { %144 = vadd.xlane.f32.xlu1 %v143_v5  ;;  %147 = vadd.xlane.f32.xlu0 %v146_v12  ;;  %v63_v13 = vpop.xlane.xlu0 %62  ;;  %v66_v14 = vpop.xlane.xlu1 %65 }
  0xa5   :  { %v90_v18 = vmul.f32 0.0625, %v63_v13  ;;  %v91_v19 = vmul.f32 0.0625, %v66_v14  ;;  %v120_v22 = vmul.f32 %v592_v10, %v592_v10  ;;  %v121_v16 = vmul.f32 %v595_v11, %v595_v11  ;;  %v644_v14 = vld [vmem:[%s764_s1] ss:$0 sm:$0xff] }
  0xa7   :  { %v604_v23 = vsub.f32 %v512_v20, %v90_v18  ;;  %v607_v17 = vsub.f32 %v517_v21, %v91_v19  ;;  %v152_v26 = vsel %vm30_vm0, %v120_v22, 0.0  ;;  %v155_v31 = vsel %vm30_vm0, %v121_v16, 0.0 }
  0xa8   :  { %150 = vadd.xlane.f32.xlu1 %v149_v15  ;;  %153 = vadd.xlane.f32.xlu0 %v152_v26  ;;  %v69_v27 = vpop.xlane.xlu0 %68  ;;  %v72_v30 = vpop.xlane.xlu1 %71  ;;  %v650_v26 = vld [vmem:[%s765_s2] ss:$0 sm:$0xff] }
  0xa9   :  { %v92_v32 = vmul.f32 0.0625, %v69_v27  ;;  %v93_v33 = vmul.f32 0.0625, %v72_v30  ;;  %v122_v34 = vmul.f32 %v604_v23, %v604_v23  ;;  %v123_v20 = vmul.f32 %v607_v17, %v607_v17 }
  0xab   :  { %v616_v35 = vsub.f32 %v526_v24, %v92_v32  ;;  %v619_v21 = vsub.f32 %v531_v25, %v93_v33  ;;  %v158_v38 = vsel %vm30_vm0, %v122_v34, 0.0  ;;  %v161_v41 = vsel %vm30_vm0, %v123_v20, 0.0 }
  0xac   :  { %156 = vadd.xlane.f32.xlu1 %v155_v31  ;;  %159 = vadd.xlane.f32.xlu0 %v158_v38  ;;  %v75_v39 = vpop.xlane.xlu0 %74  ;;  %v78_v40 = vpop.xlane.xlu1 %77 }
  0xad   :  { %v94_v42 = vmul.f32 0.0625, %v75_v39  ;;  %v95_v43 = vmul.f32 0.0625, %v78_v40  ;;  %v124_v46 = vmul.f32 %v616_v35, %v616_v35  ;;  %v125_v24 = vmul.f32 %v619_v21, %v619_v21 }
  0xaf   :  { %v628_v47 = vsub.f32 %v540_v28, %v94_v42  ;;  %v631_v25 = vsub.f32 %v545_v29, %v95_v43  ;;  %v164_v48 = vsel %vm30_vm0, %v124_v46, 0.0  ;;  %v167_v49 = vsel %vm30_vm0, %v125_v24, 0.0 }
  0xb0   :  { %162 = vadd.xlane.f32.xlu1 %v161_v41  ;;  %165 = vadd.xlane.f32.xlu0 %v164_v48 }
  0xb1   :  { %v126_v50 = vmul.f32 %v628_v47, %v628_v47  ;;  %v127_v51 = vmul.f32 %v631_v25, %v631_v25 }
  0xb3   :  { %v170_v52 = vsel %vm30_vm0, %v126_v50, 0.0  ;;  %v173_v28 = vsel %vm30_vm0, %v127_v51, 0.0 }
  0xb4   :  { %168 = vadd.xlane.f32.xlu1 %v167_v49  ;;  %171 = vadd.xlane.f32.xlu0 %v170_v52 }
  0xb8   :  { %174 = vadd.xlane.f32.xlu1 %v173_v28 }
 0x125   :  { %v130_v29 = vpop.xlane.xlu0 %129 }
 0x126   :  { %v176_v53 = vmul.f32 0.0625, %v130_v29 }
 0x128   :  { %v192_v56 = vadd.f32 1e-05, %v176_v53 }
 0x129   :  { %v133_v57 = vpop.xlane.xlu1 %132  ;;  %v136_v58 = vpop.xlane.xlu0 %135 }
 0x12a   :  { %405 = vrsqrt.f32 %v192_v56  ;;  %v177_v59 = vmul.f32 0.0625, %v133_v57  ;;  %v178_v60 = vmul.f32 0.0625, %v136_v58 }
 0x12c   :  { %v193_v61 = vadd.f32 1e-05, %v177_v59  ;;  %v194_v62 = vadd.f32 1e-05, %v178_v60 }
 0x12d   :  { %v139_v63 = vpop.xlane.xlu1 %138  ;;  %v142_v2 = vpop.xlane.xlu0 %141 }
 0x12e   :  { %407 = vrsqrt.f32 %v193_v61  ;;  %v179_v3 = vmul.f32 0.0625, %v139_v63  ;;  %v180_v4 = vmul.f32 0.0625, %v142_v2 }
 0x12f   :  { %409 = vrsqrt.f32 %v194_v62 }
 0x130   :  { %v195_v5 = vadd.f32 1e-05, %v179_v3  ;;  %v196_v6 = vadd.f32 1e-05, %v180_v4 }
 0x131   :  { %v145_v7 = vpop.xlane.xlu1 %144  ;;  %v148_v8 = vpop.xlane.xlu0 %147 }
 0x132   :  { %411 = vrsqrt.f32 %v195_v5  ;;  %v181_v9 = vmul.f32 0.0625, %v145_v7  ;;  %v182_v12 = vmul.f32 0.0625, %v148_v8 }
 0x133   :  { %413 = vrsqrt.f32 %v196_v6 }
 0x134   :  { %v406_v13 = vpop.eup %405  ;;  %v197_v15 = vadd.f32 1e-05, %v181_v9  ;;  %v198_v18 = vadd.f32 1e-05, %v182_v12 }
 0x135   :  { %v224_v19 = vmul.f32 %v406_v13, %v551_v36  ;;  %v151_v22 = vpop.xlane.xlu1 %150  ;;  %v154_v16 = vpop.xlane.xlu0 %153 }
 0x136   :  { %415 = vrsqrt.f32 %v197_v15  ;;  %v183_v27 = vmul.f32 0.0625, %v151_v22  ;;  %v184_v30 = vmul.f32 0.0625, %v154_v16 }
 0x137   :  { %v247_v31 = vmul.f32 %v644_v14, %v224_v19  ;;  %417 = vrsqrt.f32 %v198_v18 }
 0x138   :  { %v408_v32 = vpop.eup %407  ;;  %v199_v33 = vadd.f32 1e-05, %v183_v27  ;;  %v200_v34 = vadd.f32 1e-05, %v184_v30 }
 0x139   :  { %v410_v20 = vpop.eup %409  ;;  %v270_v36 = vadd.f32 %v650_v26, %v247_v31  ;;  %v225_v38 = vmul.f32 %v408_v32, %v559_v44  ;;  %v157_v39 = vpop.xlane.xlu1 %156 }
 0x13a   :  { %v160_v40 = vpop.xlane.xlu0 %159  ;;  %v226_v41 = vmul.f32 %v410_v20, %v553_v37  ;;  %419 = vrsqrt.f32 %v199_v33  ;;  %v185_v42 = vmul.f32 0.0625, %v157_v39 }
 0x13b   :  { %v186_v43 = vmul.f32 0.0625, %v160_v40  ;;  %v389_v46 = vpack.c.bf16 %v270_v36, %v270_v36  ;;  %v248_v24 = vmul.f32 %v644_v14, %v225_v38  ;;  %421 = vrsqrt.f32 %v200_v34 }
 0x13c   :  { %v412_v48 = vpop.eup %411  ;;  %v249_v49 = vmul.f32 %v644_v14, %v226_v41  ;;  %v201_v50 = vadd.f32 1e-05, %v185_v42 }
 0x13d   :  { %v202_v51 = vadd.f32 1e-05, %v186_v43  ;;  %v414_v52 = vpop.eup %413  ;;  %351 = vst.msk [vmem:[%s766_s3] sm:$0xf] %vm350_vm1, %v389_v46  ;;  %v271_v37 = vadd.f32 %v650_v26, %v248_v24  ;;  %v227_v44 = vmul.f32 %v412_v48, %v561_v45  ;;  %v163_v28 = vpop.xlane.xlu1 %162 }
 0x13e   :  { %v166_v29 = vpop.xlane.xlu0 %165  ;;  %v272_v53 = vadd.f32 %v650_v26, %v249_v49  ;;  %v228_v56 = vmul.f32 %v414_v52, %v569_v54  ;;  %423 = vrsqrt.f32 %v201_v50  ;;  %v187_v57 = vmul.f32 0.0625, %v163_v28 }
 0x13f   :  { %v390_v58 = vpack.c.bf16 %v271_v37, %v271_v37  ;;  %v250_v59 = vmul.f32 %v644_v14, %v227_v44  ;;  %425 = vrsqrt.f32 %v202_v51  ;;  %v188_v60 = vmul.f32 0.0625, %v166_v29 }
 0x140   :  { %v416_v61 = vpop.eup %415  ;;  %v391_v62 = vpack.c.bf16 %v272_v53, %v272_v53  ;;  %v251_v63 = vmul.f32 %v644_v14, %v228_v56  ;;  %v203_v2 = vadd.f32 1e-05, %v187_v57 }
 0x141   :  { %v418_v3 = vpop.eup %417  ;;  %352 = vst.msk [vmem:[%s766_s3 + $0x4] sm:$0xf] %vm350_vm1, %v390_v58  ;;  %v273_v45 = vadd.f32 %v650_v26, %v250_v59  ;;  %v229_v54 = vmul.f32 %v416_v61, %v571_v55  ;;  %v204_v4 = vadd.f32 1e-05, %v188_v60  ;;  %v169_v5 = vpop.xlane.xlu1 %168 }
 0x142   :  { %v172_v6 = vpop.xlane.xlu0 %171  ;;  %353 = vst.msk [vmem:[%s766_s3 + $0x8] sm:$0xf] %vm350_vm1, %v391_v62  ;;  %v274_v7 = vadd.f32 %v650_v26, %v251_v63  ;;  %v230_v8 = vmul.f32 %v418_v3, %v580_v0  ;;  %427 = vrsqrt.f32 %v203_v2  ;;  %v189_v9 = vmul.f32 0.0625, %v169_v5 }
 0x143   :  { %v392_v12 = vpack.c.bf16 %v273_v45, %v273_v45  ;;  %v252_v13 = vmul.f32 %v644_v14, %v229_v54  ;;  %429 = vrsqrt.f32 %v204_v4  ;;  %v190_v15 = vmul.f32 0.0625, %v172_v6 }
 0x144   :  { %v420_v55 = vpop.eup %419  ;;  %v393_v18 = vpack.c.bf16 %v274_v7, %v274_v7  ;;  %v253_v19 = vmul.f32 %v644_v14, %v230_v8  ;;  %v205_v22 = vadd.f32 1e-05, %v189_v9 }
 0x145   :  { %v422_v16 = vpop.eup %421  ;;  %354 = vst.msk [vmem:[%s766_s3 + $0xc] sm:$0xf] %vm350_vm1, %v392_v12  ;;  %v275_v0 = vadd.f32 %v650_v26, %v252_v13  ;;  %v231_v27 = vmul.f32 %v420_v55, %v583_v1  ;;  %v206_v30 = vadd.f32 1e-05, %v190_v15  ;;  %v175_v31 = vpop.xlane.xlu1 %174 }
 0x146   :  { %355 = vst.msk [vmem:[%s766_s3 + $0x10] sm:$0xf] %vm350_vm1, %v393_v18  ;;  %v276_v32 = vadd.f32 %v650_v26, %v253_v19  ;;  %v232_v33 = vmul.f32 %v422_v16, %v592_v10  ;;  %431 = vrsqrt.f32 %v205_v22  ;;  %v191_v34 = vmul.f32 0.0625, %v175_v31 }
 0x147   :  { %v394_v20 = vpack.c.bf16 %v275_v0, %v275_v0  ;;  %v254_v36 = vmul.f32 %v644_v14, %v231_v27  ;;  %433 = vrsqrt.f32 %v206_v30 }
 0x148   :  { %v424_v38 = vpop.eup %423  ;;  %v395_v39 = vpack.c.bf16 %v276_v32, %v276_v32  ;;  %v255_v1 = vmul.f32 %v644_v14, %v232_v33  ;;  %v207_v40 = vadd.f32 1e-05, %v191_v34 }
 0x149   :  { %v426_v41 = vpop.eup %425  ;;  %356 = vst.msk [vmem:[%s766_s3 + $0x14] sm:$0xf] %vm350_vm1, %v394_v20  ;;  %v277_v42 = vadd.f32 %v650_v26, %v254_v36  ;;  %v233_v10 = vmul.f32 %v424_v38, %v595_v11 }
 0x14a   :  { %357 = vst.msk [vmem:[%s766_s3 + $0x18] sm:$0xf] %vm350_vm1, %v395_v39  ;;  %v278_v43 = vadd.f32 %v650_v26, %v255_v1  ;;  %v234_v46 = vmul.f32 %v426_v41, %v604_v23  ;;  %435 = vrsqrt.f32 %v207_v40 }
 0x14b   :  { %v396_v24 = vpack.c.bf16 %v277_v42, %v277_v42  ;;  %v256_v48 = vmul.f32 %v644_v14, %v233_v10 }
 0x14c   :  { %v428_v49 = vpop.eup %427  ;;  %v397_v50 = vpack.c.bf16 %v278_v43, %v278_v43  ;;  %v257_v51 = vmul.f32 %v644_v14, %v234_v46 }
 0x14d   :  { %v430_v52 = vpop.eup %429  ;;  %358 = vst.msk [vmem:[%s766_s3 + $0x1c] sm:$0xf] %vm350_vm1, %v396_v24  ;;  %v279_v11 = vadd.f32 %v650_v26, %v256_v48  ;;  %v235_v37 = vmul.f32 %v428_v49, %v607_v17 }
 0x14e   :  { %359 = vst.msk [vmem:[%s766_s3 + $0x20] sm:$0xf] %vm350_vm1, %v397_v50  ;;  %v280_v23 = vadd.f32 %v650_v26, %v257_v51  ;;  %v236_v44 = vmul.f32 %v430_v52, %v616_v35 }
 0x14f   :  { %v398_v28 = vpack.c.bf16 %v279_v11, %v279_v11  ;;  %v258_v29 = vmul.f32 %v644_v14, %v235_v37 }
 0x150   :  { %v432_v53 = vpop.eup %431  ;;  %v399_v56 = vpack.c.bf16 %v280_v23, %v280_v23  ;;  %v259_v57 = vmul.f32 %v644_v14, %v236_v44 }
 0x151   :  { %v434_v58 = vpop.eup %433  ;;  %360 = vst.msk [vmem:[%s766_s3 + $0x24] sm:$0xf] %vm350_vm1, %v398_v28  ;;  %v281_v17 = vadd.f32 %v650_v26, %v258_v29  ;;  %v237_v59 = vmul.f32 %v432_v53, %v619_v21 }
 0x152   :  { %361 = vst.msk [vmem:[%s766_s3 + $0x28] sm:$0xf] %vm350_vm1, %v399_v56  ;;  %v282_v35 = vadd.f32 %v650_v26, %v259_v57  ;;  %v238_v60 = vmul.f32 %v434_v58, %v628_v47 }
 0x153   :  { %v400_v61 = vpack.c.bf16 %v281_v17, %v281_v17  ;;  %v260_v62 = vmul.f32 %v644_v14, %v237_v59 }
 0x154   :  { %v436_v63 = vpop.eup %435  ;;  %v401_v2 = vpack.c.bf16 %v282_v35, %v282_v35  ;;  %v261_v3 = vmul.f32 %v644_v14, %v238_v60 }
 0x155   :  { %362 = vst.msk [vmem:[%s766_s3 + $0x2c] sm:$0xf] %vm350_vm1, %v400_v61  ;;  %v283_v21 = vadd.f32 %v650_v26, %v260_v62  ;;  %v239_v45 = vmul.f32 %v436_v63, %v631_v25 }
 0x156   :  { %363 = vst.msk [vmem:[%s766_s3 + $0x30] sm:$0xf] %vm350_vm1, %v401_v2  ;;  %v284_v47 = vadd.f32 %v650_v26, %v261_v3 }
 0x157   :  { %v402_v54 = vpack.c.bf16 %v283_v21, %v283_v21  ;;  %v262_v4 = vmul.f32 %v644_v14, %v239_v45 }
 0x158   :  { %v403_v5 = vpack.c.bf16 %v284_v47, %v284_v47 }
 0x159   :  { %364 = vst.msk [vmem:[%s766_s3 + $0x34] sm:$0xf] %vm350_vm1, %v402_v54  ;;  %v285_v6 = vadd.f32 %v650_v26, %v262_v4 }
 0x15a   :  { %365 = vst.msk [vmem:[%s766_s3 + $0x38] sm:$0xf] %vm350_vm1, %v403_v5 }
 0x15b   :  { %v404_v25 = vpack.c.bf16 %v285_v6, %v285_v6 }
 0x15d   :  { %366 = vst.msk [vmem:[%s766_s3 + $0x3c] sm:$0xf] %vm350_vm1, %v404_v25 }

// kernel: focalnet_forward.21
= control target key start
LH: loop header
LB: loop body
LE: loop exit
PB: predicated region body
PF: predicated region fallthrough
CT: control target
= control target key end

     0   :  { %vm115_vm0 = vcmask 130048   ;;  %s493_s1 = inlined_call_operand.vmem [shape: bf16[16,128], index: 1, kind: input, shape index: {}]   ;;  %s494_s0 = inlined_call_operand.vmem [shape: bf16[128,16], index: 0, kind: input, shape index: {}]   ;;  %s495_s2 = inlined_call_operand.vmem [shape: f32[1,128], index: 2, kind: input, shape index: {}]   ;;  %s496_s3 = inlined_call_operand.vmem [shape: f32[128,128], index: 3, kind: output, shape index: {}]  }
   0x1   :  { %v378_v0 = vld [vmem:[%s493_s1] sm:$0xff]   ;;  %v381_v3 = vld [vmem:[%s494_s0 + $0x8] sm:$0xff]   ;;  %v383_v5 = vld [vmem:[%s494_s0 + $0x10] sm:$0xff]  }
   0x2   :  { %v379_v1 = vld [vmem:[%s494_s0] sm:$0xff]   ;;  %358 = vmatprep.subr.bf16.mxu0 %v378_v0  ;;  %376 = vmatprep.subr.bf16.mxu1 %v378_v0  ;;  %v382_v4 = vld [vmem:[%s494_s0 + $0x28] sm:$0xff]   ;;  %v384_v6 = vld [vmem:[%s494_s0 + $0x30] sm:$0xff]  }
   0x3   :  { %v380_v2 = vld [vmem:[%s494_s0 + $0x20] sm:$0xff]   ;;  %359 = vmatpush3.bf16.msra.mxu0 %v378_v0  ;;  %377 = vmatpush3.bf16.msra.mxu1 %v378_v0  ;;  %v385_v7 = vld [vmem:[%s494_s0 + $0x18] sm:$0xff]  }
   0x4   :  { %360 = vmatprep.mubr.msk.bf16.mxu0 %vm115_vm0, %v379_v1  ;;  %368 = vmatprep.mubr.msk.bf16.mxu1 %vm115_vm0, %v380_v2  ;;  %v386_v8 = vld [vmem:[%s494_s0 + $0x38] sm:$0xff]   ;;  %v348_v9 = vld [vmem:[%s495_s2] ss:$0 sm:$0xff] }
   0x6   :  { %361 = vmatmul.mubr.msk.bf16.vlgmr.msra.gmra.mrb[0].mxu0 %vm115_vm0, %v381_v3  ;;  %369 = vmatmul.mubr.msk.bf16.vlgmr.msra.gmra.mrb[0].mxu1 %vm115_vm0, %v382_v4 }
   0x7   :  { %364 = vmatprep.mubr.msk.bf16.mxu0 %vm115_vm0, %v383_v5  ;;  %372 = vmatprep.mubr.msk.bf16.mxu1 %vm115_vm0, %v384_v6 }
   0xe   :  { %365 = vmatmul.mubr.msk.bf16.gmra.mrb[4].mxu0 %vm115_vm0, %v385_v7  ;;  %373 = vmatmul.mubr.msk.bf16.gmra.mrb[4].mxu1 %vm115_vm0, %v386_v8 }
  0xd9   :  { %v362_v10 = vpop.f32.mrb[0].mxu0  ;;  %v370_v11 = vpop.f32.mrb[0].mxu1 }
  0xda   :  { %v297_v12 = vadd.f32 %v362_v10, %v348_v9  ;;  %v305_v13 = vadd.f32 %v370_v11, %v348_v9  ;;  %v174_v14 = vpop.f32.mrb[1].mxu0  ;;  %v206_v15 = vpop.f32.mrb[1].mxu1 }
  0xdb   :  { %v295_v16 = vadd.f32 %v348_v9, %v174_v14  ;;  %v303_v17 = vadd.f32 %v348_v9, %v206_v15  ;;  %v363_v18 = vpop.f32.mrb[2].mxu0  ;;  %v371_v19 = vpop.f32.mrb[2].mxu1 }
  0xdc   :  { %313 = vst [vmem:[%s496_s3 + $0x10] sm:$0xff] %v297_v12  ;;  %321 = vst [vmem:[%s496_s3 + $0x50] sm:$0xff] %v305_v13  ;;  %v298_v20 = vadd.f32 %v363_v18, %v348_v9  ;;  %v306_v21 = vadd.f32 %v371_v19, %v348_v9  ;;  %v177_v22 = vpop.f32.mrb[3].mxu0  ;;  %v209_v23 = vpop.f32.mrb[3].mxu1 }
  0xdd   :  { %311 = vst [vmem:[%s496_s3] sm:$0xff] %v295_v16  ;;  %319 = vst [vmem:[%s496_s3 + $0x40] sm:$0xff] %v303_v17  ;;  %v296_v24 = vadd.f32 %v348_v9, %v177_v22  ;;  %v304_v25 = vadd.f32 %v348_v9, %v209_v23 }
  0xde   :  { %314 = vst [vmem:[%s496_s3 + $0x18] sm:$0xff] %v298_v20  ;;  %322 = vst [vmem:[%s496_s3 + $0x58] sm:$0xff] %v306_v21 }
  0xdf   :  { %312 = vst [vmem:[%s496_s3 + $0x8] sm:$0xff] %v296_v24  ;;  %320 = vst [vmem:[%s496_s3 + $0x48] sm:$0xff] %v304_v25 }
  0xe1   :  { %v366_v26 = vpop.f32.mrb[4].mxu0  ;;  %v374_v27 = vpop.f32.mrb[4].mxu1 }
  0xe2   :  { %v301_v28 = vadd.f32 %v366_v26, %v348_v9  ;;  %v309_v29 = vadd.f32 %v374_v27, %v348_v9  ;;  %v190_v30 = vpop.f32.mrb[5].mxu0  ;;  %v222_v31 = vpop.f32.mrb[5].mxu1 }
  0xe3   :  { %v299_v32 = vadd.f32 %v348_v9, %v190_v30  ;;  %v307_v33 = vadd.f32 %v348_v9, %v222_v31  ;;  %v367_v34 = vpop.f32.mrb[6].mxu0  ;;  %v375_v35 = vpop.f32.mrb[6].mxu1 }
  0xe4   :  { %317 = vst [vmem:[%s496_s3 + $0x30] sm:$0xff] %v301_v28  ;;  %325 = vst [vmem:[%s496_s3 + $0x70] sm:$0xff] %v309_v29  ;;  %v302_v36 = vadd.f32 %v367_v34, %v348_v9  ;;  %v310_v37 = vadd.f32 %v375_v35, %v348_v9  ;;  %v193_v38 = vpop.f32.mrb[7].mxu0  ;;  %v225_v39 = vpop.f32.mrb[7].mxu1 }
  0xe5   :  { %315 = vst [vmem:[%s496_s3 + $0x20] sm:$0xff] %v299_v32  ;;  %323 = vst [vmem:[%s496_s3 + $0x60] sm:$0xff] %v307_v33  ;;  %v300_v40 = vadd.f32 %v348_v9, %v193_v38  ;;  %v308_v41 = vadd.f32 %v348_v9, %v225_v39 }
  0xe6   :  { %318 = vst [vmem:[%s496_s3 + $0x38] sm:$0xff] %v302_v36  ;;  %326 = vst [vmem:[%s496_s3 + $0x78] sm:$0xff] %v310_v37 }
  0xe7   :  { %316 = vst [vmem:[%s496_s3 + $0x28] sm:$0xff] %v300_v40  ;;  %324 = vst [vmem:[%s496_s3 + $0x68] sm:$0xff] %v308_v41 }

// kernel: focalnet_forward.25
= control target key start
LH: loop header
LB: loop body
LE: loop exit
PB: predicated region body
PF: predicated region fallthrough
CT: control target
= control target key end

     0   :  { %vm115_vm0 = vcmask 130048   ;;  %s921_s1 = inlined_call_operand.vmem [shape: bf16[16,128], index: 1, kind: input, shape index: {}]   ;;  %s922_s0 = inlined_call_operand.vmem [shape: bf16[128,16], index: 0, kind: input, shape index: {}]   ;;  %s923_s2 = inlined_call_operand.vmem [shape: f32[1,128], index: 2, kind: input, shape index: {}]   ;;  %s924_s3 = inlined_call_operand.vmem [shape: bf16[128,128], index: 3, kind: output, shape index: {}]  }
   0x1   :  { %v665_v0 = vld [vmem:[%s921_s1] sm:$0xff]   ;;  %v668_v3 = vld [vmem:[%s922_s0 + $0x8] sm:$0xff]   ;;  %v670_v5 = vld [vmem:[%s922_s0 + $0x10] sm:$0xff]  }
   0x2   :  { %v666_v1 = vld [vmem:[%s922_s0] sm:$0xff]   ;;  %645 = vmatprep.subr.bf16.mxu0 %v665_v0  ;;  %663 = vmatprep.subr.bf16.mxu1 %v665_v0  ;;  %v669_v4 = vld [vmem:[%s922_s0 + $0x28] sm:$0xff]   ;;  %v671_v6 = vld [vmem:[%s922_s0 + $0x30] sm:$0xff]  }
   0x3   :  { %v667_v2 = vld [vmem:[%s922_s0 + $0x20] sm:$0xff]   ;;  %646 = vmatpush3.bf16.msra.mxu0 %v665_v0  ;;  %664 = vmatpush3.bf16.msra.mxu1 %v665_v0  ;;  %v672_v7 = vld [vmem:[%s922_s0 + $0x18] sm:$0xff]  }
   0x4   :  { %647 = vmatprep.mubr.msk.bf16.mxu0 %vm115_vm0, %v666_v1  ;;  %655 = vmatprep.mubr.msk.bf16.mxu1 %vm115_vm0, %v667_v2  ;;  %v673_v8 = vld [vmem:[%s922_s0 + $0x38] sm:$0xff]   ;;  %v764_v9 = vld [vmem:[%s923_s2] ss:$0 sm:$0xff] }
   0x6   :  { %648 = vmatmul.mubr.msk.bf16.vlgmr.msra.gmra.mrb[0].mxu0 %vm115_vm0, %v668_v3  ;;  %656 = vmatmul.mubr.msk.bf16.vlgmr.msra.gmra.mrb[0].mxu1 %vm115_vm0, %v669_v4 }
   0x7   :  { %651 = vmatprep.mubr.msk.bf16.mxu0 %vm115_vm0, %v670_v5  ;;  %659 = vmatprep.mubr.msk.bf16.mxu1 %vm115_vm0, %v671_v6 }
   0xe   :  { %652 = vmatmul.mubr.msk.bf16.gmra.mrb[4].mxu0 %vm115_vm0, %v672_v7  ;;  %660 = vmatmul.mubr.msk.bf16.gmra.mrb[4].mxu1 %vm115_vm0, %v673_v8 }
  0xd9   :  { %v649_v10 = vpop.f32.mrb[0].mxu0  ;;  %v657_v11 = vpop.f32.mrb[0].mxu1 }
  0xda   :  { %v767_v12 = vadd.f32 %v649_v10, %v764_v9  ;;  %v770_v13 = vadd.f32 %v657_v11, %v764_v9  ;;  %v174_v14 = vpop.f32.mrb[1].mxu0  ;;  %v206_v15 = vpop.f32.mrb[1].mxu1 }
  0xdb   :  { %v773_v16 = vadd.f32 %v764_v9, %v174_v14  ;;  %v776_v17 = vadd.f32 %v764_v9, %v206_v15  ;;  %v650_v18 = vpop.f32.mrb[2].mxu0  ;;  %v658_v19 = vpop.f32.mrb[2].mxu1 }
  0xdc   :  { %v313_v20 = vmul.f32 %v767_v12, %v767_v12  ;;  %v321_v21 = vmul.f32 %v770_v13, %v770_v13  ;;  %v783_v22 = vadd.f32 %v650_v18, %v764_v9  ;;  %v786_v23 = vadd.f32 %v658_v19, %v764_v9  ;;  %v177_v24 = vpop.f32.mrb[3].mxu0  ;;  %v209_v25 = vpop.f32.mrb[3].mxu1 }
  0xdd   :  { %v311_v26 = vmul.f32 %v773_v16, %v773_v16  ;;  %v319_v27 = vmul.f32 %v776_v17, %v776_v17  ;;  %v793_v28 = vadd.f32 %v764_v9, %v177_v24  ;;  %v796_v29 = vadd.f32 %v764_v9, %v209_v25 }
  0xde   :  { %v329_v30 = vmul.f32 %v313_v20, %v767_v12  ;;  %v337_v31 = vmul.f32 %v321_v21, %v770_v13  ;;  %v314_v32 = vmul.f32 %v783_v22, %v783_v22  ;;  %v322_v33 = vmul.f32 %v786_v23, %v786_v23 }
  0xdf   :  { %v327_v34 = vmul.f32 %v311_v26, %v773_v16  ;;  %v335_v35 = vmul.f32 %v319_v27, %v776_v17  ;;  %v312_v36 = vmul.f32 %v793_v28, %v793_v28  ;;  %v320_v37 = vmul.f32 %v796_v29, %v796_v29 }
  0xe0   :  { %v345_v38 = vmul.f32 0.044715, %v329_v30  ;;  %v353_v39 = vmul.f32 0.044715, %v337_v31  ;;  %v330_v40 = vmul.f32 %v314_v32, %v783_v22  ;;  %v338_v41 = vmul.f32 %v322_v33, %v786_v23 }
  0xe1   :  { %v343_v42 = vmul.f32 0.044715, %v327_v34  ;;  %v351_v43 = vmul.f32 0.044715, %v335_v35  ;;  %v328_v44 = vmul.f32 %v312_v36, %v793_v28  ;;  %v336_v45 = vmul.f32 %v320_v37, %v796_v29  ;;  %v653_v46 = vpop.f32.mrb[4].mxu0  ;;  %v661_v47 = vpop.f32.mrb[4].mxu1 }
  0xe2   :  { %v361_v48 = vadd.f32 %v345_v38, %v767_v12  ;;  %v369_v49 = vadd.f32 %v353_v39, %v770_v13  ;;  %v346_v50 = vmul.f32 0.044715, %v330_v40  ;;  %v354_v51 = vmul.f32 0.044715, %v338_v41  ;;  %v190_v52 = vpop.f32.mrb[5].mxu0  ;;  %v222_v53 = vpop.f32.mrb[5].mxu1 }
  0xe3   :  { %v359_v54 = vadd.f32 %v343_v42, %v773_v16  ;;  %v367_v55 = vadd.f32 %v351_v43, %v776_v17  ;;  %v344_v56 = vmul.f32 0.044715, %v328_v44  ;;  %v352_v57 = vmul.f32 0.044715, %v336_v45  ;;  %v654_v58 = vpop.f32.mrb[6].mxu0  ;;  %v662_v59 = vpop.f32.mrb[6].mxu1 }
  0xe4   :  { %v377_v60 = vmul.f32 0.7978846, %v361_v48  ;;  %v385_v61 = vmul.f32 0.7978846, %v369_v49  ;;  %v362_v62 = vadd.f32 %v346_v50, %v783_v22  ;;  %v370_v63 = vadd.f32 %v354_v51, %v786_v23  ;;  %v193_v0 = vpop.f32.mrb[7].mxu0  ;;  %v820_v1 = vpop.f32.mrb[7].mxu1 }
  0xe5   :  { %v375_v2 = vmul.f32 0.7978846, %v359_v54  ;;  %v383_v3 = vmul.f32 0.7978846, %v367_v55  ;;  %v360_v4 = vadd.f32 %v344_v56, %v793_v28  ;;  %v368_v5 = vadd.f32 %v352_v57, %v796_v29 }
  0xe6   :  { %674 = vtanh.f32 %v377_v60  ;;  %v378_v6 = vmul.f32 0.7978846, %v362_v62  ;;  %v386_v7 = vmul.f32 0.7978846, %v370_v63  ;;  %v825_v8 = vadd.f32 %v653_v46, %v764_v9 }
  0xe7   :  { %676 = vtanh.f32 %v385_v61  ;;  %v376_v10 = vmul.f32 0.7978846, %v360_v4  ;;  %v384_v11 = vmul.f32 0.7978846, %v368_v5  ;;  %v828_v14 = vadd.f32 %v661_v47, %v764_v9 }
  0xe8   :  { %678 = vtanh.f32 %v375_v2  ;;  %v317_v15 = vmul.f32 %v825_v8, %v825_v8  ;;  %v833_v18 = vadd.f32 %v764_v9, %v190_v52  ;;  %v836_v19 = vadd.f32 %v764_v9, %v222_v53 }
  0xe9   :  { %680 = vtanh.f32 %v383_v3  ;;  %v325_v20 = vmul.f32 %v828_v14, %v828_v14  ;;  %v841_v21 = vadd.f32 %v654_v58, %v764_v9  ;;  %v844_v24 = vadd.f32 %v662_v59, %v764_v9 }
  0xea   :  { %682 = vtanh.f32 %v378_v6  ;;  %v333_v25 = vmul.f32 %v317_v15, %v825_v8  ;;  %v315_v26 = vmul.f32 %v833_v18, %v833_v18  ;;  %v323_v27 = vmul.f32 %v836_v19, %v836_v19 }
  0xeb   :  { %684 = vtanh.f32 %v386_v7  ;;  %v341_v30 = vmul.f32 %v325_v20, %v828_v14  ;;  %v318_v31 = vmul.f32 %v841_v21, %v841_v21  ;;  %v326_v32 = vmul.f32 %v844_v24, %v844_v24 }
  0xec   :  { %686 = vtanh.f32 %v376_v10  ;;  %v349_v33 = vmul.f32 0.044715, %v333_v25  ;;  %v331_v34 = vmul.f32 %v315_v26, %v833_v18  ;;  %v339_v35 = vmul.f32 %v323_v27, %v836_v19 }
  0xed   :  { %688 = vtanh.f32 %v384_v11  ;;  %v357_v36 = vmul.f32 0.044715, %v341_v30  ;;  %v334_v37 = vmul.f32 %v318_v31, %v841_v21  ;;  %v342_v38 = vmul.f32 %v326_v32, %v844_v24 }
  0xee   :  { %v365_v39 = vadd.f32 %v349_v33, %v825_v8  ;;  %v347_v40 = vmul.f32 0.044715, %v331_v34  ;;  %v355_v41 = vmul.f32 0.044715, %v339_v35  ;;  %v864_v48 = vadd.f32 %v764_v9, %v193_v0 }
  0xef   :  { %v373_v42 = vadd.f32 %v357_v36, %v828_v14  ;;  %v350_v43 = vmul.f32 0.044715, %v334_v37  ;;  %v358_v44 = vmul.f32 0.044715, %v342_v38  ;;  %v873_v5 = vadd.f32 %v764_v9, %v820_v1 }
  0xf0   :  { %v675_v45 = vpop.eup %674  ;;  %v381_v46 = vmul.f32 0.7978846, %v365_v39  ;;  %v363_v47 = vadd.f32 %v347_v40, %v833_v18  ;;  %v371_v57 = vadd.f32 %v355_v41, %v836_v19  ;;  %v316_v0 = vmul.f32 %v864_v48, %v864_v48 }
  0xf1   :  { %v677_v49 = vpop.eup %676  ;;  %v409_v50 = vadd.f32 1.0, %v675_v45  ;;  %v389_v51 = vmul.f32 0.7978846, %v373_v42  ;;  %v366_v52 = vadd.f32 %v350_v43, %v841_v21  ;;  %v374_v53 = vadd.f32 %v358_v44, %v844_v24 }
  0xf2   :  { %v679_v54 = vpop.eup %678  ;;  %v417_v55 = vadd.f32 1.0, %v677_v49  ;;  %690 = vtanh.f32 %v381_v46  ;;  %v379_v56 = vmul.f32 0.7978846, %v363_v47  ;;  %v387_v11 = vmul.f32 0.7978846, %v371_v57 }
  0xf3   :  { %v681_v58 = vpop.eup %680  ;;  %v407_v59 = vadd.f32 1.0, %v679_v54  ;;  %692 = vtanh.f32 %v389_v51  ;;  %v382_v60 = vmul.f32 0.7978846, %v366_v52  ;;  %v390_v63 = vmul.f32 0.7978846, %v374_v53 }
  0xf4   :  { %v683_v61 = vpop.eup %682  ;;  %v415_v62 = vadd.f32 1.0, %v681_v58  ;;  %v425_v3 = vmul.f32 0.5, %v409_v50  ;;  %694 = vtanh.f32 %v379_v56  ;;  %v433_v7 = vmul.f32 0.5, %v417_v55 }
  0xf5   :  { %v685_v2 = vpop.eup %684  ;;  %v410_v4 = vadd.f32 1.0, %v683_v61  ;;  %696 = vtanh.f32 %v382_v60  ;;  %v423_v20 = vmul.f32 0.5, %v407_v59  ;;  %v332_v32 = vmul.f32 %v316_v0, %v864_v48 }
  0xf6   :  { %v687_v6 = vpop.eup %686  ;;  %v418_v10 = vadd.f32 1.0, %v685_v2  ;;  %698 = vtanh.f32 %v390_v63  ;;  %v431_v27 = vmul.f32 0.5, %v415_v62  ;;  %v441_v33 = vmul.f32 %v425_v3, %v767_v12 }
  0xf7   :  { %v689_v15 = vpop.eup %688  ;;  %v426_v25 = vmul.f32 0.5, %v410_v4  ;;  %v408_v26 = vadd.f32 1.0, %v687_v6  ;;  %v324_v34 = vmul.f32 %v873_v5, %v873_v5  ;;  %v449_v35 = vmul.f32 %v433_v7, %v770_v13 }
  0xf8   :  { %v434_v30 = vmul.f32 0.5, %v418_v10  ;;  %v416_v31 = vadd.f32 1.0, %v689_v15  ;;  %v348_v38 = vmul.f32 0.044715, %v332_v32  ;;  %v439_v39 = vmul.f32 %v423_v20, %v773_v16 }
  0xf9   :  { %v442_v9 = vmul.f32 %v426_v25, %v783_v22  ;;  %v424_v1 = vmul.f32 0.5, %v408_v26  ;;  %v340_v42 = vmul.f32 %v324_v34, %v873_v5  ;;  %v447_v22 = vmul.f32 %v431_v27, %v776_v17 }
  0xfa   :  { %v450_v36 = vmul.f32 %v434_v30, %v786_v23  ;;  %v432_v37 = vmul.f32 0.5, %v416_v31  ;;  %v364_v45 = vadd.f32 %v348_v38, %v864_v48  ;;  %700 = vtanh.f32 %v387_v11 }
  0xfb   :  { %v597_v40 = vpack.c.bf16 %v442_v9, %v441_v33  ;;  %v440_v41 = vmul.f32 %v424_v1, %v793_v28  ;;  %v356_v46 = vmul.f32 0.044715, %v340_v42 }
  0xfc   :  { %v691_v12 = vpop.eup %690  ;;  %v617_v43 = vpack.c.bf16 %v450_v36, %v449_v35  ;;  %v448_v44 = vmul.f32 %v432_v37, %v796_v29  ;;  %v380_v47 = vmul.f32 0.7978846, %v364_v45 }
  0xfd   :  { %v693_v13 = vpop.eup %692  ;;  %629 = vst [vmem:[%s924_s3 + $0x8] sm:$0xff] %v597_v40   ;;  %v592_v23 = vpack.c.bf16 %v440_v41, %v439_v39  ;;  %v413_v16 = vadd.f32 1.0, %v691_v12  ;;  %v372_v29 = vadd.f32 %v356_v46, %v873_v5 }
  0xfe   :  { %633 = vst [vmem:[%s924_s3 + $0x28] sm:$0xff] %v617_v43   ;;  %v612_v28 = vpack.c.bf16 %v448_v44, %v447_v22  ;;  %v421_v17 = vadd.f32 1.0, %v693_v13  ;;  %v695_v49 = vpop.eup %694  ;;  %702 = vtanh.f32 %v380_v47 }
  0xff   :  { %593 = vst [vmem:[%s924_s3] sm:$0xff] %v592_v23   ;;  %v697_v50 = vpop.eup %696  ;;  %v429_v52 = vmul.f32 0.5, %v413_v16  ;;  %v388_v54 = vmul.f32 0.7978846, %v372_v29  ;;  %v411_v0 = vadd.f32 1.0, %v695_v49 }
 0x100   :  { %632 = vst [vmem:[%s924_s3 + $0x20] sm:$0xff] %v612_v28   ;;  %v699_v51 = vpop.eup %698  ;;  %v414_v53 = vadd.f32 1.0, %v697_v50  ;;  %v437_v55 = vmul.f32 0.5, %v421_v17 }
 0x101   :  { %v422_v56 = vadd.f32 1.0, %v699_v51  ;;  %704 = vtanh.f32 %v388_v54  ;;  %v445_v59 = vmul.f32 %v429_v52, %v825_v8  ;;  %v427_v8 = vmul.f32 0.5, %v411_v0 }
 0x102   :  { %v430_v57 = vmul.f32 0.5, %v414_v53  ;;  %v453_v61 = vmul.f32 %v437_v55, %v828_v14 }
 0x103   :  { %v438_v58 = vmul.f32 0.5, %v422_v56  ;;  %v443_v11 = vmul.f32 %v427_v8, %v833_v18 }
 0x104   :  { %v446_v60 = vmul.f32 %v430_v57, %v841_v21  ;;  %v701_v63 = vpop.eup %700 }
 0x105   :  { %v454_v62 = vmul.f32 %v438_v58, %v844_v24  ;;  %v419_v6 = vadd.f32 1.0, %v701_v63 }
 0x106   :  { %v607_v2 = vpack.c.bf16 %v446_v60, %v445_v59 }
 0x107   :  { %v627_v3 = vpack.c.bf16 %v454_v62, %v453_v61  ;;  %v435_v10 = vmul.f32 0.5, %v419_v6 }
 0x108   :  { %631 = vst [vmem:[%s924_s3 + $0x18] sm:$0xff] %v607_v2   ;;  %v703_v4 = vpop.eup %702 }
 0x109   :  { %635 = vst [vmem:[%s924_s3 + $0x38] sm:$0xff] %v627_v3   ;;  %v412_v21 = vadd.f32 1.0, %v703_v4  ;;  %v451_v26 = vmul.f32 %v435_v10, %v836_v19 }
 0x10b   :  { %v705_v7 = vpop.eup %704  ;;  %v428_v14 = vmul.f32 0.5, %v412_v21 }
 0x10c   :  { %v420_v24 = vadd.f32 1.0, %v705_v7 }
 0x10d   :  { %v444_v15 = vmul.f32 %v428_v14, %v864_v48 }
 0x10e   :  { %v436_v20 = vmul.f32 0.5, %v420_v24 }
 0x10f   :  { %v602_v25 = vpack.c.bf16 %v444_v15, %v443_v11 }
 0x110   :  { %v452_v27 = vmul.f32 %v436_v20, %v873_v5 }
 0x111   :  { %630 = vst [vmem:[%s924_s3 + $0x10] sm:$0xff] %v602_v25  }
 0x112   :  { %v622_v30 = vpack.c.bf16 %v452_v27, %v451_v26 }
 0x114   :  { %634 = vst [vmem:[%s924_s3 + $0x30] sm:$0xff] %v622_v30  }

// kernel: focalnet_forward.26
= control target key start
LH: loop header
LB: loop body
LE: loop exit
PB: predicated region body
PF: predicated region fallthrough
CT: control target
= control target key end

     0   :  { %s692_s1 = inlined_call_operand.vmem [shape: bf16[128,128], index: 1, kind: input, shape index: {}]   ;;  %s693_s0 = inlined_call_operand.vmem [shape: bf16[128,128], index: 0, kind: input, shape index: {}]   ;;  %s694_s2 = inlined_call_operand.vmem [shape: f32[1,128], index: 2, kind: input, shape index: {}]   ;;  %s695_s3 = inlined_call_operand.vmem [shape: f32[128,128], index: 3, kind: input, shape index: {}]   ;;  %s696_s4 = inlined_call_operand.vmem [shape: f32[128,128], index: 4, kind: output, shape index: {}]  }
   0x1   :  { %v486_v0 = vld [vmem:[%s692_s1] sm:$0xff]   ;;  %v487_v1 = vld [vmem:[%s692_s1 + $0x8] sm:$0xff]   ;;  %v488_v2 = vld [vmem:[%s692_s1 + $0x10] sm:$0xff]  }
   0x2   :  { %438 = vmatprep.subr.bf16.mxu0 %v486_v0  ;;  %470 = vmatprep.subr.bf16.mxu1 %v486_v0  ;;  %v489_v3 = vld [vmem:[%s692_s1 + $0x18] sm:$0xff]   ;;  %v494_v4 = vld [vmem:[%s693_s0] sm:$0xff]   ;;  %v491_v7 = vld [vmem:[%s692_s1 + $0x28] sm:$0xff]  }
   0x3   :  { %439 = vmatpush3.bf16.msra.mxu0 %v486_v0  ;;  %478 = vmatpush3.bf16.msra.mxu1 %v486_v0  ;;  %v495_v5 = vld [vmem:[%s693_s0 + $0x20] sm:$0xff]   ;;  %v492_v8 = vld [vmem:[%s692_s1 + $0x30] sm:$0xff]   ;;  %v493_v9 = vld [vmem:[%s692_s1 + $0x38] sm:$0xff]  }
   0x4   :  { %440 = vmatprep.subr.bf16.mxu0 %v487_v1  ;;  %471 = vmatprep.subr.bf16.mxu1 %v487_v1  ;;  %v490_v6 = vld [vmem:[%s692_s1 + $0x20] sm:$0xff]   ;;  %v496_v10 = vld [vmem:[%s693_s0 + $0x8] sm:$0xff]   ;;  %v498_v12 = vld [vmem:[%s693_s0 + $0x10] sm:$0xff]  }
   0x5   :  { %454 = vmatprep.mubr.bf16.mxu0 %v494_v4  ;;  %462 = vmatprep.mubr.bf16.mxu1 %v495_v5  ;;  %v497_v11 = vld [vmem:[%s693_s0 + $0x28] sm:$0xff]   ;;  %v499_v13 = vld [vmem:[%s693_s0 + $0x30] sm:$0xff]   ;;  %v500_v14 = vld [vmem:[%s693_s0 + $0x18] sm:$0xff]  }
   0x6   :  { %v501_v15 = vld [vmem:[%s693_s0 + $0x38] sm:$0xff]   ;;  %v578_v16 = vld [vmem:[%s694_s2] ss:$0 sm:$0xff]  ;;  %v355_v18 = vld [vmem:[%s695_s3 + $0x10] sm:$0xff] }
   0x7   :  { %441 = vmatpush3.bf16.msra.mxu0 %v487_v1  ;;  %479 = vmatpush3.bf16.msra.mxu1 %v487_v1  ;;  %v363_v20 = vld [vmem:[%s695_s3 + $0x50] sm:$0xff]  ;;  %v353_v24 = vld [vmem:[%s695_s3] sm:$0xff]  ;;  %v356_v30 = vld [vmem:[%s695_s3 + $0x18] sm:$0xff] }
   0x8   :  { %442 = vmatprep.subr.bf16.mxu0 %v488_v2  ;;  %472 = vmatprep.subr.bf16.mxu1 %v488_v2  ;;  %v361_v26 = vld [vmem:[%s695_s3 + $0x40] sm:$0xff]  ;;  %v364_v32 = vld [vmem:[%s695_s3 + $0x58] sm:$0xff]  ;;  %v354_v38 = vld [vmem:[%s695_s3 + $0x8] sm:$0xff] }
   0x9   :  { %v362_v40 = vld [vmem:[%s695_s3 + $0x48] sm:$0xff]  ;;  %v359_v50 = vld [vmem:[%s695_s3 + $0x30] sm:$0xff]  ;;  %v357_v56 = vld [vmem:[%s695_s3 + $0x20] sm:$0xff] }
   0xa   :  { %v367_v52 = vld [vmem:[%s695_s3 + $0x70] sm:$0xff]  ;;  %v365_v58 = vld [vmem:[%s695_s3 + $0x60] sm:$0xff]  ;;  %v360_v62 = vld [vmem:[%s695_s3 + $0x38] sm:$0xff] }
   0xb   :  { %443 = vmatpush3.bf16.msra.mxu0 %v488_v2  ;;  %480 = vmatpush3.bf16.msra.mxu1 %v488_v2  ;;  %v368_v0 = vld [vmem:[%s695_s3 + $0x78] sm:$0xff] }
   0xc   :  { %444 = vmatprep.subr.bf16.mxu0 %v489_v3  ;;  %473 = vmatprep.subr.bf16.mxu1 %v489_v3 }
   0xf   :  { %445 = vmatpush3.bf16.msra.mxu0 %v489_v3  ;;  %481 = vmatpush3.bf16.msra.mxu1 %v489_v3 }
  0x10   :  { %446 = vmatprep.subr.bf16.mxu0 %v490_v6  ;;  %474 = vmatprep.subr.bf16.mxu1 %v490_v6 }
  0x13   :  { %447 = vmatpush3.bf16.msra.mxu0 %v490_v6  ;;  %482 = vmatpush3.bf16.msra.mxu1 %v490_v6  ;;  %v358_v6 = vld [vmem:[%s695_s3 + $0x28] sm:$0xff] }
  0x14   :  { %448 = vmatprep.subr.bf16.mxu0 %v491_v7  ;;  %475 = vmatprep.subr.bf16.mxu1 %v491_v7 }
  0x17   :  { %449 = vmatpush3.bf16.msra.mxu0 %v491_v7  ;;  %483 = vmatpush3.bf16.msra.mxu1 %v491_v7 }
  0x18   :  { %450 = vmatprep.subr.bf16.mxu0 %v492_v8  ;;  %476 = vmatprep.subr.bf16.mxu1 %v492_v8 }
  0x1b   :  { %451 = vmatpush3.bf16.msra.mxu0 %v492_v8  ;;  %484 = vmatpush3.bf16.msra.mxu1 %v492_v8  ;;  %v366_v8 = vld [vmem:[%s695_s3 + $0x68] sm:$0xff] }
  0x1c   :  { %452 = vmatprep.subr.bf16.mxu0 %v493_v9  ;;  %477 = vmatprep.subr.bf16.mxu1 %v493_v9 }
  0x1f   :  { %453 = vmatpush3.bf16.msra.mxu0 %v493_v9  ;;  %485 = vmatpush3.bf16.msra.mxu1 %v493_v9 }
  0x22   :  { %455 = vmatmul.mubr.bf16.vlgmr.msra.gmra.mrb[0].mxu0 %v496_v10  ;;  %463 = vmatmul.mubr.bf16.vlgmr.msra.gmra.mrb[0].mxu1 %v497_v11 }
  0x23   :  { %458 = vmatprep.mubr.bf16.mxu0 %v498_v12  ;;  %466 = vmatprep.mubr.bf16.mxu1 %v499_v13 }
  0x2a   :  { %459 = vmatmul.mubr.bf16.gmra.mrb[4].mxu0 %v500_v14  ;;  %467 = vmatmul.mubr.bf16.gmra.mrb[4].mxu1 %v501_v15 }
  0xf5   :  { %v456_v17 = vpop.f32.mrb[0].mxu0  ;;  %v464_v19 = vpop.f32.mrb[0].mxu1 }
  0xf6   :  { %v339_v21 = vadd.f32 %v456_v17, %v578_v16  ;;  %v347_v22 = vadd.f32 %v464_v19, %v578_v16  ;;  %v216_v23 = vpop.f32.mrb[1].mxu0  ;;  %v248_v25 = vpop.f32.mrb[1].mxu1 }
  0xf7   :  { %v337_v27 = vadd.f32 %v578_v16, %v216_v23  ;;  %v345_v28 = vadd.f32 %v578_v16, %v248_v25  ;;  %v457_v29 = vpop.f32.mrb[2].mxu0  ;;  %v465_v31 = vpop.f32.mrb[2].mxu1 }
  0xf8   :  { %v371_v33 = vadd.f32 %v355_v18, %v339_v21  ;;  %v379_v34 = vadd.f32 %v363_v20, %v347_v22  ;;  %v340_v35 = vadd.f32 %v457_v29, %v578_v16  ;;  %v348_v36 = vadd.f32 %v465_v31, %v578_v16  ;;  %v219_v37 = vpop.f32.mrb[3].mxu0  ;;  %v251_v39 = vpop.f32.mrb[3].mxu1 }
  0xf9   :  { %v369_v41 = vadd.f32 %v353_v24, %v337_v27  ;;  %v377_v42 = vadd.f32 %v361_v26, %v345_v28  ;;  %v338_v43 = vadd.f32 %v578_v16, %v219_v37  ;;  %v346_v44 = vadd.f32 %v578_v16, %v251_v39 }
  0xfa   :  { %387 = vst [vmem:[%s696_s4 + $0x10] sm:$0xff] %v371_v33  ;;  %395 = vst [vmem:[%s696_s4 + $0x50] sm:$0xff] %v379_v34  ;;  %v372_v45 = vadd.f32 %v356_v30, %v340_v35  ;;  %v380_v46 = vadd.f32 %v364_v32, %v348_v36 }
  0xfb   :  { %385 = vst [vmem:[%s696_s4] sm:$0xff] %v369_v41  ;;  %393 = vst [vmem:[%s696_s4 + $0x40] sm:$0xff] %v377_v42  ;;  %v370_v47 = vadd.f32 %v354_v38, %v338_v43  ;;  %v378_v48 = vadd.f32 %v362_v40, %v346_v44 }
  0xfc   :  { %388 = vst [vmem:[%s696_s4 + $0x18] sm:$0xff] %v372_v45  ;;  %396 = vst [vmem:[%s696_s4 + $0x58] sm:$0xff] %v380_v46 }
  0xfd   :  { %386 = vst [vmem:[%s696_s4 + $0x8] sm:$0xff] %v370_v47  ;;  %394 = vst [vmem:[%s696_s4 + $0x48] sm:$0xff] %v378_v48  ;;  %v460_v49 = vpop.f32.mrb[4].mxu0  ;;  %v468_v51 = vpop.f32.mrb[4].mxu1 }
  0xfe   :  { %v343_v53 = vadd.f32 %v460_v49, %v578_v16  ;;  %v351_v54 = vadd.f32 %v468_v51, %v578_v16  ;;  %v232_v55 = vpop.f32.mrb[5].mxu0  ;;  %v264_v57 = vpop.f32.mrb[5].mxu1 }
  0xff   :  { %v341_v59 = vadd.f32 %v578_v16, %v232_v55  ;;  %v349_v60 = vadd.f32 %v578_v16, %v264_v57  ;;  %v461_v61 = vpop.f32.mrb[6].mxu0  ;;  %v469_v63 = vpop.f32.mrb[6].mxu1 }
 0x100   :  { %v375_v1 = vadd.f32 %v359_v50, %v343_v53  ;;  %v383_v2 = vadd.f32 %v367_v52, %v351_v54  ;;  %v344_v3 = vadd.f32 %v461_v61, %v578_v16  ;;  %v352_v4 = vadd.f32 %v469_v63, %v578_v16  ;;  %v235_v5 = vpop.f32.mrb[7].mxu0  ;;  %v267_v7 = vpop.f32.mrb[7].mxu1 }
 0x101   :  { %v373_v9 = vadd.f32 %v357_v56, %v341_v59  ;;  %v381_v10 = vadd.f32 %v365_v58, %v349_v60  ;;  %v342_v11 = vadd.f32 %v578_v16, %v235_v5  ;;  %v350_v12 = vadd.f32 %v578_v16, %v267_v7 }
 0x102   :  { %391 = vst [vmem:[%s696_s4 + $0x30] sm:$0xff] %v375_v1  ;;  %399 = vst [vmem:[%s696_s4 + $0x70] sm:$0xff] %v383_v2  ;;  %v376_v13 = vadd.f32 %v360_v62, %v344_v3  ;;  %v384_v14 = vadd.f32 %v368_v0, %v352_v4 }
 0x103   :  { %389 = vst [vmem:[%s696_s4 + $0x20] sm:$0xff] %v373_v9  ;;  %397 = vst [vmem:[%s696_s4 + $0x60] sm:$0xff] %v381_v10  ;;  %v374_v15 = vadd.f32 %v358_v6, %v342_v11  ;;  %v382_v16 = vadd.f32 %v366_v8, %v350_v12 }
 0x104   :  { %392 = vst [vmem:[%s696_s4 + $0x38] sm:$0xff] %v376_v13  ;;  %400 = vst [vmem:[%s696_s4 + $0x78] sm:$0xff] %v384_v14 }
 0x105   :  { %390 = vst [vmem:[%s696_s4 + $0x28] sm:$0xff] %v374_v15  ;;  %398 = vst [vmem:[%s696_s4 + $0x68] sm:$0xff] %v382_v16 }

// kernel: focalnet_forward.23
= control target key start
LH: loop header
LB: loop body
LE: loop exit
PB: predicated region body
PF: predicated region fallthrough
CT: control target
= control target key end

     0   :  { %vm118_vm0 = vcmask 130048   ;;  %s599_s1 = inlined_call_operand.vmem [shape: bf16[16,128], index: 1, kind: input, shape index: {}]   ;;  %s600_s0 = inlined_call_operand.vmem [shape: bf16[128,16], index: 0, kind: input, shape index: {}]   ;;  %s601_s2 = inlined_call_operand.vmem [shape: f32[1,128], index: 2, kind: input, shape index: {}]   ;;  %s602_s3 = inlined_call_operand.vmem [shape: f32[128,128], index: 3, kind: input, shape index: {}]   ;;  %s603_s4 = inlined_call_operand.vmem [shape: f32[128,128], index: 4, kind: output, shape index: {}]  }
   0x1   :  { %v413_v0 = vld [vmem:[%s599_s1] sm:$0xff]   ;;  %v416_v3 = vld [vmem:[%s600_s0 + $0x8] sm:$0xff]   ;;  %v418_v5 = vld [vmem:[%s600_s0 + $0x10] sm:$0xff]  }
   0x2   :  { %v414_v1 = vld [vmem:[%s600_s0] sm:$0xff]   ;;  %393 = vmatprep.subr.bf16.mxu0 %v413_v0  ;;  %411 = vmatprep.subr.bf16.mxu1 %v413_v0  ;;  %v417_v4 = vld [vmem:[%s600_s0 + $0x28] sm:$0xff]   ;;  %v419_v6 = vld [vmem:[%s600_s0 + $0x30] sm:$0xff]  }
   0x3   :  { %v415_v2 = vld [vmem:[%s600_s0 + $0x20] sm:$0xff]   ;;  %394 = vmatpush3.bf16.msra.mxu0 %v413_v0  ;;  %412 = vmatpush3.bf16.msra.mxu1 %v413_v0  ;;  %v420_v7 = vld [vmem:[%s600_s0 + $0x18] sm:$0xff]   ;;  %v316_v11 = vld [vmem:[%s602_s3 + $0x10] sm:$0xff] }
   0x4   :  { %395 = vmatprep.mubr.msk.bf16.mxu0 %vm118_vm0, %v414_v1  ;;  %403 = vmatprep.mubr.msk.bf16.mxu1 %vm118_vm0, %v415_v2  ;;  %v421_v8 = vld [vmem:[%s600_s0 + $0x38] sm:$0xff]   ;;  %v485_v9 = vld [vmem:[%s601_s2] ss:$0 sm:$0xff]  ;;  %v324_v13 = vld [vmem:[%s602_s3 + $0x50] sm:$0xff] }
   0x5   :  { %v314_v17 = vld [vmem:[%s602_s3] sm:$0xff]  ;;  %v317_v23 = vld [vmem:[%s602_s3 + $0x18] sm:$0xff]  ;;  %v315_v31 = vld [vmem:[%s602_s3 + $0x8] sm:$0xff] }
   0x6   :  { %396 = vmatmul.mubr.msk.bf16.vlgmr.msra.gmra.mrb[0].mxu0 %vm118_vm0, %v416_v3  ;;  %404 = vmatmul.mubr.msk.bf16.vlgmr.msra.gmra.mrb[0].mxu1 %vm118_vm0, %v417_v4  ;;  %v322_v19 = vld [vmem:[%s602_s3 + $0x40] sm:$0xff]  ;;  %v325_v25 = vld [vmem:[%s602_s3 + $0x58] sm:$0xff]  ;;  %v323_v33 = vld [vmem:[%s602_s3 + $0x48] sm:$0xff] }
   0x7   :  { %399 = vmatprep.mubr.msk.bf16.mxu0 %vm118_vm0, %v418_v5  ;;  %407 = vmatprep.mubr.msk.bf16.mxu1 %vm118_vm0, %v419_v6  ;;  %v320_v43 = vld [vmem:[%s602_s3 + $0x30] sm:$0xff]  ;;  %v318_v49 = vld [vmem:[%s602_s3 + $0x20] sm:$0xff]  ;;  %v321_v55 = vld [vmem:[%s602_s3 + $0x38] sm:$0xff] }
   0x8   :  { %v328_v45 = vld [vmem:[%s602_s3 + $0x70] sm:$0xff]  ;;  %v326_v51 = vld [vmem:[%s602_s3 + $0x60] sm:$0xff]  ;;  %v329_v57 = vld [vmem:[%s602_s3 + $0x78] sm:$0xff] }
   0x9   :  { %v319_v63 = vld [vmem:[%s602_s3 + $0x28] sm:$0xff] }
   0xa   :  { %v327_v1 = vld [vmem:[%s602_s3 + $0x68] sm:$0xff] }
   0xe   :  { %400 = vmatmul.mubr.msk.bf16.gmra.mrb[4].mxu0 %vm118_vm0, %v420_v7  ;;  %408 = vmatmul.mubr.msk.bf16.gmra.mrb[4].mxu1 %vm118_vm0, %v421_v8 }
  0xd9   :  { %v397_v10 = vpop.f32.mrb[0].mxu0  ;;  %v405_v12 = vpop.f32.mrb[0].mxu1 }
  0xda   :  { %v300_v14 = vadd.f32 %v397_v10, %v485_v9  ;;  %v308_v15 = vadd.f32 %v405_v12, %v485_v9  ;;  %v177_v16 = vpop.f32.mrb[1].mxu0  ;;  %v209_v18 = vpop.f32.mrb[1].mxu1 }
  0xdb   :  { %v298_v20 = vadd.f32 %v485_v9, %v177_v16  ;;  %v306_v21 = vadd.f32 %v485_v9, %v209_v18  ;;  %v398_v22 = vpop.f32.mrb[2].mxu0  ;;  %v406_v24 = vpop.f32.mrb[2].mxu1 }
  0xdc   :  { %v332_v26 = vadd.f32 %v316_v11, %v300_v14  ;;  %v340_v27 = vadd.f32 %v324_v13, %v308_v15  ;;  %v301_v28 = vadd.f32 %v398_v22, %v485_v9  ;;  %v309_v29 = vadd.f32 %v406_v24, %v485_v9  ;;  %v180_v30 = vpop.f32.mrb[3].mxu0  ;;  %v212_v32 = vpop.f32.mrb[3].mxu1 }
  0xdd   :  { %v330_v34 = vadd.f32 %v314_v17, %v298_v20  ;;  %v338_v35 = vadd.f32 %v322_v19, %v306_v21  ;;  %v299_v36 = vadd.f32 %v485_v9, %v180_v30  ;;  %v307_v37 = vadd.f32 %v485_v9, %v212_v32 }
  0xde   :  { %348 = vst [vmem:[%s603_s4 + $0x10] sm:$0xff] %v332_v26  ;;  %356 = vst [vmem:[%s603_s4 + $0x50] sm:$0xff] %v340_v27  ;;  %v333_v38 = vadd.f32 %v317_v23, %v301_v28  ;;  %v341_v39 = vadd.f32 %v325_v25, %v309_v29 }
  0xdf   :  { %346 = vst [vmem:[%s603_s4] sm:$0xff] %v330_v34  ;;  %354 = vst [vmem:[%s603_s4 + $0x40] sm:$0xff] %v338_v35  ;;  %v331_v40 = vadd.f32 %v315_v31, %v299_v36  ;;  %v339_v41 = vadd.f32 %v323_v33, %v307_v37 }
  0xe0   :  { %349 = vst [vmem:[%s603_s4 + $0x18] sm:$0xff] %v333_v38  ;;  %357 = vst [vmem:[%s603_s4 + $0x58] sm:$0xff] %v341_v39 }
  0xe1   :  { %347 = vst [vmem:[%s603_s4 + $0x8] sm:$0xff] %v331_v40  ;;  %355 = vst [vmem:[%s603_s4 + $0x48] sm:$0xff] %v339_v41  ;;  %v401_v42 = vpop.f32.mrb[4].mxu0  ;;  %v409_v44 = vpop.f32.mrb[4].mxu1 }
  0xe2   :  { %v304_v46 = vadd.f32 %v401_v42, %v485_v9  ;;  %v312_v47 = vadd.f32 %v409_v44, %v485_v9  ;;  %v193_v48 = vpop.f32.mrb[5].mxu0  ;;  %v225_v50 = vpop.f32.mrb[5].mxu1 }
  0xe3   :  { %v302_v52 = vadd.f32 %v485_v9, %v193_v48  ;;  %v310_v53 = vadd.f32 %v485_v9, %v225_v50  ;;  %v402_v54 = vpop.f32.mrb[6].mxu0  ;;  %v410_v56 = vpop.f32.mrb[6].mxu1 }
  0xe4   :  { %v336_v58 = vadd.f32 %v320_v43, %v304_v46  ;;  %v344_v59 = vadd.f32 %v328_v45, %v312_v47  ;;  %v305_v60 = vadd.f32 %v402_v54, %v485_v9  ;;  %v313_v61 = vadd.f32 %v410_v56, %v485_v9  ;;  %v196_v62 = vpop.f32.mrb[7].mxu0  ;;  %v228_v0 = vpop.f32.mrb[7].mxu1 }
  0xe5   :  { %v334_v2 = vadd.f32 %v318_v49, %v302_v52  ;;  %v342_v3 = vadd.f32 %v326_v51, %v310_v53  ;;  %v303_v4 = vadd.f32 %v485_v9, %v196_v62  ;;  %v311_v5 = vadd.f32 %v485_v9, %v228_v0 }
  0xe6   :  { %352 = vst [vmem:[%s603_s4 + $0x30] sm:$0xff] %v336_v58  ;;  %360 = vst [vmem:[%s603_s4 + $0x70] sm:$0xff] %v344_v59  ;;  %v337_v6 = vadd.f32 %v321_v55, %v305_v60  ;;  %v345_v7 = vadd.f32 %v329_v57, %v313_v61 }
  0xe7   :  { %350 = vst [vmem:[%s603_s4 + $0x20] sm:$0xff] %v334_v2  ;;  %358 = vst [vmem:[%s603_s4 + $0x60] sm:$0xff] %v342_v3  ;;  %v335_v8 = vadd.f32 %v319_v63, %v303_v4  ;;  %v343_v9 = vadd.f32 %v327_v1, %v311_v5 }
  0xe8   :  { %353 = vst [vmem:[%s603_s4 + $0x38] sm:$0xff] %v337_v6  ;;  %361 = vst [vmem:[%s603_s4 + $0x78] sm:$0xff] %v345_v7 }
  0xe9   :  { %351 = vst [vmem:[%s603_s4 + $0x28] sm:$0xff] %v335_v8  ;;  %359 = vst [vmem:[%s603_s4 + $0x68] sm:$0xff] %v343_v9 }

// kernel: focalnet_forward.27
= control target key start
LH: loop header
LB: loop body
LE: loop exit
PB: predicated region body
PF: predicated region fallthrough
CT: control target
= control target key end

     0   :  { %vm73_vm0 = vcmask 523264   ;;  %s249_s1 = inlined_call_operand.vmem [shape: bf16[64,128], index: 1, kind: input, shape index: {}]   ;;  %s250_s0 = inlined_call_operand.vmem [shape: bf16[32,64], index: 0, kind: input, shape index: {}]   ;;  %s251_s2 = inlined_call_operand.vmem [shape: f32[1,128], index: 2, kind: input, shape index: {}]   ;;  %s252_s3 = inlined_call_operand.vmem [shape: f32[32,128], index: 3, kind: output, shape index: {}]  }
   0x1   :  { %v190_v0 = vld [vmem:[%s249_s1] sm:$0xff]   ;;  %v191_v1 = vld [vmem:[%s249_s1 + $0x8] sm:$0xff]   ;;  %v192_v2 = vld [vmem:[%s249_s1 + $0x10] sm:$0xff]  }
   0x2   :  { %178 = vmatprep.subr.bf16.mxu0 %v190_v0  ;;  %v194_v3 = vld [vmem:[%s250_s0] sm:$0xff]   ;;  %v193_v4 = vld [vmem:[%s249_s1 + $0x18] sm:$0xff]   ;;  %v195_v5 = vld [vmem:[%s250_s0 + $0x8] sm:$0xff]  }
   0x3   :  { %179 = vmatpush3.bf16.msra.mxu0 %v190_v0  ;;  %186 = vmatprep.mubr.msk.bf16.mxu0 %vm73_vm0, %v194_v3  ;;  %v171_v6 = vld [vmem:[%s251_s2] ss:$0 sm:$0xff] }
   0x4   :  { %180 = vmatprep.subr.bf16.mxu0 %v191_v1 }
   0x7   :  { %181 = vmatpush3.bf16.msra.mxu0 %v191_v1 }
   0x8   :  { %182 = vmatprep.subr.bf16.mxu0 %v192_v2 }
   0xb   :  { %183 = vmatpush3.bf16.msra.mxu0 %v192_v2 }
   0xc   :  { %184 = vmatprep.subr.bf16.mxu0 %v193_v4 }
   0xf   :  { %185 = vmatpush3.bf16.msra.mxu0 %v193_v4 }
  0x12   :  { %187 = vmatmul.mubr.msk.bf16.vlgmr.msra.gmra.mrb[0].mxu0 %vm73_vm0, %v195_v5 }
  0xe5   :  { %v188_v7 = vpop.f32.mrb[0].mxu0 }
  0xe6   :  { %v153_v8 = vadd.f32 %v188_v7, %v171_v6  ;;  %v114_v9 = vpop.f32.mrb[1].mxu0 }
  0xe7   :  { %v151_v10 = vadd.f32 %v171_v6, %v114_v9  ;;  %v189_v11 = vpop.f32.mrb[2].mxu0 }
  0xe8   :  { %157 = vst [vmem:[%s252_s3 + $0x10] sm:$0xff] %v153_v8  ;;  %v154_v12 = vadd.f32 %v189_v11, %v171_v6  ;;  %v117_v13 = vpop.f32.mrb[3].mxu0 }
  0xe9   :  { %155 = vst [vmem:[%s252_s3] sm:$0xff] %v151_v10  ;;  %v152_v14 = vadd.f32 %v171_v6, %v117_v13 }
  0xea   :  { %158 = vst [vmem:[%s252_s3 + $0x18] sm:$0xff] %v154_v12 }
  0xeb   :  { %156 = vst [vmem:[%s252_s3 + $0x8] sm:$0xff] %v152_v14 }

// kernel: focalnet_forward.29
= control target key start
LH: loop header
LB: loop body
LE: loop exit
PB: predicated region body
PF: predicated region fallthrough
CT: control target
= control target key end

     0   :  { %vm18_vm0 = vcmask 261120   ;;  %vm110_vm1 = vcmask 257024   ;;  %s199_s0 = inlined_call_operand.vmem [shape: f32[32,32], index: 0, kind: input, shape index: {}]   ;;  %s200_s1 = inlined_call_operand.vmem [shape: f32[1,32], index: 1, kind: input, shape index: {}]   ;;  %s201_s2 = inlined_call_operand.vmem [shape: f32[1,32], index: 2, kind: input, shape index: {}]   ;;  %s202_s3 = inlined_call_operand.vmem [shape: bf16[32,32], index: 3, kind: output, shape index: {}]  }
   0x1   :  { %v14_v0 = vld [vmem:[%s199_s0] sm:$0xff]  ;;  %v16_v1 = vld [vmem:[%s199_s0 + $0x10] sm:$0xff]  ;;  %v15_v2 = vld [vmem:[%s199_s0 + $0x8] sm:$0xff] }
   0x2   :  { %v19_v3 = vsel %vm18_vm0, %v14_v0, 0.0  ;;  %v25_v4 = vsel %vm18_vm0, %v16_v1, 0.0  ;;  %v17_v5 = vld [vmem:[%s199_s0 + $0x18] sm:$0xff]  ;;  %v22_v6 = vsel %vm18_vm0, %v15_v2, 0.0  ;;  %v119_v41 = vld [vmem:[%s200_s1] ss:$0 sm:$0xff] }
   0x3   :  { %20 = vadd.xlane.f32.xlu0 %v19_v3  ;;  %26 = vadd.xlane.f32.xlu1 %v25_v4  ;;  %v28_v7 = vsel %vm18_vm0, %v17_v5, 0.0  ;;  %v120_v43 = vld [vmem:[%s201_s2] ss:$0 sm:$0xff] }
   0x7   :  { %23 = vadd.xlane.f32.xlu0 %v22_v6  ;;  %29 = vadd.xlane.f32.xlu1 %v28_v7 }
  0x90   :  { %v21_v8 = vpop.xlane.xlu0 %20  ;;  %v27_v9 = vpop.xlane.xlu1 %26 }
  0x91   :  { %v32_v10 = vmul.f32 0.03125, %v21_v8  ;;  %v34_v11 = vmul.f32 0.03125, %v27_v9 }
  0x93   :  { %v36_v12 = vsub.f32 %v14_v0, %v32_v10  ;;  %v38_v13 = vsub.f32 %v16_v1, %v34_v11 }
  0x94   :  { %v24_v14 = vpop.xlane.xlu0 %23  ;;  %v30_v15 = vpop.xlane.xlu1 %29 }
  0x95   :  { %v33_v16 = vmul.f32 0.03125, %v24_v14  ;;  %v35_v17 = vmul.f32 0.03125, %v30_v15  ;;  %v40_v18 = vmul.f32 %v36_v12, %v36_v12  ;;  %v42_v19 = vmul.f32 %v38_v13, %v38_v13 }
  0x97   :  { %v37_v20 = vsub.f32 %v15_v2, %v33_v16  ;;  %v39_v21 = vsub.f32 %v17_v5, %v35_v17  ;;  %v44_v22 = vsel %vm18_vm0, %v40_v18, 0.0  ;;  %v50_v23 = vsel %vm18_vm0, %v42_v19, 0.0 }
  0x98   :  { %45 = vadd.xlane.f32.xlu0 %v44_v22 }
  0x99   :  { %v41_v24 = vmul.f32 %v37_v20, %v37_v20  ;;  %v43_v25 = vmul.f32 %v39_v21, %v39_v21 }
  0x9b   :  { %v47_v26 = vsel %vm18_vm0, %v41_v24, 0.0  ;;  %v53_v27 = vsel %vm18_vm0, %v43_v25, 0.0 }
  0x9c   :  { %51 = vadd.xlane.f32.xlu0 %v50_v23  ;;  %48 = vadd.xlane.f32.xlu1 %v47_v26 }
  0xa0   :  { %54 = vadd.xlane.f32.xlu1 %v53_v27 }
 0x125   :  { %v46_v28 = vpop.xlane.xlu0 %45 }
 0x126   :  { %v56_v29 = vmul.f32 0.03125, %v46_v28 }
 0x128   :  { %v60_v30 = vadd.f32 1e-05, %v56_v29 }
 0x129   :  { %v49_v31 = vpop.xlane.xlu1 %48  ;;  %v52_v32 = vpop.xlane.xlu0 %51 }
 0x12a   :  { %129 = vrsqrt.f32 %v60_v30  ;;  %v57_v33 = vmul.f32 0.03125, %v49_v31  ;;  %v58_v34 = vmul.f32 0.03125, %v52_v32 }
 0x12c   :  { %v61_v35 = vadd.f32 1e-05, %v57_v33  ;;  %v62_v36 = vadd.f32 1e-05, %v58_v34 }
 0x12d   :  { %v55_v37 = vpop.xlane.xlu1 %54 }
 0x12e   :  { %131 = vrsqrt.f32 %v61_v35  ;;  %v59_v38 = vmul.f32 0.03125, %v55_v37 }
 0x12f   :  { %133 = vrsqrt.f32 %v62_v36 }
 0x130   :  { %v63_v39 = vadd.f32 1e-05, %v59_v38 }
 0x132   :  { %135 = vrsqrt.f32 %v63_v39 }
 0x134   :  { %v130_v40 = vpop.eup %129 }
 0x135   :  { %v68_v42 = vmul.f32 %v130_v40, %v36_v12 }
 0x137   :  { %v79_v44 = vmul.f32 %v119_v41, %v68_v42 }
 0x138   :  { %v132_v45 = vpop.eup %131 }
 0x139   :  { %v134_v46 = vpop.eup %133  ;;  %v90_v47 = vadd.f32 %v120_v43, %v79_v44  ;;  %v69_v48 = vmul.f32 %v132_v45, %v37_v20 }
 0x13a   :  { %v70_v49 = vmul.f32 %v134_v46, %v38_v13 }
 0x13b   :  { %v125_v50 = vpack.c.bf16 %v90_v47, %v90_v47  ;;  %v80_v51 = vmul.f32 %v119_v41, %v69_v48 }
 0x13c   :  { %v136_v52 = vpop.eup %135  ;;  %v81_v53 = vmul.f32 %v119_v41, %v70_v49 }
 0x13d   :  { %111 = vst.msk [vmem:[%s202_s3] sm:$0xf] %vm110_vm1, %v125_v50  ;;  %v91_v54 = vadd.f32 %v120_v43, %v80_v51  ;;  %v71_v55 = vmul.f32 %v136_v52, %v39_v21 }
 0x13e   :  { %v92_v56 = vadd.f32 %v120_v43, %v81_v53 }
 0x13f   :  { %v126_v57 = vpack.c.bf16 %v91_v54, %v91_v54  ;;  %v82_v58 = vmul.f32 %v119_v41, %v71_v55 }
 0x140   :  { %v127_v59 = vpack.c.bf16 %v92_v56, %v92_v56 }
 0x141   :  { %112 = vst.msk [vmem:[%s202_s3 + $0x4] sm:$0xf] %vm110_vm1, %v126_v57  ;;  %v93_v60 = vadd.f32 %v120_v43, %v82_v58 }
 0x142   :  { %113 = vst.msk [vmem:[%s202_s3 + $0x8] sm:$0xf] %vm110_vm1, %v127_v59 }
 0x143   :  { %v128_v61 = vpack.c.bf16 %v93_v60, %v93_v60 }
 0x145   :  { %114 = vst.msk [vmem:[%s202_s3 + $0xc] sm:$0xf] %vm110_vm1, %v128_v61 }

// kernel: focalnet_forward.28
= control target key start
LH: loop header
LB: loop body
LE: loop exit
PB: predicated region body
PF: predicated region fallthrough
CT: control target
= control target key end

     0   :  { %vm18_vm0 = vcmask 261120   ;;  %s174_s0 = inlined_call_operand.vmem [shape: f32[32,32], index: 0, kind: input, shape index: {}]   ;;  %s175_s1 = inlined_call_operand.vmem [shape: f32[1,32], index: 1, kind: input, shape index: {}]   ;;  %s176_s2 = inlined_call_operand.vmem [shape: f32[1,32], index: 2, kind: input, shape index: {}]   ;;  %s177_s3 = inlined_call_operand.vmem [shape: f32[32,32], index: 3, kind: output, shape index: {}]  }
   0x1   :  { %v14_v0 = vld [vmem:[%s174_s0] sm:$0xff]  ;;  %v16_v1 = vld [vmem:[%s174_s0 + $0x10] sm:$0xff]  ;;  %v15_v2 = vld [vmem:[%s174_s0 + $0x8] sm:$0xff] }
   0x2   :  { %v19_v3 = vsel %vm18_vm0, %v14_v0, 0.0  ;;  %v25_v4 = vsel %vm18_vm0, %v16_v1, 0.0  ;;  %v17_v5 = vld [vmem:[%s174_s0 + $0x18] sm:$0xff]  ;;  %v22_v6 = vsel %vm18_vm0, %v15_v2, 0.0  ;;  %v102_v41 = vld [vmem:[%s175_s1] ss:$0 sm:$0xff] }
   0x3   :  { %20 = vadd.xlane.f32.xlu0 %v19_v3  ;;  %26 = vadd.xlane.f32.xlu1 %v25_v4  ;;  %v28_v7 = vsel %vm18_vm0, %v17_v5, 0.0  ;;  %v103_v43 = vld [vmem:[%s176_s2] ss:$0 sm:$0xff] }
   0x7   :  { %23 = vadd.xlane.f32.xlu0 %v22_v6  ;;  %29 = vadd.xlane.f32.xlu1 %v28_v7 }
  0x90   :  { %v21_v8 = vpop.xlane.xlu0 %20  ;;  %v27_v9 = vpop.xlane.xlu1 %26 }
  0x91   :  { %v32_v10 = vmul.f32 0.03125, %v21_v8  ;;  %v34_v11 = vmul.f32 0.03125, %v27_v9 }
  0x93   :  { %v36_v12 = vsub.f32 %v14_v0, %v32_v10  ;;  %v38_v13 = vsub.f32 %v16_v1, %v34_v11 }
  0x94   :  { %v24_v14 = vpop.xlane.xlu0 %23  ;;  %v30_v15 = vpop.xlane.xlu1 %29 }
  0x95   :  { %v33_v16 = vmul.f32 0.03125, %v24_v14  ;;  %v35_v17 = vmul.f32 0.03125, %v30_v15  ;;  %v40_v18 = vmul.f32 %v36_v12, %v36_v12  ;;  %v42_v19 = vmul.f32 %v38_v13, %v38_v13 }
  0x97   :  { %v37_v20 = vsub.f32 %v15_v2, %v33_v16  ;;  %v39_v21 = vsub.f32 %v17_v5, %v35_v17  ;;  %v44_v22 = vsel %vm18_vm0, %v40_v18, 0.0  ;;  %v50_v23 = vsel %vm18_vm0, %v42_v19, 0.0 }
  0x98   :  { %45 = vadd.xlane.f32.xlu0 %v44_v22 }
  0x99   :  { %v41_v24 = vmul.f32 %v37_v20, %v37_v20  ;;  %v43_v25 = vmul.f32 %v39_v21, %v39_v21 }
  0x9b   :  { %v47_v26 = vsel %vm18_vm0, %v41_v24, 0.0  ;;  %v53_v27 = vsel %vm18_vm0, %v43_v25, 0.0 }
  0x9c   :  { %51 = vadd.xlane.f32.xlu0 %v50_v23  ;;  %48 = vadd.xlane.f32.xlu1 %v47_v26 }
  0xa0   :  { %54 = vadd.xlane.f32.xlu1 %v53_v27 }
 0x125   :  { %v46_v28 = vpop.xlane.xlu0 %45 }
 0x126   :  { %v56_v29 = vmul.f32 0.03125, %v46_v28 }
 0x128   :  { %v60_v30 = vadd.f32 1e-05, %v56_v29 }
 0x129   :  { %v49_v31 = vpop.xlane.xlu1 %48  ;;  %v52_v32 = vpop.xlane.xlu0 %51 }
 0x12a   :  { %104 = vrsqrt.f32 %v60_v30  ;;  %v57_v33 = vmul.f32 0.03125, %v49_v31  ;;  %v58_v34 = vmul.f32 0.03125, %v52_v32 }
 0x12c   :  { %v61_v35 = vadd.f32 1e-05, %v57_v33  ;;  %v62_v36 = vadd.f32 1e-05, %v58_v34 }
 0x12d   :  { %v55_v37 = vpop.xlane.xlu1 %54 }
 0x12e   :  { %106 = vrsqrt.f32 %v61_v35  ;;  %v59_v38 = vmul.f32 0.03125, %v55_v37 }
 0x12f   :  { %108 = vrsqrt.f32 %v62_v36 }
 0x130   :  { %v63_v39 = vadd.f32 1e-05, %v59_v38 }
 0x132   :  { %110 = vrsqrt.f32 %v63_v39 }
 0x134   :  { %v105_v40 = vpop.eup %104 }
 0x135   :  { %v68_v42 = vmul.f32 %v105_v40, %v36_v12 }
 0x137   :  { %v79_v44 = vmul.f32 %v102_v41, %v68_v42 }
 0x138   :  { %v107_v45 = vpop.eup %106 }
 0x139   :  { %v109_v46 = vpop.eup %108  ;;  %v90_v47 = vadd.f32 %v103_v43, %v79_v44  ;;  %v69_v48 = vmul.f32 %v107_v45, %v37_v20 }
 0x13a   :  { %v70_v49 = vmul.f32 %v109_v46, %v38_v13 }
 0x13b   :  { %94 = vst.msk [vmem:[%s177_s3] sm:$0xff] %vm18_vm0, %v90_v47  ;;  %v80_v50 = vmul.f32 %v102_v41, %v69_v48 }
 0x13c   :  { %v111_v51 = vpop.eup %110  ;;  %v81_v52 = vmul.f32 %v102_v41, %v70_v49 }
 0x13d   :  { %v91_v53 = vadd.f32 %v103_v43, %v80_v50  ;;  %v71_v54 = vmul.f32 %v111_v51, %v39_v21 }
 0x13e   :  { %v92_v55 = vadd.f32 %v103_v43, %v81_v52 }
 0x13f   :  { %95 = vst.msk [vmem:[%s177_s3 + $0x8] sm:$0xff] %vm18_vm0, %v91_v53  ;;  %v82_v56 = vmul.f32 %v102_v41, %v71_v54 }
 0x140   :  { %96 = vst.msk [vmem:[%s177_s3 + $0x10] sm:$0xff] %vm18_vm0, %v92_v55 }
 0x141   :  { %v93_v57 = vadd.f32 %v103_v43, %v82_v56 }
 0x143   :  { %97 = vst.msk [vmem:[%s177_s3 + $0x18] sm:$0xff] %vm18_vm0, %v93_v57 }

// kernel: focalnet_forward.22
= control target key start
LH: loop header
LB: loop body
LE: loop exit
PB: predicated region body
PF: predicated region fallthrough
CT: control target
= control target key end

     0   :  { %s3618_s24 = smov 0   ;;  %s6066_s0 = inlined_call_operand.vmem [shape: f32[2,8,8,16], index: 0, kind: input, shape index: {}]   ;;  %s6067_s1 = inlined_call_operand.vmem [shape: f32[2,8,8,16], index: 1, kind: input, shape index: {}]   ;;  %s6068_s2 = inlined_call_operand.vmem [shape: f32[2,8,8,3], index: 2, kind: input, shape index: {}]   ;;  %s6069_s3 = inlined_call_operand.vmem [shape: f32[3,3,16], index: 3, kind: input, shape index: {}]   ;;  %s6070_s4 = inlined_call_operand.vmem [shape: f32[5,5,16], index: 4, kind: input, shape index: {}]   ;;  %s6071_s5 = inlined_call_operand.vmem [shape: bf16[16,16], index: 5, kind: input, shape index: {}]   ;;  %s6072_s6 = inlined_call_operand.vmem [shape: f32[1,16], index: 6, kind: input, shape index: {}]   ;;  %s6073_s7 = inlined_call_operand.vmem [shape: bf16[2,8,8,16], index: 7, kind: output, shape index: {}]  }
   0x1 LB: > { %s3430_s25 = sadd.s32 4294967295, %s3572_s24   ;;  %p3434_p0 = scmp.ge.s32.totalorder %s3572_s24, 1  ;;  %s3572_s24 = sphi %s3618_s24, %s17_s24  }
   0x2   : > { %p257_p1 = scmp.lt.s32.totalorder %s3572_s24, 3 }
   0x4   : > { %p258_p2 = pnand %p3434_p0, %p257_p1 }
   0x6   : > { %261 = sbr.rel (%p258_p2) target bundleno = 791 (0x317), region = 48 }
   0xd   : > { %p299_p3 = scmp.lt.s32.totalorder %s3430_s25, 1  ;;  %vm344_vm0 = vcmask 130048   ;;  %v3574_v0 = vmov 0   ;;  %vm356_vm1 = vcmask 123904   ;;  %v404_v1 = vlaneseq  ;;  %v401_v4 = vld [vmem:[%s6069_s3] sm:$0x7] }
   0xe   : > { %3485 = vset.pattern.permute.xlu1 %v3574_v0  ;;  %3484 = vset.pattern.permute.xlu0 %v3574_v0  ;;  %v3575_v2 = vmov 0.0   ;;  %vm346_vm2 = vcmask 125952   ;;  %v402_v11 = vld [vmem:[%s6069_s3 + $0x4] sm:$0x7]  ;;  %v403_v24 = vld [vmem:[%s6069_s3 + $0x8] sm:$0x7] }
   0xf   : > { %s6515_s25 = smov (!%p299_p3, %s3430_s25), 1  ;;  %360 = vst.msk [vmem:[#allocation2 + $0x50] sm:$0x3] %vm356_vm1, %v3575_v2  ;;  %361 = vst.msk [vmem:[#allocation2 + $0x60] sm:$0x3] %vm356_vm1, %v3575_v2  ;;  %v3650_v3 = vshrl.u32 %v404_v1, 7 }
  0x10   : > { %362 = vst.msk [vmem:[#allocation2 + $0x70] sm:$0x3] %vm356_vm1, %v3575_v2  ;;  %368 = vst.msk [vmem:[#allocation2 + $0x5a] sm:$0x3] %vm356_vm1, %v3575_v2  ;;  %s3653_s26 = sshll.u32 %s6515_s25, 6  ;;  %vm532_vm3 = vcmask 1046528  }
  0x11   : > { %369 = vst.msk [vmem:[#allocation2 + $0x6a] sm:$0x3] %vm356_vm1, %v3575_v2  ;;  %370 = vst.msk [vmem:[#allocation2 + $0x7a] sm:$0x3] %vm356_vm1, %v3575_v2  ;;  %s3663_s29 = scalar_lea.vmem %s6068_s2, %s3653_s26  ;;  %v3669_v5 = vsub.s32 1, %v3650_v3  ;;  %v3672_v6 = vsub.s32 2, %v3650_v3  ;;  %s3685_s11 = scalar_lea.vmem %s6067_s1, %s3653_s26 }
  0x12   : > { %345 = vst.msk [vmem:[#allocation2] sm:$0xff] %vm344_vm0, %v3575_v2  ;;  %348 = vst.msk [vmem:[#allocation2 + $0x10] sm:$0xff] %vm344_vm0, %v3575_v2  ;;  %v3675_v7 = vld [vmem:[%s3663_s29 + $0x20] sm:$0xff]  ;;  %v3689_v9 = vld [vmem:[%s3663_s29 + $0x28] sm:$0xff]  ;;  %v3698_v12 = vsub.s32 0, %v3650_v3  ;;  %vm809_vm4 = vcmask 1045504   ;;  %s303_s10 = scalar_lea.vmem %s6066_s0, %s3653_s26 }
  0x13   : > { %351 = vst.msk [vmem:[#allocation2 + $0xa0] sm:$0xff] %vm344_vm0, %v3575_v2  ;;  %353 = vst.msk [vmem:[#allocation2 + $0xb0] sm:$0xff] %vm344_vm0, %v3575_v2  ;;  %v3678_v8 = vld [vmem:[%s3663_s29] sm:$0xff]  ;;  %1212 = vperm.xlu1 %3485, %v3675_v7   ;;  %v3692_v10 = vld [vmem:[%s3663_s29 + $0x8] sm:$0xff]  ;;  %v3701_v13 = vrot.slane %v401_v4, %v3669_v5  ;;  %v3704_v14 = vrot.slane %v401_v4, %v3672_v6  ;;  %v3752_v36 = vrot.slane %v402_v11, %v3669_v5  ;;  %v3576_v39 = vmov 1   ;;  %s3454_s13 = sshll.u32 %s6515_s25, 5 }
  0x14   : > { %357 = vst.msk [vmem:[#allocation2 + $0x20] sm:$0x3] %vm356_vm1, %v3575_v2  ;;  %358 = vst.msk [vmem:[#allocation2 + $0x30] sm:$0x3] %vm356_vm1, %v3575_v2  ;;  %1196 = vperm.xlu0 %3484, %v3678_v8   ;;  %v331_v15 = vld [vmem:[%s3685_s11 + $0x18] sm:$0xff]  ;;  %v332_v16 = vld [vmem:[%s3685_s11 + $0x20] sm:$0xff]  ;;  %v3734_v28 = vrot.slane %v401_v4, %v3698_v12  ;;  %v3745_v33 = vrot.slane %v402_v11, %v3698_v12  ;;  %v3749_v35 = vrot.slane %v403_v24, %v3698_v12  ;;  %s6045_s15 = scalar_lea.vmem %s6073_s7, %s3454_s13 }
  0x15   : > { %359 = vst.msk [vmem:[#allocation2 + $0x40] sm:$0x3] %vm356_vm1, %v3575_v2  ;;  %363 = vst.msk [vmem:[#allocation2 + $0x80] sm:$0x3] %vm356_vm1, %v3575_v2  ;;  %v333_v17 = vld [vmem:[%s3685_s11 + $0x28] sm:$0xff]  ;;  %v328_v21 = vld [vmem:[%s3685_s11] sm:$0xff]  ;;  %v3759_v40 = vrot.slane %v403_v24, %v3669_v5  ;;  %v3762_v41 = vrot.slane %v402_v11, %v3672_v6  ;;  %v3765_v42 = vrot.slane %v403_v24, %v3672_v6 }
  0x16   : > { %364 = vst.msk [vmem:[#allocation2 + $0x90] sm:$0x3] %vm356_vm1, %v3575_v2  ;;  %365 = vst.msk [vmem:[#allocation2 + $0x2a] sm:$0x3] %vm356_vm1, %v3575_v2  ;;  %v329_v22 = vld [vmem:[%s3685_s11 + $0x8] sm:$0xff]  ;;  %v334_v23 = vld [vmem:[%s3685_s11 + $0x30] sm:$0xff] }
  0x17   : > { %366 = vst.msk [vmem:[#allocation2 + $0x3a] sm:$0x3] %vm356_vm1, %v3575_v2  ;;  %367 = vst.msk [vmem:[#allocation2 + $0x4a] sm:$0x3] %vm356_vm1, %v3575_v2  ;;  %1216 = vperm.xlu1 %3485, %v3689_v9   ;;  %v330_v26 = vld [vmem:[%s3685_s11 + $0x10] sm:$0xff]  ;;  %v3731_v27 = vld [vmem:[%s3663_s29 + $0x18] sm:$0xff] }
  0x18   : > { %371 = vst.msk [vmem:[#allocation2 + $0x8a] sm:$0x3] %vm356_vm1, %v3575_v2  ;;  %372 = vst.msk [vmem:[#allocation2 + $0x9a] sm:$0x3] %vm356_vm1, %v3575_v2  ;;  %1200 = vperm.xlu0 %3484, %v3692_v10   ;;  %v335_v32 = vld [vmem:[%s3685_s11 + $0x38] sm:$0xff]  ;;  %vm1258_vm5 = vcmask 130049  }
  0x19   : > { %349 = vst.msk [vmem:[#allocation2 + $0x18] sm:$0xf] %vm346_vm2, %v3575_v2  ;;  %347 = vst.msk [vmem:[#allocation2 + $0x8] sm:$0xf] %vm346_vm2, %v3575_v2  ;;  %v3710_v18 = vld [vmem:[#allocation2 + $0x10] sm:$0xff]  ;;  %vm1260_vm6 = vcmask 122880  }
  0x1a   : > { %352 = vst.msk [vmem:[#allocation2 + $0xa8] sm:$0xf] %vm346_vm2, %v3575_v2  ;;  %354 = vst.msk [vmem:[#allocation2 + $0xb8] sm:$0xf] %vm346_vm2, %v3575_v2  ;;  %v500_v19 = vmul.f32 %v3701_v13, %v3710_v18  ;;  %v777_v20 = vmul.f32 %v3704_v14, %v3710_v18  ;;  %v3774_v45 = vmul.f32 %v3734_v28, %v3710_v18  ;;  %vm2193_vm7 = vcmask 1044480  }
  0x1b   : > { %6242 = vst [vmem:[#allocation3_spill] sm:$0xff] %v3701_v13  ;;  %6243 = vst [vmem:[#allocation4_spill] sm:$0xff] %v3704_v14  ;;  %3486 = vset.pattern.permute.xlu1 %v3576_v39  ;;  %vm2574_vm8 = vcmask 1043456  }
  0x1c   : > { %376 = vst.msk [vmem:[#allocation2 + $0x52] sm:$0xff] %vm344_vm0, %v331_v15  ;;  %377 = vst.msk [vmem:[#allocation2 + $0x62] sm:$0xff] %vm344_vm0, %v332_v16  ;;  %v533_v30 = vrot.slane %v500_v19, 1  ;;  %v810_v34 = vrot.slane %v777_v20, 2  ;;  %1208 = vperm.xlu0 %3484, %v3731_v27   ;;  %2996 = vperm.xlu1 %3486, %v3692_v10  }
  0x1d   : > { %378 = vst.msk [vmem:[#allocation2 + $0x72] sm:$0xff] %vm344_vm0, %v333_v17  ;;  %373 = vst.msk [vmem:[#allocation2 + $0x22] sm:$0xff] %vm344_vm0, %v328_v21  ;;  %v3828_v21 = vld [vmem:[%s3663_s29 + $0x10] sm:$0xff] }
  0x1e   : > { %374 = vst.msk [vmem:[#allocation2 + $0x32] sm:$0xff] %vm344_vm0, %v329_v22  ;;  %379 = vst.msk [vmem:[#allocation2 + $0x82] sm:$0xff] %vm344_vm0, %v334_v23 }
  0x1f   : > { %6244 = vst [vmem:[#allocation5_spill] sm:$0xff] %v3734_v28  ;;  %375 = vst.msk [vmem:[#allocation2 + $0x42] sm:$0xff] %vm344_vm0, %v330_v26 }
  0x20   : > { %v382_v25 = vld [vmem:[#allocation2 + $0x18] sm:$0xf]  ;;  %6245 = vst [vmem:[#allocation6_spill] sm:$0xff] %v3745_v33  ;;  %380 = vst.msk [vmem:[#allocation2 + $0x92] sm:$0xff] %vm344_vm0, %v335_v32  ;;  %3488 = vset.pattern.permute.xlu0 %v3576_v39  ;;  %3008 = vperm.xlu1 %3486, %v3675_v7  }
  0x21   : > { %v3737_v29 = vmul.f32 %v3701_v13, %v382_v25  ;;  %v3740_v31 = vmul.f32 %v3704_v14, %v382_v25  ;;  %6246 = vst [vmem:[#allocation7_spill] sm:$0xff] %v3749_v35  ;;  %6247 = vst [vmem:[#allocation8_spill] sm:$0xff] %v3752_v36  ;;  %v3777_v46 = vmul.f32 %v3734_v28, %v382_v25  ;;  %2992 = vperm.xlu0 %3488, %v3678_v8  }
  0x22   : > { %6248 = vst [vmem:[#allocation9_spill] sm:$0xff] %v3759_v40  ;;  %6249 = vst [vmem:[#allocation10_spill] sm:$0xff] %v3762_v41 }
  0x23   : > { %v534_v37 = vrot.slane %v3737_v29, 1  ;;  %v811_v38 = vrot.slane %v3740_v31, 2  ;;  %6250 = vst [vmem:[#allocation11_spill] sm:$0xff] %v3765_v42  ;;  %v3768_v43 = vld [vmem:[#allocation2 + $0x50] sm:$0xff]  ;;  %v3770_v44 = vld [vmem:[#allocation2 + $0x58] sm:$0xf] }
  0x24   : > { %v3789_v49 = vld [vmem:[#allocation2 + $0x60] sm:$0xff]  ;;  %v3791_v50 = vld [vmem:[#allocation2 + $0x68] sm:$0xf]  ;;  %v3793_v51 = vld [vmem:[#allocation2 + $0x70] sm:$0xff]  ;;  %v416_v52 = vmul.f32 %v3734_v28, %v3768_v43  ;;  %v417_v53 = vmul.f32 %v3734_v28, %v3770_v44  ;;  %v508_v54 = vmul.f32 %v3701_v13, %v3768_v43  ;;  %v509_v55 = vmul.f32 %v3701_v13, %v3770_v44  ;;  %3487 = vset.pattern.permute.xlu1 %v3574_v0 }
  0x25   : > { %v3782_v47 = vsel %vm532_vm3, %v533_v30, %v534_v37  ;;  %v3787_v48 = vsel %vm809_vm4, %v810_v34, %v811_v38  ;;  %v3803_v56 = vld [vmem:[#allocation2 + $0x78] sm:$0xf]  ;;  %v436_v57 = vmul.f32 %v3745_v33, %v3789_v49  ;;  %v437_v58 = vmul.f32 %v3745_v33, %v3791_v50  ;;  %3012 = vperm.xlu0 %3488, %v3689_v9  }
  0x26   : > { %v472_v59 = vmul.f32 %v3749_v35, %v3793_v51  ;;  %v601_v60 = vmul.f32 %v3752_v36, %v3789_v49  ;;  %v473_v61 = vmul.f32 %v3749_v35, %v3803_v56  ;;  %v545_v62 = vrot.slane %v508_v54, 1  ;;  %1204 = vperm.xlu1 %3487, %v3828_v21  }
  0x27   : > { %v546_v63 = vrot.slane %v509_v55, 1  ;;  %v602_v1 = vmul.f32 %v3752_v36, %v3791_v50  ;;  %v452_v2 = vadd.f32 %v436_v57, %v416_v52  ;;  %v453_v4 = vadd.f32 %v437_v58, %v417_v53  ;;  %v3839_v57 = vld [vmem:[#allocation2 + $0x20] sm:$0xff] }
  0x28   : > { %v637_v11 = vrot.slane %v601_v60, 1  ;;  %v693_v15 = vmul.f32 %v3759_v40, %v3793_v51  ;;  %v694_v19 = vmul.f32 %v3759_v40, %v3803_v56  ;;  %v785_v20 = vmul.f32 %v3704_v14, %v3768_v43 }
  0x29   : > { %v547_v16 = vsel %vm532_vm3, %v545_v62, %v546_v63  ;;  %v638_v17 = vrot.slane %v602_v1, 1  ;;  %v488_v22 = vadd.f32 %v472_v59, %v452_v2  ;;  %v489_v23 = vadd.f32 %v473_v61, %v453_v4  ;;  %v3847_v61 = vld [vmem:[#allocation2 + $0x30] sm:$0xff]  ;;  %3000 = vperm.xlu0 %3488, %v3828_v21  }
  0x2a   : > { %v729_v24 = vrot.slane %v693_v15, 1  ;;  %v786_v25 = vmul.f32 %v3704_v14, %v3770_v44  ;;  %v730_v30 = vrot.slane %v694_v19, 1  ;;  %v822_v32 = vrot.slane %v785_v20, 2  ;;  %v3850_v62 = vld [vmem:[%s3663_s29 + $0x30] sm:$0xff] }
  0x2b   : > { %v639_v26 = vsel %vm532_vm3, %v637_v11, %v638_v17  ;;  %v878_v34 = vmul.f32 %v3762_v41, %v3789_v49  ;;  %v581_v52 = vadd.f32 %v547_v16, %v488_v22  ;;  %v582_v53 = vadd.f32 %v546_v63, %v489_v23  ;;  %v3853_v11 = vld [vmem:[#allocation2 + $0x28] sm:$0xf]  ;;  %1220 = vperm.xlu1 %3487, %v3850_v62  }
  0x2c   : > { %v823_v54 = vrot.slane %v786_v25, 2  ;;  %v879_v55 = vmul.f32 %v3762_v41, %v3791_v50  ;;  %v731_v58 = vsel %vm532_vm3, %v729_v24, %v730_v30  ;;  %v970_v60 = vmul.f32 %v3765_v42, %v3793_v51  ;;  %v3861_v24 = vld [vmem:[#allocation2 + $0x38] sm:$0xf] }
  0x2d   : > { %v914_v59 = vrot.slane %v878_v34, 2  ;;  %v971_v0 = vmul.f32 %v3765_v42, %v3803_v56  ;;  %v673_v63 = vadd.f32 %v639_v26, %v581_v52  ;;  %v674_v1 = vadd.f32 %v638_v17, %v582_v53  ;;  %v3872_v53 = vld [vmem:[%s3663_s29 + $0x38] sm:$0xff] }
  0x2e   : > { %v824_v2 = vsel %vm809_vm4, %v822_v32, %v823_v54  ;;  %v915_v4 = vrot.slane %v879_v55, 2  ;;  %v1006_v15 = vrot.slane %v970_v60, 2  ;;  %v428_v19 = vmul.f32 %v3745_v33, %v3839_v57  ;;  %3020 = vperm.xlu0 %3488, %v3872_v53  }
  0x2f   : > { %v1007_v16 = vrot.slane %v971_v0, 2  ;;  %v429_v20 = vmul.f32 %v3745_v33, %v3853_v11  ;;  %v765_v22 = vadd.f32 %v731_v58, %v673_v63  ;;  %v766_v23 = vadd.f32 %v730_v30, %v674_v1  ;;  %1224 = vperm.xlu1 %3487, %v3872_v53  }
  0x30   : > { %v916_v17 = vsel %vm809_vm4, %v914_v59, %v915_v4  ;;  %v464_v25 = vmul.f32 %v3749_v35, %v3847_v61  ;;  %v444_v32 = vadd.f32 %v428_v19, %v3774_v45  ;;  %v465_v52 = vmul.f32 %v3749_v35, %v3861_v24 }
  0x31   : > { %v1008_v26 = vsel %vm809_vm4, %v1006_v15, %v1007_v16  ;;  %v445_v34 = vadd.f32 %v429_v20, %v3777_v46  ;;  %v858_v30 = vadd.f32 %v824_v2, %v765_v22  ;;  %v859_v55 = vadd.f32 %v823_v54, %v766_v23 }
  0x32   : > { %v593_v58 = vmul.f32 %v3752_v36, %v3839_v57  ;;  %v594_v59 = vmul.f32 %v3752_v36, %v3853_v11  ;;  %v480_v60 = vadd.f32 %v464_v25, %v444_v32  ;;  %v685_v45 = vmul.f32 %v3759_v40, %v3847_v61 }
  0x33   : > { %v481_v0 = vadd.f32 %v465_v52, %v445_v34  ;;  %v686_v46 = vmul.f32 %v3759_v40, %v3861_v24  ;;  %v950_v63 = vadd.f32 %v916_v17, %v858_v30  ;;  %v951_v1 = vadd.f32 %v915_v4, %v859_v55  ;;  %3489 = vset.pattern.permute.xlu1 %v3576_v39 }
  0x34   : > { %v625_v2 = vrot.slane %v593_v58, 1  ;;  %v626_v54 = vrot.slane %v594_v59, 1  ;;  %v573_v15 = vadd.f32 %v3782_v47, %v480_v60  ;;  %v717_v20 = vrot.slane %v685_v45, 1  ;;  %3004 = vperm.xlu1 %3489, %v3731_v27  }
  0x35   : > { %v574_v19 = vadd.f32 %v534_v37, %v481_v0  ;;  %v718_v22 = vrot.slane %v686_v46, 1  ;;  %v3887_v23 = vadd.f32 %v1008_v26, %v950_v63  ;;  %v3889_v25 = vadd.f32 %v1007_v16, %v951_v1 }
  0x36   : > { %v627_v32 = vsel %vm532_vm3, %v625_v2, %v626_v54  ;;  %v870_v4 = vmul.f32 %v3762_v41, %v3839_v57  ;;  %v871_v47 = vmul.f32 %v3762_v41, %v3853_v11  ;;  %v3577_v29 = vmov 2  }
  0x37   : > { %v665_v17 = vadd.f32 %v627_v32, %v573_v15  ;;  %v666_v34 = vadd.f32 %v626_v54, %v574_v19  ;;  %v719_v52 = vsel %vm532_vm3, %v717_v20, %v718_v22  ;;  %3491 = vset.pattern.permute.xlu0 %v3577_v29  ;;  %v1058_v37 = vmul.f32 %v3887_v23, %v3887_v23  ;;  %v3916_v54 = vld [vmem:[#allocation2 + $0x80] sm:$0xff] }
  0x38   : > { %v1059_v16 = vmul.f32 %v3889_v25, %v3889_v25  ;;  %v902_v26 = vrot.slane %v870_v4, 2  ;;  %v962_v30 = vmul.f32 %v3765_v42, %v3847_v61  ;;  %3108 = vperm.xlu0 %3491, %v3692_v10   ;;  %v903_v59 = vrot.slane %v871_v47, 2  ;;  %6251 = vst [vmem:[#allocation12_spill] sm:$0xff] %v3916_v54  ;;  %3016 = vperm.xlu1 %3489, %v3850_v62  }
  0x39   : > { %v757_v55 = vadd.f32 %v719_v52, %v665_v17  ;;  %v758_v58 = vadd.f32 %v718_v22, %v666_v34  ;;  %v963_v60 = vmul.f32 %v3765_v42, %v3861_v24  ;;  %v1074_v0 = vmul.f32 %v1058_v37, %v3887_v23  ;;  %v3929_v34 = vld [vmem:[#allocation2 + $0x88] sm:$0xf] }
  0x3a   : > { %v1075_v45 = vmul.f32 %v1059_v16, %v3889_v25  ;;  %v994_v46 = vrot.slane %v962_v30, 2  ;;  %v418_v63 = vmul.f32 %v3734_v28, %v3789_v49  ;;  %v904_v1 = vsel %vm809_vm4, %v902_v26, %v903_v59  ;;  %6252 = vst [vmem:[#allocation13_spill] sm:$0xff] %v3929_v34 }
  0x3b   : > { %v850_v39 = vadd.f32 %v3787_v48, %v757_v55  ;;  %v851_v10 = vadd.f32 %v811_v38, %v758_v58  ;;  %v995_v2 = vrot.slane %v963_v60, 2  ;;  %v1090_v15 = vmul.f32 0.044715, %v1074_v0 }
  0x3c   : > { %v1091_v19 = vmul.f32 0.044715, %v1075_v45  ;;  %v419_v20 = vmul.f32 %v3734_v28, %v3791_v50  ;;  %v438_v22 = vmul.f32 %v3745_v33, %v3793_v51  ;;  %3112 = vperm.xlu0 %3491, %v3828_v21   ;;  %v439_v38 = vmul.f32 %v3745_v33, %v3803_v56  ;;  %3490 = vset.pattern.permute.xlu1 %v3577_v29 }
  0x3d   : > { %v942_v32 = vadd.f32 %v904_v1, %v850_v39  ;;  %v943_v48 = vadd.f32 %v903_v59, %v851_v10  ;;  %v996_v31 = vsel %vm809_vm4, %v994_v46, %v995_v2  ;;  %v1106_v4 = vadd.f32 %v1090_v15, %v3887_v23  ;;  %3104 = vperm.xlu1 %3490, %v3678_v8  }
  0x3e   : > { %v1107_v17 = vadd.f32 %v1091_v19, %v3889_v25  ;;  %v454_v52 = vadd.f32 %v438_v22, %v418_v63  ;;  %v474_v47 = vmul.f32 %v3749_v35, %v3916_v54  ;;  %v455_v16 = vadd.f32 %v439_v38, %v419_v20 }
  0x3f   : > { %v3933_v21 = vadd.f32 %v996_v31, %v942_v32  ;;  %v3935_v37 = vadd.f32 %v995_v2, %v943_v48  ;;  %v475_v26 = vmul.f32 %v3749_v35, %v3929_v34  ;;  %v1122_v30 = vmul.f32 0.7978846, %v1106_v4 }
  0x40   : > { %v1123_v55 = vmul.f32 0.7978846, %v1107_v17  ;;  %v490_v58 = vadd.f32 %v474_v47, %v454_v52  ;;  %v510_v59 = vmul.f32 %v3701_v13, %v3789_v49  ;;  %3128 = vperm.xlu0 %3491, %v3850_v62   ;;  %v511_v46 = vmul.f32 %v3701_v13, %v3791_v50 }
  0x41   : > { %v1050_v60 = vmul.f32 %v3933_v21, %v3933_v21  ;;  %v1051_v0 = vmul.f32 %v3935_v37, %v3935_v37  ;;  %v491_v45 = vadd.f32 %v475_v26, %v455_v16  ;;  %3493 = vtanh.f32 %v1122_v30  ;;  %3120 = vperm.xlu1 %3490, %v3675_v7  }
  0x42   : > { %v548_v63 = vrot.slane %v510_v59, 1  ;;  %v603_v39 = vmul.f32 %v3752_v36, %v3793_v51  ;;  %v604_v10 = vmul.f32 %v3752_v36, %v3803_v56  ;;  %3495 = vtanh.f32 %v1123_v55 }
  0x43   : > { %v1066_v62 = vmul.f32 %v1050_v60, %v3933_v21  ;;  %v1067_v1 = vmul.f32 %v1051_v0, %v3935_v37  ;;  %v549_v2 = vrot.slane %v511_v46, 1  ;;  %v695_v29 = vmul.f32 %v3759_v40, %v3916_v54 }
  0x44   : > { %v640_v15 = vrot.slane %v603_v39, 1  ;;  %v641_v19 = vrot.slane %v604_v10, 1  ;;  %v696_v20 = vmul.f32 %v3759_v40, %v3929_v34  ;;  %v787_v26 = vmul.f32 %v3704_v14, %v3789_v49 }
  0x45   : > { %v1082_v22 = vmul.f32 0.044715, %v1066_v62  ;;  %v1083_v32 = vmul.f32 0.044715, %v1067_v1  ;;  %v550_v48 = vsel %vm532_vm3, %v548_v63, %v549_v2  ;;  %v584_v31 = vadd.f32 %v549_v2, %v491_v45  ;;  %3124 = vperm.xlu1 %3490, %v3689_v9  }
  0x46   : > { %v583_v8 = vadd.f32 %v550_v48, %v490_v58  ;;  %v642_v38 = vsel %vm532_vm3, %v640_v15, %v641_v19  ;;  %v732_v4 = vrot.slane %v695_v29, 1  ;;  %v733_v17 = vrot.slane %v696_v20, 1 }
  0x47   : > { %v1098_v52 = vadd.f32 %v1082_v22, %v3933_v21  ;;  %v1099_v47 = vadd.f32 %v1083_v32, %v3935_v37  ;;  %v676_v16 = vadd.f32 %v641_v19, %v584_v31  ;;  %v788_v58 = vmul.f32 %v3704_v14, %v3791_v50 }
  0x48   : > { %v675_v30 = vadd.f32 %v642_v38, %v583_v8  ;;  %v734_v55 = vsel %vm532_vm3, %v732_v4, %v733_v17  ;;  %v880_v59 = vmul.f32 %v3762_v41, %v3793_v51  ;;  %v825_v45 = vrot.slane %v787_v26, 2  ;;  %v3981_v8 = vld [vmem:[#allocation2 + $0x40] sm:$0xff] }
  0x49   : > { %v1114_v60 = vmul.f32 0.7978846, %v1098_v52  ;;  %v1115_v0 = vmul.f32 0.7978846, %v1099_v47  ;;  %v768_v7 = vadd.f32 %v733_v17, %v676_v16  ;;  %v826_v63 = vrot.slane %v788_v58, 2  ;;  %3116 = vperm.xlu1 %3490, %v3731_v27  }
  0x4a   : > { %v767_v46 = vadd.f32 %v734_v55, %v675_v30  ;;  %v881_v39 = vmul.f32 %v3762_v41, %v3803_v56  ;;  %v917_v10 = vrot.slane %v880_v59, 2  ;;  %v972_v62 = vmul.f32 %v3765_v42, %v3916_v54  ;;  %v3992_v59 = vld [vmem:[#allocation2 + $0x48] sm:$0xf] }
  0x4b   : > { %3497 = vtanh.f32 %v1114_v60  ;;  %v973_v1 = vmul.f32 %v3765_v42, %v3929_v34  ;;  %v410_v2 = vmul.f32 %v3734_v28, %v3839_v57  ;;  %v3494_v15 = vpop.eup %3493  ;;  %v827_v19 = vsel %vm809_vm4, %v825_v45, %v826_v63 }
  0x4c   : > { %3499 = vtanh.f32 %v1115_v0  ;;  %v861_v29 = vadd.f32 %v826_v63, %v768_v7  ;;  %v918_v20 = vrot.slane %v881_v39, 2  ;;  %v3496_v22 = vpop.eup %3495  ;;  %v1154_v32 = vadd.f32 1.0, %v3494_v15 }
  0x4d   : > { %v860_v9 = vadd.f32 %v827_v19, %v767_v46  ;;  %v1009_v48 = vrot.slane %v972_v62, 2  ;;  %v1010_v31 = vrot.slane %v973_v1, 2  ;;  %v1155_v38 = vadd.f32 1.0, %v3496_v22  ;;  %3132 = vperm.xlu1 %3490, %v3872_v53  }
  0x4e   : > { %v919_v4 = vsel %vm809_vm4, %v917_v10, %v918_v20  ;;  %v953_v17 = vadd.f32 %v918_v20, %v861_v29  ;;  %v411_v52 = vmul.f32 %v3734_v28, %v3853_v11  ;;  %v1170_v47 = vmul.f32 0.5, %v1154_v32 }
  0x4f   : > { %v952_v16 = vadd.f32 %v919_v4, %v860_v9  ;;  %v1011_v26 = vsel %vm809_vm4, %v1009_v48, %v1010_v31  ;;  %v430_v30 = vmul.f32 %v3745_v33, %v3847_v61  ;;  %v1171_v55 = vmul.f32 0.5, %v1155_v38 }
  0x50   : > { %v3990_v58 = vadd.f32 %v1010_v31, %v953_v17  ;;  %v431_v60 = vmul.f32 %v3745_v33, %v3861_v24  ;;  %v466_v0 = vmul.f32 %v3749_v35, %v3981_v8  ;;  %v3999_v27 = vmul.f32 %v1170_v47, %v3887_v23 }
  0x51   : > { %v4001_v7 = vadd.f32 %v1011_v26, %v952_v16  ;;  %v446_v45 = vadd.f32 %v430_v30, %v410_v2  ;;  %v467_v46 = vmul.f32 %v3749_v35, %v3992_v59  ;;  %v4006_v63 = vmul.f32 %v1171_v55, %v3889_v25 }
  0x52   : > { %6253 = vst [vmem:[#allocation14_spill] sm:$0xff] %v3999_v27  ;;  %v1061_v39 = vmul.f32 %v3990_v58, %v3990_v58  ;;  %v447_v10 = vadd.f32 %v431_v60, %v411_v52  ;;  %v502_v62 = vmul.f32 %v3701_v13, %v3839_v57  ;;  %1268 = vst.msk [vmem:[#allocation2 + $0x61] sm:$0xfe] %vm1258_vm5, %v3999_v27 }
  0x53   : > { %6254 = vst [vmem:[#allocation15_spill] sm:$0xff] %v4006_v63  ;;  %v1060_v23 = vmul.f32 %v4001_v7, %v4001_v7  ;;  %v482_v1 = vadd.f32 %v466_v0, %v446_v45  ;;  %v503_v25 = vmul.f32 %v3701_v13, %v3853_v11  ;;  %v595_v2 = vmul.f32 %v3752_v36, %v3847_v61 }
  0x54   : > { %1269 = vst.msk [vmem:[#allocation2 + $0x69] sm:$0x1] %vm1260_vm6, %v4006_v63  ;;  %v1077_v15 = vmul.f32 %v1061_v39, %v3990_v58  ;;  %v483_v19 = vadd.f32 %v467_v46, %v447_v10  ;;  %v536_v53 = vrot.slane %v502_v62, 1  ;;  %v596_v29 = vmul.f32 %v3752_v36, %v3861_v24 }
  0x55   : > { %v3498_v20 = vpop.eup %3497  ;;  %v1076_v22 = vmul.f32 %v1060_v23, %v4001_v7  ;;  %v537_v32 = vrot.slane %v503_v25, 1  ;;  %v628_v9 = vrot.slane %v595_v2, 1  ;;  %v687_v48 = vmul.f32 %v3759_v40, %v3981_v8 }
  0x56   : > { %v3500_v31 = vpop.eup %3499  ;;  %v1146_v38 = vadd.f32 1.0, %v3498_v20  ;;  %v1093_v4 = vmul.f32 0.044715, %v1077_v15  ;;  %v629_v17 = vrot.slane %v596_v29, 1  ;;  %v688_v52 = vmul.f32 %v3759_v40, %v3992_v59 }
  0x57   : > { %v1147_v47 = vadd.f32 1.0, %v3500_v31  ;;  %v1092_v16 = vmul.f32 0.044715, %v1076_v22  ;;  %v538_v26 = vsel %vm532_vm3, %v536_v53, %v537_v32  ;;  %v576_v30 = vadd.f32 %v537_v32, %v483_v19 }
  0x58   : > { %v1162_v55 = vmul.f32 0.5, %v1146_v38  ;;  %v1109_v60 = vadd.f32 %v1093_v4, %v3990_v58  ;;  %v575_v0 = vadd.f32 %v538_v26, %v482_v1  ;;  %v630_v45 = vsel %vm532_vm3, %v628_v9, %v629_v17  ;;  %v4061_v38 = vld [vmem:[%s6070_s4] sm:$0x1f] }
  0x59   : > { %v1163_v46 = vmul.f32 0.5, %v1147_v47  ;;  %v1108_v39 = vadd.f32 %v1092_v16, %v4001_v7  ;;  %v668_v10 = vadd.f32 %v629_v17, %v576_v30  ;;  %v720_v62 = vrot.slane %v687_v48, 1 }
  0x5a   : > { %v4036_v23 = vmul.f32 %v1162_v55, %v3933_v21  ;;  %v1125_v25 = vmul.f32 0.7978846, %v1109_v60  ;;  %v667_v2 = vadd.f32 %v630_v45, %v575_v0  ;;  %v721_v15 = vrot.slane %v688_v52, 1  ;;  %v4068_v55 = vld [vmem:[#allocation2 + $0x18] sm:$0xf] }
  0x5b   : > { %v4039_v53 = vmul.f32 %v1163_v46, %v3935_v37  ;;  %v1124_v19 = vmul.f32 0.7978846, %v1108_v39  ;;  %v779_v1 = vmul.f32 %v3704_v14, %v3839_v57  ;;  %v780_v29 = vmul.f32 %v3704_v14, %v3853_v11  ;;  %v4075_v46 = vld [vmem:[%s6070_s4 + $0x8] sm:$0x1f]  ;;  %v4080_v39 = vld [vmem:[%s6070_s4 + $0x10] sm:$0x1f] }
  0x5c   : > { %6255 = vst [vmem:[#allocation16_spill] sm:$0xff] %v4036_v23  ;;  %1259 = vst.msk [vmem:[#allocation2 + $0x21] sm:$0xfe] %vm1258_vm5, %v4036_v23  ;;  %3501 = vtanh.f32 %v1125_v25  ;;  %v722_v21 = vsel %vm532_vm3, %v720_v62, %v721_v15  ;;  %v760_v20 = vadd.f32 %v721_v15, %v668_v10  ;;  %v872_v22 = vmul.f32 %v3762_v41, %v3847_v61  ;;  %v4089_v25 = vld [vmem:[%s6070_s4 + $0x18] sm:$0x1f] }
  0x5d   : > { %6256 = vst [vmem:[#allocation17_spill] sm:$0xff] %v4039_v53  ;;  %1261 = vst.msk [vmem:[#allocation2 + $0x29] sm:$0x1] %vm1260_vm6, %v4039_v53  ;;  %3503 = vtanh.f32 %v1124_v19  ;;  %v759_v37 = vadd.f32 %v722_v21, %v667_v2  ;;  %v813_v32 = vrot.slane %v779_v1, 2  ;;  %v814_v57 = vrot.slane %v780_v29, 2 }
  0x5e   : > { %v873_v11 = vmul.f32 %v3762_v41, %v3861_v24  ;;  %v905_v9 = vrot.slane %v872_v22, 2  ;;  %v964_v48 = vmul.f32 %v3765_v42, %v3981_v8  ;;  %v965_v31 = vmul.f32 %v3765_v42, %v3992_v59  ;;  %v4106_v21 = vld [vmem:[%s6070_s4 + $0x20] sm:$0x1f] }
  0x5f   : > { %v815_v4 = vsel %vm809_vm4, %v813_v32, %v814_v57  ;;  %v853_v17 = vadd.f32 %v814_v57, %v760_v20  ;;  %v4066_v52 = vrot.slane %v4061_v38, %v3669_v5  ;;  %v4084_v10 = vrot.slane %v4061_v38, %v3698_v12 }
  0x60   : > { %v852_v47 = vadd.f32 %v815_v4, %v759_v37  ;;  %v906_v16 = vrot.slane %v873_v11, 2  ;;  %v997_v26 = vrot.slane %v964_v48, 2  ;;  %v998_v30 = vrot.slane %v965_v31, 2 }
  0x61   : > { %6257 = vst [vmem:[#allocation18_spill] sm:$0xff] %v4066_v52  ;;  %6258 = vst [vmem:[#allocation19_spill] sm:$0xff] %v4084_v10  ;;  %v1403_v2 = vmul.f32 %v4066_v52, %v3710_v18  ;;  %v1404_v15 = vmul.f32 %v4066_v52, %v4068_v55  ;;  %v4099_v1 = vrot.slane %v4061_v38, %v3672_v6 }
  0x62   : > { %v907_v60 = vsel %vm809_vm4, %v905_v9, %v906_v16  ;;  %v945_v0 = vadd.f32 %v906_v16, %v853_v17  ;;  %v999_v45 = vsel %vm809_vm4, %v997_v26, %v998_v30  ;;  %v4110_v20 = vrot.slane %v4075_v46, %v3698_v12 }
  0x63   : > { %v944_v62 = vadd.f32 %v907_v60, %v852_v47  ;;  %6259 = vst [vmem:[#allocation20_spill] sm:$0xff] %v4099_v1  ;;  %v4114_v22 = vrot.slane %v4080_v39, %v3698_v12  ;;  %v4120_v57 = vmul.f32 %v4084_v10, %v3710_v18  ;;  %v4124_v11 = vrot.slane %v4089_v25, %v3698_v12 }
  0x64   : > { %v4095_v19 = vadd.f32 %v998_v30, %v945_v0  ;;  %6260 = vst [vmem:[#allocation21_spill] sm:$0xff] %v4110_v20  ;;  %v4127_v9 = vsub.s32 3, %v3650_v3  ;;  %v1436_v17 = vrot.slane %v1403_v2, 1  ;;  %v1437_v47 = vrot.slane %v1404_v15, 1 }
  0x65   : > { %v4101_v29 = vadd.f32 %v999_v45, %v944_v62  ;;  %6261 = vst [vmem:[#allocation22_spill] sm:$0xff] %v4114_v22  ;;  %6262 = vst [vmem:[#allocation23_spill] sm:$0xff] %v4124_v11  ;;  %v4134_v30 = vrot.slane %v4106_v21, %v3698_v12  ;;  %v4138_v60 = vmul.f32 %v4099_v1, %v3710_v18 }
  0x66   : > { %v3502_v37 = vpop.eup %3501  ;;  %v1053_v32 = vmul.f32 %v4095_v19, %v4095_v19  ;;  %v4143_v62 = vrot.slane %v4075_v46, %v3669_v5  ;;  %v4147_v2 = vrot.slane %v4080_v39, %v3669_v5  ;;  %v4151_v12 = vrot.slane %v4089_v25, %v3669_v5 }
  0x67   : > { %v3504_v48 = vpop.eup %3503  ;;  %v1157_v31 = vadd.f32 1.0, %v3502_v37  ;;  %v1052_v4 = vmul.f32 %v4101_v29, %v4101_v29  ;;  %6263 = vst [vmem:[#allocation24_spill] sm:$0xff] %v4134_v30  ;;  %v4155_v18 = vrot.slane %v4106_v21, %v3669_v5  ;;  %v4173_v5 = vmul.f32 %v4099_v1, %v4068_v55 }
  0x68   : > { %v1156_v16 = vadd.f32 1.0, %v3504_v48  ;;  %v1069_v26 = vmul.f32 %v1053_v32, %v4095_v19  ;;  %6264 = vst [vmem:[#allocation25_spill] sm:$0xff] %v4143_v62  ;;  %6265 = vst [vmem:[#allocation26_spill] sm:$0xff] %v4147_v2  ;;  %v433_v63 = vmul.f32 %v3745_v33, %v3992_v59  ;;  %v434_v27 = vmul.f32 %v3745_v33, %v3768_v43 }
  0x69   : > { %v1173_v0 = vmul.f32 0.5, %v1157_v31  ;;  %v1068_v45 = vmul.f32 %v1052_v4, %v4101_v29  ;;  %6266 = vst [vmem:[#allocation27_spill] sm:$0xff] %v4151_v12  ;;  %6267 = vst [vmem:[#allocation28_spill] sm:$0xff] %v4155_v18  ;;  %v4161_v31 = vsel %vm532_vm3, %v1436_v17, %v1437_v47  ;;  %v4165_v4 = vrot.slane %v4075_v46, %v3672_v6 }
  0x6a   : > { %v1172_v15 = vmul.f32 0.5, %v1156_v16  ;;  %v1085_v37 = vmul.f32 0.044715, %v1069_v26  ;;  %6269 = vst [vmem:[#allocation30_spill] sm:$0xff] %v4161_v31  ;;  %v412_v47 = vmul.f32 %v3734_v28, %v3847_v61  ;;  %v435_v23 = vmul.f32 %v3745_v33, %v3770_v44 }
  0x6b   : > { %v4158_v32 = vmul.f32 %v1173_v0, %v3990_v58  ;;  %v1084_v48 = vmul.f32 0.044715, %v1068_v45  ;;  %6270 = vst [vmem:[#allocation31_spill] sm:$0xff] %v4165_v4  ;;  %v414_v0 = vmul.f32 %v3734_v28, %v3981_v8  ;;  %v470_v1 = vmul.f32 %v3749_v35, %v3789_v49 }
  0x6c   : > { %v4168_v16 = vmul.f32 %v1172_v15, %v4001_v7  ;;  %v1101_v26 = vadd.f32 %v1085_v37, %v4095_v19  ;;  %v413_v7 = vmul.f32 %v3734_v28, %v3861_v24  ;;  %v4188_v15 = vsub.s32 4, %v3650_v3 }
  0x6d   : > { %6268 = vst [vmem:[#allocation29_spill] sm:$0xff] %v4158_v32  ;;  %1271 = vst.msk [vmem:[#allocation2 + $0x79] sm:$0x1] %vm1260_vm6, %v4158_v32  ;;  %v1100_v17 = vadd.f32 %v1084_v48, %v4101_v29  ;;  %v415_v37 = vmul.f32 %v3734_v28, %v3992_v59  ;;  %v432_v48 = vmul.f32 %v3745_v33, %v3981_v8 }
  0x6e   : > { %6271 = vst [vmem:[#allocation32_spill] sm:$0xff] %v4168_v16  ;;  %1270 = vst.msk [vmem:[#allocation2 + $0x71] sm:$0xfe] %vm1258_vm5, %v4168_v16  ;;  %v1117_v45 = vmul.f32 0.7978846, %v1101_v26  ;;  %v468_v3 = vmul.f32 %v3749_v35, %v3768_v43  ;;  %v469_v32 = vmul.f32 %v3749_v35, %v3770_v44  ;;  %v449_v16 = vadd.f32 %v433_v63, %v413_v7 }
  0x6f   : > { %v1116_v58 = vmul.f32 0.7978846, %v1100_v17  ;;  %v448_v26 = vadd.f32 %v432_v48, %v412_v47  ;;  %v450_v17 = vadd.f32 %v434_v27, %v414_v0  ;;  %v451_v53 = vadd.f32 %v435_v23, %v415_v37 }
  0x70   : > { %3505 = vtanh.f32 %v1117_v45  ;;  %v471_v52 = vmul.f32 %v3749_v35, %v3791_v50  ;;  %v504_v47 = vmul.f32 %v3701_v13, %v3847_v61  ;;  %v485_v45 = vadd.f32 %v469_v32, %v449_v16 }
  0x71   : > { %3507 = vtanh.f32 %v1116_v58  ;;  %v484_v10 = vadd.f32 %v468_v3, %v448_v26  ;;  %v505_v48 = vmul.f32 %v3701_v13, %v3861_v24  ;;  %v506_v58 = vmul.f32 %v3701_v13, %v3981_v8 }
  0x72   : > { %v507_v27 = vmul.f32 %v3701_v13, %v3992_v59  ;;  %v486_v63 = vadd.f32 %v470_v1, %v450_v17  ;;  %v487_v23 = vadd.f32 %v471_v52, %v451_v53  ;;  %v539_v7 = vrot.slane %v504_v47, 1 }
  0x73   : > { %v597_v0 = vmul.f32 %v3752_v36, %v3981_v8  ;;  %v540_v37 = vrot.slane %v505_v48, 1  ;;  %v542_v26 = vrot.slane %v506_v58, 1  ;;  %v598_v32 = vmul.f32 %v3752_v36, %v3992_v59 }
  0x74   : > { %v543_v3 = vrot.slane %v507_v27, 1  ;;  %v599_v16 = vmul.f32 %v3752_v36, %v3768_v43  ;;  %v600_v31 = vmul.f32 %v3752_v36, %v3770_v44  ;;  %v689_v53 = vmul.f32 %v3759_v40, %v3768_v43 }
  0x75   : > { %v631_v18 = vrot.slane %v597_v0, 1  ;;  %v541_v52 = vsel %vm532_vm3, %v539_v7, %v540_v37  ;;  %v578_v17 = vadd.f32 %v540_v37, %v485_v45  ;;  %v632_v27 = vrot.slane %v598_v32, 1 }
  0x76   : > { %v544_v1 = vsel %vm532_vm3, %v542_v26, %v543_v3  ;;  %v580_v47 = vadd.f32 %v543_v3, %v487_v23  ;;  %v577_v48 = vadd.f32 %v541_v52, %v484_v10  ;;  %v634_v12 = vrot.slane %v599_v16, 1 }
  0x77   : > { %v579_v58 = vadd.f32 %v544_v1, %v486_v63  ;;  %v635_v30 = vrot.slane %v600_v31, 1  ;;  %v690_v11 = vmul.f32 %v3759_v40, %v3770_v44  ;;  %v691_v0 = vmul.f32 %v3759_v40, %v3789_v49 }
  0x78   : > { %v692_v36 = vmul.f32 %v3759_v40, %v3791_v50  ;;  %v633_v7 = vsel %vm532_vm3, %v631_v18, %v632_v27  ;;  %v670_v26 = vadd.f32 %v632_v27, %v578_v17  ;;  %v723_v45 = vrot.slane %v689_v53, 1 }
  0x79   : > { %v781_v10 = vmul.f32 %v3704_v14, %v3847_v61  ;;  %v636_v31 = vsel %vm532_vm3, %v634_v12, %v635_v30  ;;  %v669_v37 = vadd.f32 %v633_v7, %v577_v48  ;;  %v672_v3 = vadd.f32 %v635_v30, %v580_v47 }
  0x7a   : > { %v3506_v13 = vpop.eup %3505  ;;  %v671_v16 = vadd.f32 %v636_v31, %v579_v58  ;;  %v724_v52 = vrot.slane %v690_v11, 1  ;;  %v726_v1 = vrot.slane %v691_v0, 1  ;;  %v727_v40 = vrot.slane %v692_v36, 1 }
  0x7b   : > { %v3508_v63 = vpop.eup %3507  ;;  %v1149_v23 = vadd.f32 1.0, %v3506_v13  ;;  %v782_v18 = vmul.f32 %v3704_v14, %v3861_v24  ;;  %v783_v53 = vmul.f32 %v3704_v14, %v3981_v8  ;;  %v784_v12 = vmul.f32 %v3704_v14, %v3992_v59 }
  0x7c   : > { %v1148_v32 = vadd.f32 1.0, %v3508_v63  ;;  %v725_v61 = vsel %vm532_vm3, %v723_v45, %v724_v52  ;;  %v762_v13 = vadd.f32 %v724_v52, %v670_v26  ;;  %v728_v11 = vsel %vm532_vm3, %v726_v1, %v727_v40 }
  0x7d   : > { %v1165_v35 = vmul.f32 0.5, %v1149_v23  ;;  %v761_v47 = vadd.f32 %v725_v61, %v669_v37  ;;  %v764_v36 = vadd.f32 %v727_v40, %v672_v3  ;;  %v763_v24 = vadd.f32 %v728_v11, %v671_v16 }
  0x7e   : > { %v1164_v17 = vmul.f32 0.5, %v1148_v32  ;;  %v816_v58 = vrot.slane %v781_v10, 2  ;;  %v817_v27 = vrot.slane %v782_v18, 2  ;;  %v819_v0 = vrot.slane %v783_v53, 2 }
  0x7f   : > { %v4246_v30 = vmul.f32 %v1165_v35, %v4095_v19  ;;  %v820_v7 = vrot.slane %v784_v12, 2  ;;  %v874_v26 = vmul.f32 %v3762_v41, %v3981_v8  ;;  %v875_v35 = vmul.f32 %v3762_v41, %v3992_v59 }
  0x80   : > { %v4250_v48 = vmul.f32 %v1164_v17, %v4101_v29  ;;  %v818_v40 = vsel %vm809_vm4, %v816_v58, %v817_v27  ;;  %v855_v19 = vadd.f32 %v817_v27, %v762_v13  ;;  %v876_v29 = vmul.f32 %v3762_v41, %v3768_v43 }
  0x81   : > { %1263 = vst.msk [vmem:[#allocation2 + $0x39] sm:$0x1] %vm1260_vm6, %v4246_v30  ;;  %v877_v45 = vmul.f32 %v3762_v41, %v3770_v44  ;;  %v821_v10 = vsel %vm809_vm4, %v819_v0, %v820_v7  ;;  %v854_v63 = vadd.f32 %v818_v40, %v761_v47  ;;  %v857_v23 = vadd.f32 %v820_v7, %v764_v36 }
  0x82   : > { %1262 = vst.msk [vmem:[#allocation2 + $0x31] sm:$0xfe] %vm1258_vm5, %v4250_v48  ;;  %v908_v8 = vrot.slane %v874_v26, 2  ;;  %v856_v31 = vadd.f32 %v821_v10, %v763_v24  ;;  %v909_v37 = vrot.slane %v875_v35, 2  ;;  %v911_v59 = vrot.slane %v876_v29, 2  ;;  %v4309_v29 = vld [vmem:[#allocation2 + $0x10] sm:$0xff] }
  0x83   : > { %v912_v3 = vrot.slane %v877_v45, 2  ;;  %v966_v32 = vmul.f32 %v3765_v42, %v3768_v43  ;;  %v967_v16 = vmul.f32 %v3765_v42, %v3770_v44  ;;  %v968_v52 = vmul.f32 %v3765_v42, %v3789_v49  ;;  %6277 = vst [vmem:[#allocation38_spill] sm:$0xff] %v4309_v29 }
  0x84   : > { %v969_v1 = vmul.f32 %v3765_v42, %v3791_v50  ;;  %v910_v18 = vsel %vm809_vm4, %v908_v8, %v909_v37  ;;  %v947_v17 = vadd.f32 %v909_v37, %v855_v19  ;;  %v4278_v43 = vrot.slane %v4080_v39, %v3672_v6 }
  0x85   : > { %v913_v53 = vsel %vm809_vm4, %v911_v59, %v912_v3  ;;  %v949_v61 = vadd.f32 %v912_v3, %v857_v23  ;;  %v946_v13 = vadd.f32 %v910_v18, %v854_v63  ;;  %v1000_v11 = vrot.slane %v966_v32, 2 }
  0x86   : > { %v948_v12 = vadd.f32 %v913_v53, %v856_v31  ;;  %v1001_v47 = vrot.slane %v967_v16, 2  ;;  %6272 = vst [vmem:[#allocation33_spill] sm:$0xff] %v4278_v43  ;;  %v4282_v44 = vrot.slane %v4061_v38, %v4127_v9  ;;  %v1003_v49 = vrot.slane %v968_v52, 2  ;;  %v4341_v52 = vld [vmem:[#allocation2 + $0x20] sm:$0xff] }
  0x87   : > { %v1004_v50 = vrot.slane %v969_v1, 2  ;;  %v4286_v36 = vrot.slane %v4089_v25, %v3672_v6  ;;  %v4290_v24 = vrot.slane %v4106_v21, %v3672_v6  ;;  %v1817_v0 = vrot.slane %v4173_v5, 2  ;;  %6283 = vst [vmem:[#allocation43_spill] sm:$0xff] %v4341_v52 }
  0x88   : > { %6273 = vst [vmem:[#allocation34_spill] sm:$0xff] %v4282_v44  ;;  %v1002_v58 = vsel %vm809_vm4, %v1000_v11, %v1001_v47  ;;  %v4293_v27 = vadd.f32 %v1001_v47, %v947_v17  ;;  %v4303_v40 = vrot.slane %v4061_v38, %v4188_v15  ;;  %v2163_v5 = vmul.f32 %v4309_v29, %v4282_v44 }
  0x89   : > { %6274 = vst [vmem:[#allocation35_spill] sm:$0xff] %v4286_v36  ;;  %6275 = vst [vmem:[#allocation36_spill] sm:$0xff] %v4290_v24  ;;  %v1005_v7 = vsel %vm809_vm4, %v1003_v49, %v1004_v50  ;;  %v4297_v26 = vadd.f32 %v1002_v58, %v946_v13  ;;  %v4299_v35 = vadd.f32 %v1004_v50, %v949_v61  ;;  %v6280_v37 = vrot.slane %v4138_v60, 2  ;;  %v4353_v50 = vld [vmem:[#allocation2 + $0x28] sm:$0xf] }
  0x8a   : > { %6276 = vst [vmem:[#allocation37_spill] sm:$0xff] %v4303_v40  ;;  %v4305_v19 = vadd.f32 %v1005_v7, %v948_v12  ;;  %v1055_v6 = vmul.f32 %v4293_v27, %v4293_v27  ;;  %v2164_v45 = vmul.f32 %v4282_v44, %v4068_v55  ;;  %v4321_v63 = vrot.slane %v4075_v46, %v4127_v9 }
  0x8b   : > { %v1054_v10 = vmul.f32 %v4297_v26, %v4297_v26  ;;  %v1057_v38 = vmul.f32 %v4299_v35, %v4299_v35  ;;  %v4325_v23 = vrot.slane %v4080_v39, %v4127_v9  ;;  %v4333_v59 = vsel %vm809_vm4, %v6280_v37, %v1817_v0  ;;  %6285 = vst [vmem:[#allocation45_spill] sm:$0xff] %v4353_v50 }
  0x8c   : > { %6278 = vst [vmem:[#allocation39_spill] sm:$0xff] %v4321_v63  ;;  %v1056_v8 = vmul.f32 %v4305_v19, %v4305_v19  ;;  %v1071_v31 = vmul.f32 %v1055_v6, %v4293_v27  ;;  %6281 = vst [vmem:[#allocation41_spill] sm:$0xff] %v4333_v59  ;;  %v4337_v3 = vrot.slane %v4089_v25, %v4127_v9  ;;  %v2197_v17 = vrot.slane %v2163_v5, 3  ;;  %v4363_v6 = vld [vmem:[#allocation2 + $0x30] sm:$0xff] }
  0x8d   : > { %6279 = vst [vmem:[#allocation40_spill] sm:$0xff] %v4325_v23  ;;  %v1070_v32 = vmul.f32 %v1054_v10, %v4297_v26  ;;  %v1073_v16 = vmul.f32 %v1057_v38, %v4299_v35  ;;  %v2544_v1 = vmul.f32 %v4309_v29, %v4303_v40  ;;  %v2545_v18 = vmul.f32 %v4303_v40, %v4068_v55  ;;  %v4366_v38 = vld [vmem:[#allocation2 + $0x38] sm:$0xf]  ;;  %v6297_v40 = vld [vmem:[#allocation3_spill] sm:$0xff] }
  0x8e   : > { %6282 = vst [vmem:[#allocation42_spill] sm:$0xff] %v4337_v3  ;;  %v1072_v60 = vmul.f32 %v1056_v8, %v4305_v19  ;;  %v1087_v53 = vmul.f32 0.044715, %v1071_v31  ;;  %v2198_v61 = vrot.slane %v2164_v45, 3  ;;  %v4350_v11 = vrot.slane %v4106_v21, %v4127_v9  ;;  %6287 = vst [vmem:[#allocation47_spill] sm:$0xff] %v4363_v6 }
  0x8f   : > { %v1086_v13 = vmul.f32 0.044715, %v1070_v32  ;;  %v1089_v12 = vmul.f32 0.044715, %v1073_v16  ;;  %v4357_v55 = vrot.slane %v4075_v46, %v4188_v15  ;;  %v1322_v7 = vmul.f32 %v4110_v20, %v4341_v52  ;;  %6288 = vst [vmem:[#allocation48_spill] sm:$0xff] %v4366_v38 }
  0x90   : > { %6284 = vst [vmem:[#allocation44_spill] sm:$0xff] %v4350_v11  ;;  %v1088_v47 = vmul.f32 0.044715, %v1072_v60  ;;  %v1103_v49 = vadd.f32 %v1087_v53, %v4293_v27  ;;  %v2578_v9 = vrot.slane %v2544_v1, 4  ;;  %v2579_v5 = vrot.slane %v2545_v18, 4 }
  0x91   : > { %6286 = vst [vmem:[#allocation46_spill] sm:$0xff] %v4357_v55  ;;  %v1102_v58 = vadd.f32 %v1086_v13, %v4297_v26  ;;  %v1105_v0 = vadd.f32 %v1089_v12, %v4299_v35  ;;  %v4369_v8 = vsel %vm2193_vm7, %v2197_v17, %v2198_v61  ;;  %v4373_v46 = vrot.slane %v4080_v39, %v4188_v15  ;;  %v4449_v13 = vld [vmem:[#allocation2 + $0x98] sm:$0xf] }
  0x92   : > { %v1104_v45 = vadd.f32 %v1088_v47, %v4305_v19  ;;  %v1119_v10 = vmul.f32 0.7978846, %v1103_v49  ;;  %6289 = vst [vmem:[#allocation49_spill] sm:$0xff] %v4369_v8  ;;  %v4377_v16 = vmul.f32 %v4143_v62, %v4341_v52  ;;  %v4381_v1 = vmul.f32 %v4143_v62, %v4353_v50  ;;  %6295 = vst [vmem:[#allocation55_spill] sm:$0xff] %v4449_v13 }
  0x93   : > { %6290 = vst [vmem:[#allocation50_spill] sm:$0xff] %v4373_v46  ;;  %v1118_v31 = vmul.f32 0.7978846, %v1102_v58  ;;  %v1121_v37 = vmul.f32 0.7978846, %v1105_v0  ;;  %v4385_v18 = vrot.slane %v4089_v25, %v4188_v15  ;;  %v4389_v39 = vrot.slane %v4106_v21, %v4188_v15  ;;  %v4429_v0 = vld [vmem:[#allocation2 + $0x90] sm:$0xff]  ;;  %v4480_v3 = vpop.permute.xlu0 %1196 }
  0x94   : > { %v1120_v32 = vmul.f32 0.7978846, %v1104_v45  ;;  %3509 = vtanh.f32 %v1119_v10  ;;  %v1330_v60 = vadd.f32 %v1322_v7, %v4120_v57  ;;  %v1342_v53 = vmul.f32 %v4114_v22, %v4363_v6  ;;  %6294 = vst [vmem:[#allocation54_spill] sm:$0xff] %v4429_v0  ;;  %v6296_v10 = vld [vmem:[#allocation7_spill] sm:$0xff]  ;;  %6299 = vst [vmem:[#allocation56_spill] sm:$0xff] %v4480_v3 }
  0x95   : > { %6291 = vst [vmem:[#allocation51_spill] sm:$0xff] %v4385_v18  ;;  %6292 = vst [vmem:[#allocation52_spill] sm:$0xff] %v4389_v39  ;;  %3511 = vtanh.f32 %v1118_v31  ;;  %v4396_v17 = vmul.f32 %v4147_v2, %v4363_v6  ;;  %v4400_v61 = vmul.f32 %v4147_v2, %v4366_v38  ;;  %v4403_v25 = vsel %vm2574_vm8, %v2578_v9, %v2579_v5 }
  0x96   : > { %3513 = vtanh.f32 %v1120_v32  ;;  %6293 = vst [vmem:[#allocation53_spill] sm:$0xff] %v4403_v25  ;;  %v4407_v21 = vmul.f32 %v4165_v4, %v4341_v52  ;;  %v4411_v57 = vmul.f32 %v4165_v4, %v4353_v50  ;;  %v4417_v12 = vmul.f32 %v4278_v43, %v4363_v6 }
  0x97   : > { %3515 = vtanh.f32 %v1121_v37  ;;  %v420_v47 = vmul.f32 %v3734_v28, %v3793_v51  ;;  %v4423_v49 = vmul.f32 %v4278_v43, %v4366_v38  ;;  %v4427_v58 = vmul.f32 %v4321_v63, %v4341_v52 }
  0x98   : > { %v421_v7 = vmul.f32 %v3734_v28, %v3803_v56  ;;  %v440_v9 = vmul.f32 %v3745_v33, %v3916_v54  ;;  %v4435_v5 = vadd.f32 %v1342_v53, %v1330_v60  ;;  %v4441_v31 = vmul.f32 %v4321_v63, %v4353_v50  ;;  %v6298_v53 = vld [vmem:[#allocation8_spill] sm:$0xff] }
  0x99   : > { %v4447_v15 = vmul.f32 %v4325_v23, %v4363_v6  ;;  %v441_v60 = vmul.f32 %v3745_v33, %v3929_v34  ;;  %v476_v28 = vmul.f32 %v6296_v10, %v4429_v0  ;;  %v477_v37 = vmul.f32 %v6296_v10, %v4449_v13 }
  0x9a   : > { %v456_v45 = vadd.f32 %v440_v9, %v420_v47  ;;  %v512_v63 = vmul.f32 %v6297_v40, %v3793_v51  ;;  %v4465_v47 = vmul.f32 %v4325_v23, %v4366_v38  ;;  %v513_v9 = vmul.f32 %v6297_v40, %v3803_v56 }
  0x9b   : > { %v457_v25 = vadd.f32 %v441_v60, %v421_v7  ;;  %v605_v10 = vmul.f32 %v6298_v53, %v3916_v54  ;;  %v2349_v7 = vrot.slane %v4447_v15, 3  ;;  %v606_v29 = vmul.f32 %v6298_v53, %v3929_v34 }
  0x9c   : > { %v551_v60 = vrot.slane %v512_v63, 1  ;;  %v2621_v33 = vmul.f32 %v4357_v55, %v4341_v52  ;;  %v2622_v23 = vmul.f32 %v4357_v55, %v4353_v50  ;;  %v492_v62 = vadd.f32 %v476_v28, %v456_v45 }
  0x9d   : > { %v493_v40 = vadd.f32 %v477_v37, %v457_v25  ;;  %v2697_v63 = vmul.f32 %v4373_v46, %v4363_v6  ;;  %v643_v15 = vrot.slane %v605_v10, 1  ;;  %v644_v53 = vrot.slane %v606_v29, 1 }
  0x9e   : > { %v3510_v44 = vpop.eup %3509 }
  0x9f   : > { %v3512_v32 = vpop.eup %3511  ;;  %v1151_v8 = vadd.f32 1.0, %v3510_v44  ;;  %v552_v44 = vrot.slane %v513_v9, 1 }
  0xa0   : > { %v3514_v4 = vpop.eup %3513  ;;  %v1150_v20 = vadd.f32 1.0, %v3512_v32  ;;  %v1201_v32 = vpop.permute.xlu0 %1200 }
  0xa1   : > { %v3516_v59 = vpop.eup %3515  ;;  %v1152_v39 = vadd.f32 1.0, %v3514_v4  ;;  %v1167_v18 = vmul.f32 0.5, %v1151_v8  ;;  %v553_v28 = vsel %vm532_vm3, %v551_v60, %v552_v44  ;;  %v586_v4 = vadd.f32 %v552_v44, %v493_v40 }
  0xa2   : > { %v1153_v11 = vadd.f32 1.0, %v3516_v59  ;;  %v1166_v43 = vmul.f32 0.5, %v1150_v20  ;;  %v585_v45 = vadd.f32 %v553_v28, %v492_v62  ;;  %v645_v8 = vsel %vm532_vm3, %v643_v15, %v644_v53  ;;  %v6303_v20 = vld [vmem:[#allocation9_spill] sm:$0xff] }
  0xa3   : > { %v1168_v52 = vmul.f32 0.5, %v1152_v39  ;;  %v4483_v24 = vmul.f32 %v1167_v18, %v4293_v27  ;;  %v697_v27 = vmul.f32 %v6303_v20, %v4429_v0  ;;  %v698_v29 = vmul.f32 %v6303_v20, %v4449_v13 }
  0xa4   : > { %v1169_v25 = vmul.f32 0.5, %v1153_v11  ;;  %v4488_v59 = vmul.f32 %v1166_v43, %v4297_v26  ;;  %v2698_v40 = vmul.f32 %v4373_v46, %v4366_v38  ;;  %v678_v43 = vadd.f32 %v644_v53, %v586_v4 }
  0xa5   : > { %6300 = vst [vmem:[#allocation57_spill] sm:$0xff] %v4483_v24  ;;  %v4491_v10 = vmul.f32 %v1168_v52, %v4305_v19  ;;  %1265 = vst.msk [vmem:[#allocation2 + $0x49] sm:$0x1] %vm1260_vm6, %v4483_v24  ;;  %v789_v26 = vmul.f32 %v3704_v14, %v3793_v51  ;;  %v2350_v19 = vrot.slane %v4465_v47, 3  ;;  %v735_v52 = vrot.slane %v697_v27, 1 }
  0xa6   : > { %6301 = vst [vmem:[#allocation58_spill] sm:$0xff] %v4488_v59  ;;  %v4500_v62 = vmul.f32 %v1169_v25, %v4299_v35  ;;  %1264 = vst.msk [vmem:[#allocation2 + $0x41] sm:$0xfe] %vm1258_vm5, %v4488_v59  ;;  %v736_v11 = vrot.slane %v698_v29, 1  ;;  %v790_v35 = vmul.f32 %v3704_v14, %v3803_v56  ;;  %v2654_v18 = vrot.slane %v2621_v33, 4 }
  0xa7   : > { %6302 = vst [vmem:[#allocation59_spill] sm:$0xff] %v4491_v10  ;;  %1266 = vst.msk [vmem:[#allocation2 + $0x51] sm:$0xfe] %vm1258_vm5, %v4491_v10  ;;  %v2655_v39 = vrot.slane %v2622_v23, 4  ;;  %v677_v37 = vadd.f32 %v645_v8, %v585_v45  ;;  %v828_v51 = vrot.slane %v789_v26, 2  ;;  %v882_v60 = vmul.f32 %v3762_v41, %v3916_v54 }
  0xa8   : > { %6304 = vst [vmem:[#allocation60_spill] sm:$0xff] %v4500_v62  ;;  %1267 = vst.msk [vmem:[#allocation2 + $0x59] sm:$0x1] %vm1260_vm6, %v4500_v62  ;;  %v737_v53 = vsel %vm532_vm3, %v735_v52, %v736_v11  ;;  %v829_v9 = vrot.slane %v790_v35, 2  ;;  %v883_v47 = vmul.f32 %v3762_v41, %v3929_v34  ;;  %v1227_v44 = vrot.slane %v1201_v32, 7  ;;  %v4558_v52 = vld [vmem:[#allocation2 + $0x60] sm:$0xff] }
  0xa9   : > { %v2730_v15 = vrot.slane %v2697_v63, 4  ;;  %v2731_v56 = vrot.slane %v2698_v40, 4  ;;  %v770_v28 = vadd.f32 %v736_v11, %v678_v43  ;;  %v6305_v25 = vrot.slane %v4381_v1, 1  ;;  %6315 = vst [vmem:[#allocation61_spill] sm:$0xff] %v4558_v52  ;;  %v6328_v62 = vld [vmem:[#allocation30_spill] sm:$0xff] }
  0xaa   : > { %v6306_v33 = vrot.slane %v4377_v16, 1  ;;  %v6307_v45 = vrot.slane %v4400_v61, 1  ;;  %v6308_v4 = vrot.slane %v4396_v17, 1  ;;  %v6309_v27 = vrot.slane %v4411_v57, 2 }
  0xab   : > { %v6310_v29 = vrot.slane %v4407_v21, 2  ;;  %v974_v1 = vmul.f32 %v3765_v42, %v4429_v0  ;;  %v6311_v16 = vrot.slane %v4423_v49, 2  ;;  %v6312_v40 = vrot.slane %v4417_v12, 2  ;;  %v6331_v0 = vld [vmem:[#allocation44_spill] sm:$0xff] }
  0xac   : > { %v1514_v23 = vsel %vm532_vm3, %v6306_v33, %v6305_v25  ;;  %v4530_v8 = vsel %vm532_vm3, %v6308_v4, %v6307_v45  ;;  %v6313_v17 = vrot.slane %v4441_v31, 3  ;;  %v6314_v43 = vrot.slane %v4427_v58, 3  ;;  %v6325_v4 = vld [vmem:[#allocation28_spill] sm:$0xff] }
  0xad   : > { %v4537_v63 = vsel %vm809_vm4, %v6310_v29, %v6309_v27  ;;  %v4546_v61 = vsel %vm809_vm4, %v6312_v40, %v6311_v16  ;;  %v4556_v21 = vsel %vm2193_vm7, %v2349_v7, %v2350_v19  ;;  %v769_v26 = vadd.f32 %v737_v53, %v677_v37  ;;  %v4567_v58 = vld [vmem:[#allocation2 + $0x40] sm:$0xff] }
  0xae   : > { %v4553_v57 = vsel %vm2193_vm7, %v6314_v43, %v6313_v17  ;;  %v4561_v49 = vsel %vm2574_vm8, %v2654_v18, %v2655_v39  ;;  %v830_v12 = vsel %vm809_vm4, %v828_v51, %v829_v9  ;;  %v920_v11 = vrot.slane %v882_v60, 2  ;;  %v4569_v32 = vld [vmem:[#allocation2 + $0x50] sm:$0xff]  ;;  %v4581_v51 = vld [vmem:[#allocation2 + $0x48] sm:$0xf] }
  0xaf   : > { %v921_v35 = vrot.slane %v883_v47, 2  ;;  %v4565_v31 = vmul.f32 %v1227_v44, %v4250_v48  ;;  %6317 = vst [vmem:[#allocation63_spill] sm:$0xff] %v4569_v32  ;;  %v4572_v7 = vsel %vm2574_vm8, %v2730_v15, %v2731_v56  ;;  %v863_v19 = vadd.f32 %v829_v9, %v770_v28  ;;  %v4576_v18 = vld [vmem:[#allocation2 + $0x70] sm:$0xff]  ;;  %v6320_v48 = vld [vmem:[#allocation23_spill] sm:$0xff]  ;;  %v6321_v60 = vld [vmem:[#allocation24_spill] sm:$0xff] }
  0xb0   : > { %v975_v37 = vmul.f32 %v3765_v42, %v4449_v13  ;;  %6318 = vst [vmem:[#allocation64_spill] sm:$0xff] %v4576_v18  ;;  %v4579_v39 = vmul.f32 %v1227_v44, %v4246_v30  ;;  %v1362_v53 = vmul.f32 %v6320_v48, %v4567_v58  ;;  %v1382_v47 = vmul.f32 %v6321_v60, %v4569_v32  ;;  %v4587_v15 = vld [vmem:[#allocation2 + $0x68] sm:$0xf]  ;;  %v4589_v9 = vld [vmem:[#allocation2 + $0x58] sm:$0xf]  ;;  %v6324_v56 = vld [vmem:[#allocation27_spill] sm:$0xff] }
  0xb1   : > { %6316 = vst [vmem:[#allocation62_spill] sm:$0xff] %v4565_v31  ;;  %v1012_v25 = vrot.slane %v974_v1, 2  ;;  %6322 = vst [vmem:[#allocation66_spill] sm:$0xff] %v4587_v15  ;;  %v1631_v28 = vmul.f32 %v6324_v56, %v4567_v58  ;;  %v1632_v30 = vmul.f32 %v6324_v56, %v4581_v51  ;;  %v862_v44 = vadd.f32 %v830_v12, %v769_v26  ;;  %v4613_v26 = vld [vmem:[#allocation2 + $0x78] sm:$0xf] }
  0xb2   : > { %6319 = vst [vmem:[#allocation65_spill] sm:$0xff] %v4579_v39  ;;  %6323 = vst [vmem:[#allocation67_spill] sm:$0xff] %v4589_v9  ;;  %v4597_v33 = vmul.f32 %v4114_v22, %v4558_v52  ;;  %v1370_v45 = vadd.f32 %v1362_v53, %v4435_v5  ;;  %v1707_v27 = vmul.f32 %v6325_v4, %v4569_v32  ;;  %v1013_v40 = vrot.slane %v975_v37, 2  ;;  %v6327_v37 = vld [vmem:[#allocation36_spill] sm:$0xff] }
  0xb3   : > { %v1708_v29 = vmul.f32 %v6325_v4, %v4589_v9  ;;  %v922_v1 = vsel %vm809_vm4, %v920_v11, %v921_v35  ;;  %v955_v16 = vadd.f32 %v921_v35, %v863_v19  ;;  %v4607_v17 = vmul.f32 %v6320_v48, %v4576_v18  ;;  %6326 = vst [vmem:[#allocation68_spill] sm:$0xff] %v4613_v26 }
  0xb4   : > { %v4611_v43 = vmul.f32 %v4147_v2, %v4558_v52  ;;  %v1390_v5 = vadd.f32 %v1382_v47, %v1370_v45  ;;  %v2011_v12 = vmul.f32 %v4286_v36, %v4567_v58  ;;  %v2012_v53 = vmul.f32 %v4286_v36, %v4581_v51 }
  0xb5   : > { %v4621_v11 = vmul.f32 %v4147_v2, %v4587_v15  ;;  %v1664_v35 = vrot.slane %v1631_v28, 1  ;;  %v1665_v19 = vrot.slane %v1632_v30, 1  ;;  %v2087_v24 = vmul.f32 %v6327_v37, %v4569_v32  ;;  %v6329_v30 = vld [vmem:[#allocation33_spill] sm:$0xff] }
  0xb6   : > { %v954_v59 = vadd.f32 %v922_v1, %v862_v44  ;;  %v1466_v10 = vadd.f32 %v6328_v62, %v1390_v5  ;;  %v1740_v3 = vrot.slane %v1707_v27, 1  ;;  %v1741_v47 = vrot.slane %v1708_v29, 1  ;;  %v6330_v1 = vld [vmem:[#allocation42_spill] sm:$0xff] }
  0xb7   : > { %v2088_v45 = vmul.f32 %v6327_v37, %v4589_v9  ;;  %v1014_v41 = vsel %vm809_vm4, %v1012_v25, %v1013_v40  ;;  %v4631_v14 = vmul.f32 %v6324_v56, %v4576_v18  ;;  %v4635_v28 = vmul.f32 %v6324_v56, %v4613_v26 }
  0xb8   : > { %v4639_v44 = vmul.f32 %v6329_v30, %v4558_v52  ;;  %v1542_v62 = vadd.f32 %v1514_v23, %v1466_v10  ;;  %v2044_v27 = vrot.slane %v2011_v12, 2  ;;  %v2045_v29 = vrot.slane %v2012_v53, 2  ;;  %v6332_v12 = vld [vmem:[#allocation51_spill] sm:$0xff] }
  0xb9   : > { %v2392_v5 = vmul.f32 %v6330_v1, %v4567_v58  ;;  %v1666_v25 = vsel %vm532_vm3, %v1664_v35, %v1665_v19  ;;  %v2120_v42 = vrot.slane %v2087_v24, 2  ;;  %v2393_v13 = vmul.f32 %v6330_v1, %v4581_v51 }
  0xba   : > { %v2468_v34 = vmul.f32 %v6331_v0, %v4569_v32  ;;  %v1618_v54 = vadd.f32 %v4530_v8, %v1542_v62  ;;  %v1742_v20 = vsel %vm532_vm3, %v1740_v3, %v1741_v47  ;;  %v2121_v39 = vrot.slane %v2088_v45, 2  ;;  %v6333_v8 = vld [vmem:[#allocation52_spill] sm:$0xff] }
  0xbb   : > { %v4650_v10 = vadd.f32 %v1014_v41, %v954_v59  ;;  %v2469_v23 = vmul.f32 %v6331_v0, %v4589_v9  ;;  %v2773_v53 = vmul.f32 %v6332_v12, %v4567_v58  ;;  %v2774_v24 = vmul.f32 %v6332_v12, %v4581_v51 }
  0xbc   : > { %v4658_v35 = vadd.f32 %v1013_v40, %v955_v16  ;;  %v1694_v19 = vadd.f32 %v1666_v25, %v1618_v54  ;;  %v2425_v31 = vrot.slane %v2392_v5, 3  ;;  %v2849_v62 = vmul.f32 %v6333_v8, %v4569_v32  ;;  %v6334_v54 = vld [vmem:[#allocation19_spill] sm:$0xff]  ;;  %v6335_v5 = vld [vmem:[#allocation21_spill] sm:$0xff] }
  0xbd   : > { %v1062_v41 = vmul.f32 %v4650_v10, %v4650_v10  ;;  %v2426_v3 = vrot.slane %v2393_v13, 3  ;;  %v2501_v59 = vrot.slane %v2468_v34, 3  ;;  %v2850_v47 = vmul.f32 %v6333_v8, %v4589_v9  ;;  %v6336_v13 = vld [vmem:[#allocation41_spill] sm:$0xff] }
  0xbe   : > { %v1063_v45 = vmul.f32 %v4658_v35, %v4658_v35  ;;  %v1770_v38 = vadd.f32 %v1742_v20, %v1694_v19  ;;  %v1313_v40 = vmul.f32 %v6334_v54, %v4567_v58  ;;  %v1325_v25 = vmul.f32 %v6335_v5, %v4569_v32 }
  0xbf   : > { %v1078_v16 = vmul.f32 %v1062_v41, %v4650_v10  ;;  %v2502_v56 = vrot.slane %v2469_v23, 3  ;;  %v2806_v50 = vrot.slane %v2773_v53, 4  ;;  %v2807_v2 = vrot.slane %v2774_v24, 4  ;;  %v6337_v41 = vld [vmem:[#allocation18_spill] sm:$0xff] }
  0xc0   : > { %v1079_v34 = vmul.f32 %v1063_v45, %v4658_v35  ;;  %v1846_v48 = vadd.f32 %v6336_v13, %v1770_v38  ;;  %v2046_v6 = vsel %vm809_vm4, %v2044_v27, %v2045_v29  ;;  %v2882_v22 = vrot.slane %v2849_v62, 4 }
  0xc1   : > { %v1094_v8 = vmul.f32 0.044715, %v1078_v16  ;;  %v2883_v20 = vrot.slane %v2850_v47, 4  ;;  %v1409_v0 = vmul.f32 %v6337_v41, %v4567_v58  ;;  %v1410_v37 = vmul.f32 %v6337_v41, %v4581_v51 }
  0xc2   : > { %v1095_v19 = vmul.f32 0.044715, %v1079_v34  ;;  %v1922_v23 = vadd.f32 %v4537_v63, %v1846_v48  ;;  %v2122_v53 = vsel %vm809_vm4, %v2120_v42, %v2121_v39  ;;  %v1333_v45 = vadd.f32 %v1325_v25, %v1313_v40  ;;  %v6338_v34 = vld [vmem:[#allocation25_spill] sm:$0xff] }
  0xc3   : > { %v1110_v24 = vadd.f32 %v1094_v8, %v4650_v10  ;;  %v2427_v38 = vsel %vm2193_vm7, %v2425_v31, %v2426_v3  ;;  %v2503_v27 = vsel %vm2193_vm7, %v2501_v59, %v2502_v56  ;;  %v4686_v29 = vsel %vm2574_vm8, %v2806_v50, %v2807_v2  ;;  %v6339_v50 = vld [vmem:[#allocation20_spill] sm:$0xff]  ;;  %v6340_v59 = vld [vmem:[#allocation31_spill] sm:$0xff] }
  0xc4   : > { %v1111_v62 = vadd.f32 %v1095_v19, %v4658_v35  ;;  %v1998_v47 = vadd.f32 %v4546_v61, %v1922_v23  ;;  %v1485_v63 = vmul.f32 %v6338_v34, %v4569_v32  ;;  %v1486_v42 = vmul.f32 %v6338_v34, %v4589_v9  ;;  %v6341_v23 = vld [vmem:[#allocation49_spill] sm:$0xff] }
  0xc5   : > { %v1126_v16 = vmul.f32 0.7978846, %v1110_v24  ;;  %v4695_v39 = vsel %vm2574_vm8, %v2882_v22, %v2883_v20  ;;  %v1445_v48 = vrot.slane %v1409_v0, 1  ;;  %v1446_v56 = vrot.slane %v1410_v37, 1 }
  0xc6   : > { %v1127_v31 = vmul.f32 0.7978846, %v1111_v62  ;;  %v2074_v8 = vadd.f32 %v2046_v6, %v1998_v47  ;;  %v1353_v2 = vadd.f32 %v4597_v33, %v1333_v45  ;;  %v1789_v61 = vmul.f32 %v6339_v50, %v4567_v58 }
  0xc7   : > { %3517 = vtanh.f32 %v1126_v16  ;;  %v1790_v3 = vmul.f32 %v6339_v50, %v4581_v51  ;;  %v1865_v40 = vmul.f32 %v6340_v59, %v4569_v32  ;;  %v1866_v22 = vmul.f32 %v6340_v59, %v4589_v9 }
  0xc8   : > { %3519 = vtanh.f32 %v1127_v31  ;;  %v2150_v25 = vadd.f32 %v2122_v53, %v2074_v8  ;;  %v1521_v0 = vrot.slane %v1485_v63, 1  ;;  %v1522_v37 = vrot.slane %v1486_v42, 1  ;;  %v6342_v31 = vld [vmem:[#allocation34_spill] sm:$0xff] }
  0xc9   : > { %v1942_v6 = vmul.f32 %v6329_v30, %v4587_v15  ;;  %v1597_v33 = vrot.slane %v4611_v43, 1  ;;  %v1598_v13 = vrot.slane %v4621_v11, 1  ;;  %v2017_v20 = vmul.f32 %v4286_v36, %v4576_v18 }
  0xca   : > { %v2018_v19 = vmul.f32 %v4286_v36, %v4613_v26  ;;  %v2227_v24 = vadd.f32 %v6341_v23, %v2150_v25  ;;  %v1673_v45 = vrot.slane %v4631_v14, 1  ;;  %v1674_v53 = vrot.slane %v4635_v28, 1 }
  0xcb   : > { %v1825_v62 = vrot.slane %v1789_v61, 2  ;;  %v1826_v47 = vrot.slane %v1790_v3, 2  ;;  %v1901_v16 = vrot.slane %v1865_v40, 2  ;;  %v1902_v63 = vrot.slane %v1866_v22, 2  ;;  %v6343_v3 = vld [vmem:[#allocation39_spill] sm:$0xff] }
  0xcc   : > { %v1977_v43 = vrot.slane %v4639_v44, 2  ;;  %v2303_v11 = vadd.f32 %v4553_v57, %v2227_v24  ;;  %v1978_v42 = vrot.slane %v1942_v6, 2  ;;  %v4721_v8 = vmul.f32 %v6342_v31, %v4567_v58 }
  0xcd   : > { %v4725_v25 = vmul.f32 %v6342_v31, %v4581_v51  ;;  %v4728_v14 = vsel %vm532_vm3, %v1445_v48, %v1446_v56  ;;  %v2053_v28 = vrot.slane %v2017_v20, 2  ;;  %v2054_v61 = vrot.slane %v2018_v19, 2 }
  0xce   : > { %v4732_v40 = vmul.f32 %v6343_v3, %v4569_v32  ;;  %v2379_v57 = vadd.f32 %v4556_v21, %v2303_v11  ;;  %v4736_v44 = vadd.f32 %v4607_v17, %v1353_v2  ;;  %v4739_v22 = vsel %vm532_vm3, %v1521_v0, %v1522_v37 }
  0xcf   : > { %v4742_v6 = vsel %vm532_vm3, %v1597_v33, %v1598_v13  ;;  %v4745_v48 = vsel %vm532_vm3, %v1673_v45, %v1674_v53  ;;  %v4748_v56 = vsel %vm809_vm4, %v1825_v62, %v1826_v47  ;;  %v4751_v20 = vsel %vm809_vm4, %v1901_v16, %v1902_v63  ;;  %v6344_v45 = vld [vmem:[#allocation40_spill] sm:$0xff] }
  0xd0   : > { %v2247_v21 = vmul.f32 %v6343_v3, %v4589_v9  ;;  %v2455_v2 = vadd.f32 %v2427_v38, %v2379_v57  ;;  %v4756_v0 = vsel %vm809_vm4, %v1977_v43, %v1978_v42  ;;  %v2206_v37 = vrot.slane %v4721_v8, 3  ;;  %v6345_v42 = vld [vmem:[#allocation37_spill] sm:$0xff] }
  0xd1   : > { %v3518_v17 = vpop.eup %3517  ;;  %v2207_v33 = vrot.slane %v4725_v25, 3  ;;  %v4761_v23 = vsel %vm809_vm4, %v2053_v28, %v2054_v61  ;;  %v2282_v24 = vrot.slane %v4732_v40, 3  ;;  %v2322_v53 = vmul.f32 %v6344_v45, %v4558_v52  ;;  %v6346_v25 = vld [vmem:[#allocation53_spill] sm:$0xff] }
  0xd2   : > { %v3520_v13 = vpop.eup %3519  ;;  %v1158_v19 = vadd.f32 1.0, %v3518_v17  ;;  %v2531_v62 = vadd.f32 %v2503_v27, %v2455_v2  ;;  %v2323_v38 = vmul.f32 %v6344_v45, %v4587_v15  ;;  %v2398_v16 = vmul.f32 %v6330_v1, %v4576_v18 }
  0xd3   : > { %v1159_v47 = vadd.f32 1.0, %v3520_v13  ;;  %v2283_v43 = vrot.slane %v2247_v21, 3  ;;  %v2399_v11 = vmul.f32 %v6330_v1, %v4613_v26  ;;  %v2550_v8 = vmul.f32 %v6345_v42, %v4567_v58 }
  0xd4   : > { %v1174_v63 = vmul.f32 0.5, %v1158_v19  ;;  %v2608_v28 = vadd.f32 %v6346_v25, %v2531_v62  ;;  %v2551_v27 = vmul.f32 %v6345_v42, %v4581_v51  ;;  %v2627_v40 = vmul.f32 %v4357_v55, %v4569_v32  ;;  %v4792_v25 = vld [vmem:[#allocation2] sm:$0xff] }
  0xd5   : > { %v1175_v61 = vmul.f32 0.5, %v1159_v47  ;;  %v2628_v21 = vmul.f32 %v4357_v55, %v4589_v9  ;;  %v2703_v17 = vmul.f32 %v4373_v46, %v4558_v52  ;;  %v2704_v2 = vmul.f32 %v4373_v46, %v4587_v15  ;;  %v4800_v52 = vld [vmem:[#allocation2 + $0x8] sm:$0xf] }
  0xd6   : > { %v4780_v57 = vmul.f32 %v1174_v63, %v4650_v10  ;;  %v2684_v13 = vadd.f32 %v4561_v49, %v2608_v28  ;;  %v2358_v62 = vrot.slane %v2322_v53, 3  ;;  %v2359_v47 = vrot.slane %v2323_v38, 3 }
  0xd7   : > { %v4790_v19 = vmul.f32 %v1175_v61, %v4658_v35  ;;  %v2434_v10 = vrot.slane %v2398_v16, 3  ;;  %v2435_v63 = vrot.slane %v2399_v11, 3  ;;  %v2779_v9 = vmul.f32 %v6332_v12, %v4576_v18 }
  0xd8   : > { %6347 = vst [vmem:[#allocation30_spill] sm:$0xff] %v4780_v57  ;;  %1272 = vst.msk [vmem:[#allocation2 + $0x81] sm:$0xfe] %vm1258_vm5, %v4780_v57  ;;  %v2780_v15 = vmul.f32 %v6332_v12, %v4613_v26  ;;  %v2760_v49 = vadd.f32 %v4572_v7, %v2684_v13  ;;  %v2587_v35 = vrot.slane %v2550_v8, 4  ;;  %v2588_v53 = vrot.slane %v2551_v27, 4  ;;  %v6349_v26 = vld [vmem:[#allocation38_spill] sm:$0xff] }
  0xd9   : > { %6348 = vst [vmem:[#allocation41_spill] sm:$0xff] %v4790_v19  ;;  %1273 = vst.msk [vmem:[#allocation2 + $0x89] sm:$0x1] %vm1260_vm6, %v4790_v19  ;;  %v2663_v38 = vrot.slane %v2627_v40, 4  ;;  %v2664_v28 = vrot.slane %v2628_v21, 4  ;;  %v2739_v61 = vrot.slane %v2703_v17, 4  ;;  %v1309_v11 = vmul.f32 %v6334_v54, %v4792_v25 }
  0xda   : > { %v2740_v16 = vrot.slane %v2704_v2, 4  ;;  %v2836_v57 = vadd.f32 %v4686_v29, %v2760_v49  ;;  %v1321_v18 = vmul.f32 %v6349_v26, %v6335_v5  ;;  %v1401_v7 = vmul.f32 %v6337_v41, %v4792_v25 }
  0xdb   : > { %v1402_v13 = vmul.f32 %v6337_v41, %v4800_v52  ;;  %v4815_v8 = vsel %vm2193_vm7, %v2206_v37, %v2207_v33  ;;  %v2815_v27 = vrot.slane %v2779_v9, 4  ;;  %v2816_v40 = vrot.slane %v2780_v15, 4 }
  0xdc   : > { %v1477_v21 = vmul.f32 %v6349_v26, %v6338_v34  ;;  %v4820_v17 = vadd.f32 %v4695_v39, %v2836_v57  ;;  %v4823_v29 = vsel %vm2193_vm7, %v2282_v24, %v2283_v43  ;;  %v4826_v2 = vsel %vm2193_vm7, %v2358_v62, %v2359_v47  ;;  %v4840_v39 = vld [vmem:[#allocation2 + $0x18] sm:$0xf] }
  0xdd   : > { %v4829_v49 = vsel %vm2193_vm7, %v2434_v10, %v2435_v63  ;;  %v4832_v37 = vsel %vm2574_vm8, %v2587_v35, %v2588_v53  ;;  %v4835_v15 = vsel %vm2574_vm8, %v2663_v38, %v2664_v28  ;;  %v4838_v9 = vsel %vm2574_vm8, %v2739_v61, %v2740_v16 }
  0xde   : > { %6350 = vst [vmem:[#allocation49_spill] sm:$0xff] %v4835_v15  ;;  %6351 = vst [vmem:[#allocation40_spill] sm:$0xff] %v4838_v9  ;;  %v1478_v33 = vmul.f32 %v4840_v39, %v6338_v34  ;;  %v2920_v24 = vmul.f32 %v4820_v17, %v4820_v17  ;;  %v1329_v57 = vadd.f32 %v1321_v18, %v1309_v11  ;;  %v1433_v62 = vrot.slane %v1401_v7, 1  ;;  %v6355_v7 = vld [vmem:[#allocation36_spill] sm:$0xff] }
  0xdf   : > { %v4846_v43 = vld [vmem:[#allocation2 + $0x80] sm:$0xff]  ;;  %v1434_v47 = vrot.slane %v1402_v13, 1  ;;  %v4853_v35 = vsel %vm2574_vm8, %v2815_v27, %v2816_v40  ;;  %v1509_v53 = vrot.slane %v1477_v21, 1  ;;  %v1781_v38 = vmul.f32 %v6339_v50, %v4792_v25 }
  0xe0   : > { %6352 = vst [vmem:[#allocation53_spill] sm:$0xff] %v4846_v43  ;;  %v4848_v10 = vld [vmem:[#allocation2 + $0x88] sm:$0xf]  ;;  %v1385_v63 = vmul.f32 %v6321_v60, %v4846_v43  ;;  %6354 = vst [vmem:[#allocation69_spill] sm:$0xff] %v4853_v35  ;;  %v2928_v28 = vmul.f32 %v2920_v24, %v4820_v17  ;;  %v1713_v61 = vmul.f32 %v6325_v4, %v4846_v43  ;;  %v1510_v40 = vrot.slane %v1478_v33, 1 }
  0xe1   : > { %6353 = vst [vmem:[#allocation38_spill] sm:$0xff] %v4848_v10  ;;  %v1714_v18 = vmul.f32 %v6325_v4, %v4848_v10  ;;  %v1782_v16 = vmul.f32 %v6339_v50, %v4800_v52  ;;  %v2093_v13 = vmul.f32 %v6355_v7, %v4846_v43  ;;  %v2094_v27 = vmul.f32 %v6355_v7, %v4848_v10 }
  0xe2   : > { %v1393_v11 = vadd.f32 %v1385_v63, %v4736_v44  ;;  %v2936_v21 = vmul.f32 0.044715, %v2928_v28  ;;  %v4870_v24 = vsel %vm532_vm3, %v1433_v62, %v1434_v47  ;;  %v1857_v19 = vmul.f32 %v6349_v26, %v6340_v59  ;;  %v6356_v44 = vld [vmem:[#allocation44_spill] sm:$0xff] }
  0xe3   : > { %v1858_v34 = vmul.f32 %v4840_v39, %v6340_v59  ;;  %v2474_v63 = vmul.f32 %v6356_v44, %v4846_v43  ;;  %v2475_v41 = vmul.f32 %v6356_v44, %v4848_v10  ;;  %v1813_v35 = vrot.slane %v1781_v38, 2 }
  0xe4   : > { %v1469_v50 = vadd.f32 %v4728_v14, %v1393_v11  ;;  %v2944_v33 = vadd.f32 %v2936_v21, %v4820_v17  ;;  %v1749_v28 = vrot.slane %v1713_v61, 1  ;;  %v1750_v62 = vrot.slane %v1714_v18, 1 }
  0xe5   : > { %v1814_v47 = vrot.slane %v1782_v16, 2  ;;  %v2129_v54 = vrot.slane %v2093_v13, 2  ;;  %v2130_v32 = vrot.slane %v2094_v27, 2  ;;  %v2161_v59 = vmul.f32 %v6342_v31, %v4792_v25  ;;  %v6358_v27 = vld [vmem:[#allocation43_spill] sm:$0xff] }
  0xe6   : > { %v1545_v5 = vadd.f32 %v4739_v22, %v1469_v50  ;;  %v2952_v14 = vmul.f32 0.7978846, %v2944_v33  ;;  %v1511_v11 = vsel %vm532_vm3, %v1509_v53, %v1510_v40  ;;  %v1889_v9 = vrot.slane %v1857_v19, 2  ;;  %v6357_v22 = vld [vmem:[#allocation52_spill] sm:$0xff]  ;;  %v6359_v40 = vld [vmem:[#allocation22_spill] sm:$0xff]  ;;  %v6360_v33 = vld [vmem:[#allocation47_spill] sm:$0xff] }
  0xe7   : > { %v2162_v15 = vmul.f32 %v6342_v31, %v4800_v52  ;;  %v2510_v21 = vrot.slane %v2474_v63, 3  ;;  %v2511_v61 = vrot.slane %v2475_v41, 3  ;;  %v1890_v18 = vrot.slane %v1858_v34, 2 }
  0xe8   : > { %v1621_v38 = vadd.f32 %v4742_v6, %v1545_v5  ;;  %3521 = vtanh.f32 %v2952_v14  ;;  %v1751_v50 = vsel %vm532_vm3, %v1749_v28, %v1750_v62  ;;  %v4892_v16 = vmul.f32 %v6357_v22, %v4846_v43  ;;  %v6361_v28 = vld [vmem:[#allocation23_spill] sm:$0xff] }
  0xe9   : > { %v4896_v13 = vmul.f32 %v6357_v22, %v4848_v10  ;;  %v2131_v53 = vsel %vm809_vm4, %v2129_v54, %v2130_v32  ;;  %v4901_v5 = vsel %vm809_vm4, %v1813_v35, %v1814_v47  ;;  %v2194_v41 = vrot.slane %v2161_v59, 3  ;;  %v4921_v59 = vpop.permute.xlu1 %1212 }
  0xea   : > { %v1697_v19 = vadd.f32 %v4745_v48, %v1621_v38  ;;  %v2195_v34 = vrot.slane %v2162_v15, 3  ;;  %v4905_v6 = vmul.f32 %v6349_v26, %v6343_v3  ;;  %v1341_v63 = vmul.f32 %v6359_v40, %v6358_v27  ;;  %6362 = vst [vmem:[#allocation43_spill] sm:$0xff] %v4921_v59  ;;  %v6363_v38 = vld [vmem:[#allocation26_spill] sm:$0xff]  ;;  %v6366_v59 = vld [vmem:[#allocation48_spill] sm:$0xff] }
  0xeb   : > { %v1361_v62 = vmul.f32 %v6361_v28, %v6360_v33  ;;  %v4912_v48 = vsel %vm2193_vm7, %v2510_v21, %v2511_v61  ;;  %v4915_v32 = vsel %vm809_vm4, %v1889_v9, %v1890_v18  ;;  %v4919_v54 = vmul.f32 %v4840_v39, %v6343_v3  ;;  %v6364_v61 = vld [vmem:[#allocation45_spill] sm:$0xff] }
  0xec   : > { %v1773_v14 = vadd.f32 %v1751_v50, %v1697_v19  ;;  %v4925_v15 = vmul.f32 %v6345_v42, %v4792_v25  ;;  %v1349_v35 = vadd.f32 %v1341_v63, %v1329_v57  ;;  %v1381_v47 = vmul.f32 %v6321_v60, %v4567_v58  ;;  %v6365_v50 = vld [vmem:[#allocation27_spill] sm:$0xff] }
  0xed   : > { %v1553_v21 = vmul.f32 %v6363_v38, %v6358_v27  ;;  %v1554_v18 = vmul.f32 %v6363_v38, %v6364_v61  ;;  %v1629_v19 = vmul.f32 %v6365_v50, %v6360_v33  ;;  %v1630_v3 = vmul.f32 %v6365_v50, %v6366_v59 }
  0xee   : > { %v1849_v9 = vadd.f32 %v4748_v56, %v1773_v14  ;;  %v4939_v25 = vsel %vm2193_vm7, %v2194_v41, %v2195_v34  ;;  %v1369_v63 = vadd.f32 %v1361_v62, %v1349_v35  ;;  %v1705_v60 = vmul.f32 %v6325_v4, %v4567_v58 }
  0xef   : > { %v1585_v14 = vrot.slane %v1553_v21, 1  ;;  %v1586_v31 = vrot.slane %v1554_v18, 1  ;;  %v1661_v10 = vrot.slane %v1629_v19, 1  ;;  %v1662_v28 = vrot.slane %v1630_v3, 1 }
  0xf0   : > { %v1925_v56 = vadd.f32 %v4751_v20, %v1849_v9  ;;  %v1389_v38 = vadd.f32 %v1381_v47, %v1369_v63  ;;  %v1706_v43 = vmul.f32 %v6325_v4, %v4581_v51  ;;  %v1933_v41 = vmul.f32 %v6329_v30, %v6358_v27  ;;  %v4957_v47 = vpop.permute.xlu1 %1216 }
  0xf1   : > { %v4953_v35 = vmul.f32 %v6345_v42, %v4800_v52  ;;  %v1934_v20 = vmul.f32 %v6329_v30, %v6364_v61  ;;  %v4961_v3 = vmul.f32 %v6349_v26, %v4357_v55  ;;  %v4965_v9 = vmul.f32 %v4840_v39, %v4357_v55 }
  0xf2   : > { %v2001_v34 = vadd.f32 %v4756_v0, %v1925_v56  ;;  %v3522_v21 = vpop.eup %3521  ;;  %v1465_v0 = vadd.f32 %v4870_v24, %v1389_v38  ;;  %v1737_v18 = vrot.slane %v1705_v60, 1  ;;  %v1587_v63 = vsel %vm532_vm3, %v1585_v14, %v1586_v31 }
  0xf3   : > { %v2968_v19 = vadd.f32 1.0, %v3522_v21  ;;  %v1738_v56 = vrot.slane %v1706_v43, 1  ;;  %v1663_v62 = vsel %vm532_vm3, %v1661_v10, %v1662_v28  ;;  %v1965_v4 = vrot.slane %v1933_v41, 2 }
  0xf4   : > { %v2077_v52 = vadd.f32 %v4761_v23, %v2001_v34  ;;  %v1541_v57 = vadd.f32 %v1511_v11, %v1465_v0  ;;  %v2009_v26 = vmul.f32 %v4286_v36, %v6360_v33  ;;  %v1966_v39 = vrot.slane %v1934_v20, 2  ;;  %v2997_v28 = vpop.permute.xlu1 %2996 }
  0xf5   : > { %v2976_v42 = vmul.f32 0.5, %v2968_v19  ;;  %v2010_v24 = vmul.f32 %v4286_v36, %v6366_v59  ;;  %v2575_v60 = vrot.slane %v4925_v15, 4  ;;  %v2576_v23 = vrot.slane %v4953_v35, 4 }
  0xf6   : > { %v2153_v30 = vadd.f32 %v2131_v53, %v2077_v52  ;;  %v1617_v38 = vadd.f32 %v1587_v63, %v1541_v57  ;;  %v2085_v31 = vmul.f32 %v6355_v7, %v4567_v58  ;;  %v2651_v11 = vrot.slane %v4961_v3, 4  ;;  %v6367_v52 = vld [vmem:[#allocation62_spill] sm:$0xff] }
  0xf7   : > { %v4980_v43 = vmul.f32 %v2976_v42, %v4820_v17  ;;  %v1739_v53 = vsel %vm532_vm3, %v1737_v18, %v1738_v56  ;;  %v2652_v14 = vrot.slane %v4965_v9, 4  ;;  %v2041_v15 = vrot.slane %v2009_v26, 2  ;;  %v6369_v56 = vld [vmem:[#allocation65_spill] sm:$0xff] }
  0xf8   : > { %v2230_v10 = vadd.f32 %v4815_v8, %v2153_v30  ;;  %v1693_v41 = vadd.f32 %v1663_v62, %v1617_v38  ;;  %v2086_v57 = vmul.f32 %v6355_v7, %v4581_v51  ;;  %v1967_v42 = vsel %vm809_vm4, %v1965_v4, %v1966_v39 }
  0xf9   : > { %v3024_v34 = vmul.f32 %v2997_v28, %v4980_v43  ;;  %v2042_v17 = vrot.slane %v2010_v24, 2  ;;  %v2117_v8 = vrot.slane %v2085_v31, 2  ;;  %v2314_v20 = vmul.f32 %v6344_v45, %v6358_v27 }
  0xfa   : > { %v2306_v35 = vadd.f32 %v4823_v29, %v2230_v10  ;;  %v1769_v30 = vadd.f32 %v1739_v53, %v1693_v41  ;;  %v2315_v21 = vmul.f32 %v6344_v45, %v6364_v61  ;;  %v2390_v9 = vmul.f32 %v6330_v1, %v6360_v33 }
  0xfb   : > { %v3040_v62 = vrot.slane %v3024_v34, 7  ;;  %v2391_v29 = vmul.f32 %v6330_v1, %v6366_v59  ;;  %v2118_v0 = vrot.slane %v2086_v57, 2  ;;  %v2466_v18 = vmul.f32 %v6356_v44, %v4567_v58 }
  0xfc   : > { %v2382_v3 = vadd.f32 %v4826_v2, %v2306_v35  ;;  %v1845_v4 = vadd.f32 %v4901_v5, %v1769_v30  ;;  %v2467_v19 = vmul.f32 %v6356_v44, %v4581_v51  ;;  %v2695_v39 = vmul.f32 %v4373_v46, %v6358_v27 }
  0xfd   : > { %v5006_v63 = vadd.f32 %v3040_v62, %v6367_v52  ;;  %v5009_v2 = vadd.f32 %v3040_v62, %v6369_v56  ;;  %v2043_v24 = vsel %vm809_vm4, %v2041_v15, %v2042_v17  ;;  %v2346_v38 = vrot.slane %v2314_v20, 3  ;;  %v6378_v56 = vld [vmem:[#allocation7_spill] sm:$0xff] }
  0xfe   : > { %v2458_v26 = vadd.f32 %v4829_v49, %v2382_v3  ;;  %v1921_v5 = vadd.f32 %v4915_v32, %v1845_v4  ;;  %v2696_v31 = vmul.f32 %v4373_v46, %v6364_v61  ;;  %v2347_v53 = vrot.slane %v2315_v21, 3 }
  0xff   : > { %6368 = vst [vmem:[#allocation47_spill] sm:$0xff] %v5006_v63  ;;  %6370 = vst [vmem:[#allocation45_spill] sm:$0xff] %v5009_v2  ;;  %v2422_v28 = vrot.slane %v2390_v9, 3  ;;  %v2423_v41 = vrot.slane %v2391_v29, 3  ;;  %v2498_v34 = vrot.slane %v2466_v18, 3  ;;  %v2499_v35 = vrot.slane %v2467_v19, 3 }
 0x100   : > { %v2534_v10 = vadd.f32 %v4912_v48, %v2458_v26  ;;  %v1997_v57 = vadd.f32 %v1967_v42, %v1921_v5  ;;  %v5021_v49 = vmul.f32 %v6332_v12, %v6360_v33  ;;  %v2119_v27 = vsel %vm809_vm4, %v2117_v8, %v2118_v0  ;;  %v400_v9 = vld [vmem:[#allocation2 + $0xa8] sm:$0xf]  ;;  %v6377_v0 = vld [vmem:[#allocation49_spill] sm:$0xff] }
 0x101   : > { %v2727_v32 = vrot.slane %v2695_v39, 4  ;;  %v2728_v15 = vrot.slane %v2696_v31, 4  ;;  %v5026_v17 = vmul.f32 %v6332_v12, %v6366_v59  ;;  %v6371_v61 = vrot.slane %v4919_v54, 3  ;;  %v5045_v54 = vld [vmem:[#allocation2 + $0xa0] sm:$0xff]  ;;  %v6375_v29 = vld [vmem:[#allocation12_spill] sm:$0xff]  ;;  %v6380_v31 = vld [vmem:[#allocation54_spill] sm:$0xff] }
 0x102   : > { %v2611_v48 = vadd.f32 %v4832_v37, %v2534_v10  ;;  %v6372_v42 = vrot.slane %v4905_v6, 3  ;;  %v2073_v20 = vadd.f32 %v2043_v24, %v1997_v57  ;;  %v5036_v33 = vmul.f32 %v6357_v22, %v4567_v58  ;;  %6373 = vst [vmem:[#allocation48_spill] sm:$0xff] %v5045_v54  ;;  %v6379_v24 = vld [vmem:[#allocation13_spill] sm:$0xff]  ;;  %v6381_v10 = vld [vmem:[#allocation6_spill] sm:$0xff]  ;;  %v6382_v57 = vld [vmem:[#allocation55_spill] sm:$0xff] }
 0x103   : > { %v2577_v8 = vsel %vm2574_vm8, %v2575_v60, %v2576_v23  ;;  %v2653_v21 = vsel %vm2574_vm8, %v2651_v11, %v2652_v14  ;;  %v2348_v59 = vsel %vm2193_vm7, %v2346_v38, %v2347_v53  ;;  %v5043_v37 = vmul.f32 %v6357_v22, %v4581_v51  ;;  %v6374_v11 = vld [vmem:[#allocation9_spill] sm:$0xff] }
 0x104   : > { %v2272_v30 = vsel %vm2193_vm7, %v6372_v42, %v6371_v61  ;;  %v2149_v6 = vadd.f32 %v2119_v27, %v2073_v20  ;;  %v2424_v62 = vsel %vm2193_vm7, %v2422_v28, %v2423_v41  ;;  %v2500_v3 = vsel %vm2193_vm7, %v2498_v34, %v2499_v35  ;;  %v6376_v51 = vld [vmem:[#allocation5_spill] sm:$0xff]  ;;  %v6383_v34 = vld [vmem:[#allocation3_spill] sm:$0xff] }
 0x105   : > { %v2803_v58 = vrot.slane %v5021_v49, 4  ;;  %v2729_v60 = vsel %vm2574_vm8, %v2727_v32, %v2728_v15  ;;  %v2804_v23 = vrot.slane %v5026_v17, 4  ;;  %v699_v14 = vmul.f32 %v6374_v11, %v5045_v54  ;;  %v6384_v27 = vld [vmem:[#allocation11_spill] sm:$0xff] }
 0x106   : > { %v422_v4 = vmul.f32 %v6376_v51, %v6375_v29  ;;  %v2687_v18 = vadd.f32 %v6377_v0, %v2611_v48  ;;  %v2226_v19 = vadd.f32 %v4939_v25, %v2149_v6  ;;  %v2879_v52 = vrot.slane %v5036_v33, 4 }
 0x107   : > { %v478_v26 = vmul.f32 %v6378_v56, %v5045_v54  ;;  %v2880_v39 = vrot.slane %v5043_v37, 4  ;;  %v700_v5 = vmul.f32 %v6374_v11, %v400_v9  ;;  %v423_v38 = vmul.f32 %v6376_v51, %v6379_v24 }
 0x108   : > { %v442_v53 = vmul.f32 %v6381_v10, %v6380_v31  ;;  %v2302_v28 = vadd.f32 %v2272_v30, %v2226_v19  ;;  %v479_v41 = vmul.f32 %v6378_v56, %v400_v9  ;;  %v443_v25 = vmul.f32 %v6381_v10, %v6382_v57  ;;  %v6385_v30 = vld [vmem:[#allocation8_spill] sm:$0xff] }
 0x109   : > { %v514_v35 = vmul.f32 %v6383_v34, %v6375_v29  ;;  %v738_v49 = vrot.slane %v699_v14, 1  ;;  %v976_v32 = vmul.f32 %v6384_v27, %v5045_v54  ;;  %v515_v17 = vmul.f32 %v6383_v34, %v6379_v24  ;;  %v6387_v34 = vld [vmem:[#allocation10_spill] sm:$0xff]  ;;  %v5192_v54 = vld [vmem:[#allocation2 + $0x60] sm:$0xff] }
 0x10a   : > { %v458_v15 = vadd.f32 %v442_v53, %v422_v4  ;;  %v2378_v48 = vadd.f32 %v2348_v59, %v2302_v28  ;;  %v459_v61 = vadd.f32 %v443_v25, %v423_v38  ;;  %v607_v20 = vmul.f32 %v6385_v30, %v6380_v31  ;;  %v6386_v4 = vld [vmem:[#allocation4_spill] sm:$0xff] }
 0x10b   : > { %v554_v42 = vrot.slane %v514_v35, 1  ;;  %v739_v33 = vrot.slane %v700_v5, 1  ;;  %v555_v6 = vrot.slane %v515_v17, 1  ;;  %v608_v11 = vmul.f32 %v6385_v30, %v6382_v57 }
 0x10c   : > { %v494_v37 = vadd.f32 %v478_v26, %v458_v15  ;;  %v2454_v14 = vadd.f32 %v2424_v62, %v2378_v48  ;;  %v495_v51 = vadd.f32 %v479_v41, %v459_v61  ;;  %v646_v0 = vrot.slane %v607_v20, 1  ;;  %v6388_v20 = vld [vmem:[#allocation40_spill] sm:$0xff] }
 0x10d   : > { %v791_v19 = vmul.f32 %v6386_v4, %v6375_v29  ;;  %v977_v56 = vmul.f32 %v6384_v27, %v400_v9  ;;  %v556_v59 = vsel %vm532_vm3, %v554_v42, %v555_v6  ;;  %v647_v38 = vrot.slane %v608_v11, 1 }
 0x10e   : > { %v792_v10 = vmul.f32 %v6386_v4, %v6379_v24  ;;  %v2530_v5 = vadd.f32 %v2500_v3, %v2454_v14  ;;  %v587_v26 = vadd.f32 %v556_v59, %v494_v37  ;;  %v588_v53 = vadd.f32 %v555_v6, %v495_v51 }
 0x10f   : > { %v831_v28 = vrot.slane %v791_v19, 2  ;;  %v740_v25 = vsel %vm532_vm3, %v738_v49, %v739_v33  ;;  %v648_v62 = vsel %vm532_vm3, %v646_v0, %v647_v38  ;;  %v884_v29 = vmul.f32 %v6387_v34, %v6380_v31  ;;  %v6389_v0 = vld [vmem:[#allocation63_spill] sm:$0xff]  ;;  %v6391_v19 = vld [vmem:[#allocation61_spill] sm:$0xff] }
 0x110   : > { %v832_v41 = vrot.slane %v792_v10, 2  ;;  %v2607_v35 = vadd.f32 %v2577_v8, %v2530_v5  ;;  %v679_v9 = vadd.f32 %v648_v62, %v587_v26  ;;  %v680_v27 = vadd.f32 %v647_v38, %v588_v53  ;;  %v6393_v38 = vld [vmem:[#allocation69_spill] sm:$0xff]  ;;  %v6394_v5 = vld [vmem:[#allocation64_spill] sm:$0xff]  ;;  %v6395_v53 = vld [vmem:[#allocation18_spill] sm:$0xff] }
 0x111   : > { %v885_v15 = vmul.f32 %v6387_v34, %v6382_v57  ;;  %v1015_v17 = vrot.slane %v976_v32, 2  ;;  %v1016_v24 = vrot.slane %v977_v56, 2  ;;  %v923_v48 = vrot.slane %v884_v29, 2 }
 0x112   : > { %v833_v3 = vsel %vm809_vm4, %v831_v28, %v832_v41  ;;  %v2683_v61 = vadd.f32 %v2653_v21, %v2607_v35  ;;  %v771_v42 = vadd.f32 %v740_v25, %v679_v9  ;;  %v772_v49 = vadd.f32 %v739_v33, %v680_v27  ;;  %v6390_v33 = vld [vmem:[#allocation19_spill] sm:$0xff]  ;;  %v6397_v35 = vld [vmem:[#allocation56_spill] sm:$0xff] }
 0x113   : > { %v924_v30 = vrot.slane %v885_v15, 2  ;;  %v2763_v37 = vadd.f32 %v6388_v20, %v2687_v18  ;;  %v2891_v6 = vrot.slane %v4892_v16, 4  ;;  %v2892_v8 = vrot.slane %v4896_v13, 4  ;;  %v6392_v18 = vld [vmem:[#allocation21_spill] sm:$0xff]  ;;  %v6396_v25 = vld [vmem:[#allocation67_spill] sm:$0xff] }
 0x114   : > { %v2805_v31 = vsel %vm2574_vm8, %v2803_v58, %v2804_v23  ;;  %v2759_v11 = vadd.f32 %v2729_v60, %v2683_v61  ;;  %v864_v14 = vadd.f32 %v833_v3, %v771_v42  ;;  %v865_v57 = vadd.f32 %v832_v41, %v772_v49  ;;  %v6400_v61 = vld [vmem:[#allocation23_spill] sm:$0xff] }
 0x115   : > { %v925_v32 = vsel %vm809_vm4, %v923_v48, %v924_v30  ;;  %v2881_v51 = vsel %vm2574_vm8, %v2879_v52, %v2880_v39  ;;  %v1017_v21 = vsel %vm809_vm4, %v1015_v17, %v1016_v24  ;;  %v1314_v4 = vmul.f32 %v6390_v33, %v6389_v0  ;;  %v6399_v48 = vld [vmem:[#allocation53_spill] sm:$0xff] }
 0x116   : > { %v1326_v56 = vmul.f32 %v6392_v18, %v6391_v19  ;;  %v2835_v16 = vadd.f32 %v2805_v31, %v2759_v11  ;;  %v956_v59 = vadd.f32 %v925_v32, %v864_v14  ;;  %v957_v13 = vadd.f32 %v924_v30, %v865_v57  ;;  %v6402_v11 = vld [vmem:[#allocation17_spill] sm:$0xff]  ;;  %v6403_v57 = vld [vmem:[#allocation32_spill] sm:$0xff] }
 0x117   : > { %v2839_v58 = vadd.f32 %v6393_v38, %v2763_v37  ;;  %v2893_v60 = vsel %vm2574_vm8, %v2891_v6, %v2892_v8  ;;  %v1346_v26 = vmul.f32 %v6359_v40, %v6394_v5  ;;  %v1411_v28 = vmul.f32 %v6395_v53, %v6389_v0  ;;  %v6401_v37 = vld [vmem:[#allocation25_spill] sm:$0xff] }
 0x118   : > { %v5106_v23 = vadd.f32 %v2881_v51, %v2835_v16  ;;  %v5108_v10 = vadd.f32 %v1017_v21, %v956_v59  ;;  %v5110_v52 = vadd.f32 %v1016_v24, %v957_v13  ;;  %v1334_v39 = vadd.f32 %v1326_v56, %v1314_v4  ;;  %v6405_v51 = vld [vmem:[#allocation29_spill] sm:$0xff] }
 0x119   : > { %v1412_v62 = vmul.f32 %v6395_v53, %v6396_v25  ;;  %v6196_v9 = vrot.slane %v6397_v35, 7  ;;  %v1231_v27 = vrot.slane %v4957_v47, 7  ;;  %v5126_v15 = vadd.f32 %v2893_v60, %v2839_v58  ;;  %v6408_v58 = vld [vmem:[#allocation66_spill] sm:$0xff] }
 0x11a   : > { %v2919_v41 = vmul.f32 %v5106_v23, %v5106_v23  ;;  %v1064_v34 = vmul.f32 %v5108_v10, %v5108_v10  ;;  %v1065_v29 = vmul.f32 %v5110_v52, %v5110_v52  ;;  %v1366_v42 = vmul.f32 %v6400_v61, %v6399_v48 }
 0x11b   : > { %6398 = vst [vmem:[#allocation62_spill] sm:$0xff] %v5126_v15  ;;  %v1354_v49 = vadd.f32 %v1346_v26, %v1334_v39  ;;  %v1448_v30 = vrot.slane %v1411_v28, 1  ;;  %v1449_v20 = vrot.slane %v1412_v62, 1  ;;  %v1487_v6 = vmul.f32 %v6401_v37, %v6391_v19  ;;  %v6409_v62 = vld [vmem:[#allocation26_spill] sm:$0xff] }
 0x11c   : > { %v2927_v17 = vmul.f32 %v2919_v41, %v5106_v23  ;;  %v1080_v24 = vmul.f32 %v1064_v34, %v5108_v10  ;;  %v1081_v3 = vmul.f32 %v1065_v29, %v5110_v52  ;;  %v5138_v14 = vmul.f32 %v6196_v9, %v6402_v11  ;;  %v6410_v29 = vld [vmem:[#allocation68_spill] sm:$0xff] }
 0x11d   : > { %v5141_v32 = vmul.f32 %v1231_v27, %v6403_v57  ;;  %v5144_v21 = vmul.f32 %v1231_v27, %v6405_v51  ;;  %v5148_v4 = vsel %vm344_vm0, %v4980_v43, 0.0  ;;  %v5155_v13 = vmul.f32 %v5126_v15, %v5126_v15 }
 0x11e   : > { %v2935_v8 = vmul.f32 0.044715, %v2927_v17  ;;  %v1096_v31 = vmul.f32 0.044715, %v1080_v24  ;;  %v1097_v47 = vmul.f32 0.044715, %v1081_v3  ;;  %v5157_v38 = vadd.f32 %v1366_v42, %v1354_v49 }
 0x11f   : > { %6404 = vst [vmem:[#allocation65_spill] sm:$0xff] %v5141_v32  ;;  %6406 = vst [vmem:[#allocation9_spill] sm:$0xff] %v5144_v21  ;;  %v1488_v60 = vmul.f32 %v6401_v37, %v6408_v58  ;;  %v1524_v39 = vrot.slane %v1487_v6, 1  ;;  %v5162_v43 = vsel %vm532_vm3, %v1448_v30, %v1449_v20  ;;  %v1563_v41 = vmul.f32 %v6409_v62, %v6394_v5  ;;  %v6411_v24 = vld [vmem:[#allocation38_spill] sm:$0xff]  ;;  %v6412_v42 = vld [vmem:[#allocation20_spill] sm:$0xff] }
 0x120   : > { %v2943_v56 = vadd.f32 %v2935_v8, %v5106_v23  ;;  %v1112_v16 = vadd.f32 %v1096_v31, %v5108_v10  ;;  %v1113_v59 = vadd.f32 %v1097_v47, %v5110_v52  ;;  %6407 = vst [vmem:[#allocation12_spill] sm:$0xff] %v5155_v13  ;;  %v1564_v27 = vmul.f32 %v6409_v62, %v6410_v29  ;;  %v6413_v20 = vld [vmem:[#allocation31_spill] sm:$0xff]  ;;  %v6414_v31 = vld [vmem:[#allocation33_spill] sm:$0xff] }
 0x121   : > { %v1639_v17 = vmul.f32 %v6365_v50, %v6399_v48  ;;  %v1640_v3 = vmul.f32 %v6365_v50, %v6411_v24  ;;  %v1791_v49 = vmul.f32 %v6412_v42, %v6389_v0  ;;  %v1792_v30 = vmul.f32 %v6412_v42, %v6396_v25 }
 0x122   : > { %v2951_v26 = vmul.f32 0.7978846, %v2943_v56  ;;  %v1128_v28 = vmul.f32 0.7978846, %v1112_v16  ;;  %v1129_v34 = vmul.f32 0.7978846, %v1113_v59  ;;  %v1867_v6 = vmul.f32 %v6413_v20, %v6391_v19 }
 0x123   : > { %v1868_v8 = vmul.f32 %v6413_v20, %v6408_v58  ;;  %v1943_v47 = vmul.f32 %v6414_v31, %v6394_v5  ;;  %v1944_v11 = vmul.f32 %v6414_v31, %v6410_v29  ;;  %v1525_v57 = vrot.slane %v1488_v60, 1  ;;  %v6415_v59 = vld [vmem:[#allocation34_spill] sm:$0xff] }
 0x124   : > { %3523 = vtanh.f32 %v2951_v26  ;;  %v2019_v51 = vmul.f32 %v4286_v36, %v6399_v48  ;;  %v2020_v56 = vmul.f32 %v4286_v36, %v6411_v24  ;;  %v1600_v16 = vrot.slane %v1563_v41, 1  ;;  %v6416_v41 = vld [vmem:[#allocation39_spill] sm:$0xff] }
 0x125   : > { %3525 = vtanh.f32 %v1128_v28  ;;  %v1601_v19 = vrot.slane %v1564_v27, 1  ;;  %v2171_v26 = vmul.f32 %v6415_v59, %v6389_v0  ;;  %v2172_v28 = vmul.f32 %v6415_v59, %v6396_v25 }
 0x126   : > { %3527 = vtanh.f32 %v1129_v34  ;;  %v1676_v9 = vrot.slane %v1639_v17, 1  ;;  %v1677_v2 = vrot.slane %v1640_v3, 1  ;;  %v1828_v63 = vrot.slane %v1791_v49, 2 }
 0x127   : > { %v1829_v35 = vrot.slane %v1792_v30, 2  ;;  %v1904_v34 = vrot.slane %v1867_v6, 2  ;;  %v1905_v60 = vrot.slane %v1868_v8, 2  ;;  %v1980_v21 = vrot.slane %v1943_v47, 2 }
 0x128   : > { %v1981_v32 = vrot.slane %v1944_v11, 2  ;;  %v2056_v13 = vrot.slane %v2019_v51, 2  ;;  %v2057_v15 = vrot.slane %v2020_v56, 2  ;;  %v5196_v27 = vmul.f32 %v5192_v54, %v6416_v41  ;;  %v6419_v51 = vld [vmem:[#allocation37_spill] sm:$0xff] }
 0x129   : > { %v5200_v0 = vmul.f32 %v6416_v41, %v6408_v58  ;;  %v2209_v25 = vrot.slane %v2171_v26, 3  ;;  %v2210_v17 = vrot.slane %v2172_v28, 3  ;;  %v5204_v3 = vmul.f32 %v6344_v45, %v6394_v5 }
 0x12a   : > { %v5208_v49 = vmul.f32 %v6344_v45, %v6410_v29  ;;  %v5211_v30 = vsel %vm532_vm3, %v1524_v39, %v1525_v57  ;;  %v5214_v6 = vsel %vm532_vm3, %v1600_v16, %v1601_v19  ;;  %v5217_v8 = vsel %vm532_vm3, %v1676_v9, %v1677_v2  ;;  %v5236_v2 = vpop.permute.xlu0 %1208 }
 0x12b   : > { %v5221_v58 = vmul.f32 %v6330_v1, %v6399_v48  ;;  %v5224_v5 = vsel %vm809_vm4, %v1828_v63, %v1829_v35  ;;  %v5227_v47 = vsel %vm809_vm4, %v1904_v34, %v1905_v60  ;;  %v5230_v29 = vsel %vm809_vm4, %v1980_v21, %v1981_v32  ;;  %6417 = vst [vmem:[#allocation5_spill] sm:$0xff] %v5236_v2  ;;  %v5243_v35 = vld [vmem:[#allocation2 + $0x50] sm:$0xff]  ;;  %v5255_v34 = vld [vmem:[#allocation2 + $0x58] sm:$0xf] }
 0x12c   : > { %v5234_v39 = vmul.f32 %v6330_v1, %v6411_v24  ;;  %v5239_v9 = vsel %vm809_vm4, %v2056_v13, %v2057_v15  ;;  %v2285_v57 = vrot.slane %v5196_v27, 3  ;;  %v2286_v63 = vrot.slane %v5200_v0, 3 }
 0x12d   : > { %6418 = vst [vmem:[#allocation49_spill] sm:$0xff] %v5239_v9  ;;  %v5247_v32 = vmul.f32 %v5243_v35, %v6419_v51  ;;  %v5250_v16 = vsel %vm2193_vm7, %v2209_v25, %v2210_v17  ;;  %v2361_v19 = vrot.slane %v5204_v3, 3  ;;  %v2362_v15 = vrot.slane %v5208_v49, 3  ;;  %v5262_v17 = vld [vmem:[#allocation2 + $0x68] sm:$0xf]  ;;  %v5283_v9 = vld [vmem:[#allocation2 + $0x20] sm:$0xff] }
 0x12e   : > { %v3524_v11 = vpop.eup %3523  ;;  %6420 = vst [vmem:[#allocation7_spill] sm:$0xff] %v5250_v16  ;;  %v2437_v28 = vrot.slane %v5221_v58, 3  ;;  %v2553_v60 = vmul.f32 %v5255_v34, %v6419_v51  ;;  %v2629_v27 = vmul.f32 %v5192_v54, %v4357_v55  ;;  %v2438_v25 = vrot.slane %v5234_v39, 3  ;;  %6421 = vst [vmem:[#allocation13_spill] sm:$0xff] %v5262_v17  ;;  %v5271_v16 = vld [vmem:[#allocation2 + $0x78] sm:$0xf] }
 0x12f   : > { %v3526_v21 = vpop.eup %3525  ;;  %v2967_v56 = vadd.f32 1.0, %v3524_v11  ;;  %v2630_v3 = vmul.f32 %v5262_v17, %v4357_v55  ;;  %v2590_v58 = vrot.slane %v5247_v32, 4  ;;  %6423 = vst [vmem:[#allocation6_spill] sm:$0xff] %v5271_v16  ;;  %v2781_v51 = vmul.f32 %v6332_v12, %v6399_v48  ;;  %v2993_v32 = vpop.permute.xlu0 %2992 }
 0x130   : > { %v3528_v13 = vpop.eup %3527  ;;  %v1160_v26 = vadd.f32 1.0, %v3526_v21  ;;  %v5267_v21 = vld [vmem:[#allocation2 + $0x70] sm:$0xff]  ;;  %v2591_v1 = vrot.slane %v2553_v60, 4 }
 0x131   : > { %v2975_v0 = vmul.f32 0.5, %v2967_v56  ;;  %v1161_v11 = vadd.f32 1.0, %v3528_v13  ;;  %6422 = vst [vmem:[#allocation54_spill] sm:$0xff] %v5267_v21  ;;  %v2705_v2 = vmul.f32 %v5267_v21, %v4373_v46  ;;  %v2706_v56 = vmul.f32 %v5271_v16, %v4373_v46 }
 0x132   : > { %v1176_v49 = vmul.f32 0.5, %v1160_v26  ;;  %v2782_v26 = vmul.f32 %v6332_v12, %v6411_v24  ;;  %v2666_v21 = vrot.slane %v2629_v27, 4  ;;  %v1311_v16 = vmul.f32 %v5283_v9, %v6390_v33  ;;  %v5298_v27 = vld [vmem:[#allocation2 + $0x30] sm:$0xff] }
 0x133   : > { %v2983_v39 = vmul.f32 %v2975_v0, %v5106_v23  ;;  %v1177_v13 = vmul.f32 0.5, %v1161_v11  ;;  %v2667_v0 = vrot.slane %v2630_v3, 4  ;;  %v2743_v60 = vrot.slane %v2706_v56, 4  ;;  %v5311_v56 = vld [vmem:[#allocation2 + $0x28] sm:$0xf] }
 0x134   : > { %v5281_v55 = vmul.f32 %v1176_v49, %v5108_v10  ;;  %v2742_v10 = vrot.slane %v2705_v2, 4  ;;  %v1323_v11 = vmul.f32 %v5298_v27, %v6392_v18  ;;  %v2819_v3 = vrot.slane %v2782_v26, 4 }
 0x135   : > { %v5287_v46 = vmul.f32 %v2993_v32, %v2983_v39  ;;  %v3071_v23 = vsel %vm344_vm0, %v2983_v39, 0.0  ;;  %v5291_v48 = vmul.f32 %v1177_v13, %v5110_v52  ;;  %v2818_v52 = vrot.slane %v2781_v51, 4  ;;  %v5305_v39 = vld [vmem:[#allocation2 + $0x40] sm:$0xff] }
 0x136   : > { %6424 = vst [vmem:[#allocation55_spill] sm:$0xff] %v5281_v55  ;;  %v5294_v24 = vadd.f32 %v5148_v4, %v3071_v23  ;;  %1274 = vst.msk [vmem:[#allocation2 + $0x91] sm:$0xfe] %vm1258_vm5, %v5281_v55  ;;  %v1343_v4 = vmul.f32 %v5305_v39, %v6359_v40  ;;  %v1331_v13 = vadd.f32 %v1323_v11, %v1311_v16  ;;  %v5325_v16 = vld [vmem:[#allocation2 + $0x38] sm:$0xf] }
 0x137   : > { %6425 = vst [vmem:[#allocation3_spill] sm:$0xff] %v5287_v46  ;;  %6426 = vst [vmem:[#allocation11_spill] sm:$0xff] %v5291_v48  ;;  %v6216_v49 = vrot.slane %v5287_v46, 7  ;;  %v1405_v2 = vmul.f32 %v5283_v9, %v6395_v53  ;;  %v1406_v32 = vmul.f32 %v5311_v56, %v6395_v53  ;;  %v1481_v23 = vmul.f32 %v5298_v27, %v6401_v37 }
 0x138   : > { %6427 = vst [vmem:[#allocation8_spill] sm:$0xff] %v5294_v24  ;;  %1275 = vst.msk [vmem:[#allocation2 + $0x99] sm:$0x1] %vm1260_vm6, %v5291_v48  ;;  %v5323_v26 = vsel %vm2193_vm7, %v2285_v57, %v2286_v63  ;;  %v1482_v11 = vmul.f32 %v5325_v16, %v6401_v37  ;;  %v1557_v48 = vmul.f32 %v5305_v39, %v6409_v62 }
 0x139   : > { %v5320_v51 = vadd.f32 %v6216_v49, %v5138_v14  ;;  %v1351_v55 = vadd.f32 %v1343_v4, %v1331_v13  ;;  %v1363_v24 = vmul.f32 %v5243_v35, %v6400_v61  ;;  %v1439_v53 = vrot.slane %v1405_v2, 1 }
 0x13a   : > { %v1440_v40 = vrot.slane %v1406_v32, 1  ;;  %v5334_v14 = vsel %vm2193_vm7, %v2361_v19, %v2362_v15  ;;  %v5337_v57 = vsel %vm2193_vm7, %v2437_v28, %v2438_v25  ;;  %v5340_v63 = vsel %vm2574_vm8, %v2590_v58, %v2591_v1  ;;  %v6432_v19 = vld [vmem:[#allocation24_spill] sm:$0xff] }
 0x13b   : > { %6428 = vst [vmem:[#allocation4_spill] sm:$0xff] %v5320_v51  ;;  %v5343_v49 = vsel %vm2574_vm8, %v2666_v21, %v2667_v0  ;;  %v5346_v51 = vsel %vm2574_vm8, %v2742_v10, %v2743_v60  ;;  %v5349_v4 = vsel %vm2574_vm8, %v2818_v52, %v2819_v3  ;;  %v1515_v13 = vrot.slane %v1481_v23, 1  ;;  %v5355_v28 = vld [vmem:[#allocation2 + $0x48] sm:$0xf] }
 0x13c   : > { %6429 = vst [vmem:[#allocation10_spill] sm:$0xff] %v5343_v49  ;;  %6430 = vst [vmem:[#allocation40_spill] sm:$0xff] %v5346_v51  ;;  %v1516_v2 = vrot.slane %v1482_v11, 1  ;;  %v1383_v15 = vmul.f32 %v5192_v54, %v6432_v19  ;;  %v1558_v1 = vmul.f32 %v5355_v28, %v6409_v62  ;;  %v1591_v25 = vrot.slane %v1557_v48, 1  ;;  %v6434_v10 = vld [vmem:[#allocation28_spill] sm:$0xff] }
 0x13d   : > { %6431 = vst [vmem:[#allocation63_spill] sm:$0xff] %v5349_v4  ;;  %v5351_v32 = vld [vmem:[#allocation2 + $0x90] sm:$0xff]  ;;  %v1633_v58 = vmul.f32 %v5243_v35, %v6365_v50  ;;  %v1371_v52 = vadd.f32 %v1363_v24, %v1351_v55  ;;  %v1441_v3 = vsel %vm532_vm3, %v1439_v53, %v1440_v40  ;;  %v1634_v40 = vmul.f32 %v5255_v34, %v6365_v50 }
 0x13e   : > { %v1386_v0 = vmul.f32 %v6432_v19, %v5351_v32  ;;  %v1715_v60 = vmul.f32 %v6434_v10, %v5351_v32  ;;  %v5372_v48 = vmul.f32 %v6355_v7, %v5351_v32  ;;  %v5380_v46 = vmul.f32 %v6356_v44, %v5351_v32 }
 0x13f   : > { %v5361_v21 = vld [vmem:[#allocation2 + $0x98] sm:$0xf]  ;;  %v1517_v55 = vsel %vm532_vm3, %v1515_v13, %v1516_v2  ;;  %v1709_v53 = vmul.f32 %v5192_v54, %v6434_v10  ;;  %v1592_v37 = vrot.slane %v1558_v1, 1  ;;  %v1667_v18 = vrot.slane %v1633_v58, 1 }
 0x140   : > { %6433 = vst [vmem:[#allocation61_spill] sm:$0xff] %v5361_v21  ;;  %v1716_v23 = vmul.f32 %v6434_v10, %v5361_v21  ;;  %v5376_v11 = vmul.f32 %v6355_v7, %v5361_v21  ;;  %v1394_v62 = vadd.f32 %v1386_v0, %v5157_v38  ;;  %v5390_v24 = vmul.f32 %v6356_v44, %v5361_v21 }
 0x141   : > { %v1710_v33 = vmul.f32 %v5262_v17, %v6434_v10  ;;  %v1752_v38 = vrot.slane %v1715_v60, 1  ;;  %v1391_v13 = vadd.f32 %v1383_v15, %v1371_v52  ;;  %v2132_v2 = vrot.slane %v5372_v48, 2 }
 0x142   : > { %v1470_v19 = vadd.f32 %v5162_v43, %v1394_v62  ;;  %v1753_v0 = vrot.slane %v1716_v23, 1  ;;  %v2133_v61 = vrot.slane %v5376_v11, 2  ;;  %v2513_v4 = vrot.slane %v5380_v46, 3  ;;  %v6439_v46 = vld [vmem:[#allocation46_spill] sm:$0xff] }
 0x143   : > { %v5400_v51 = vmul.f32 %v6357_v22, %v5351_v32  ;;  %v1467_v58 = vadd.f32 %v1441_v3, %v1391_v13  ;;  %v1668_v49 = vrot.slane %v1634_v40, 1  ;;  %v1743_v10 = vrot.slane %v1709_v53, 1 }
 0x144   : > { %v1546_v1 = vadd.f32 %v5211_v30, %v1470_v19  ;;  %v1593_v43 = vsel %vm532_vm3, %v1591_v25, %v1592_v37  ;;  %v1744_v62 = vrot.slane %v1710_v33, 1  ;;  %v1785_v15 = vmul.f32 %v5283_v9, %v6412_v42 }
 0x145   : > { %v1786_v60 = vmul.f32 %v5311_v56, %v6412_v42  ;;  %v1754_v23 = vsel %vm532_vm3, %v1752_v38, %v1753_v0  ;;  %v1543_v48 = vadd.f32 %v1517_v55, %v1467_v58  ;;  %v1861_v30 = vmul.f32 %v5298_v27, %v6413_v20 }
 0x146   : > { %v1622_v52 = vadd.f32 %v5214_v6, %v1546_v1  ;;  %v1669_v19 = vsel %vm532_vm3, %v1667_v18, %v1668_v49  ;;  %v1819_v3 = vrot.slane %v1785_v15, 2  ;;  %v1862_v33 = vmul.f32 %v5325_v16, %v6413_v20 }
 0x147   : > { %v1820_v11 = vrot.slane %v1786_v60, 2  ;;  %v1619_v25 = vadd.f32 %v1593_v43, %v1543_v48  ;;  %v1745_v40 = vsel %vm532_vm3, %v1743_v10, %v1744_v62  ;;  %v1937_v6 = vmul.f32 %v5305_v39, %v6414_v31 }
 0x148   : > { %v1698_v37 = vadd.f32 %v5217_v8, %v1622_v52  ;;  %v1895_v53 = vrot.slane %v1861_v30, 2  ;;  %v1896_v55 = vrot.slane %v1862_v33, 2  ;;  %v1938_v38 = vmul.f32 %v5355_v28, %v6414_v31 }
 0x149   : > { %v2013_v18 = vmul.f32 %v5243_v35, %v4286_v36  ;;  %v1695_v0 = vadd.f32 %v1669_v19, %v1619_v25  ;;  %v1821_v13 = vsel %vm809_vm4, %v1819_v3, %v1820_v11  ;;  %v2014_v8 = vmul.f32 %v5255_v34, %v4286_v36 }
 0x14a   : > { %v1774_v49 = vadd.f32 %v1754_v23, %v1698_v37  ;;  %v1971_v1 = vrot.slane %v1937_v6, 2  ;;  %v1972_v10 = vrot.slane %v1938_v38, 2  ;;  %v2089_v43 = vmul.f32 %v5192_v54, %v6355_v7 }
 0x14b   : > { %v2047_v58 = vrot.slane %v2013_v18, 2  ;;  %v1771_v15 = vadd.f32 %v1745_v40, %v1695_v0  ;;  %v2048_v60 = vrot.slane %v2014_v8, 2  ;;  %v2090_v52 = vmul.f32 %v5262_v17, %v6355_v7 }
 0x14c   : > { %v1850_v62 = vadd.f32 %v5224_v5, %v1774_v49  ;;  %v1897_v23 = vsel %vm809_vm4, %v1895_v53, %v1896_v55  ;;  %v2123_v48 = vrot.slane %v2089_v43, 2  ;;  %v2165_v30 = vmul.f32 %v5283_v9, %v6415_v59  ;;  %v6435_v49 = vld [vmem:[#allocation49_spill] sm:$0xff]  ;;  %v6436_v43 = vld [vmem:[#allocation42_spill] sm:$0xff] }
 0x14d   : > { %v2166_v19 = vmul.f32 %v5311_v56, %v6415_v59  ;;  %v2514_v11 = vrot.slane %v5390_v24, 3  ;;  %v1847_v33 = vadd.f32 %v1821_v13, %v1771_v15  ;;  %v2124_v5 = vrot.slane %v2090_v52, 2 }
 0x14e   : > { %v1926_v3 = vadd.f32 %v5227_v47, %v1850_v62  ;;  %v2134_v37 = vsel %vm809_vm4, %v2132_v2, %v2133_v61  ;;  %v1973_v25 = vsel %vm809_vm4, %v1971_v1, %v1972_v10  ;;  %v2242_v40 = vmul.f32 %v5298_v27, %v6416_v41 }
 0x14f   : > { %v2243_v6 = vmul.f32 %v5325_v16, %v6416_v41  ;;  %v1923_v55 = vadd.f32 %v1897_v23, %v1847_v33  ;;  %v2049_v38 = vsel %vm809_vm4, %v2047_v58, %v2048_v60  ;;  %v2318_v47 = vmul.f32 %v5305_v39, %v6344_v45 }
 0x150   : > { %v2002_v53 = vadd.f32 %v5230_v29, %v1926_v3  ;;  %v2125_v24 = vsel %vm809_vm4, %v2123_v48, %v2124_v5  ;;  %v2200_v18 = vrot.slane %v2165_v30, 3  ;;  %v2201_v61 = vrot.slane %v2166_v19, 3  ;;  %v6437_v3 = vld [vmem:[#allocation37_spill] sm:$0xff]  ;;  %v6438_v5 = vld [vmem:[#allocation7_spill] sm:$0xff] }
 0x151   : > { %v2319_v2 = vmul.f32 %v5355_v28, %v6344_v45  ;;  %v1999_v13 = vadd.f32 %v1973_v25, %v1923_v55  ;;  %v2276_v8 = vrot.slane %v2242_v40, 3  ;;  %v2277_v1 = vrot.slane %v2243_v6, 3 }
 0x152   : > { %v2078_v0 = vadd.f32 %v6435_v49, %v2002_v53  ;;  %v2352_v10 = vrot.slane %v2318_v47, 3  ;;  %v2394_v58 = vmul.f32 %v5243_v35, %v6436_v43  ;;  %v2395_v62 = vmul.f32 %v5255_v34, %v6436_v43 }
 0x153   : > { %v2353_v29 = vrot.slane %v2319_v2, 3  ;;  %v2075_v60 = vadd.f32 %v2049_v38, %v1999_v13  ;;  %v2470_v52 = vmul.f32 %v5192_v54, %v6356_v44  ;;  %v2471_v23 = vmul.f32 %v5262_v17, %v6356_v44 }
 0x154   : > { %v2154_v15 = vadd.f32 %v2134_v37, %v2078_v0  ;;  %v2858_v48 = vmul.f32 %v6357_v22, %v5361_v21  ;;  %v2894_v30 = vrot.slane %v5400_v51, 4  ;;  %v2202_v19 = vsel %vm2193_vm7, %v2200_v18, %v2201_v61  ;;  %v6440_v0 = vld [vmem:[#allocation50_spill] sm:$0xff] }
 0x155   : > { %v2546_v33 = vmul.f32 %v5283_v9, %v6437_v3  ;;  %v2515_v37 = vsel %vm2193_vm7, %v2513_v4, %v2514_v11  ;;  %v2151_v40 = vadd.f32 %v2125_v24, %v2075_v60  ;;  %v2547_v6 = vmul.f32 %v5311_v56, %v6437_v3 }
 0x156   : > { %v2231_v25 = vadd.f32 %v6438_v5, %v2154_v15  ;;  %v2278_v53 = vsel %vm2193_vm7, %v2276_v8, %v2277_v1  ;;  %v2354_v55 = vsel %vm2193_vm7, %v2352_v10, %v2353_v29  ;;  %v2428_v51 = vrot.slane %v2394_v58, 3 }
 0x157   : > { %v2429_v38 = vrot.slane %v2395_v62, 3  ;;  %v2228_v18 = vadd.f32 %v2202_v19, %v2151_v40  ;;  %v2504_v9 = vrot.slane %v2470_v52, 3  ;;  %v2505_v61 = vrot.slane %v2471_v23, 3  ;;  %v5496_v40 = vld [vmem:[#allocation2 + $0xa8] sm:$0xf] }
 0x158   : > { %v2307_v47 = vadd.f32 %v5323_v26, %v2231_v25  ;;  %v2581_v2 = vrot.slane %v2546_v33, 4  ;;  %v2582_v49 = vrot.slane %v2547_v6, 4  ;;  %v2623_v4 = vmul.f32 %v5298_v27, %v6439_v46  ;;  %6441 = vst [vmem:[#allocation69_spill] sm:$0xff] %v5496_v40 }
 0x159   : > { %v2624_v11 = vmul.f32 %v5325_v16, %v6439_v46  ;;  %v2304_v24 = vadd.f32 %v2278_v53, %v2228_v18  ;;  %v2699_v13 = vmul.f32 %v5305_v39, %v6440_v0  ;;  %v2700_v26 = vmul.f32 %v5355_v28, %v6440_v0 }
 0x15a   : > { %v2383_v56 = vadd.f32 %v5334_v14, %v2307_v47  ;;  %v2895_v8 = vrot.slane %v2858_v48, 4  ;;  %v2430_v1 = vsel %vm2193_vm7, %v2428_v51, %v2429_v38  ;;  %v2775_v10 = vmul.f32 %v5243_v35, %v6332_v12 }
 0x15b   : > { %v2776_v29 = vmul.f32 %v5255_v34, %v6332_v12  ;;  %v2380_v62 = vadd.f32 %v2354_v55, %v2304_v24  ;;  %v2506_v14 = vsel %vm2193_vm7, %v2504_v9, %v2505_v61  ;;  %v2851_v15 = vmul.f32 %v5192_v54, %v6357_v22  ;;  %v1298_v9 = vld [vmem:[#allocation2 + $0xb0] sm:$0xff]  ;;  %v6442_v61 = vld [vmem:[#allocation48_spill] sm:$0xff]  ;;  %v6444_v24 = vld [vmem:[#allocation10_spill] sm:$0xff] }
 0x15c   : > { %v2459_v58 = vadd.f32 %v5337_v57, %v2383_v56  ;;  %v2583_v60 = vsel %vm2574_vm8, %v2581_v2, %v2582_v49  ;;  %v2657_v52 = vrot.slane %v2623_v4, 4  ;;  %v2658_v23 = vrot.slane %v2624_v11, 4  ;;  %v5498_v57 = vld [vmem:[#allocation2 + $0xb8] sm:$0xf]  ;;  %v6443_v4 = vld [vmem:[#allocation28_spill] sm:$0xff] }
 0x15d   : > { %v2852_v48 = vmul.f32 %v5262_v17, %v6357_v22  ;;  %v2456_v33 = vadd.f32 %v2430_v1, %v2380_v62  ;;  %v2733_v5 = vrot.slane %v2699_v13, 4  ;;  %v2734_v25 = vrot.slane %v2700_v26, 4 }
 0x15e   : > { %v2535_v19 = vadd.f32 %v2515_v37, %v2459_v58  ;;  %v2809_v6 = vrot.slane %v2775_v10, 4  ;;  %v2810_v53 = vrot.slane %v2776_v29, 4  ;;  %v2885_v55 = vrot.slane %v2851_v15, 4  ;;  %v6445_v58 = vld [vmem:[#allocation40_spill] sm:$0xff] }
 0x15f   : > { %v2886_v51 = vrot.slane %v2852_v48, 4  ;;  %v2896_v47 = vsel %vm2574_vm8, %v2894_v30, %v2895_v8  ;;  %v2532_v18 = vadd.f32 %v2506_v14, %v2456_v33  ;;  %v1643_v37 = vmul.f32 %v6365_v50, %v6442_v61  ;;  %v6446_v33 = vld [vmem:[#allocation63_spill] sm:$0xff] }
 0x160   : > { %v2612_v38 = vadd.f32 %v5340_v63, %v2535_v19  ;;  %v2659_v2 = vsel %vm2574_vm8, %v2657_v52, %v2658_v23  ;;  %v1644_v49 = vmul.f32 %v6365_v50, %v5496_v40  ;;  %v1719_v11 = vmul.f32 %v6443_v4, %v1298_v9 }
 0x161   : > { %v1720_v56 = vmul.f32 %v6443_v4, %v5498_v57  ;;  %v2609_v63 = vadd.f32 %v2583_v60, %v2532_v18  ;;  %v2735_v30 = vsel %vm2574_vm8, %v2733_v5, %v2734_v25  ;;  %v2023_v26 = vmul.f32 %v4286_v36, %v6442_v61 }
 0x162   : > { %v2688_v13 = vadd.f32 %v6444_v24, %v2612_v38  ;;  %v2811_v8 = vsel %vm2574_vm8, %v2809_v6, %v2810_v53  ;;  %v2887_v1 = vsel %vm2574_vm8, %v2885_v55, %v2886_v51  ;;  %v1682_v10 = vrot.slane %v1643_v37, 1  ;;  %v6447_v37 = vld [vmem:[#allocation62_spill] sm:$0xff] }
 0x163   : > { %v2024_v29 = vmul.f32 %v4286_v36, %v5496_v40  ;;  %v2685_v14 = vadd.f32 %v2659_v2, %v2609_v63  ;;  %v1683_v15 = vrot.slane %v1644_v49, 1  ;;  %v2099_v52 = vmul.f32 %v6355_v7, %v1298_v9  ;;  %v6448_v2 = vld [vmem:[#allocation12_spill] sm:$0xff] }
 0x164   : > { %v2764_v62 = vadd.f32 %v6445_v58, %v2688_v13  ;;  %v1758_v60 = vrot.slane %v1719_v11, 1  ;;  %v1759_v23 = vrot.slane %v1720_v56, 1  ;;  %v2062_v48 = vrot.slane %v2023_v26, 2  ;;  %v6450_v13 = vld [vmem:[#allocation23_spill] sm:$0xff] }
 0x165   : > { %v2100_v19 = vmul.f32 %v6355_v7, %v5498_v57  ;;  %v2761_v25 = vadd.f32 %v2735_v30, %v2685_v14  ;;  %v2063_v6 = vrot.slane %v2024_v29, 2  ;;  %v2404_v53 = vmul.f32 %v6436_v43, %v6442_v61 }
 0x166   : > { %v2840_v5 = vadd.f32 %v6446_v33, %v2764_v62  ;;  %v2138_v55 = vrot.slane %v2099_v52, 2  ;;  %v2405_v38 = vmul.f32 %v6436_v43, %v5496_v40  ;;  %v2480_v18 = vmul.f32 %v6356_v44, %v1298_v9 }
 0x167   : > { %v2139_v51 = vrot.slane %v2100_v19, 2  ;;  %v5530_v49 = vmul.f32 %v6448_v2, %v6447_v37  ;;  %v2837_v56 = vadd.f32 %v2811_v8, %v2761_v25  ;;  %v2481_v24 = vmul.f32 %v6356_v44, %v5498_v57  ;;  %v6459_v37 = vld [vmem:[#allocation25_spill] sm:$0xff]  ;;  %v5593_v44 = vld [vmem:[#allocation2 + $0x88] sm:$0xf] }
 0x168   : > { %v5532_v11 = vadd.f32 %v2896_v47, %v2840_v5  ;;  %v1368_v63 = vmul.f32 %v6450_v13, %v6442_v61  ;;  %v2443_v30 = vrot.slane %v2404_v53, 3  ;;  %v2444_v26 = vrot.slane %v2405_v38, 3  ;;  %v6451_v47 = vld [vmem:[#allocation24_spill] sm:$0xff]  ;;  %v5572_v53 = vld [vmem:[#allocation2 + $0x80] sm:$0xff] }
 0x169   : > { %6449 = vst [vmem:[#allocation64_spill] sm:$0xff] %v5530_v49  ;;  %v5540_v29 = vmul.f32 %v6332_v12, %v6442_v61  ;;  %v5544_v62 = vadd.f32 %v2887_v1, %v2837_v56  ;;  %v1388_v14 = vmul.f32 %v6451_v47, %v1298_v9  ;;  %v5548_v8 = vsel %vm532_vm3, %v1682_v10, %v1683_v15  ;;  %v6456_v56 = vld [vmem:[#allocation22_spill] sm:$0xff] }
 0x16a   : > { %v2924_v58 = vmul.f32 %v5532_v11, %v5532_v11  ;;  %v5551_v52 = vsel %vm532_vm3, %v1758_v60, %v1759_v23  ;;  %v5554_v19 = vsel %vm809_vm4, %v2062_v48, %v2063_v6  ;;  %v5557_v33 = vsel %vm809_vm4, %v2138_v55, %v2139_v51  ;;  %v6453_v23 = vld [vmem:[#allocation19_spill] sm:$0xff]  ;;  %v6454_v48 = vld [vmem:[#allocation54_spill] sm:$0xff]  ;;  %v6455_v55 = vld [vmem:[#allocation21_spill] sm:$0xff] }
 0x16b   : > { %v2519_v61 = vrot.slane %v2480_v18, 3  ;;  %v2921_v1 = vmul.f32 %v5544_v62, %v5544_v62  ;;  %v2520_v25 = vrot.slane %v2481_v24, 3  ;;  %v5564_v10 = vmul.f32 %v6332_v12, %v5496_v40  ;;  %v6458_v40 = vld [vmem:[#allocation6_spill] sm:$0xff] }
 0x16c   : > { %v2932_v5 = vmul.f32 %v2924_v58, %v5532_v11  ;;  %v5567_v15 = vsel %vm2193_vm7, %v2443_v30, %v2444_v26  ;;  %v1316_v6 = vmul.f32 %v6454_v48, %v6453_v23  ;;  %v1328_v51 = vmul.f32 %v5572_v53, %v6455_v55  ;;  %v6457_v58 = vld [vmem:[#allocation18_spill] sm:$0xff] }
 0x16d   : > { %6452 = vst [vmem:[#allocation67_spill] sm:$0xff] %v5567_v15  ;;  %v2929_v18 = vmul.f32 %v2921_v1, %v5544_v62  ;;  %v5578_v2 = vmul.f32 %v6357_v22, %v1298_v9  ;;  %v1348_v24 = vmul.f32 %v6456_v56, %v5351_v32  ;;  %v5584_v30 = vmul.f32 %v6357_v22, %v5498_v57 }
 0x16e   : > { %v2940_v38 = vmul.f32 0.044715, %v2932_v5  ;;  %v1336_v26 = vadd.f32 %v1328_v51, %v1316_v6  ;;  %v1415_v60 = vmul.f32 %v6454_v48, %v6457_v58  ;;  %v1416_v12 = vmul.f32 %v6458_v40, %v6457_v58  ;;  %v6460_v51 = vld [vmem:[#allocation26_spill] sm:$0xff] }
 0x16f   : > { %v2937_v1 = vmul.f32 0.044715, %v2929_v18  ;;  %v1491_v9 = vmul.f32 %v5572_v53, %v6459_v37  ;;  %v1492_v49 = vmul.f32 %v5593_v44, %v6459_v37  ;;  %v1567_v43 = vmul.f32 %v6460_v51, %v5351_v32 }
 0x170   : > { %v2948_v5 = vadd.f32 %v2940_v38, %v5532_v11  ;;  %v1356_v57 = vadd.f32 %v1348_v24, %v1336_v26  ;;  %v1454_v22 = vrot.slane %v1415_v60, 1  ;;  %v1455_v6 = vrot.slane %v1416_v12, 1 }
 0x171   : > { %v2945_v36 = vadd.f32 %v2937_v1, %v5544_v62  ;;  %v1530_v15 = vrot.slane %v1491_v9, 1  ;;  %v1531_v38 = vrot.slane %v1492_v49, 1  ;;  %v5601_v18 = vsel %vm2193_vm7, %v2519_v61, %v2520_v25 }
 0x172   : > { %v2956_v7 = vmul.f32 0.7978846, %v2948_v5  ;;  %v1376_v4 = vadd.f32 %v1368_v63, %v1356_v57  ;;  %v1568_v17 = vmul.f32 %v6460_v51, %v5361_v21  ;;  %v1606_v50 = vrot.slane %v1567_v43, 1 }
 0x173   : > { %v2953_v24 = vmul.f32 0.7978846, %v2945_v36  ;;  %v1456_v12 = vsel %vm532_vm3, %v1454_v22, %v1455_v6  ;;  %v1795_v60 = vmul.f32 %v6454_v48, %v6412_v42  ;;  %v1796_v49 = vmul.f32 %v6458_v40, %v6412_v42 }
 0x174   : > { %3529 = vtanh.f32 %v2956_v7  ;;  %v1396_v26 = vadd.f32 %v1388_v14, %v1376_v4  ;;  %v1607_v5 = vrot.slane %v1568_v17, 1  ;;  %v1871_v61 = vmul.f32 %v5572_v53, %v6413_v20 }
 0x175   : > { %3531 = vtanh.f32 %v2953_v24  ;;  %v1532_v63 = vsel %vm532_vm3, %v1530_v15, %v1531_v38  ;;  %v1872_v7 = vmul.f32 %v5593_v44, %v6413_v20  ;;  %v1947_v36 = vmul.f32 %v6414_v31, %v5351_v32 }
 0x176   : > { %v2825_v22 = vrot.slane %v5564_v10, 4  ;;  %v1472_v43 = vadd.f32 %v1456_v12, %v1396_v26  ;;  %v1608_v17 = vsel %vm532_vm3, %v1606_v50, %v1607_v5  ;;  %v1834_v4 = vrot.slane %v1795_v60, 2 }
 0x177   : > { %v1835_v14 = vrot.slane %v1796_v49, 2  ;;  %v1910_v25 = vrot.slane %v1871_v61, 2  ;;  %v1948_v1 = vmul.f32 %v6414_v31, %v5361_v21  ;;  %v2175_v15 = vmul.f32 %v6454_v48, %v6415_v59 }
 0x178   : > { %v1548_v9 = vadd.f32 %v1532_v63, %v1472_v43  ;;  %v1911_v57 = vrot.slane %v1872_v7, 2  ;;  %v2176_v6 = vmul.f32 %v6458_v40, %v6415_v59  ;;  %v2252_v10 = vmul.f32 %v5572_v53, %v6416_v41 }
 0x179   : > { %v1986_v50 = vrot.slane %v1947_v36, 2  ;;  %v1987_v24 = vrot.slane %v1948_v1, 2  ;;  %v2253_v12 = vmul.f32 %v5593_v44, %v6416_v41  ;;  %v2215_v26 = vrot.slane %v2175_v15, 3 }
 0x17a   : > { %v1624_v60 = vadd.f32 %v1608_v17, %v1548_v9  ;;  %v2216_v5 = vrot.slane %v2176_v6, 3  ;;  %v2328_v49 = vmul.f32 %v6344_v45, %v5351_v32  ;;  %v2291_v63 = vrot.slane %v2252_v10, 3 }
 0x17b   : > { %v2292_v7 = vrot.slane %v2253_v12, 3  ;;  %v2329_v43 = vmul.f32 %v6344_v45, %v5361_v21  ;;  %v6461_v38 = vrot.slane %v5540_v29, 4  ;;  %v1836_v17 = vsel %vm809_vm4, %v1834_v4, %v1835_v14 }
 0x17c   : > { %v1700_v1 = vadd.f32 %v5548_v8, %v1624_v60  ;;  %v1912_v15 = vsel %vm809_vm4, %v1910_v25, %v1911_v57  ;;  %v2367_v6 = vrot.slane %v2328_v49, 3  ;;  %v2556_v10 = vmul.f32 %v6454_v48, %v6437_v3 }
 0x17d   : > { %v5638_v36 = vsel %vm2574_vm8, %v6461_v38, %v2825_v22  ;;  %v2368_v41 = vrot.slane %v2329_v43, 3  ;;  %v2557_v12 = vmul.f32 %v6458_v40, %v6437_v3  ;;  %v1988_v22 = vsel %vm809_vm4, %v1986_v50, %v1987_v24  ;;  %v3013_v50 = vpop.permute.xlu0 %3012 }
 0x17e   : > { %v3530_v9 = vpop.eup %3529  ;;  %v1776_v29 = vadd.f32 %v5551_v52, %v1700_v1  ;;  %v2217_v8 = vsel %vm2193_vm7, %v2215_v26, %v2216_v5  ;;  %v2293_v4 = vsel %vm2193_vm7, %v2291_v63, %v2292_v7  ;;  %v2633_v14 = vmul.f32 %v5572_v53, %v6439_v46 }
 0x17f   : > { %v2972_v61 = vadd.f32 1.0, %v3530_v9  ;;  %v3532_v38 = vpop.eup %3531  ;;  %v2634_v25 = vmul.f32 %v5593_v44, %v6439_v46  ;;  %v2709_v57 = vmul.f32 %v6440_v0, %v5351_v32  ;;  %v2710_v52 = vmul.f32 %v6440_v0, %v5361_v21 }
 0x180   : > { %v2969_v49 = vadd.f32 1.0, %v3532_v38  ;;  %v1852_v43 = vadd.f32 %v1836_v17, %v1776_v29  ;;  %v2369_v24 = vsel %vm2193_vm7, %v2367_v6, %v2368_v41  ;;  %v2596_v26 = vrot.slane %v2556_v10, 4 }
 0x181   : > { %v2980_v60 = vmul.f32 0.5, %v2972_v61  ;;  %v2597_v5 = vrot.slane %v2557_v12, 4  ;;  %v1312_v63 = vmul.f32 %v5298_v27, %v6453_v23  ;;  %v1324_v61 = vmul.f32 %v5305_v39, %v6455_v55 }
 0x182   : > { %v2977_v1 = vmul.f32 0.5, %v2969_v49  ;;  %v1928_v9 = vadd.f32 %v1912_v15, %v1852_v43  ;;  %v2672_v17 = vrot.slane %v2633_v14, 4  ;;  %v2673_v29 = vrot.slane %v2634_v25, 4 }
 0x183   : > { %v5663_v7 = vmul.f32 %v2980_v60, %v5532_v11  ;;  %v2748_v38 = vrot.slane %v2709_v57, 4  ;;  %v1344_v21 = vmul.f32 %v5243_v35, %v6456_v56  ;;  %v2749_v12 = vrot.slane %v2710_v52, 4 }
 0x184   : > { %v5671_v6 = vmul.f32 %v2977_v1, %v5544_v62  ;;  %v2004_v10 = vadd.f32 %v1988_v22, %v1928_v9  ;;  %v1332_v11 = vadd.f32 %v1324_v61, %v1312_v63  ;;  %v1364_v15 = vmul.f32 %v5192_v54, %v6450_v13  ;;  %v6464_v22 = vld [vmem:[#allocation8_spill] sm:$0xff]  ;;  %v6465_v1 = vld [vmem:[#allocation65_spill] sm:$0xff] }
 0x185   : > { %6462 = vst [vmem:[#allocation53_spill] sm:$0xff] %v5663_v7  ;;  %v3028_v41 = vmul.f32 %v3013_v50, %v5663_v7  ;;  %v1407_v60 = vmul.f32 %v5298_v27, %v6457_v58  ;;  %v1408_v14 = vmul.f32 %v5325_v16, %v6457_v58  ;;  %v1384_v62 = vmul.f32 %v6454_v48, %v6451_v47  ;;  %v6467_v61 = vld [vmem:[#allocation9_spill] sm:$0xff] }
 0x186   : > { %6463 = vst [vmem:[#allocation17_spill] sm:$0xff] %v5671_v6  ;;  %v3074_v57 = vsel %vm344_vm0, %v5671_v6, 0.0  ;;  %v2080_v49 = vadd.f32 %v5554_v19, %v2004_v10  ;;  %v1352_v52 = vadd.f32 %v1344_v21, %v1332_v11  ;;  %v2598_v6 = vsel %vm2574_vm8, %v2596_v26, %v2597_v5 }
 0x187   : > { %v3044_v25 = vrot.slane %v3028_v41, 7  ;;  %v5685_v43 = vadd.f32 %v3074_v57, %v6464_v22  ;;  %v1442_v50 = vrot.slane %v1407_v60, 1  ;;  %v1443_v63 = vrot.slane %v1408_v14, 1 }
 0x188   : > { %v2156_v41 = vadd.f32 %v5557_v33, %v2080_v49  ;;  %v2674_v19 = vsel %vm2574_vm8, %v2672_v17, %v2673_v29  ;;  %v1372_v10 = vadd.f32 %v1364_v15, %v1352_v52  ;;  %v1483_v57 = vmul.f32 %v5305_v39, %v6459_v37  ;;  %v6469_v15 = vld [vmem:[#allocation27_spill] sm:$0xff] }
 0x189   : > { %v5688_v9 = vadd.f32 %v3044_v25, %v6465_v1  ;;  %v5691_v7 = vadd.f32 %v3044_v25, %v6467_v61  ;;  %v1484_v21 = vmul.f32 %v5355_v28, %v6459_v37  ;;  %v2750_v60 = vsel %vm2574_vm8, %v2748_v38, %v2749_v12 }
 0x18a   : > { %v2233_v11 = vadd.f32 %v2217_v8, %v2156_v41  ;;  %v1444_v14 = vsel %vm532_vm3, %v1442_v50, %v1443_v63  ;;  %v1559_v25 = vmul.f32 %v5243_v35, %v6460_v51  ;;  %v1392_v33 = vadd.f32 %v1384_v62, %v1372_v10  ;;  %v6470_v8 = vld [vmem:[#allocation13_spill] sm:$0xff]  ;;  %v6471_v63 = vld [vmem:[#allocation28_spill] sm:$0xff] }
 0x18b   : > { %6466 = vst [vmem:[#allocation32_spill] sm:$0xff] %v5688_v9  ;;  %6468 = vst [vmem:[#allocation29_spill] sm:$0xff] %v5691_v7  ;;  %v1518_v49 = vrot.slane %v1483_v57, 1  ;;  %v1519_v26 = vrot.slane %v1484_v21, 1  ;;  %v1560_v5 = vmul.f32 %v5255_v34, %v6460_v51  ;;  %v1635_v22 = vmul.f32 %v5192_v54, %v6469_v15 }
 0x18c   : > { %v2309_v17 = vadd.f32 %v2293_v4, %v2233_v11  ;;  %v1594_v29 = vrot.slane %v1559_v25, 1  ;;  %v1636_v52 = vmul.f32 %v6470_v8, %v6469_v15  ;;  %v1468_v38 = vadd.f32 %v1444_v14, %v1392_v33  ;;  %v6472_v14 = vld [vmem:[#allocation67_spill] sm:$0xff] }
 0x18d   : > { %v1520_v12 = vsel %vm532_vm3, %v1518_v49, %v1519_v26  ;;  %v1595_v50 = vrot.slane %v1560_v5, 1  ;;  %v1711_v62 = vmul.f32 %v6454_v48, %v6471_v63  ;;  %v1670_v61 = vrot.slane %v1635_v22, 1 }
 0x18e   : > { %v2385_v1 = vadd.f32 %v2369_v24, %v2309_v17  ;;  %v1671_v41 = vrot.slane %v1636_v52, 1  ;;  %v1712_v4 = vmul.f32 %v6458_v40, %v6471_v63  ;;  %v1544_v10 = vadd.f32 %v1520_v12, %v1468_v38 }
 0x18f   : > { %v1596_v57 = vsel %vm532_vm3, %v1594_v29, %v1595_v50  ;;  %v1746_v21 = vrot.slane %v1711_v62, 1  ;;  %v1787_v11 = vmul.f32 %v5298_v27, %v6412_v42  ;;  %v1788_v24 = vmul.f32 %v5325_v16, %v6412_v42 }
 0x190   : > { %v2461_v25 = vadd.f32 %v6472_v14, %v2385_v1  ;;  %v1672_v33 = vsel %vm532_vm3, %v1670_v61, %v1671_v41  ;;  %v1747_v49 = vrot.slane %v1712_v4, 1  ;;  %v1620_v26 = vadd.f32 %v1596_v57, %v1544_v10  ;;  %v6473_v57 = vld [vmem:[#allocation35_spill] sm:$0xff] }
 0x191   : > { %v1822_v5 = vrot.slane %v1787_v11, 2  ;;  %v1863_v17 = vmul.f32 %v5305_v39, %v6413_v20  ;;  %v1864_v29 = vmul.f32 %v5355_v28, %v6413_v20  ;;  %v1823_v38 = vrot.slane %v1788_v24, 2  ;;  %v6474_v24 = vld [vmem:[#allocation36_spill] sm:$0xff] }
 0x192   : > { %v2537_v22 = vadd.f32 %v5601_v18, %v2461_v25  ;;  %v1748_v52 = vsel %vm532_vm3, %v1746_v21, %v1747_v49  ;;  %v1939_v12 = vmul.f32 %v5243_v35, %v6414_v31  ;;  %v1696_v50 = vadd.f32 %v1672_v33, %v1620_v26 }
 0x193   : > { %v1898_v62 = vrot.slane %v1863_v17, 2  ;;  %v1899_v1 = vrot.slane %v1864_v29, 2  ;;  %v1940_v61 = vmul.f32 %v5255_v34, %v6414_v31  ;;  %v1824_v4 = vsel %vm809_vm4, %v1822_v5, %v1823_v38 }
 0x194   : > { %v2614_v41 = vadd.f32 %v2598_v6, %v2537_v22  ;;  %v1974_v10 = vrot.slane %v1939_v12, 2  ;;  %v2015_v11 = vmul.f32 %v5192_v54, %v6473_v57  ;;  %v1772_v18 = vadd.f32 %v1748_v52, %v1696_v50  ;;  %v5745_v52 = vpop.permute.xlu1 %3008 }
 0x195   : > { %v1900_v21 = vsel %vm809_vm4, %v1898_v62, %v1899_v1  ;;  %v1975_v14 = vrot.slane %v1940_v61, 2  ;;  %v2016_v25 = vmul.f32 %v6470_v8, %v6473_v57  ;;  %v2091_v26 = vmul.f32 %v6454_v48, %v6474_v24 }
 0x196   : > { %v2690_v33 = vadd.f32 %v2674_v19, %v2614_v41  ;;  %v2050_v49 = vrot.slane %v2015_v11, 2  ;;  %v2092_v6 = vmul.f32 %v6458_v40, %v6474_v24  ;;  %v1848_v5 = vadd.f32 %v1824_v4, %v1772_v18 }
 0x197   : > { %v1976_v17 = vsel %vm809_vm4, %v1974_v10, %v1975_v14  ;;  %v2051_v29 = vrot.slane %v2016_v25, 2  ;;  %v2167_v22 = vmul.f32 %v5298_v27, %v6415_v59  ;;  %v2126_v12 = vrot.slane %v2091_v26, 2  ;;  %v6477_v10 = vld [vmem:[#allocation39_spill] sm:$0xff] }
 0x198   : > { %v2766_v38 = vadd.f32 %v2750_v60, %v2690_v33  ;;  %v2127_v50 = vrot.slane %v2092_v6, 2  ;;  %v2168_v19 = vmul.f32 %v5325_v16, %v6415_v59  ;;  %v6475_v62 = vrot.slane %v5584_v30, 4  ;;  %v5765_v26 = vpop.permute.xlu1 %1204 }
 0x199   : > { %v6476_v1 = vrot.slane %v5578_v2, 4  ;;  %v1924_v41 = vadd.f32 %v1900_v21, %v1848_v5  ;;  %v2203_v4 = vrot.slane %v2167_v22, 3  ;;  %v2244_v11 = vmul.f32 %v5305_v39, %v6477_v10  ;;  %6478 = vst [vmem:[#allocation66_spill] sm:$0xff] %v5765_v26  ;;  %v6480_v22 = vld [vmem:[#allocation64_spill] sm:$0xff] }
 0x19a   : > { %v2842_v18 = vadd.f32 %v5638_v36, %v2766_v38  ;;  %v2052_v60 = vsel %vm809_vm4, %v2050_v49, %v2051_v29  ;;  %v2204_v14 = vrot.slane %v2168_v19, 3  ;;  %v2245_v25 = vmul.f32 %v5355_v28, %v6477_v10  ;;  %v6479_v49 = vld [vmem:[#allocation42_spill] sm:$0xff] }
 0x19b   : > { %v2902_v61 = vsel %vm2574_vm8, %v6476_v1, %v6475_v62  ;;  %v2000_v33 = vadd.f32 %v1976_v17, %v1924_v41  ;;  %v2128_v30 = vsel %vm809_vm4, %v2126_v12, %v2127_v50  ;;  %v2320_v2 = vmul.f32 %v5243_v35, %v6344_v45 }
 0x19c   : > { %v2321_v21 = vmul.f32 %v5255_v34, %v6344_v45  ;;  %v5767_v6 = vadd.f32 %v2902_v61, %v2842_v18  ;;  %v2279_v36 = vrot.slane %v2244_v11, 3  ;;  %v2280_v5 = vrot.slane %v2245_v25, 3  ;;  %v6481_v61 = vld [vmem:[#allocation44_spill] sm:$0xff] }
 0x19d   : > { %v2396_v29 = vmul.f32 %v5192_v54, %v6479_v49  ;;  %v2939_v38 = vmul.f32 0.044715, %v6480_v22  ;;  %v2076_v17 = vadd.f32 %v2052_v60, %v2000_v33  ;;  %v2205_v12 = vsel %vm2193_vm7, %v2203_v4, %v2204_v14 }
 0x19e   : > { %v2397_v50 = vmul.f32 %v6470_v8, %v6479_v49  ;;  %v2926_v19 = vmul.f32 %v5767_v6, %v5767_v6  ;;  %v2355_v62 = vrot.slane %v2320_v2, 3  ;;  %v2356_v1 = vrot.slane %v2321_v21, 3 }
 0x19f   : > { %v2472_v41 = vmul.f32 %v6454_v48, %v6481_v61  ;;  %v2152_v11 = vadd.f32 %v2128_v30, %v2076_v17  ;;  %v2431_v18 = vrot.slane %v2396_v29, 3  ;;  %v2473_v54 = vmul.f32 %v6458_v40, %v6481_v61  ;;  %v5789_v29 = vpop.permute.xlu1 %1220 }
 0x1a0   : > { %v2432_v25 = vrot.slane %v2397_v50, 3  ;;  %v2934_v60 = vmul.f32 %v2926_v19, %v5767_v6  ;;  %v2281_v4 = vsel %vm2193_vm7, %v2279_v36, %v2280_v5  ;;  %v2548_v14 = vmul.f32 %v5298_v27, %v6437_v3  ;;  %6482 = vst [vmem:[#allocation68_spill] sm:$0xff] %v5789_v29  ;;  %v6483_v5 = vld [vmem:[#allocation62_spill] sm:$0xff]  ;;  %v6486_v29 = vld [vmem:[#allocation55_spill] sm:$0xff] }
 0x1a1   : > { %v2549_v33 = vmul.f32 %v5325_v16, %v6437_v3  ;;  %v2229_v2 = vadd.f32 %v2205_v12, %v2152_v11  ;;  %v2507_v21 = vrot.slane %v2472_v41, 3  ;;  %v2508_v22 = vrot.slane %v2473_v54, 3 }
 0x1a2   : > { %v2625_v30 = vmul.f32 %v5305_v39, %v6439_v46  ;;  %v2942_v17 = vmul.f32 0.044715, %v2934_v60  ;;  %v2357_v50 = vsel %vm2193_vm7, %v2355_v62, %v2356_v1  ;;  %v2626_v36 = vmul.f32 %v5355_v28, %v6439_v46 }
 0x1a3   : > { %v2947_v19 = vadd.f32 %v2939_v38, %v6483_v5  ;;  %v2305_v27 = vadd.f32 %v2281_v4, %v2229_v2  ;;  %v2433_v7 = vsel %vm2193_vm7, %v2431_v18, %v2432_v25  ;;  %v2584_v16 = vrot.slane %v2548_v14, 4  ;;  %v5802_v38 = vld [vmem:[#allocation2 + $0x60] sm:$0xff] }
 0x1a4   : > { %v2950_v12 = vadd.f32 %v2942_v17, %v5767_v6  ;;  %v2585_v41 = vrot.slane %v2549_v33, 4  ;;  %v2701_v39 = vmul.f32 %v5243_v35, %v6440_v0  ;;  %v2702_v11 = vmul.f32 %v5255_v34, %v6440_v0  ;;  %v6484_v4 = vld [vmem:[#allocation51_spill] sm:$0xff]  ;;  %v6485_v35 = vld [vmem:[#allocation52_spill] sm:$0xff] }
 0x1a5   : > { %v2381_v54 = vadd.f32 %v2357_v50, %v2305_v27  ;;  %v2509_v62 = vsel %vm2193_vm7, %v2507_v21, %v2508_v22  ;;  %v2660_v1 = vrot.slane %v2625_v30, 4  ;;  %v2661_v60 = vrot.slane %v2626_v36, 4  ;;  %v1225_v21 = vpop.permute.xlu1 %1224 }
 0x1a6   : > { %v2958_v28 = vmul.f32 0.7978846, %v2950_v12  ;;  %v2777_v18 = vmul.f32 %v5802_v38, %v6484_v4  ;;  %v2778_v25 = vmul.f32 %v6470_v8, %v6484_v4  ;;  %v2955_v14 = vmul.f32 0.7978846, %v2947_v19 }
 0x1a7   : > { %v2457_v33 = vadd.f32 %v2433_v7, %v2381_v54  ;;  %v2853_v2 = vmul.f32 %v6454_v48, %v6485_v35  ;;  %v2854_v34 = vmul.f32 %v6458_v40, %v6485_v35  ;;  %v2586_v22 = vsel %vm2574_vm8, %v2584_v16, %v2585_v41  ;;  %v5821_v41 = vld [vmem:[#allocation2 + $0xa0] sm:$0xff] }
 0x1a8   : > { %3533 = vtanh.f32 %v2958_v28  ;;  %v2736_v30 = vrot.slane %v2701_v39, 4  ;;  %v2737_v17 = vrot.slane %v2702_v11, 4  ;;  %v1233_v50 = vrot.slane %v1225_v21, 7  ;;  %v6487_v28 = vld [vmem:[#allocation11_spill] sm:$0xff] }
 0x1a9   : > { %v2533_v36 = vadd.f32 %v2509_v62, %v2457_v33  ;;  %v2662_v27 = vsel %vm2574_vm8, %v2660_v1, %v2661_v60  ;;  %v2812_v12 = vrot.slane %v2777_v18, 4  ;;  %v2813_v8 = vrot.slane %v2778_v25, 4  ;;  %v6488_v25 = vld [vmem:[#allocation69_spill] sm:$0xff] }
 0x1aa   : > { %v2888_v7 = vrot.slane %v2853_v2, 4  ;;  %v2889_v54 = vrot.slane %v2854_v34, 4  ;;  %3535 = vtanh.f32 %v2955_v14  ;;  %v2738_v9 = vsel %vm2574_vm8, %v2736_v30, %v2737_v17  ;;  %v5843_v2 = vpop.permute.xlu0 %3000  ;;  %v5852_v34 = vld [vmem:[#allocation2 + $0x68] sm:$0xf] }
 0x1ab   : > { %v2610_v19 = vadd.f32 %v2586_v22, %v2533_v36  ;;  %v5816_v40 = vmul.f32 %v1233_v50, %v6486_v29  ;;  %v5819_v26 = vmul.f32 %v1233_v50, %v6487_v28  ;;  %v5825_v39 = vmul.f32 %v5821_v41, %v6471_v63  ;;  %v5856_v22 = vld [vmem:[#allocation2 + $0x70] sm:$0xff] }
 0x1ac   : > { %v2814_v11 = vsel %vm2574_vm8, %v2812_v12, %v2813_v8  ;;  %v1387_v62 = vmul.f32 %v5821_v41, %v6451_v47  ;;  %v1315_v1 = vmul.f32 %v5802_v38, %v6453_v23  ;;  %v1327_v29 = vmul.f32 %v6454_v48, %v6455_v55 }
 0x1ad   : > { %v2686_v16 = vadd.f32 %v2662_v27, %v2610_v19  ;;  %v2890_v18 = vsel %vm2574_vm8, %v2888_v7, %v2889_v54  ;;  %v5837_v14 = vmul.f32 %v6471_v63, %v6488_v25  ;;  %v5841_v33 = vmul.f32 %v5821_v41, %v6474_v24 }
 0x1ae   : > { %v1335_v47 = vadd.f32 %v1327_v29, %v1315_v1  ;;  %v1347_v23 = vmul.f32 %v5572_v53, %v6456_v56  ;;  %v1367_v48 = vmul.f32 %v6450_v13, %v5351_v32  ;;  %v1413_v55 = vmul.f32 %v5802_v38, %v6457_v58  ;;  %v5860_v13 = vld [vmem:[#allocation2 + $0x78] sm:$0xf] }
 0x1af   : > { %v2762_v60 = vadd.f32 %v2738_v9, %v2686_v16  ;;  %v1755_v63 = vrot.slane %v5825_v39, 1  ;;  %v1414_v21 = vmul.f32 %v5852_v34, %v6457_v58  ;;  %v1489_v30 = vmul.f32 %v5856_v22, %v6459_v37  ;;  %v3492_v39 = vld [vmem:[%s6071_s5] sm:$0xff]  }
 0x1b0   : > { %v1355_v17 = vadd.f32 %v1347_v23, %v1335_v47  ;;  %v1451_v50 = vrot.slane %v1413_v55, 1  ;;  %v1490_v36 = vmul.f32 %v5860_v13, %v6459_v37  ;;  %v1565_v27 = vmul.f32 %v5572_v53, %v6460_v51  ;;  %3460 = vmatprep.subr.bf16.mxu0 %v3492_v39  ;;  %3470 = vmatprep.subr.bf16.mxu1 %v3492_v39 }
 0x1b1   : > { %v2838_v9 = vadd.f32 %v2814_v11, %v2762_v60  ;;  %v1452_v58 = vrot.slane %v1414_v21, 1  ;;  %v1527_v19 = vrot.slane %v1489_v30, 1  ;;  %v1566_v28 = vmul.f32 %v5593_v44, %v6460_v51  ;;  %3461 = vmatpush3.bf16.msra.mxu0 %v3492_v39  ;;  %3471 = vmatpush3.bf16.msra.mxu1 %v3492_v39 }
 0x1b2   : > { %v3534_v56 = vpop.eup %3533  ;;  %v1375_v7 = vadd.f32 %v1367_v48, %v1355_v17  ;;  %v1528_v54 = vrot.slane %v1490_v36, 1  ;;  %v1603_v16 = vrot.slane %v1565_v27, 1  ;;  %v1641_v29 = vmul.f32 %v6469_v15, %v5351_v32  ;;  %v6489_v48 = vld [vmem:[#allocation61_spill] sm:$0xff] }
 0x1b3   : > { %v2974_v12 = vadd.f32 1.0, %v3534_v56  ;;  %v5866_v8 = vadd.f32 %v2890_v18, %v2838_v9  ;;  %v1453_v1 = vsel %vm532_vm3, %v1451_v50, %v1452_v58  ;;  %v3021_v18 = vpop.permute.xlu0 %3020  ;;  %v1604_v51 = vrot.slane %v1566_v28, 1 }
 0x1b4   : > { %v3536_v60 = vpop.eup %3535  ;;  %v1395_v47 = vadd.f32 %v1387_v62, %v1375_v7  ;;  %v1529_v23 = vsel %vm532_vm3, %v1527_v19, %v1528_v54  ;;  %v1642_v55 = vmul.f32 %v6469_v15, %v6489_v48  ;;  %v1679_v30 = vrot.slane %v1641_v29, 1 }
 0x1b5   : > { %v2982_v11 = vmul.f32 0.5, %v2974_v12  ;;  %v2922_v37 = vmul.f32 %v5866_v8, %v5866_v8  ;;  %v1793_v32 = vmul.f32 %v5802_v38, %v6412_v42  ;;  %v1756_v62 = vrot.slane %v5837_v14, 1 }
 0x1b6   : > { %v1471_v56 = vadd.f32 %v1453_v1, %v1395_v47  ;;  %v1680_v17 = vrot.slane %v1642_v55, 1  ;;  %v1794_v15 = vmul.f32 %v5852_v34, %v6412_v42  ;;  %v1869_v7 = vmul.f32 %v5856_v22, %v6413_v20  ;;  %v5916_v55 = vld [vmem:[#allocation2 + $0x98] sm:$0xf] }
 0x1b7   : > { %v5882_v9 = vmul.f32 %v2982_v11, %v5767_v6  ;;  %v2930_v21 = vmul.f32 %v2922_v37, %v5866_v8  ;;  %v1605_v6 = vsel %vm532_vm3, %v1603_v16, %v1604_v51  ;;  %v1831_v27 = vrot.slane %v1793_v32, 2 }
 0x1b8   : > { %v1547_v12 = vadd.f32 %v1529_v23, %v1471_v56  ;;  %v1681_v58 = vsel %vm532_vm3, %v1679_v30, %v1680_v17  ;;  %v1832_v19 = vrot.slane %v1794_v15, 2  ;;  %v1870_v28 = vmul.f32 %v5860_v13, %v6413_v20 }
 0x1b9   : > { %v3030_v50 = vmul.f32 %v3021_v18, %v5882_v9  ;;  %v2938_v36 = vmul.f32 0.044715, %v2930_v21  ;;  %v1945_v42 = vmul.f32 %v5572_v53, %v6414_v31  ;;  %v1757_v39 = vsel %vm532_vm3, %v1755_v63, %v1756_v62  ;;  %v5912_v63 = vld [vmem:[#allocation2 + $0x90] sm:$0xff] }
 0x1ba   : > { %v1623_v16 = vadd.f32 %v1605_v6, %v1547_v12  ;;  %v1907_v11 = vrot.slane %v1869_v7, 2  ;;  %v1946_v37 = vmul.f32 %v5593_v44, %v6414_v31  ;;  %v1908_v47 = vrot.slane %v1870_v28, 2  ;;  %v6490_v6 = vld [vmem:[#allocation5_spill] sm:$0xff] }
 0x1bb   : > { %v3046_v54 = vrot.slane %v3030_v50, 7  ;;  %v2946_v14 = vadd.f32 %v2938_v36, %v5866_v8  ;;  %v2098_v20 = vmul.f32 %v6474_v24, %v6488_v25  ;;  %v1833_v51 = vsel %vm809_vm4, %v1831_v27, %v1832_v19 }
 0x1bc   : > { %v1699_v23 = vadd.f32 %v1681_v58, %v1623_v16  ;;  %v2021_v48 = vmul.f32 %v5912_v63, %v6473_v57  ;;  %v1983_v31 = vrot.slane %v1945_v42, 2  ;;  %v2971_v21 = vadd.f32 1.0, %v3536_v60 }
 0x1bd   : > { %v5904_v1 = vadd.f32 %v3046_v54, %v5816_v40  ;;  %v5907_v29 = vadd.f32 %v3046_v54, %v5819_v26  ;;  %v2954_v18 = vmul.f32 0.7978846, %v2946_v14  ;;  %v1984_v40 = vrot.slane %v1946_v37, 2 }
 0x1be   : > { %v2022_v26 = vmul.f32 %v5916_v55, %v6473_v57  ;;  %v1775_v30 = vadd.f32 %v1757_v39, %v1699_v23  ;;  %v2173_v24 = vmul.f32 %v5802_v38, %v6415_v59  ;;  %v1909_v32 = vsel %vm809_vm4, %v1907_v11, %v1908_v47  ;;  %v6491_v47 = vld [vmem:[#allocation59_spill] sm:$0xff] }
 0x1bf   : > { %3537 = vtanh.f32 %v2954_v18  ;;  %v2059_v62 = vrot.slane %v2021_v48, 2  ;;  %v2174_v17 = vmul.f32 %v5852_v34, %v6415_v59  ;;  %v2135_v15 = vrot.slane %v5841_v33, 2 }
 0x1c0   : > { %v2060_v56 = vrot.slane %v2022_v26, 2  ;;  %v2136_v50 = vrot.slane %v2098_v20, 2  ;;  %v1851_v36 = vadd.f32 %v1833_v51, %v1775_v30  ;;  %v1229_v27 = vrot.slane %v6490_v6, 7 }
 0x1c1   : > { %v1985_v57 = vsel %vm809_vm4, %v1983_v31, %v1984_v40  ;;  %v2250_v60 = vmul.f32 %v5856_v22, %v6477_v10  ;;  %v2251_v12 = vmul.f32 %v5860_v13, %v6477_v10  ;;  %v2979_v58 = vmul.f32 0.5, %v2971_v21 }
 0x1c2   : > { %v2478_v19 = vmul.f32 %v5821_v41, %v6481_v61  ;;  %v1927_v7 = vadd.f32 %v1909_v32, %v1851_v36  ;;  %v2212_v59 = vrot.slane %v2173_v24, 3  ;;  %v2061_v33 = vsel %vm809_vm4, %v2059_v62, %v2060_v56  ;;  %v6492_v56 = vld [vmem:[#allocation60_spill] sm:$0xff] }
 0x1c3   : > { %v2213_v54 = vrot.slane %v2174_v17, 3  ;;  %v2326_v14 = vmul.f32 %v5572_v53, %v6344_v45  ;;  %v2327_v28 = vmul.f32 %v5593_v44, %v6344_v45  ;;  %v2137_v42 = vsel %vm809_vm4, %v2135_v15, %v2136_v50 }
 0x1c4   : > { %v2479_v10 = vmul.f32 %v6481_v61, %v6488_v25  ;;  %v2003_v39 = vadd.f32 %v1985_v57, %v1927_v7  ;;  %v2288_v16 = vrot.slane %v2250_v60, 3  ;;  %v2289_v11 = vrot.slane %v2251_v12, 3  ;;  %v6493_v57 = vld [vmem:[#allocation53_spill] sm:$0xff]  ;;  %v3005_v60 = vpop.permute.xlu1 %3004 }
 0x1c5   : > { %v2402_v37 = vmul.f32 %v5912_v63, %v6479_v49  ;;  %v2403_v18 = vmul.f32 %v5916_v55, %v6479_v49  ;;  %v1248_v20 = vmul.f32 %v1229_v27, %v6491_v47  ;;  %v5948_v23 = vmul.f32 %v2979_v58, %v6483_v5 }
 0x1c6   : > { %v2079_v45 = vadd.f32 %v2061_v33, %v2003_v39  ;;  %v2516_v48 = vrot.slane %v2478_v19, 3  ;;  %v2214_v31 = vsel %vm2193_vm7, %v2212_v59, %v2213_v54  ;;  %v2364_v61 = vrot.slane %v2326_v14, 3 }
 0x1c7   : > { %v2365_v40 = vrot.slane %v2327_v28, 3  ;;  %v2517_v21 = vrot.slane %v2479_v10, 3  ;;  %v2554_v24 = vmul.f32 %v5802_v38, %v6437_v3  ;;  %v2290_v49 = vsel %vm2193_vm7, %v2288_v16, %v2289_v11 }
 0x1c8   : > { %v2155_v30 = vadd.f32 %v2137_v42, %v2079_v45  ;;  %v2440_v32 = vrot.slane %v2402_v37, 3  ;;  %v2441_v62 = vrot.slane %v2403_v18, 3  ;;  %v2555_v5 = vmul.f32 %v5852_v34, %v6437_v3 }
 0x1c9   : > { %v3538_v51 = vpop.eup %3537  ;;  %v1249_v17 = vmul.f32 %v1229_v27, %v6492_v56  ;;  %v2631_v36 = vmul.f32 %v5856_v22, %v6439_v46  ;;  %v3078_v6 = vsel %vm344_vm0, %v5948_v23, 0.0  ;;  %v3080_v38 = vsel %vm344_vm0, %v6493_v57, 0.0 }
 0x1ca   : > { %v2970_v26 = vadd.f32 1.0, %v3538_v51  ;;  %v2232_v50 = vadd.f32 %v2214_v31, %v2155_v30  ;;  %v2366_v12 = vsel %vm2193_vm7, %v2364_v61, %v2365_v40  ;;  %v2632_v58 = vmul.f32 %v5860_v13, %v6439_v46 }
 0x1cb   : > { %v2518_v34 = vsel %vm2193_vm7, %v2516_v48, %v2517_v21  ;;  %v2593_v19 = vrot.slane %v2554_v24, 4  ;;  %v2442_v22 = vsel %vm2193_vm7, %v2440_v32, %v2441_v62  ;;  %v2594_v7 = vrot.slane %v2555_v5, 4 }
 0x1cc   : > { %v2978_v15 = vmul.f32 0.5, %v2970_v26  ;;  %v2308_v27 = vadd.f32 %v2290_v49, %v2232_v50  ;;  %v2707_v59 = vmul.f32 %v5572_v53, %v6440_v0  ;;  %v2708_v33 = vmul.f32 %v5593_v44, %v6440_v0 }
 0x1cd   : > { %v2669_v46 = vrot.slane %v2631_v36, 4  ;;  %v2783_v42 = vmul.f32 %v5912_v63, %v6484_v4  ;;  %v2784_v10 = vmul.f32 %v5916_v55, %v6484_v4  ;;  %v2859_v53 = vmul.f32 %v5821_v41, %v6485_v35 }
 0x1ce   : > { %v2986_v3 = vmul.f32 %v2978_v15, %v5866_v8  ;;  %v2384_v28 = vadd.f32 %v2366_v12, %v2308_v27  ;;  %v2670_v8 = vrot.slane %v2632_v58, 4  ;;  %v2860_v44 = vmul.f32 %v6485_v35, %v6488_v25  ;;  %v3017_v27 = vpop.permute.xlu1 %3016 }
 0x1cf   : > { %v2595_v11 = vsel %vm2574_vm8, %v2593_v19, %v2594_v7  ;;  %v2745_v37 = vrot.slane %v2707_v59, 4  ;;  %v2821_v55 = vrot.slane %v2783_v42, 4  ;;  %v2822_v45 = vrot.slane %v2784_v10, 4  ;;  %v6495_v10 = vld [vmem:[#allocation17_spill] sm:$0xff] }
 0x1d0   : > { %v3026_v54 = vmul.f32 %v3005_v60, %v2986_v3  ;;  %v3076_v14 = vsel %vm344_vm0, %v2986_v3, 0.0  ;;  %v2460_v0 = vadd.f32 %v2442_v22, %v2384_v28  ;;  %v2671_v4 = vsel %vm2574_vm8, %v2669_v46, %v2670_v8  ;;  %v3109_v46 = vpop.permute.xlu0 %3108  ;;  %v6494_v8 = vld [vmem:[#allocation66_spill] sm:$0xff] }
 0x1d1   : > { %v3077_v13 = vadd.f32 %v3076_v14, %v5685_v43  ;;  %v2746_v43 = vrot.slane %v2708_v33, 4  ;;  %v2897_v48 = vrot.slane %v2859_v53, 4  ;;  %v2898_v31 = vrot.slane %v2860_v44, 4  ;;  %v6496_v44 = vld [vmem:[#allocation43_spill] sm:$0xff] }
 0x1d2   : > { %v3042_v39 = vrot.slane %v3026_v54, 7  ;;  %v2536_v63 = vadd.f32 %v2518_v34, %v2460_v0  ;;  %v2823_v61 = vsel %vm2574_vm8, %v2821_v55, %v2822_v45  ;;  %v3084_v50 = vsel %vm344_vm0, %v5882_v9, 0.0  ;;  %v3105_v59 = vpop.permute.xlu1 %3104 }
 0x1d3   : > { %v3079_v16 = vadd.f32 %v3078_v6, %v3077_v13  ;;  %v2747_v35 = vsel %vm2574_vm8, %v2745_v37, %v2746_v43  ;;  %v3027_v13 = vmul.f32 %v5745_v52, %v5948_v23  ;;  %v1228_v42 = vrot.slane %v6494_v8, 7  ;;  %v6498_v43 = vld [vmem:[#allocation16_spill] sm:$0xff]  ;;  %v6501_v52 = vld [vmem:[#allocation58_spill] sm:$0xff] }
 0x1d4   : > { %v5984_v18 = vadd.f32 %v3042_v39, %v1248_v20  ;;  %v5986_v47 = vadd.f32 %v3042_v39, %v1249_v17  ;;  %v2613_v41 = vadd.f32 %v2595_v11, %v2536_v63  ;;  %v2899_v20 = vsel %vm2574_vm8, %v2897_v48, %v2898_v31  ;;  %v6497_v11 = vld [vmem:[#allocation68_spill] sm:$0xff]  ;;  %v3113_v48 = vpop.permute.xlu0 %3112  ;;  %v6502_v31 = vld [vmem:[#allocation57_spill] sm:$0xff] }
 0x1d5   : > { %v3081_v51 = vadd.f32 %v3080_v38, %v3079_v16  ;;  %v3025_v39 = vmul.f32 %v5843_v2, %v6495_v10  ;;  %v1230_v0 = vrot.slane %v6496_v44, 7  ;;  %v1232_v37 = vrot.slane %v6497_v11, 7  ;;  %v6499_v63 = vld [vmem:[#allocation56_spill] sm:$0xff]  ;;  %v6511_v11 = vld [vmem:[#allocation29_spill] sm:$0xff] }
 0x1d6   : > { %v2689_v25 = vadd.f32 %v2671_v4, %v2613_v41  ;;  %v3121_v28 = vpop.permute.xlu1 %3120  ;;  %v6500_v4 = vrot.slane %v6499_v63, 7  ;;  %v3043_v45 = vrot.slane %v3027_v13, 7  ;;  %v1246_v23 = vmul.f32 %v1228_v42, %v6501_v52 }
 0x1d8   : > { %v2765_v40 = vadd.f32 %v2747_v35, %v2689_v25  ;;  %v1242_v55 = vmul.f32 %v6500_v4, %v6498_v43  ;;  %v1247_v35 = vmul.f32 %v1228_v42, %v6502_v31  ;;  %v3041_v25 = vrot.slane %v3025_v39, 7  ;;  %v6512_v43 = vld [vmem:[#allocation47_spill] sm:$0xff]  ;;  %v6513_v4 = vld [vmem:[#allocation45_spill] sm:$0xff] }
 0x1da   : > { %v2841_v26 = vadd.f32 %v2823_v61, %v2765_v40  ;;  %v3125_v9 = vpop.permute.xlu1 %3124  ;;  %v6503_v61 = vld [vmem:[#allocation14_spill] sm:$0xff] }
 0x1db   : > { %v1250_v40 = vmul.f32 %v1230_v0, %v6503_v61 }
 0x1dc   : > { %v2917_v21 = vadd.f32 %v2899_v20, %v2841_v26  ;;  %v6504_v20 = vld [vmem:[#allocation15_spill] sm:$0xff] }
 0x1dd   : > { %v1251_v26 = vmul.f32 %v1230_v0, %v6504_v20  ;;  %v6509_v0 = vld [vmem:[#allocation4_spill] sm:$0xff] }
 0x1de   : > { %v2925_v30 = vmul.f32 %v2917_v21, %v2917_v21  ;;  %v3117_v41 = vpop.permute.xlu1 %3116 }
 0x1e0   : > { %v2933_v24 = vmul.f32 %v2925_v30, %v2917_v21  ;;  %v6505_v30 = vld [vmem:[#allocation30_spill] sm:$0xff] }
 0x1e2   : > { %v2941_v49 = vmul.f32 0.044715, %v2933_v24  ;;  %v1254_v24 = vmul.f32 %v1232_v37, %v6505_v30 }
 0x1e4   : > { %v2949_v32 = vadd.f32 %v2941_v49, %v2917_v21  ;;  %v6506_v49 = vld [vmem:[#allocation41_spill] sm:$0xff] }
 0x1e6   : > { %v2957_v62 = vmul.f32 0.7978846, %v2949_v32  ;;  %v1255_v32 = vmul.f32 %v1232_v37, %v6506_v49 }
 0x1e8   : > { %3539 = vtanh.f32 %v2957_v62  ;;  %v3063_v62 = vadd.f32 %v3043_v45, %v1250_v40 }
 0x1f2   : > { %v3540_v5 = vpop.eup %3539 }
 0x1f3   : > { %v2973_v56 = vadd.f32 1.0, %v3540_v5  ;;  %v3064_v5 = vadd.f32 %v3043_v45, %v1251_v26 }
 0x1f5   : > { %v2981_v17 = vmul.f32 0.5, %v2973_v56  ;;  %v6507_v56 = vld [vmem:[#allocation3_spill] sm:$0xff] }
 0x1f7   : > { %v2989_v15 = vmul.f32 %v2981_v17, %v2917_v21  ;;  %v6508_v17 = vrot.slane %v6507_v56, 7 }
 0x1f9   : > { %v3082_v36 = vsel %vm344_vm0, %v2989_v15, 0.0  ;;  %v3029_v53 = vmul.f32 %v3017_v27, %v2989_v15  ;;  %v3055_v15 = vadd.f32 %v6508_v17, %v1242_v55  ;;  %v3129_v27 = vpop.permute.xlu0 %3128 }
 0x1fa   : > { %v3083_v6 = vadd.f32 %v3082_v36, %v3081_v51  ;;  %v3059_v36 = vadd.f32 %v3041_v25, %v1246_v23 }
 0x1fb   : > { %v3045_v2 = vrot.slane %v3029_v53, 7 }
 0x1fc   : > { %v3085_v57 = vadd.f32 %v3084_v50, %v3083_v6  ;;  %v3060_v6 = vadd.f32 %v3041_v25, %v1247_v35 }
 0x1fe   : > { %v3086_v38 = vrot.slane %v3085_v57, 4 }
 0x200   : > { %v3087_v60 = vadd.f32 %v3086_v38, %v3085_v57  ;;  %v3067_v57 = vadd.f32 %v3045_v2, %v1254_v24  ;;  %v3068_v38 = vadd.f32 %v3045_v2, %v1255_v32 }
 0x202   : > { %v3088_v12 = vrot.slane %v3087_v60, 2 }
 0x204   : > { %v3089_v58 = vadd.f32 %v3088_v12, %v3087_v60 }
 0x206   : > { %v3090_v3 = vrot.slane %v3089_v58, 1 }
 0x208   : > { %v3091_v34 = vadd.f32 %v3090_v3, %v3089_v58 }
 0x20a   : > { %v3093_v19 = vmul.f32 0.015625, %v3091_v34  ;;  %v3133_v34 = vpop.permute.xlu1 %3132 }
 0x20c   : > { %v3094_v22 = vmul.f32 %v3093_v19, %v3093_v19 }
 0x20e   : > { %v3095_v7 = vmul.f32 %v3094_v22, %v3093_v19 }
 0x210   : > { %v3096_v33 = vmul.f32 0.044715, %v3095_v7 }
 0x212   : > { %v3097_v54 = vadd.f32 %v3096_v33, %v3093_v19 }
 0x214   : > { %v3098_v14 = vmul.f32 0.7978846, %v3097_v54 }
 0x216   : > { %3541 = vtanh.f32 %v3098_v14 }
 0x220   : > { %v3542_v16 = vpop.eup %3541 }
 0x221   : > { %v3100_v51 = vadd.f32 1.0, %v3542_v16 }
 0x223   : > { %v3101_v21 = vmul.f32 0.5, %v3100_v51 }
 0x225   : > { %v3102_v50 = vmul.f32 %v3101_v21, %v3093_v19 }
 0x227   : > { %v3135_v60 = vmul.f32 %v3105_v59, %v3102_v50  ;;  %v3139_v12 = vmul.f32 %v3121_v28, %v3102_v50  ;;  %v3140_v58 = vmul.f32 %v3125_v9, %v3102_v50  ;;  %v3136_v3 = vmul.f32 %v3109_v46, %v3102_v50  ;;  %v6510_v46 = vld [vmem:[#allocation32_spill] sm:$0xff] }
 0x228   : > { %v3138_v22 = vmul.f32 %v3117_v41, %v3102_v50  ;;  %v3137_v7 = vmul.f32 %v3113_v48, %v3102_v50  ;;  %v3142_v33 = vmul.f32 %v3133_v34, %v3102_v50  ;;  %v3141_v54 = vmul.f32 %v3129_v27, %v3102_v50  ;;  %v322_v34 = vld [vmem:[%s303_s10 + $0x10] sm:$0xff] }
 0x229   : > { %v3151_v14 = vrot.slane %v3135_v60, 7  ;;  %v3155_v13 = vrot.slane %v3139_v12, 7  ;;  %v3156_v8 = vrot.slane %v3140_v58, 7  ;;  %v3152_v42 = vrot.slane %v3136_v3, 7  ;;  %v3443_v3 = vld [vmem:[%s6072_s6] ss:$0 sm:$0xff] }
 0x22a   : > { %v3154_v10 = vrot.slane %v3138_v22, 7  ;;  %v3153_v19 = vrot.slane %v3137_v7, 7  ;;  %v3158_v39 = vrot.slane %v3142_v33, 7  ;;  %v3157_v53 = vrot.slane %v3141_v54, 7  ;;  %v320_v7 = vld [vmem:[%s303_s10] sm:$0xff]  ;;  %v326_v54 = vld [vmem:[%s303_s10 + $0x30] sm:$0xff] }
 0x22b   : > { %v3167_v44 = vadd.f32 %v3151_v14, %v3055_v15  ;;  %v3168_v59 = vadd.f32 %v3151_v14, %v6509_v0  ;;  %v3175_v28 = vadd.f32 %v3155_v13, %v3063_v62  ;;  %v3176_v9 = vadd.f32 %v3155_v13, %v3064_v5  ;;  %v321_v0 = vld [vmem:[%s303_s10 + $0x8] sm:$0xff] }
 0x22c   : > { %v3177_v16 = vadd.f32 %v3156_v8, %v6510_v46  ;;  %v3178_v37 = vadd.f32 %v3156_v8, %v6511_v11  ;;  %v3169_v63 = vadd.f32 %v3152_v42, %v6512_v43  ;;  %v3170_v55 = vadd.f32 %v3152_v42, %v6513_v4  ;;  %v323_v8 = vld [vmem:[%s303_s10 + $0x18] sm:$0xff] }
 0x22d   : > { %v3199_v45 = vrot.slane %v3167_v44, 1  ;;  %v3200_v51 = vrot.slane %v3168_v59, 1  ;;  %v3211_v41 = vrot.slane %v3175_v28, 1  ;;  %v3212_v48 = vrot.slane %v3176_v9, 1  ;;  %v327_v46 = vld [vmem:[%s303_s10 + $0x38] sm:$0xff] }
 0x22e   : > { %v3214_v52 = vrot.slane %v3177_v16, 1  ;;  %v3215_v23 = vrot.slane %v3178_v37, 1  ;;  %v3202_v31 = vrot.slane %v3169_v63, 1  ;;  %v3203_v35 = vrot.slane %v3170_v55, 1  ;;  %v325_v55 = vld [vmem:[%s303_s10 + $0x28] sm:$0xff] }
 0x22f   : > { %v3173_v25 = vadd.f32 %v3154_v10, %v5984_v18  ;;  %v3174_v2 = vadd.f32 %v3154_v10, %v5986_v47  ;;  %v3171_v61 = vadd.f32 %v3153_v19, %v3059_v36  ;;  %v3172_v40 = vadd.f32 %v3153_v19, %v3060_v6 }
 0x230   : > { %v3181_v20 = vadd.f32 %v3158_v39, %v5904_v1  ;;  %v3182_v26 = vadd.f32 %v3158_v39, %v5907_v29  ;;  %v3179_v21 = vadd.f32 %v3157_v53, %v3067_v57  ;;  %v3180_v30 = vadd.f32 %v3157_v53, %v3068_v38  ;;  %v324_v39 = vld [vmem:[%s303_s10 + $0x20] sm:$0xff] }
 0x231   : > { %v3208_v24 = vrot.slane %v3173_v25, 1  ;;  %v3209_v49 = vrot.slane %v3174_v2, 1  ;;  %v3205_v32 = vrot.slane %v3171_v61, 1  ;;  %v3206_v62 = vrot.slane %v3172_v40, 1 }
 0x232   : > { %v3220_v5 = vrot.slane %v3181_v20, 1  ;;  %v3221_v56 = vrot.slane %v3182_v26, 1  ;;  %v3217_v17 = vrot.slane %v3179_v21, 1  ;;  %v3218_v15 = vrot.slane %v3180_v30, 1 }
 0x233   : > { %v3210_v18 = vsel %vm532_vm3, %v3208_v24, %v3209_v49  ;;  %v3207_v47 = vsel %vm532_vm3, %v3205_v32, %v3206_v62  ;;  %v3201_v50 = vsel %vm532_vm3, %v3199_v45, %v3200_v51  ;;  %v3204_v1 = vsel %vm532_vm3, %v3202_v31, %v3203_v35 }
 0x234   : > { %v3222_v29 = vsel %vm532_vm3, %v3220_v5, %v3221_v56  ;;  %v3219_v36 = vsel %vm532_vm3, %v3217_v17, %v3218_v15  ;;  %v3231_v6 = vpack.c.bf16 %v3204_v1, %v3201_v50  ;;  %v3213_v57 = vsel %vm532_vm3, %v3211_v41, %v3212_v48 }
 0x235   : > { %v3216_v38 = vsel %vm532_vm3, %v3214_v52, %v3215_v23  ;;  %v3232_v60 = vpack.c.bf16 %v3210_v18, %v3207_v47  ;;  %v3234_v12 = vpack.c.bf16 %v3222_v29, %v3219_v36 }
 0x236   : > { %3462 = vmatprep.mubr.msk.bf16.mxu0 %vm344_vm0, %v3231_v6  ;;  %v3233_v58 = vpack.c.bf16 %v3216_v38, %v3213_v57 }
 0x237   : > { %3463 = vmatmul.mubr.msk.bf16.vlgmr.msra.gmra.mrb[0].mxu0 %vm344_vm0, %v3232_v60 }
 0x238   : > { %3466 = vmatprep.mubr.msk.bf16.mxu1 %vm344_vm0, %v3233_v58 }
 0x239   : > { %3467 = vmatmul.mubr.msk.bf16.vlgmr.msra.gmra.mrb[0].mxu1 %vm344_vm0, %v3234_v12 }
 0x30a   : > { %v3464_v27 = vpop.f32.mrb[0].mxu0 }
 0x30b   : > { %v3305_v22 = vadd.f32 %v3464_v27, %v3443_v3  ;;  %v3296_v33 = vpop.f32.mrb[1].mxu0 }
 0x30c   : > { %v3468_v14 = vpop.f32.mrb[0].mxu1  ;;  %v3297_v13 = vadd.f32 %v3443_v3, %v3296_v33  ;;  %v3465_v42 = vpop.f32.mrb[2].mxu0 }
 0x30d   : > { %v3329_v10 = vmul.f32 %v3305_v22, %v322_v34  ;;  %v3321_v19 = vadd.f32 %v3468_v14, %v3443_v3  ;;  %v3312_v53 = vpop.f32.mrb[1].mxu1  ;;  %v3308_v44 = vadd.f32 %v3465_v42, %v3443_v3  ;;  %v3299_v59 = vpop.f32.mrb[3].mxu0 }
 0x30e   : > { %v3327_v28 = vmul.f32 %v3297_v13, %v320_v7  ;;  %v3313_v9 = vadd.f32 %v3443_v3, %v3312_v53  ;;  %v3469_v16 = vpop.f32.mrb[2].mxu1  ;;  %v3300_v11 = vadd.f32 %v3443_v3, %v3299_v59 }
 0x30f   : > { %v3337_v37 = vpack.c.bf16 %v3329_v10, %v3329_v10  ;;  %v3333_v43 = vmul.f32 %v3321_v19, %v326_v54  ;;  %v3330_v63 = vmul.f32 %v3308_v44, %v323_v8  ;;  %v3324_v4 = vadd.f32 %v3469_v16, %v3443_v3  ;;  %v3315_v45 = vpop.f32.mrb[3].mxu1 }
 0x310   : > { %v3335_v51 = vpack.c.bf16 %v3327_v28, %v3327_v28  ;;  %v3331_v41 = vmul.f32 %v3313_v9, %v324_v39  ;;  %v3328_v48 = vmul.f32 %v3300_v11, %v321_v0  ;;  %v3316_v52 = vadd.f32 %v3443_v3, %v3315_v45 }
 0x311   : > { %3345 = vst.msk [vmem:[%s6045_s15 + $0x8] sm:$0xf] %vm346_vm2, %v3337_v37  ;;  %v3341_v23 = vpack.c.bf16 %v3333_v43, %v3333_v43  ;;  %v3338_v31 = vpack.c.bf16 %v3330_v63, %v3330_v63  ;;  %v3334_v35 = vmul.f32 %v3324_v4, %v327_v46 }
 0x312   : > { %3343 = vst.msk [vmem:[%s6045_s15] sm:$0xf] %vm346_vm2, %v3335_v51  ;;  %v3339_v25 = vpack.c.bf16 %v3331_v41, %v3331_v41  ;;  %v3336_v2 = vpack.c.bf16 %v3328_v48, %v3328_v48  ;;  %v3332_v61 = vmul.f32 %v3316_v52, %v325_v55 }
 0x313   : > { %3349 = vst.msk [vmem:[%s6045_s15 + $0x18] sm:$0xf] %vm346_vm2, %v3341_v23  ;;  %3346 = vst.msk [vmem:[%s6045_s15 + $0xc] sm:$0xf] %vm346_vm2, %v3338_v31  ;;  %v3342_v40 = vpack.c.bf16 %v3334_v35, %v3334_v35 }
 0x314   : > { %3347 = vst.msk [vmem:[%s6045_s15 + $0x10] sm:$0xf] %vm346_vm2, %v3339_v25  ;;  %3344 = vst.msk [vmem:[%s6045_s15 + $0x4] sm:$0xf] %vm346_vm2, %v3336_v2  ;;  %v3340_v20 = vpack.c.bf16 %v3332_v61, %v3332_v61 }
 0x315   : > { %3350 = vst.msk [vmem:[%s6045_s15 + $0x1c] sm:$0xf] %vm346_vm2, %v3342_v40 }
 0x316   : > { %3348 = vst.msk [vmem:[%s6045_s15 + $0x14] sm:$0xf] %vm346_vm2, %v3340_v20 }
 0x317 PF: > { %s17_s24 = sadd.s32 1, %s3572_s24  }
 0x318   : > { %p14_p4 = scmp.ge.s32.totalorder %s17_s24, 4  }
 0x31a   :  { %16 = sbr.rel (!%p14_p4) target bundleno = 1 (0x1), region = 86 }

// kernel: focalnet_forward.30
= control target key start
LH: loop header
LB: loop body
LE: loop exit
PB: predicated region body
PF: predicated region fallthrough
CT: control target
= control target key end

     0   :  { %vm57_vm0 = vcmask 261120   ;;  %s217_s1 = inlined_call_operand.vmem [shape: bf16[32,128], index: 1, kind: input, shape index: {}]   ;;  %s218_s0 = inlined_call_operand.vmem [shape: bf16[32,32], index: 0, kind: input, shape index: {}]   ;;  %s219_s2 = inlined_call_operand.vmem [shape: f32[1,128], index: 2, kind: input, shape index: {}]   ;;  %s220_s3 = inlined_call_operand.vmem [shape: f32[32,128], index: 3, kind: output, shape index: {}]  }
   0x1   :  { %v166_v0 = vld [vmem:[%s217_s1] sm:$0xff]   ;;  %v167_v1 = vld [vmem:[%s217_s1 + $0x8] sm:$0xff]  }
   0x2   :  { %158 = vmatprep.subr.bf16.mxu0 %v166_v0  ;;  %v168_v2 = vld [vmem:[%s218_s0] sm:$0xff]   ;;  %v169_v3 = vld [vmem:[%s218_s0 + $0x8] sm:$0xff]  }
   0x3   :  { %159 = vmatpush3.bf16.msra.mxu0 %v166_v0  ;;  %162 = vmatprep.mubr.msk.bf16.mxu0 %vm57_vm0, %v168_v2  ;;  %v153_v4 = vld [vmem:[%s219_s2] ss:$0 sm:$0xff] }
   0x4   :  { %160 = vmatprep.subr.bf16.mxu0 %v167_v1 }
   0x7   :  { %161 = vmatpush3.bf16.msra.mxu0 %v167_v1 }
   0xa   :  { %163 = vmatmul.mubr.msk.bf16.vlgmr.msra.gmra.mrb[0].mxu0 %vm57_vm0, %v169_v3 }
  0xdd   :  { %v164_v5 = vpop.f32.mrb[0].mxu0 }
  0xde   :  { %v137_v6 = vadd.f32 %v164_v5, %v153_v4  ;;  %v98_v7 = vpop.f32.mrb[1].mxu0 }
  0xdf   :  { %v135_v8 = vadd.f32 %v153_v4, %v98_v7  ;;  %v165_v9 = vpop.f32.mrb[2].mxu0 }
  0xe0   :  { %141 = vst [vmem:[%s220_s3 + $0x10] sm:$0xff] %v137_v6  ;;  %v138_v10 = vadd.f32 %v165_v9, %v153_v4  ;;  %v101_v11 = vpop.f32.mrb[3].mxu0 }
  0xe1   :  { %139 = vst [vmem:[%s220_s3] sm:$0xff] %v135_v8  ;;  %v136_v12 = vadd.f32 %v153_v4, %v101_v11 }
  0xe2   :  { %142 = vst [vmem:[%s220_s3 + $0x18] sm:$0xff] %v138_v10 }
  0xe3   :  { %140 = vst [vmem:[%s220_s3 + $0x8] sm:$0xff] %v136_v12 }

// kernel: focalnet_forward.32
= control target key start
LH: loop header
LB: loop body
LE: loop exit
PB: predicated region body
PF: predicated region fallthrough
CT: control target
= control target key end

     0   :  { %vm60_vm0 = vcmask 261120   ;;  %s245_s1 = inlined_call_operand.vmem [shape: bf16[32,128], index: 1, kind: input, shape index: {}]   ;;  %s246_s0 = inlined_call_operand.vmem [shape: bf16[32,32], index: 0, kind: input, shape index: {}]   ;;  %s247_s2 = inlined_call_operand.vmem [shape: f32[1,128], index: 2, kind: input, shape index: {}]   ;;  %s248_s3 = inlined_call_operand.vmem [shape: f32[32,128], index: 3, kind: input, shape index: {}]   ;;  %s249_s4 = inlined_call_operand.vmem [shape: f32[32,128], index: 4, kind: output, shape index: {}]  }
   0x1   :  { %v177_v0 = vld [vmem:[%s245_s1] sm:$0xff]   ;;  %v178_v1 = vld [vmem:[%s245_s1 + $0x8] sm:$0xff]   ;;  %v144_v6 = vld [vmem:[%s248_s3 + $0x10] sm:$0xff] }
   0x2   :  { %169 = vmatprep.subr.bf16.mxu0 %v177_v0  ;;  %v179_v2 = vld [vmem:[%s246_s0] sm:$0xff]   ;;  %v180_v3 = vld [vmem:[%s246_s0 + $0x8] sm:$0xff]   ;;  %v145_v12 = vld [vmem:[%s248_s3 + $0x18] sm:$0xff] }
   0x3   :  { %170 = vmatpush3.bf16.msra.mxu0 %v177_v0  ;;  %173 = vmatprep.mubr.msk.bf16.mxu0 %vm60_vm0, %v179_v2  ;;  %v164_v4 = vld [vmem:[%s247_s2] ss:$0 sm:$0xff]  ;;  %v143_v16 = vld [vmem:[%s248_s3 + $0x8] sm:$0xff] }
   0x4   :  { %171 = vmatprep.subr.bf16.mxu0 %v178_v1  ;;  %v142_v9 = vld [vmem:[%s248_s3] sm:$0xff] }
   0x7   :  { %172 = vmatpush3.bf16.msra.mxu0 %v178_v1 }
   0xa   :  { %174 = vmatmul.mubr.msk.bf16.vlgmr.msra.gmra.mrb[0].mxu0 %vm60_vm0, %v180_v3 }
  0xdd   :  { %v175_v5 = vpop.f32.mrb[0].mxu0 }
  0xde   :  { %v140_v7 = vadd.f32 %v175_v5, %v164_v4  ;;  %v101_v8 = vpop.f32.mrb[1].mxu0 }
  0xdf   :  { %v138_v10 = vadd.f32 %v164_v4, %v101_v8  ;;  %v176_v11 = vpop.f32.mrb[2].mxu0 }
  0xe0   :  { %v148_v13 = vadd.f32 %v144_v6, %v140_v7  ;;  %v141_v14 = vadd.f32 %v176_v11, %v164_v4  ;;  %v104_v15 = vpop.f32.mrb[3].mxu0 }
  0xe1   :  { %v146_v17 = vadd.f32 %v142_v9, %v138_v10  ;;  %v139_v18 = vadd.f32 %v164_v4, %v104_v15 }
  0xe2   :  { %152 = vst [vmem:[%s249_s4 + $0x10] sm:$0xff] %v148_v13  ;;  %v149_v19 = vadd.f32 %v145_v12, %v141_v14 }
  0xe3   :  { %150 = vst [vmem:[%s249_s4] sm:$0xff] %v146_v17  ;;  %v147_v20 = vadd.f32 %v143_v16, %v139_v18 }
  0xe4   :  { %153 = vst [vmem:[%s249_s4 + $0x18] sm:$0xff] %v149_v19 }
  0xe5   :  { %151 = vst [vmem:[%s249_s4 + $0x8] sm:$0xff] %v147_v20 }

// kernel: focalnet_forward.34
= control target key start
LH: loop header
LB: loop body
LE: loop exit
PB: predicated region body
PF: predicated region fallthrough
CT: control target
= control target key end

     0   :  { %vm57_vm0 = vcmask 261120   ;;  %s290_s1 = inlined_call_operand.vmem [shape: bf16[32,128], index: 1, kind: input, shape index: {}]   ;;  %s291_s0 = inlined_call_operand.vmem [shape: bf16[32,32], index: 0, kind: input, shape index: {}]   ;;  %s292_s2 = inlined_call_operand.vmem [shape: f32[1,128], index: 2, kind: input, shape index: {}]   ;;  %s293_s3 = inlined_call_operand.vmem [shape: bf16[32,128], index: 3, kind: output, shape index: {}]  }
   0x1   :  { %v237_v0 = vld [vmem:[%s290_s1] sm:$0xff]   ;;  %v238_v1 = vld [vmem:[%s290_s1 + $0x8] sm:$0xff]  }
   0x2   :  { %229 = vmatprep.subr.bf16.mxu0 %v237_v0  ;;  %v239_v2 = vld [vmem:[%s291_s0] sm:$0xff]   ;;  %v240_v3 = vld [vmem:[%s291_s0 + $0x8] sm:$0xff]  }
   0x3   :  { %230 = vmatpush3.bf16.msra.mxu0 %v237_v0  ;;  %233 = vmatprep.mubr.msk.bf16.mxu0 %vm57_vm0, %v239_v2  ;;  %v205_v4 = vld [vmem:[%s292_s2] ss:$0 sm:$0xff] }
   0x4   :  { %231 = vmatprep.subr.bf16.mxu0 %v238_v1 }
   0x7   :  { %232 = vmatpush3.bf16.msra.mxu0 %v238_v1 }
   0xa   :  { %234 = vmatmul.mubr.msk.bf16.vlgmr.msra.gmra.mrb[0].mxu0 %vm57_vm0, %v240_v3 }
  0xdd   :  { %v235_v5 = vpop.f32.mrb[0].mxu0 }
  0xde   :  { %v137_v6 = vadd.f32 %v235_v5, %v205_v4  ;;  %v98_v7 = vpop.f32.mrb[1].mxu0 }
  0xdf   :  { %v135_v8 = vadd.f32 %v205_v4, %v98_v7  ;;  %v236_v9 = vpop.f32.mrb[2].mxu0 }
  0xe0   :  { %v141_v10 = vmul.f32 %v137_v6, %v137_v6  ;;  %v138_v11 = vadd.f32 %v236_v9, %v205_v4  ;;  %v101_v12 = vpop.f32.mrb[3].mxu0 }
  0xe1   :  { %v139_v13 = vmul.f32 %v135_v8, %v135_v8  ;;  %v136_v14 = vadd.f32 %v205_v4, %v101_v12 }
  0xe2   :  { %v145_v15 = vmul.f32 %v141_v10, %v137_v6  ;;  %v142_v16 = vmul.f32 %v138_v11, %v138_v11 }
  0xe3   :  { %v143_v17 = vmul.f32 %v139_v13, %v135_v8  ;;  %v140_v18 = vmul.f32 %v136_v14, %v136_v14 }
  0xe4   :  { %v149_v19 = vmul.f32 0.044715, %v145_v15  ;;  %v146_v20 = vmul.f32 %v142_v16, %v138_v11 }
  0xe5   :  { %v147_v21 = vmul.f32 0.044715, %v143_v17  ;;  %v144_v22 = vmul.f32 %v140_v18, %v136_v14 }
  0xe6   :  { %v153_v23 = vadd.f32 %v149_v19, %v137_v6  ;;  %v150_v24 = vmul.f32 0.044715, %v146_v20 }
  0xe7   :  { %v151_v25 = vadd.f32 %v147_v21, %v135_v8  ;;  %v148_v26 = vmul.f32 0.044715, %v144_v22 }
  0xe8   :  { %v157_v27 = vmul.f32 0.7978846, %v153_v23  ;;  %v154_v28 = vadd.f32 %v150_v24, %v138_v11 }
  0xe9   :  { %v155_v29 = vmul.f32 0.7978846, %v151_v25  ;;  %v152_v30 = vadd.f32 %v148_v26, %v136_v14 }
  0xea   :  { %241 = vtanh.f32 %v157_v27  ;;  %v158_v31 = vmul.f32 0.7978846, %v154_v28 }
  0xeb   :  { %243 = vtanh.f32 %v155_v29  ;;  %v156_v32 = vmul.f32 0.7978846, %v152_v30 }
  0xec   :  { %245 = vtanh.f32 %v158_v31 }
  0xed   :  { %247 = vtanh.f32 %v156_v32 }
  0xf4   :  { %v242_v33 = vpop.eup %241 }
  0xf5   :  { %v244_v34 = vpop.eup %243  ;;  %v165_v35 = vadd.f32 1.0, %v242_v33 }
  0xf6   :  { %v246_v36 = vpop.eup %245  ;;  %v163_v37 = vadd.f32 1.0, %v244_v34 }
  0xf7   :  { %v248_v38 = vpop.eup %247  ;;  %v169_v39 = vmul.f32 0.5, %v165_v35  ;;  %v166_v40 = vadd.f32 1.0, %v246_v36 }
  0xf8   :  { %v167_v41 = vmul.f32 0.5, %v163_v37  ;;  %v164_v42 = vadd.f32 1.0, %v248_v38 }
  0xf9   :  { %v170_v43 = vmul.f32 0.5, %v166_v40  ;;  %v173_v45 = vmul.f32 %v169_v39, %v137_v6 }
  0xfa   :  { %v168_v44 = vmul.f32 0.5, %v164_v42  ;;  %v171_v47 = vmul.f32 %v167_v41, %v135_v8 }
  0xfb   :  { %v174_v46 = vmul.f32 %v170_v43, %v138_v11 }
  0xfc   :  { %v172_v48 = vmul.f32 %v168_v44, %v136_v14 }
  0xfd   :  { %v222_v49 = vpack.c.bf16 %v174_v46, %v173_v45 }
  0xfe   :  { %v217_v50 = vpack.c.bf16 %v172_v48, %v171_v47 }
  0xff   :  { %224 = vst [vmem:[%s293_s3 + $0x8] sm:$0xff] %v222_v49  }
 0x100   :  { %218 = vst [vmem:[%s293_s3] sm:$0xff] %v217_v50  }

// kernel: focalnet_forward.31
= control target key start
LH: loop header
LB: loop body
LE: loop exit
PB: predicated region body
PF: predicated region fallthrough
CT: control target
= control target key end

     0   :  { %s1614_s24 = smov 0   ;;  %s2405_s0 = inlined_call_operand.vmem [shape: f32[2,4,4,32], index: 0, kind: input, shape index: {}]   ;;  %s2406_s1 = inlined_call_operand.vmem [shape: f32[2,4,4,32], index: 1, kind: input, shape index: {}]   ;;  %s2407_s2 = inlined_call_operand.vmem [shape: f32[2,4,4,3], index: 2, kind: input, shape index: {}]   ;;  %s2408_s3 = inlined_call_operand.vmem [shape: f32[3,3,32], index: 3, kind: input, shape index: {}]   ;;  %s2409_s4 = inlined_call_operand.vmem [shape: f32[5,5,32], index: 4, kind: input, shape index: {}]   ;;  %s2410_s5 = inlined_call_operand.vmem [shape: bf16[32,32], index: 5, kind: input, shape index: {}]   ;;  %s2411_s6 = inlined_call_operand.vmem [shape: f32[1,32], index: 6, kind: input, shape index: {}]   ;;  %s2412_s7 = inlined_call_operand.vmem [shape: bf16[2,4,4,32], index: 7, kind: output, shape index: {}]  }
   0x1 LB: > { %s1484_s25 = sadd.s32 4294967295, %s1567_s24   ;;  %p1488_p0 = scmp.ge.s32.totalorder %s1567_s24, 1  ;;  %s1567_s24 = sphi %s1614_s24, %s17_s24  }
   0x2   : > { %p257_p1 = scmp.lt.s32.totalorder %s1567_s24, 3 }
   0x4   : > { %p258_p2 = pnand %p1488_p0, %p257_p1 }
   0x6   : > { %261 = sbr.rel (%p258_p2) target bundleno = 476 (0x1dc), region = 48 }
   0xd   : > { %p299_p3 = scmp.lt.s32.totalorder %s1484_s25, 1  ;;  %v1569_v0 = vmov 0   ;;  %vm339_vm0 = vcmask 254976   ;;  %v362_v1 = vlaneseq  ;;  %v2413_v2 = vmov 0.0   ;;  %v359_v4 = vld [vmem:[%s2408_s3] sm:$0x7] }
   0xe   : > { %1536 = vset.pattern.permute.xlu1 %v1569_v0  ;;  %1535 = vset.pattern.permute.xlu0 %v1569_v0  ;;  %341 = vst.msk [vmem:[#allocation2 + $0x18] sm:$0x3] %vm339_vm0, %v2413_v2  ;;  %342 = vst.msk [vmem:[#allocation2 + $0x20] sm:$0x3] %vm339_vm0, %v2413_v2  ;;  %vm332_vm1 = vcmask 261120   ;;  %vm348_vm2 = vcmask 257024  }
   0xf   : > { %s2516_s25 = smov (!%p299_p3, %s1484_s25), 1  ;;  %343 = vst.msk [vmem:[#allocation2 + $0x28] sm:$0x3] %vm339_vm0, %v2413_v2  ;;  %345 = vst.msk [vmem:[#allocation2 + $0x1e] sm:$0x3] %vm339_vm0, %v2413_v2  ;;  %1514 = vmatprep.subr.bf16.mxu0 %v2413_v2  ;;  %v1641_v3 = vshrl.u32 %v362_v1, 7 }
  0x10   : > { %346 = vst.msk [vmem:[#allocation2 + $0x26] sm:$0x3] %vm339_vm0, %v2413_v2  ;;  %347 = vst.msk [vmem:[#allocation2 + $0x2e] sm:$0x3] %vm339_vm0, %v2413_v2  ;;  %s1652_s26 = sshll.u32 %s2516_s25, 4  ;;  %v1571_v41 = vmov 1  }
  0x11   : > { %340 = vst.msk [vmem:[#allocation2 + $0x10] sm:$0x3] %vm339_vm0, %v2413_v2  ;;  %344 = vst.msk [vmem:[#allocation2 + $0x16] sm:$0x3] %vm339_vm0, %v2413_v2  ;;  %s313_s29 = scalar_lea.vmem %s2407_s2, %s1652_s26  ;;  %s308_s9 = scalar_lea.vmem %s2406_s1, %s1652_s26  ;;  %v1666_v5 = vsub.s32 0, %v1641_v3  ;;  %v1669_v6 = vsub.s32 1, %v1641_v3 }
  0x12   : > { %334 = vst.msk [vmem:[#allocation2 + $0x8] sm:$0xff] %vm332_vm1, %v2413_v2  ;;  %333 = vst.msk [vmem:[#allocation2] sm:$0xff] %vm332_vm1, %v2413_v2  ;;  %v1672_v7 = vsub.s32 2, %v1641_v3  ;;  %v1677_v8 = vld [vmem:[%s2409_s4] sm:$0x1f]  ;;  %v1786_v51 = vsub.s32 3, %v1641_v3  ;;  %s303_s12 = scalar_lea.vmem %s2405_s0, %s1652_s26 }
  0x13   : > { %336 = vst.msk [vmem:[#allocation2 + $0x30] sm:$0xff] %vm332_vm1, %v2413_v2  ;;  %337 = vst.msk [vmem:[#allocation2 + $0x38] sm:$0xff] %vm332_vm1, %v2413_v2  ;;  %v1679_v9 = vld [vmem:[%s313_s29 + $0x8] sm:$0xf]  ;;  %v324_v10 = vld [vmem:[%s308_s9] sm:$0xf]  ;;  %v1700_v19 = vrot.slane %v359_v4, %v1669_v6  ;;  %v1707_v21 = vrot.slane %v1677_v8, %v1666_v5  ;;  %v1710_v22 = vrot.slane %v359_v4, %v1666_v5 }
  0x14   : > { %v325_v11 = vld [vmem:[%s308_s9 + $0x4] sm:$0xf]  ;;  %584 = vperm.xlu1 %1536, %v1679_v9   ;;  %v326_v13 = vld [vmem:[%s308_s9 + $0x8] sm:$0xf]  ;;  %v327_v14 = vld [vmem:[%s308_s9 + $0xc] sm:$0xf]  ;;  %v1703_v20 = vrot.slane %v359_v4, %v1672_v7  ;;  %v1714_v23 = vrot.slane %v1677_v8, %v1669_v6 }
  0x15   : > { %v360_v12 = vld [vmem:[%s2408_s3 + $0x4] sm:$0x7]  ;;  %349 = vst.msk [vmem:[#allocation2 + $0x12] sm:$0xf] %vm348_vm2, %v324_v10  ;;  %350 = vst.msk [vmem:[#allocation2 + $0x1a] sm:$0xf] %vm348_vm2, %v325_v11 }
  0x16   : > { %v1687_v15 = vld [vmem:[%s313_s29] sm:$0xf]  ;;  %v361_v16 = vld [vmem:[%s2408_s3 + $0x8] sm:$0x7]  ;;  %351 = vst.msk [vmem:[#allocation2 + $0x22] sm:$0xf] %vm348_vm2, %v326_v13  ;;  %v1718_v24 = vrot.slane %v360_v12, %v1666_v5  ;;  %v1740_v31 = vrot.slane %v360_v12, %v1669_v6  ;;  %v1753_v35 = vrot.slane %v360_v12, %v1672_v7 }
  0x17   : > { %352 = vst.msk [vmem:[#allocation2 + $0x2a] sm:$0xf] %vm348_vm2, %v327_v14  ;;  %576 = vperm.xlu0 %1535, %v1687_v15   ;;  %v1695_v17 = vld [vmem:[%s313_s29 + $0xc] sm:$0xf]  ;;  %v1697_v18 = vld [vmem:[%s313_s29 + $0x4] sm:$0xf]  ;;  %v1721_v25 = vrot.slane %v361_v16, %v1669_v6  ;;  %v1729_v28 = vrot.slane %v361_v16, %v1666_v5  ;;  %v1756_v36 = vrot.slane %v361_v16, %v1672_v7 }
  0x18   : > { %588 = vperm.xlu1 %1536, %v1695_v17   ;;  %vm602_vm3 = vcmask 258049   ;;  %vm1573_vm4 = vmmov 0   ;;  %vm1296_vm5 = vcmask 1042432   ;;  %vm1297_vm6 = vcmask 1046532   ;;  %s1510_s15 = sshll.u32 %s2516_s25, 3 }
  0x19   : > { %v1723_v26 = vld [vmem:[#allocation2 + $0x8] sm:$0xff]  ;;  %vm1298_vm7 = vmor %vm1296_vm5, %vm1297_vm6  ;;  %s318_s26 = scalar_lea.vmem %s2412_s7, %s1510_s15 }
  0x1a   : > { %v1725_v27 = vld [vmem:[#allocation2 + $0x30] sm:$0xff]  ;;  %v1733_v29 = vmul.f32 %v1707_v21, %v1723_v26  ;;  %v1737_v30 = vmul.f32 %v1714_v23, %v1723_v26  ;;  %v398_v32 = vmul.f32 %v1700_v19, %v1723_v26  ;;  %v1746_v33 = vmul.f32 %v1703_v20, %v1723_v26 }
  0x1b   : > { %580 = vperm.xlu0 %1535, %v1697_v18   ;;  %v1750_v34 = vmul.f32 %v1721_v25, %v1725_v27  ;;  %v366_v38 = vmul.f32 %v1710_v22, %v1723_v26  ;;  %v389_v40 = vmul.f32 %v1729_v28, %v1725_v27 }
  0x1c   : > { %v1758_v37 = vld [vmem:[#allocation2 + $0x18] sm:$0xff]  ;;  %v1762_v39 = vld [vmem:[#allocation2 + $0x10] sm:$0xff]  ;;  %1538 = vset.pattern.permute.xlu1 %v1571_v41  ;;  %v406_v53 = vrot.slane %v398_v32, 1  ;;  %v478_v54 = vrot.slane %v1746_v33, 2 }
  0x1d   : > { %v1766_v42 = vld [vmem:[#allocation2 + $0x20] sm:$0xff]  ;;  %v368_v44 = vmul.f32 %v1710_v22, %v1758_v37  ;;  %v400_v45 = vmul.f32 %v1700_v19, %v1758_v37  ;;  %v472_v46 = vmul.f32 %v1703_v20, %v1758_v37  ;;  %v374_v47 = vmul.f32 %v1718_v24, %v1762_v39  ;;  %1197 = vperm.xlu1 %1538, %v1697_v18  }
  0x1e   : > { %v1768_v43 = vld [vmem:[#allocation2 + $0x28] sm:$0xff]  ;;  %v376_v48 = vmul.f32 %v1718_v24, %v1766_v42  ;;  %v424_v50 = vmul.f32 %v1740_v31, %v1766_v42  ;;  %v457_v55 = vrot.slane %v1750_v34, 1  ;;  %v496_v58 = vmul.f32 %v1753_v35, %v1766_v42 }
  0x1f   : > { %1537 = vset.pattern.permute.xlu0 %v1571_v41  ;;  %v388_v49 = vmul.f32 %v1729_v28, %v1768_v43  ;;  %v408_v52 = vrot.slane %v400_v45, 1  ;;  %v448_v57 = vmul.f32 %v1721_v25, %v1768_v43  ;;  %v378_v59 = vadd.f32 %v374_v47, %v366_v38 }
  0x20   : > { %1193 = vperm.xlu0 %1537, %v1687_v15   ;;  %v380_v56 = vadd.f32 %v376_v48, %v368_v44  ;;  %v432_v60 = vrot.slane %v424_v50, 1  ;;  %v480_v61 = vrot.slane %v472_v46, 2  ;;  %v386_v62 = vmul.f32 %v1729_v28, %v1758_v37 }
  0x21   : > { %v422_v63 = vmul.f32 %v1740_v31, %v1762_v39  ;;  %1201 = vperm.xlu1 %1538, %v1679_v9   ;;  %v520_v1 = vmul.f32 %v1756_v36, %v1768_v43  ;;  %v446_v4 = vmul.f32 %v1721_v25, %v1758_v37  ;;  %v494_v10 = vmul.f32 %v1753_v35, %v1762_v39 }
  0x22   : > { %v392_v0 = vadd.f32 %v388_v49, %v380_v56  ;;  %v390_v11 = vadd.f32 %v386_v62, %v378_v59  ;;  %v518_v13 = vmul.f32 %v1756_v36, %v1758_v37  ;;  %v369_v14 = vmul.f32 %v1710_v22, %v1766_v42 }
  0x23   : > { %v430_v12 = vrot.slane %v422_v63, 1  ;;  %v456_v32 = vrot.slane %v448_v57, 1  ;;  %v504_v33 = vrot.slane %v496_v58, 2  ;;  %v377_v38 = vmul.f32 %v1718_v24, %v1768_v43 }
  0x24   : > { %1205 = vperm.xlu0 %1537, %v1695_v17   ;;  %v416_v16 = vadd.f32 %v408_v52, %v392_v0  ;;  %v414_v41 = vadd.f32 %v406_v53, %v390_v11  ;;  %v454_v44 = vrot.slane %v446_v4, 1  ;;  %v401_v45 = vmul.f32 %v1700_v19, %v1766_v42 }
  0x25   : > { %v425_v46 = vmul.f32 %v1740_v31, %v1768_v43  ;;  %v1572_v47 = vmov 2   ;;  %v528_v49 = vrot.slane %v520_v1, 2  ;;  %v502_v50 = vrot.slane %v494_v10, 2 }
  0x26   : > { %1539 = vset.pattern.permute.xlu1 %v1572_v47  ;;  %v440_v48 = vadd.f32 %v432_v60, %v416_v16  ;;  %v381_v56 = vadd.f32 %v377_v38, %v369_v14  ;;  %v438_v52 = vadd.f32 %v430_v12, %v414_v41  ;;  %v526_v57 = vrot.slane %v518_v13, 2 }
  0x27   : > { %1253 = vperm.xlu1 %1539, %v1687_v15   ;;  %v409_v58 = vrot.slane %v401_v45, 1  ;;  %v367_v53 = vmul.f32 %v1710_v22, %v1762_v39  ;;  %v433_v63 = vrot.slane %v425_v46, 1  ;;  %v473_v60 = vmul.f32 %v1703_v20, %v1766_v42 }
  0x28   : > { %1540 = vset.pattern.permute.xlu0 %v1572_v47  ;;  %v464_v59 = vadd.f32 %v456_v32, %v440_v48  ;;  %v393_v62 = vadd.f32 %v389_v40, %v381_v56  ;;  %v462_v0 = vadd.f32 %v454_v44, %v438_v52  ;;  %v375_v1 = vmul.f32 %v1718_v24, %v1758_v37 }
  0x29   : > { %1257 = vperm.xlu0 %1540, %v1697_v18   ;;  %v387_v15 = vmul.f32 %v1729_v28, %v1766_v42  ;;  %v399_v4 = vmul.f32 %v1700_v19, %v1762_v39  ;;  %v497_v18 = vmul.f32 %v1753_v35, %v1768_v43  ;;  %v423_v40 = vmul.f32 %v1740_v31, %v1758_v37 }
  0x2a   : > { %v488_v10 = vadd.f32 %v480_v61, %v464_v59  ;;  %v417_v22 = vadd.f32 %v409_v58, %v393_v62  ;;  %v486_v11 = vadd.f32 %v478_v54, %v462_v0  ;;  %v379_v12 = vadd.f32 %v375_v1, %v367_v53 }
  0x2b   : > { %1261 = vperm.xlu1 %1539, %v1679_v9   ;;  %v407_v13 = vrot.slane %v399_v4, 1  ;;  %v447_v24 = vmul.f32 %v1721_v25, %v1766_v42  ;;  %v521_v19 = vmul.f32 %v1756_v36, %v1725_v27  ;;  %v481_v14 = vrot.slane %v473_v60, 2 }
  0x2c   : > { %v512_v28 = vadd.f32 %v504_v33, %v488_v10  ;;  %v441_v61 = vadd.f32 %v433_v63, %v417_v22  ;;  %v510_v16 = vadd.f32 %v502_v50, %v486_v11  ;;  %v391_v32 = vadd.f32 %v387_v15, %v379_v12  ;;  %v1891_v15 = vld [vmem:[#allocation2] sm:$0xff] }
  0x2d   : > { %v431_v43 = vrot.slane %v423_v40, 1  ;;  %v471_v31 = vmul.f32 %v1703_v20, %v1762_v39  ;;  %v505_v54 = vrot.slane %v497_v18, 2  ;;  %v1846_v25 = vrot.slane %v1677_v8, %v1672_v7 }
  0x2e   : > { %v1840_v38 = vadd.f32 %v528_v49, %v512_v28  ;;  %v465_v9 = vadd.f32 %v457_v55, %v441_v61  ;;  %v1849_v33 = vadd.f32 %v526_v57, %v510_v16  ;;  %v415_v41 = vadd.f32 %v407_v13, %v391_v32  ;;  %v616_v57 = vld [vmem:[%s2409_s4 + $0x8] sm:$0x1f]  ;;  %v619_v32 = vld [vmem:[%s2409_s4 + $0x20] sm:$0x1f] }
  0x2f   : > { %1265 = vperm.xlu1 %1539, %v1695_v17   ;;  %v455_v44 = vrot.slane %v447_v24, 1  ;;  %v495_v45 = vmul.f32 %v1753_v35, %v1758_v37  ;;  %v529_v39 = vrot.slane %v521_v19, 2  ;;  %v1857_v55 = vmul.f32 %v1846_v25, %v1723_v26  ;;  %v618_v19 = vld [vmem:[%s2409_s4 + $0x18] sm:$0x1f] }
  0x30   : > { %v540_v20 = vmul.f32 %v1840_v38, %v1840_v38  ;;  %v489_v34 = vadd.f32 %v481_v14, %v465_v9  ;;  %v538_v46 = vmul.f32 %v1849_v33, %v1849_v33  ;;  %v439_v17 = vadd.f32 %v431_v43, %v415_v41 }
  0x31   : > { %v479_v47 = vrot.slane %v471_v31, 2  ;;  %v519_v48 = vmul.f32 %v1756_v36, %v1766_v42  ;;  %v1865_v37 = vsub.s32 4, %v1641_v3  ;;  %v503_v52 = vrot.slane %v495_v45, 2 }
  0x32   : > { %v544_v49 = vmul.f32 %v540_v20, %v1840_v38  ;;  %v513_v35 = vadd.f32 %v505_v54, %v489_v34  ;;  %v542_v50 = vmul.f32 %v538_v46, %v1849_v33  ;;  %v463_v56 = vadd.f32 %v455_v44, %v439_v17 }
  0x33   : > { %v1873_v58 = vrot.slane %v1677_v8, %v1786_v51  ;;  %v527_v62 = vrot.slane %v519_v48, 2  ;;  %v1885_v0 = vrot.slane %v616_v57, %v1666_v5  ;;  %v1889_v1 = vrot.slane %v1677_v8, %v1865_v37 }
  0x34   : > { %v548_v53 = vmul.f32 0.044715, %v544_v49  ;;  %v1875_v36 = vadd.f32 %v529_v39, %v513_v35  ;;  %v546_v42 = vmul.f32 0.044715, %v542_v50  ;;  %v487_v59 = vadd.f32 %v479_v47, %v463_v56 }
  0x35   : > { %v1879_v3 = vmul.f32 %v1873_v58, %v1723_v26  ;;  %2440 = vst [vmem:[#allocation3_spill] sm:$0xff] %v1889_v1  ;;  %v1895_v22 = vrot.slane %v616_v57, %v1669_v6  ;;  %v1899_v11 = vrot.slane %v616_v57, %v1672_v7  ;;  %v1903_v12 = vmul.f32 %v1889_v1, %v1723_v26 }
  0x36   : > { %v552_v63 = vadd.f32 %v548_v53, %v1840_v38  ;;  %v541_v60 = vmul.f32 %v1875_v36, %v1875_v36  ;;  %v550_v4 = vadd.f32 %v546_v42, %v1849_v33  ;;  %v511_v10 = vadd.f32 %v503_v52, %v487_v59 }
  0x37   : > { %2441 = vst [vmem:[#allocation4_spill] sm:$0xff] %v1903_v12  ;;  %v624_v24 = vmul.f32 %v1707_v21, %v1891_v15  ;;  %v1913_v61 = vrot.slane %v616_v57, %v1786_v51  ;;  %v632_v14 = vmul.f32 %v1885_v0, %v1723_v26  ;;  %v1923_v43 = vrot.slane %v616_v57, %v1865_v37 }
  0x38   : > { %v556_v18 = vmul.f32 0.7978846, %v552_v63  ;;  %v545_v40 = vmul.f32 %v541_v60, %v1875_v36  ;;  %v554_v8 = vmul.f32 0.7978846, %v550_v4  ;;  %v1905_v13 = vadd.f32 %v527_v62, %v511_v10 }
  0x39   : > { %2442 = vst [vmem:[#allocation5_spill] sm:$0xff] %v1913_v61  ;;  %2443 = vst [vmem:[#allocation6_spill] sm:$0xff] %v1923_v43  ;;  %v1927_v31 = vmul.f32 %v1895_v22, %v1723_v26  ;;  %v1930_v54 = vadd.f32 %v632_v14, %v624_v24  ;;  %v1934_v41 = vmul.f32 %v1899_v11, %v1723_v26 }
  0x3a   : > { %1543 = vtanh.f32 %v556_v18  ;;  %v549_v28 = vmul.f32 0.044715, %v545_v40  ;;  %v539_v16 = vmul.f32 %v1905_v13, %v1905_v13  ;;  %v1938_v45 = vrot.slane %v618_v19, %v1666_v5 }
  0x3b   : > { %1545 = vtanh.f32 %v554_v8  ;;  %v1941_v39 = vrot.slane %v619_v32, %v1666_v5  ;;  %v1944_v34 = vrot.slane %v619_v32, %v1669_v6  ;;  %v1948_v46 = vmul.f32 %v1913_v61, %v1723_v26 }
  0x3c   : > { %v553_v9 = vadd.f32 %v549_v28, %v1875_v36  ;;  %v543_v44 = vmul.f32 %v539_v16, %v1905_v13  ;;  %v1951_v47 = vrot.slane %v619_v32, %v1672_v7  ;;  %v1954_v48 = vrot.slane %v619_v32, %v1786_v51 }
  0x3d   : > { %v1958_v49 = vmul.f32 %v1923_v43, %v1723_v26  ;;  %v1961_v35 = vrot.slane %v619_v32, %v1865_v37  ;;  %v1965_v50 = vmul.f32 %v1941_v39, %v1725_v27  ;;  %v1969_v56 = vmul.f32 %v1944_v34, %v1725_v27 }
  0x3e   : > { %v557_v20 = vmul.f32 0.7978846, %v553_v9  ;;  %v547_v17 = vmul.f32 0.044715, %v543_v44  ;;  %v1973_v57 = vrot.slane %v618_v19, %v1669_v6  ;;  %v1977_v26 = vmul.f32 %v1951_v47, %v1725_v27 }
  0x3f   : > { %2444 = vst [vmem:[#allocation7_spill] sm:$0xff] %v1958_v49  ;;  %v1980_v53 = vrot.slane %v618_v19, %v1672_v7  ;;  %v1984_v42 = vmul.f32 %v1954_v48, %v1725_v27  ;;  %v1988_v59 = vmul.f32 %v1961_v35, %v1725_v27  ;;  %v1992_v62 = vmul.f32 %v1938_v45, %v1725_v27 }
  0x40   : > { %1547 = vtanh.f32 %v557_v20  ;;  %v551_v52 = vadd.f32 %v547_v17, %v1905_v13  ;;  %2445 = vst [vmem:[#allocation8_spill] sm:$0xff] %v1977_v26  ;;  %v1996_v60 = vmul.f32 %v1973_v57, %v1725_v27  ;;  %v1999_v10 = vrot.slane %v618_v19, %v1786_v51 }
  0x41   : > { %2446 = vst [vmem:[#allocation9_spill] sm:$0xff] %v1984_v42  ;;  %2447 = vst [vmem:[#allocation10_spill] sm:$0xff] %v1988_v59  ;;  %v2003_v18 = vmul.f32 %v1980_v53, %v1725_v27  ;;  %v2006_v24 = vrot.slane %v618_v19, %v1865_v37 }
  0x42   : > { %v555_v63 = vmul.f32 0.7978846, %v551_v52  ;;  %2448 = vst [vmem:[#allocation11_spill] sm:$0xff] %v1996_v60  ;;  %v2010_v14 = vmul.f32 %v1999_v10, %v1725_v27 }
  0x43   : > { %2449 = vst [vmem:[#allocation12_spill] sm:$0xff] %v2003_v18  ;;  %2450 = vst [vmem:[#allocation13_spill] sm:$0xff] %v2006_v24  ;;  %v2014_v32 = vmul.f32 %v2006_v24, %v1725_v27 }
  0x44   : > { %v1544_v4 = vpop.eup %1543  ;;  %1549 = vtanh.f32 %v555_v63  ;;  %2451 = vst [vmem:[#allocation14_spill] sm:$0xff] %v2010_v14 }
  0x45   : > { %v1546_v40 = vpop.eup %1545  ;;  %v564_v8 = vadd.f32 1.0, %v1544_v4  ;;  %2452 = vst [vmem:[#allocation15_spill] sm:$0xff] %v2014_v32 }
  0x46   : > { %v562_v28 = vadd.f32 1.0, %v1546_v40 }
  0x47   : > { %v568_v16 = vmul.f32 0.5, %v564_v8 }
  0x48   : > { %v566_v9 = vmul.f32 0.5, %v562_v28 }
  0x49   : > { %v2017_v44 = vmul.f32 %v568_v16, %v1840_v38  ;;  %v617_v38 = vld [vmem:[%s2409_s4 + $0x10] sm:$0x1f]  ;;  %v2046_v16 = vmul.f32 %v1714_v23, %v1891_v15 }
  0x4a   : > { %v1548_v20 = vpop.eup %1547  ;;  %v2020_v17 = vmul.f32 %v566_v9, %v1849_v33  ;;  %v2037_v8 = vrot.slane %v617_v38, %v1666_v5  ;;  %v2050_v9 = vmul.f32 %v1846_v25, %v1891_v15  ;;  %v2058_v5 = vmul.f32 %v1873_v58, %v1891_v15 }
  0x4b   : > { %2453 = vst [vmem:[#allocation16_spill] sm:$0xff] %v2017_v44  ;;  %605 = vst.msk [vmem:[#allocation2 + $0x21] sm:$0x1e] %vm602_vm3, %v2017_v44  ;;  %v565_v19 = vadd.f32 1.0, %v1548_v20  ;;  %v2076_v2 = vrot.slane %v617_v38, %v1865_v37  ;;  %v688_v20 = vrot.slane %v2046_v16, 1 }
  0x4c   : > { %2454 = vst [vmem:[#allocation17_spill] sm:$0xff] %v2020_v17  ;;  %603 = vst.msk [vmem:[#allocation2 + $0x11] sm:$0x1e] %vm602_vm3, %v2020_v17 }
  0x4d   : > { %v569_v52 = vmul.f32 0.5, %v565_v19  ;;  %v2054_v19 = vrot.slane %v617_v38, %v1669_v6 }
  0x4e   : > { %v1550_v63 = vpop.eup %1549 }
  0x4f   : > { %v2027_v27 = vmul.f32 %v569_v52, %v1875_v36  ;;  %v563_v4 = vadd.f32 1.0, %v1550_v63  ;;  %v2064_v52 = vrot.slane %v617_v38, %v1672_v7 }
  0x51   : > { %2455 = vst [vmem:[#allocation18_spill] sm:$0xff] %v2027_v27  ;;  %606 = vst.msk [vmem:[#allocation2 + $0x29] sm:$0x1e] %vm602_vm3, %v2027_v27  ;;  %v567_v33 = vmul.f32 0.5, %v563_v4  ;;  %v2069_v4 = vmul.f32 %v1889_v1, %v1891_v15 }
  0x52   : > { %v2086_v6 = vld [vmem:[#allocation2 + $0x20] sm:$0xff] }
  0x53   : > { %v2034_v40 = vld [vmem:[#allocation2 + $0x10] sm:$0xff]  ;;  %v2040_v28 = vmul.f32 %v567_v33, %v1905_v13  ;;  %2457 = vst [vmem:[#allocation20_spill] sm:$0xff] %v2069_v4  ;;  %v2073_v33 = vrot.slane %v617_v38, %v1786_v51  ;;  %v2097_v16 = vmul.f32 %v1973_v57, %v2086_v6  ;;  %v2104_v51 = vmul.f32 %v1980_v53, %v2086_v6 }
  0x54   : > { %v633_v36 = vmul.f32 %v1885_v0, %v2034_v40  ;;  %v644_v13 = vmul.f32 %v2037_v8, %v2034_v40  ;;  %v2108_v38 = vmul.f32 %v1999_v10, %v2086_v6  ;;  %v705_v17 = vmul.f32 %v1895_v22, %v2034_v40 }
  0x55   : > { %2456 = vst [vmem:[#allocation19_spill] sm:$0xff] %v2040_v28  ;;  %604 = vst.msk [vmem:[#allocation2 + $0x19] sm:$0x1e] %vm602_vm3, %v2040_v28  ;;  %v2116_v15 = vmul.f32 %v1899_v11, %v2034_v40  ;;  %v2129_v27 = vmul.f32 %v1913_v61, %v2034_v40  ;;  %v657_v59 = vmul.f32 %v1938_v45, %v2086_v6  ;;  %v761_v42 = vrot.slane %v2097_v16, 1 }
  0x56   : > { %v637_v63 = vadd.f32 %v633_v36, %v1733_v29  ;;  %v2084_v36 = vld [vmem:[#allocation2 + $0x38] sm:$0xff]  ;;  %v648_v29 = vadd.f32 %v644_v13, %v1930_v54  ;;  %2460 = vst [vmem:[#allocation23_spill] sm:$0xff] %v2108_v38  ;;  %v2144_v18 = vmul.f32 %v1923_v43, %v2034_v40  ;;  %v713_v1 = vrot.slane %v705_v17, 1 }
  0x57   : > { %2458 = vst [vmem:[#allocation21_spill] sm:$0xff] %v2084_v36  ;;  %v2093_v28 = vmul.f32 %v1944_v34, %v2084_v36  ;;  %v2121_v13 = vmul.f32 %v1941_v39, %v2084_v36  ;;  %2462 = vst [vmem:[#allocation25_spill] sm:$0xff] %v2129_v27  ;;  %v2135_v14 = vmul.f32 %v1951_v47, %v2084_v36 }
  0x58   : > { %v2123_v7 = vld [vmem:[#allocation2 + $0x28] sm:$0xff]  ;;  %2464 = vst [vmem:[#allocation27_spill] sm:$0xff] %v2144_v18  ;;  %v728_v32 = vmul.f32 %v2054_v19, %v2034_v40  ;;  %v646_v18 = vmul.f32 %v2037_v8, %v2086_v6 }
  0x59   : > { %2459 = vst [vmem:[#allocation22_spill] sm:$0xff] %v2093_v28  ;;  %2461 = vst [vmem:[#allocation24_spill] sm:$0xff] %v2121_v13  ;;  %v669_v49 = vmul.f32 %v1941_v39, %v2123_v7  ;;  %v2177_v4 = vmul.f32 %v1951_v47, %v2123_v7  ;;  %v2191_v38 = vmul.f32 %v1954_v48, %v2123_v7 }
  0x5a   : > { %2463 = vst [vmem:[#allocation26_spill] sm:$0xff] %v2135_v14  ;;  %v668_v14 = vmul.f32 %v1941_v39, %v2086_v6  ;;  %v626_v39 = vmul.f32 %v1707_v21, %v2034_v40  ;;  %v736_v16 = vrot.slane %v728_v32, 1  ;;  %v2467_v32 = vrot.slane %v1927_v31, 1 }
  0x5b   : > { %v730_v31 = vmul.f32 %v2054_v19, %v2086_v6 }
  0x5c   : > { %v2125_v44 = vld [vmem:[#allocation2 + $0x18] sm:$0xff] }
  0x5d   : > { %v645_v54 = vmul.f32 %v2037_v8, %v2125_v44  ;;  %v656_v36 = vmul.f32 %v1938_v45, %v2125_v44  ;;  %v729_v43 = vmul.f32 %v2054_v19, %v2125_v44 }
  0x5f   : > { %v649_v28 = vadd.f32 %v645_v54, %v637_v63  ;;  %v660_v12 = vadd.f32 %v656_v36, %v648_v29  ;;  %v2163_v63 = vmul.f32 %v2006_v24, %v2086_v6  ;;  %v752_v54 = vmul.f32 %v1973_v57, %v2125_v44 }
  0x60   : > { %v776_v29 = vmul.f32 %v1944_v34, %v2086_v6  ;;  %v848_v36 = vmul.f32 %v2064_v52, %v2034_v40  ;;  %v2466_v24 = vrot.slane %v1737_v30, 1  ;;  %v2198_v30 = vmul.f32 %v1961_v35, %v2123_v7 }
  0x61   : > { %v661_v60 = vadd.f32 %v657_v59, %v649_v28  ;;  %2465 = vst [vmem:[#allocation28_spill] sm:$0xff] %v2163_v63  ;;  %v672_v17 = vadd.f32 %v668_v14, %v660_v12  ;;  %v777_v28 = vmul.f32 %v1944_v34, %v2123_v7  ;;  %v634_v12 = vmul.f32 %v1885_v0, %v2125_v44 }
  0x62   : > { %v737_v14 = vrot.slane %v729_v43, 1  ;;  %v658_v34 = vmul.f32 %v1938_v45, %v2123_v7  ;;  %v706_v45 = vmul.f32 %v1895_v22, %v2125_v44  ;;  %v784_v27 = vrot.slane %v776_v29, 1 }
  0x63   : > { %v673_v59 = vadd.f32 %v669_v49, %v661_v60  ;;  %v696_v37 = vadd.f32 %v688_v20, %v672_v17  ;;  %v638_v49 = vadd.f32 %v634_v12, %v626_v39  ;;  %v682_v60 = vmul.f32 %v1714_v23, %v2034_v40 }
  0x64   : > { %v760_v17 = vrot.slane %v752_v54, 1  ;;  %v785_v39 = vrot.slane %v777_v28, 1  ;;  %v872_v29 = vmul.f32 %v1980_v53, %v2125_v44 }
  0x65   : > { %v697_v26 = vadd.f32 %v2466_v24, %v673_v59  ;;  %v720_v20 = vadd.f32 %v2467_v32, %v696_v37  ;;  %v650_v24 = vadd.f32 %v646_v18, %v638_v49  ;;  %v905_v59 = vrot.slane %v2177_v4, 2 }
  0x66   : > { %v690_v63 = vrot.slane %v682_v60, 1  ;;  %v856_v37 = vrot.slane %v848_v36, 2  ;;  %v714_v49 = vrot.slane %v706_v45, 1  ;;  %v2469_v32 = vrot.slane %v1857_v55, 2 }
  0x67   : > { %v721_v61 = vadd.f32 %v713_v1, %v697_v26  ;;  %v744_v12 = vadd.f32 %v736_v16, %v720_v20  ;;  %v662_v43 = vadd.f32 %v658_v34, %v650_v24  ;;  %v849_v1 = vmul.f32 %v2064_v52, %v2125_v44 }
  0x68   : > { %v1025_v26 = vrot.slane %v2191_v38, 3  ;;  %v754_v16 = vmul.f32 %v1973_v57, %v2123_v7  ;;  %v2217_v34 = vmul.f32 %v2073_v33, %v2034_v40  ;;  %v2468_v57 = vrot.slane %v2050_v9, 2 }
  0x69   : > { %v745_v13 = vadd.f32 %v737_v14, %v721_v61  ;;  %v768_v18 = vadd.f32 %v760_v17, %v744_v12  ;;  %v674_v28 = vadd.f32 %v1965_v50, %v662_v43  ;;  %v896_v14 = vmul.f32 %v1951_v47, %v2086_v6 }
  0x6a   : > { %v857_v36 = vrot.slane %v849_v1, 2  ;;  %v2227_v43 = vmul.f32 %v2076_v2, %v2034_v40  ;;  %v2231_v47 = vmul.f32 %v1961_v35, %v2086_v6  ;;  %v762_v24 = vrot.slane %v754_v16, 1 }
  0x6b   : > { %v769_v54 = vadd.f32 %v761_v42, %v745_v13  ;;  %v792_v61 = vadd.f32 %v784_v27, %v768_v18  ;;  %v2221_v42 = vmul.f32 %v1954_v48, %v2086_v6  ;;  %v698_v50 = vadd.f32 %v690_v63, %v674_v28 }
  0x6c   : > { %v738_v13 = vrot.slane %v730_v31, 1  ;;  %v802_v63 = vmul.f32 %v1846_v25, %v2034_v40  ;;  %v969_v9 = vmul.f32 %v2073_v33, %v2125_v44  ;;  %v2241_v45 = vmul.f32 %v2076_v2, %v2125_v44 }
  0x6d   : > { %v793_v60 = vadd.f32 %v785_v39, %v769_v54  ;;  %v816_v27 = vadd.f32 %v2468_v57, %v792_v61  ;;  %v722_v17 = vadd.f32 %v714_v49, %v698_v50  ;;  %v2470_v39 = vrot.slane %v1934_v41, 2 }
  0x6e   : > { %v880_v31 = vrot.slane %v872_v29, 2  ;;  %v2471_v1 = vrot.slane %v2116_v15, 2  ;;  %v826_v54 = vmul.f32 %v1899_v11, %v2125_v44  ;;  %v627_v28 = vmul.f32 %v1707_v21, %v2125_v44  ;;  %v1541_v15 = vld [vmem:[%s2410_s5] sm:$0xff]  }
  0x6f   : > { %v817_v20 = vadd.f32 %v2469_v32, %v793_v60  ;;  %v840_v12 = vadd.f32 %v2470_v39, %v816_v27  ;;  %v746_v18 = vadd.f32 %v738_v13, %v722_v17  ;;  %v904_v16 = vrot.slane %v896_v14, 2  ;;  %1515 = vmatpush3.bf16.msra.mxu0 %v1541_v15  ;;  %v2479_v15 = vld [vmem:[#allocation25_spill] sm:$0xff] }
  0x70   : > { %v635_v61 = vmul.f32 %v1885_v0, %v2086_v6  ;;  %v647_v41 = vmul.f32 %v2037_v8, %v2123_v7  ;;  %v810_v50 = vrot.slane %v802_v63, 2  ;;  %v850_v13 = vmul.f32 %v2064_v52, %v2086_v6 }
  0x71   : > { %v841_v55 = vadd.f32 %v2471_v1, %v817_v20  ;;  %v864_v49 = vadd.f32 %v856_v37, %v840_v12  ;;  %v770_v60 = vadd.f32 %v762_v24, %v746_v18  ;;  %v977_v57 = vrot.slane %v969_v9, 3 }
  0x72   : > { %v639_v37 = vadd.f32 %v635_v61, %v627_v28  ;;  %v683_v14 = vmul.f32 %v1714_v23, %v2125_v44  ;;  %v2472_v0 = vrot.slane %v2104_v51, 2  ;;  %v2473_v27 = vrot.slane %v1969_v56, 1  ;;  %v1542_v51 = vld [vmem:[%s2410_s5 + $0x8] sm:$0xff]  }
  0x73   : > { %v865_v29 = vadd.f32 %v857_v36, %v841_v55  ;;  %v888_v21 = vadd.f32 %v880_v31, %v864_v49  ;;  %v834_v20 = vrot.slane %v826_v54, 2  ;;  %v874_v36 = vmul.f32 %v1980_v53, %v2123_v7  ;;  %v2478_v61 = vld [vmem:[#allocation24_spill] sm:$0xff] }
  0x74   : > { %v794_v32 = vadd.f32 %v2473_v27, %v770_v60  ;;  %v2474_v17 = vmov 0.0   ;;  %v992_v63 = vmul.f32 %v1999_v10, %v2125_v44  ;;  %v651_v9 = vadd.f32 %v647_v41, %v639_v37 }
  0x75   : > { %v889_v8 = vadd.f32 %v2472_v0, %v865_v29  ;;  %1516 = vmatprep.subr.bf16.mxu0 %v2474_v17  ;;  %v912_v24 = vadd.f32 %v904_v16, %v888_v21  ;;  %v707_v23 = vmul.f32 %v1895_v22, %v2086_v6  ;;  %v976_v39 = vrot.slane %v2217_v34, 3  ;;  %1518 = vmatprep.mubr.msk.bf16.mxu0 %vm1573_vm4, %v2474_v17 }
  0x76   : > { %v818_v53 = vadd.f32 %v810_v50, %v794_v32  ;;  %v858_v12 = vrot.slane %v850_v13, 2  ;;  %v2475_v31 = vrot.slane %v2058_v5, 3  ;;  %v663_v55 = vadd.f32 %v1992_v62, %v651_v9  ;;  %1517 = vmatpush3.bf16.msra.mxu0 %v1542_v51 }
  0x77   : > { %v913_v56 = vadd.f32 %v905_v59, %v889_v8  ;;  %v691_v18 = vrot.slane %v683_v14, 1  ;;  %v731_v22 = vmul.f32 %v2054_v19, %v2123_v7  ;;  %v2476_v54 = vrot.slane %v1879_v3, 3  ;;  %v2481_v3 = vld [vmem:[#allocation5_spill] sm:$0xff] }
  0x78   : > { %v936_v1 = vadd.f32 %v2475_v31, %v912_v24  ;;  %v842_v49 = vadd.f32 %v834_v20, %v818_v53  ;;  %v882_v4 = vrot.slane %v874_v36, 2  ;;  %v922_v59 = vmul.f32 %v1873_v58, %v2034_v40  ;;  %v2482_v24 = vld [vmem:[#allocation23_spill] sm:$0xff]  ;;  %v2486_v53 = vld [vmem:[#allocation13_spill] sm:$0xff] }
  0x79   : > { %v937_v28 = vadd.f32 %v2476_v54, %v913_v56  ;;  %v2477_v34 = vrot.slane %v1948_v46, 3  ;;  %v1000_v5 = vrot.slane %v992_v63, 3  ;;  %v675_v41 = vadd.f32 %v2478_v61, %v663_v55  ;;  %v2487_v54 = vld [vmem:[#allocation20_spill] sm:$0xff] }
  0x7a   : > { %v715_v62 = vrot.slane %v707_v23, 1  ;;  %v2480_v29 = vrot.slane %v2479_v15, 3  ;;  %v1097_v19 = vrot.slane %v2241_v45, 4  ;;  %v866_v50 = vadd.f32 %v858_v12, %v842_v49  ;;  %v2484_v23 = vld [vmem:[#allocation8_spill] sm:$0xff]  ;;  %v2489_v49 = vld [vmem:[#allocation11_spill] sm:$0xff] }
  0x7b   : > { %v960_v16 = vadd.f32 %v2477_v34, %v936_v1  ;;  %v946_v13 = vmul.f32 %v2481_v3, %v2125_v44  ;;  %v1024_v37 = vrot.slane %v2221_v42, 3  ;;  %v699_v14 = vadd.f32 %v691_v18, %v675_v41  ;;  %v2494_v41 = vld [vmem:[#allocation7_spill] sm:$0xff] }
  0x7c   : > { %v961_v60 = vadd.f32 %v2480_v29, %v937_v28  ;;  %v739_v0 = vrot.slane %v731_v22, 1  ;;  %v890_v8 = vadd.f32 %v882_v4, %v866_v50  ;;  %v930_v27 = vrot.slane %v922_v59, 3 }
  0x7d   : > { %v984_v21 = vadd.f32 %v976_v39, %v960_v16  ;;  %v970_v32 = vmul.f32 %v2073_v33, %v2086_v6  ;;  %v723_v36 = vadd.f32 %v715_v62, %v699_v14  ;;  %v803_v45 = vmul.f32 %v1846_v25, %v2125_v44  ;;  %v2491_v16 = vld [vmem:[#allocation4_spill] sm:$0xff] }
  0x7e   : > { %v985_v46 = vadd.f32 %v977_v57, %v961_v60  ;;  %v2483_v63 = vrot.slane %v2482_v24, 3  ;;  %v2485_v51 = vrot.slane %v2484_v23, 2  ;;  %v954_v42 = vrot.slane %v946_v13, 3  ;;  %v2496_v60 = vld [vmem:[#allocation22_spill] sm:$0xff] }
  0x7f   : > { %v1008_v20 = vadd.f32 %v1000_v5, %v984_v21  ;;  %v994_v57 = vmul.f32 %v1999_v10, %v2123_v7  ;;  %v1112_v12 = vmul.f32 %v2486_v53, %v2125_v44  ;;  %v747_v31 = vadd.f32 %v739_v0, %v723_v36 }
  0x80   : > { %v1009_v9 = vadd.f32 %v2483_v63, %v985_v46  ;;  %v914_v56 = vadd.f32 %v2485_v51, %v890_v8  ;;  %v827_v25 = vmul.f32 %v1899_v11, %v2086_v6  ;;  %v1096_v55 = vrot.slane %v2227_v43, 4  ;;  %v2500_v8 = vld [vmem:[#allocation6_spill] sm:$0xff]  ;;  %v2501_v51 = vld [vmem:[#allocation12_spill] sm:$0xff] }
  0x81   : > { %v1032_v39 = vadd.f32 %v1024_v37, %v1008_v20  ;;  %v978_v22 = vrot.slane %v970_v32, 3  ;;  %v2488_v10 = vrot.slane %v2487_v54, 4  ;;  %v2490_v17 = vrot.slane %v2489_v49, 1  ;;  %v2498_v37 = vld [vmem:[#allocation27_spill] sm:$0xff] }
  0x82   : > { %v1033_v1 = vadd.f32 %v1025_v26, %v1009_v9  ;;  %v938_v18 = vadd.f32 %v930_v27, %v914_v56  ;;  %v811_v59 = vrot.slane %v803_v45, 2  ;;  %v851_v34 = vmul.f32 %v2064_v52, %v2123_v7  ;;  %v2493_v26 = vld [vmem:[#allocation3_spill] sm:$0xff] }
  0x83   : > { %v1056_v28 = vadd.f32 %v2488_v10, %v1032_v39  ;;  %v771_v4 = vadd.f32 %v2490_v17, %v747_v31  ;;  %v2492_v5 = vrot.slane %v2491_v16, 4  ;;  %v1002_v38 = vrot.slane %v994_v57, 3  ;;  %v2502_v57 = vld [vmem:[#allocation28_spill] sm:$0xff]  ;;  %v2504_v31 = vld [vmem:[#allocation9_spill] sm:$0xff] }
  0x84   : > { %v962_v61 = vadd.f32 %v954_v42, %v938_v18  ;;  %v1042_v43 = vmul.f32 %v2493_v26, %v2034_v40  ;;  %v2495_v62 = vrot.slane %v2494_v41, 4  ;;  %v1120_v29 = vrot.slane %v1112_v12, 4  ;;  %v2506_v18 = vld [vmem:[#allocation26_spill] sm:$0xff] }
  0x85   : > { %v1057_v11 = vadd.f32 %v2492_v5, %v1033_v1  ;;  %v2497_v50 = vrot.slane %v2496_v60, 1  ;;  %v835_v21 = vrot.slane %v827_v25, 2  ;;  %v2499_v14 = vrot.slane %v2498_v37, 4 }
  0x86   : > { %v1080_v15 = vadd.f32 %v2495_v62, %v1056_v28  ;;  %v1145_v52 = vrot.slane %v2198_v30, 4  ;;  %v986_v46 = vadd.f32 %v978_v22, %v962_v61  ;;  %v1066_v27 = vmul.f32 %v2500_v8, %v2125_v44 }
  0x87   : > { %v795_v13 = vadd.f32 %v2497_v50, %v771_v4  ;;  %v1081_v0 = vadd.f32 %v2499_v14, %v1057_v11  ;;  %v1144_v40 = vrot.slane %v2231_v47, 4  ;;  %v859_v36 = vrot.slane %v851_v34, 2  ;;  %v2509_v14 = vld [vmem:[#allocation14_spill] sm:$0xff] }
  0x88   : > { %v1104_v32 = vadd.f32 %v1096_v55, %v1080_v15  ;;  %v1010_v24 = vadd.f32 %v1002_v38, %v986_v46  ;;  %v1050_v63 = vrot.slane %v1042_v43, 4  ;;  %v1090_v9 = vmul.f32 %v2076_v2, %v2086_v6  ;;  %v2507_v43 = vld [vmem:[#allocation10_spill] sm:$0xff] }
  0x89   : > { %v819_v20 = vadd.f32 %v811_v59, %v795_v13  ;;  %v1105_v45 = vadd.f32 %v1097_v19, %v1081_v0  ;;  %v883_v56 = vrot.slane %v2501_v51, 2  ;;  %v923_v30 = vmul.f32 %v1873_v58, %v2125_v44 }
  0x8a   : > { %v1128_v23 = vadd.f32 %v1120_v29, %v1104_v32  ;;  %v2503_v39 = vrot.slane %v2502_v57, 4  ;;  %v2505_v47 = vrot.slane %v2504_v31, 3  ;;  %v1074_v1 = vrot.slane %v1066_v27, 4  ;;  %v2508_v29 = vld [vmem:[#allocation21_spill] sm:$0xff] }
  0x8b   : > { %v843_v42 = vadd.f32 %v835_v21, %v819_v20  ;;  %v1114_v19 = vmul.f32 %v2486_v53, %v2123_v7  ;;  %v907_v22 = vrot.slane %v2506_v18, 2  ;;  %v947_v10 = vmul.f32 %v2481_v3, %v2086_v6 }
  0x8c   : > { %v1129_v12 = vadd.f32 %v2503_v39, %v1105_v45  ;;  %v1034_v25 = vadd.f32 %v2505_v47, %v1010_v24  ;;  %v2346_v55 = vadd.f32 %v1144_v40, %v1128_v23  ;;  %v1098_v49 = vrot.slane %v1090_v9, 4 }
  0x8d   : > { %v867_v54 = vadd.f32 %v859_v36, %v843_v42  ;;  %v931_v59 = vrot.slane %v923_v30, 3  ;;  %v971_v53 = vmul.f32 %v2073_v33, %v2123_v7  ;;  %v1122_v5 = vrot.slane %v1114_v19, 4 }
  0x8e   : > { %v2351_v28 = vadd.f32 %v1145_v52, %v1129_v12  ;;  %v1058_v58 = vadd.f32 %v1050_v63, %v1034_v25  ;;  %v1156_v17 = vmul.f32 %v2346_v55, %v2346_v55  ;;  %v955_v61 = vrot.slane %v947_v10, 3 }
  0x8f   : > { %v891_v4 = vadd.f32 %v883_v56, %v867_v54  ;;  %v1146_v41 = vrot.slane %v2507_v43, 4  ;;  %v1019_v60 = vmul.f32 %v1954_v48, %v2508_v29  ;;  %v979_v33 = vrot.slane %v971_v53, 3 }
  0x90   : > { %v1157_v34 = vmul.f32 %v2351_v28, %v2351_v28  ;;  %v1082_v16 = vadd.f32 %v1074_v1, %v1058_v58  ;;  %v1160_v11 = vmul.f32 %v1156_v17, %v2346_v55  ;;  %v1003_v0 = vrot.slane %v2509_v14, 3 }
  0x91   : > { %v915_v3 = vadd.f32 %v907_v22, %v891_v4  ;;  %v1043_v46 = vmul.f32 %v2493_v26, %v2125_v44  ;;  %v1027_v20 = vrot.slane %v1019_v60, 3  ;;  %v1067_v48 = vmul.f32 %v2500_v8, %v2086_v6  ;;  %v2510_v6 = vld [vmem:[#allocation15_spill] sm:$0xff] }
  0x92   : > { %v1161_v38 = vmul.f32 %v1157_v34, %v2351_v28  ;;  %v1106_v62 = vadd.f32 %v1098_v49, %v1082_v16  ;;  %v1164_v15 = vmul.f32 0.044715, %v1160_v11  ;;  %v1091_v23 = vmul.f32 %v2076_v2, %v2123_v7 }
  0x93   : > { %v939_v50 = vadd.f32 %v931_v59, %v915_v3  ;;  %v1051_v9 = vrot.slane %v1043_v46, 4  ;;  %v1075_v26 = vrot.slane %v1067_v48, 4  ;;  %v1139_v42 = vmul.f32 %v1961_v35, %v2508_v29 }
  0x94   : > { %v1165_v13 = vmul.f32 0.044715, %v1161_v38  ;;  %v1130_v21 = vadd.f32 %v1122_v5, %v1106_v62  ;;  %v1168_v37 = vadd.f32 %v1164_v15, %v2346_v55  ;;  %v1099_v57 = vrot.slane %v1091_v23, 4 }
  0x95   : > { %v963_v52 = vadd.f32 %v955_v61, %v939_v50  ;;  %v1123_v8 = vrot.slane %v2510_v6, 4  ;;  %v1147_v47 = vrot.slane %v1139_v42, 4 }
  0x96   : > { %v1169_v27 = vadd.f32 %v1165_v13, %v2351_v28  ;;  %v1154_v32 = vadd.f32 %v1146_v41, %v1130_v21  ;;  %v1172_v40 = vmul.f32 0.7978846, %v1168_v37  ;;  %v585_v21 = vpop.permute.xlu1 %584 }
  0x97   : > { %v987_v36 = vadd.f32 %v979_v33, %v963_v52 }
  0x98   : > { %v1173_v45 = vmul.f32 0.7978846, %v1169_v27  ;;  %v1158_v24 = vmul.f32 %v1154_v32, %v1154_v32  ;;  %1551 = vtanh.f32 %v1172_v40  ;;  %v577_v27 = vpop.permute.xlu0 %576 }
  0x99   : > { %v1011_v63 = vadd.f32 %v1003_v0, %v987_v36 }
  0x9a   : > { %1553 = vtanh.f32 %v1173_v45  ;;  %v1162_v51 = vmul.f32 %v1158_v24, %v1154_v32  ;;  %v589_v52 = vpop.permute.xlu1 %588 }
  0x9b   : > { %v1035_v44 = vadd.f32 %v1027_v20, %v1011_v63 }
  0x9c   : > { %v1166_v56 = vmul.f32 0.044715, %v1162_v51  ;;  %v581_v48 = vpop.permute.xlu0 %580 }
  0x9d   : > { %v1059_v30 = vadd.f32 %v1051_v9, %v1035_v44  ;;  %v592_v44 = vrot.slane %v585_v21, 7  ;;  %v591_v42 = vrot.slane %v581_v48, 7 }
  0x9e   : > { %v1170_v39 = vadd.f32 %v1166_v56, %v1154_v32  ;;  %v1198_v20 = vpop.permute.xlu1 %1197  ;;  %v593_v56 = vrot.slane %v589_v52, 7 }
  0x9f   : > { %v1083_v12 = vadd.f32 %v1075_v26, %v1059_v30  ;;  %v590_v26 = vrot.slane %v577_v27, 7 }
  0xa0   : > { %v1174_v31 = vmul.f32 0.7978846, %v1170_v39  ;;  %v1194_v9 = vpop.permute.xlu0 %1193 }
  0xa1   : > { %v1107_v25 = vadd.f32 %v1099_v57, %v1083_v12 }
  0xa2   : > { %1555 = vtanh.f32 %v1174_v31  ;;  %v1552_v1 = vpop.eup %1551  ;;  %v1202_v63 = vpop.permute.xlu1 %1201 }
  0xa3   : > { %v1131_v2 = vadd.f32 %v1123_v8, %v1107_v25  ;;  %v1180_v19 = vadd.f32 1.0, %v1552_v1  ;;  %v2512_v1 = vld [vmem:[#allocation17_spill] sm:$0xff] }
  0xa4   : > { %v1554_v7 = vpop.eup %1553  ;;  %v1206_v51 = vpop.permute.xlu0 %1205 }
  0xa5   : > { %v1181_v18 = vadd.f32 1.0, %v1554_v7  ;;  %v1155_v22 = vadd.f32 %v1147_v47, %v1131_v2  ;;  %v1184_v54 = vmul.f32 0.5, %v1180_v19  ;;  %v2511_v47 = vld [vmem:[#allocation16_spill] sm:$0xff]  ;;  %v598_v2 = vmul.f32 %v590_v26, %v2512_v1  ;;  %v2513_v7 = vld [vmem:[#allocation18_spill] sm:$0xff] }
  0xa6   : > { %v1254_v23 = vpop.permute.xlu1 %1253  ;;  %v600_v25 = vmul.f32 %v592_v44, %v2511_v47  ;;  %v601_v19 = vmul.f32 %v593_v56, %v2513_v7 }
  0xa7   : > { %v1185_v10 = vmul.f32 0.5, %v1181_v18  ;;  %v1159_v58 = vmul.f32 %v1155_v22, %v1155_v22  ;;  %v1188_v35 = vmul.f32 %v1184_v54, %v2346_v55  ;;  %v2514_v18 = vld [vmem:[#allocation19_spill] sm:$0xff] }
  0xa9   : > { %v1189_v49 = vmul.f32 %v1185_v10, %v2351_v28  ;;  %v1163_v17 = vmul.f32 %v1159_v58, %v1155_v22  ;;  %v1228_v4 = vsel %vm348_vm2, %v1188_v35, 0.0  ;;  %v1208_v39 = vmul.f32 %v1194_v9, %v1188_v35 }
  0xaa   : > { %v1262_v12 = vpop.permute.xlu1 %1261 }
  0xab   : > { %v1229_v59 = vsel %vm348_vm2, %v1189_v49, 0.0  ;;  %v1167_v53 = vmul.f32 0.044715, %v1163_v17  ;;  %v1209_v57 = vmul.f32 %v1198_v20, %v1189_v49  ;;  %v1216_v58 = vrot.slane %v1208_v39, 7 }
  0xac   : > { %v1556_v34 = vpop.eup %1555  ;;  %v1230_v16 = vadd.f32 %v1229_v59, %v1228_v4  ;;  %v1258_v59 = vpop.permute.xlu0 %1257 }
  0xad   : > { %v1182_v5 = vadd.f32 1.0, %v1556_v34  ;;  %v1171_v11 = vadd.f32 %v1167_v53, %v1155_v22  ;;  %v1217_v10 = vrot.slane %v1209_v57, 7 }
  0xae   : > { %v1266_v35 = vpop.permute.xlu1 %1265 }
  0xaf   : > { %v1186_v3 = vmul.f32 0.5, %v1182_v5  ;;  %v1175_v61 = vmul.f32 0.7978846, %v1171_v11 }
  0xb1   : > { %v1190_v38 = vmul.f32 %v1186_v3, %v1154_v32  ;;  %1557 = vtanh.f32 %v1175_v61  ;;  %v1224_v3 = vadd.f32 %v1216_v58, %v598_v2 }
  0xb3   : > { %v1231_v43 = vsel %vm348_vm2, %v1190_v38, 0.0  ;;  %v1210_v6 = vmul.f32 %v1202_v63, %v1190_v38 }
  0xb4   : > { %v1232_v41 = vadd.f32 %v1231_v43, %v1230_v16 }
  0xb5   : > { %v1218_v17 = vrot.slane %v1210_v6, 7 }
  0xb7   : > { %v1226_v61 = vadd.f32 %v1218_v17, %v600_v25 }
  0xbb   : > { %v1558_v55 = vpop.eup %1557 }
  0xbc   : > { %v1183_v62 = vadd.f32 1.0, %v1558_v55 }
  0xbe   : > { %v1187_v28 = vmul.f32 0.5, %v1183_v62 }
  0xc0   : > { %v1191_v15 = vmul.f32 %v1187_v28, %v1155_v22  ;;  %v599_v22 = vmul.f32 %v591_v42, %v2514_v18  ;;  %v321_v42 = vld [vmem:[%s303_s12 + $0x4] sm:$0xf] }
  0xc2   : > { %v1233_v29 = vsel %vm348_vm2, %v1191_v15, 0.0  ;;  %v1211_v8 = vmul.f32 %v1206_v51, %v1191_v15  ;;  %v1225_v11 = vadd.f32 %v1217_v10, %v599_v22  ;;  %v320_v51 = vld [vmem:[%s303_s12] sm:$0xf] }
  0xc3   : > { %v1234_v60 = vadd.f32 %v1233_v29, %v1232_v41 }
  0xc4   : > { %v1219_v4 = vrot.slane %v1211_v8, 7 }
  0xc5   : > { %v1235_v50 = vrot.slane %v1234_v60, 4 }
  0xc6   : > { %v1227_v38 = vadd.f32 %v1219_v4, %v601_v19 }
  0xc7   : > { %v1236_v33 = vadd.f32 %v1235_v50, %v1234_v60 }
  0xc9   : > { %v1237_v13 = vrot.slane %v1236_v33, 2 }
  0xcb   : > { %v1238_v37 = vadd.f32 %v1237_v13, %v1236_v33 }
  0xcd   : > { %v1239_v14 = vrot.slane %v1238_v37, 1 }
  0xcf   : > { %v1240_v0 = vadd.f32 %v1239_v14, %v1238_v37 }
  0xd1   : > { %v1242_v46 = vmul.f32 0.0625, %v1240_v0 }
  0xd3   : > { %v1243_v32 = vmul.f32 %v1242_v46, %v1242_v46 }
  0xd5   : > { %v1244_v40 = vmul.f32 %v1243_v32, %v1242_v46 }
  0xd7   : > { %v1245_v36 = vmul.f32 0.044715, %v1244_v40 }
  0xd9   : > { %v1246_v45 = vadd.f32 %v1245_v36, %v1242_v46 }
  0xdb   : > { %v1247_v24 = vmul.f32 0.7978846, %v1246_v45 }
  0xdd   : > { %1559 = vtanh.f32 %v1247_v24 }
  0xe7   : > { %v1560_v30 = vpop.eup %1559 }
  0xe8   : > { %v1249_v31 = vadd.f32 1.0, %v1560_v30  ;;  %v322_v30 = vld [vmem:[%s303_s12 + $0x8] sm:$0xf] }
  0xea   : > { %v1250_v54 = vmul.f32 0.5, %v1249_v31  ;;  %v323_v31 = vld [vmem:[%s303_s12 + $0xc] sm:$0xf] }
  0xec   : > { %v1251_v49 = vmul.f32 %v1250_v54, %v1242_v46 }
  0xee   : > { %v1268_v53 = vmul.f32 %v1254_v23, %v1251_v49  ;;  %v1270_v34 = vmul.f32 %v1262_v12, %v1251_v49  ;;  %v1271_v16 = vmul.f32 %v1266_v35, %v1251_v49  ;;  %v1269_v5 = vmul.f32 %v1258_v59, %v1251_v49  ;;  %v1501_v23 = vld [vmem:[%s2411_s6] ss:$0 sm:$0xff] }
  0xf0   : > { %v1276_v43 = vrot.slane %v1268_v53, 7  ;;  %v1278_v41 = vrot.slane %v1270_v34, 7  ;;  %v1279_v55 = vrot.slane %v1271_v16, 7  ;;  %v1277_v62 = vrot.slane %v1269_v5, 7 }
  0xf2   : > { %v1284_v28 = vadd.f32 %v1276_v43, %v1224_v3  ;;  %v1286_v15 = vadd.f32 %v1278_v41, %v1226_v61  ;;  %v1287_v29 = vadd.f32 %v1279_v55, %v1227_v38  ;;  %v1285_v60 = vadd.f32 %v1277_v62, %v1225_v11 }
  0xf4   : > { %v1292_v50 = vcombine.high %v1284_v28, %v1284_v28  ;;  %v1294_v33 = vcombine.high %v1286_v15, %v1286_v15  ;;  %v1295_v13 = vcombine.high %v1287_v29, %v1287_v29  ;;  %v1293_v21 = vcombine.high %v1285_v60, %v1285_v60 }
  0xf5   : > { %v1497_v37 = vrot.slane %v1284_v28, 9  ;;  %v1499_v0 = vrot.slane %v1286_v15, 9  ;;  %v1500_v46 = vrot.slane %v1287_v29, 9  ;;  %v1498_v32 = vrot.slane %v1285_v60, 9 }
  0xf6   : > { %v1301_v14 = vrot.slane %v1292_v50, 5  ;;  %v1309_v52 = vrot.slane %v1294_v33, 5  ;;  %v1313_v27 = vrot.slane %v1295_v13, 5  ;;  %v1305_v40 = vrot.slane %v1293_v21, 5 }
  0xf8   : > { %v1302_v20 = vsel %vm1298_vm7, %v1497_v37, %v1301_v14  ;;  %v1310_v36 = vsel %vm1298_vm7, %v1499_v0, %v1309_v52  ;;  %v1314_v48 = vsel %vm1298_vm7, %v1500_v46, %v1313_v27  ;;  %v1306_v45 = vsel %vm1298_vm7, %v1498_v32, %v1305_v40 }
  0xf9   : > { %v1315_v24 = vcombine.low %v1302_v20, %v1306_v45  ;;  %v1316_v63 = vcombine.low %v1310_v36, %v1314_v48 }
  0xfb   : > { %v1319_v9 = vpack.c.bf16 %v1316_v63, %v1315_v24 }
  0xfd   : > { %1519 = vmatmul.mubr.msk.bf16.vlgmr.msra.gmra.mrb[0].mxu0 %vm332_vm1, %v1319_v9 }
 0x1d0   : > { %v1380_v44 = vpop.f32.mrb[0].mxu0 }
 0x1d1   : > { %v1381_v26 = vadd.f32 %v1501_v23, %v1380_v44  ;;  %v1520_v56 = vpop.f32.mrb[1].mxu0 }
 0x1d2   : > { %v1383_v57 = vpop.f32.mrb[2].mxu0 }
 0x1d3   : > { %v1389_v39 = vcombine.high %v1381_v26, %v1381_v26  ;;  %v1393_v6 = vmul.f32 %v1381_v26, %v320_v51  ;;  %v1384_v8 = vadd.f32 %v1501_v23, %v1383_v57  ;;  %v1521_v12 = vpop.f32.mrb[3].mxu0 }
 0x1d5   : > { %v1394_v47 = vmul.f32 %v1389_v39, %v321_v42  ;;  %v1397_v25 = vpack.c.bf16 %v1393_v6, %v1393_v6  ;;  %v1390_v1 = vcombine.high %v1384_v8, %v1384_v8  ;;  %v1395_v2 = vmul.f32 %v1384_v8, %v322_v30 }
 0x1d7   : > { %v1398_v7 = vpack.c.bf16 %v1394_v47, %v1394_v47  ;;  %1401 = vst.msk [vmem:[%s318_s26] sm:$0x3] %vm339_vm0, %v1397_v25  ;;  %v1396_v19 = vmul.f32 %v1390_v1, %v323_v31  ;;  %v1399_v18 = vpack.c.bf16 %v1395_v2, %v1395_v2 }
 0x1d9   : > { %1402 = vst.msk [vmem:[%s318_s26 + $0x2] sm:$0x3] %vm339_vm0, %v1398_v7  ;;  %v1400_v22 = vpack.c.bf16 %v1396_v19, %v1396_v19  ;;  %1403 = vst.msk [vmem:[%s318_s26 + $0x4] sm:$0x3] %vm339_vm0, %v1399_v18 }
 0x1db   : > { %1404 = vst.msk [vmem:[%s318_s26 + $0x6] sm:$0x3] %vm339_vm0, %v1400_v22 }
 0x1dc PF: > { %s17_s24 = sadd.s32 1, %s1567_s24  }
 0x1dd   : > { %p14_p4 = scmp.ge.s32.totalorder %s17_s24, 4  }
 0x1df   :  { %16 = sbr.rel (!%p14_p4) target bundleno = 1 (0x1), region = 86 }

// kernel: focalnet_forward.35
= control target key start
LH: loop header
LB: loop body
LE: loop exit
PB: predicated region body
PF: predicated region fallthrough
CT: control target
= control target key end

     0   :  { %s377_s0 = inlined_call_operand.vmem [shape: bf16[32,128], index: 0, kind: input, shape index: {}]   ;;  %s378_s1 = inlined_call_operand.vmem [shape: bf16[128,128], index: 1, kind: input, shape index: {}]   ;;  %s379_s2 = inlined_call_operand.vmem [shape: f32[1,128], index: 2, kind: input, shape index: {}]   ;;  %s380_s3 = inlined_call_operand.vmem [shape: f32[32,128], index: 3, kind: input, shape index: {}]   ;;  %s381_s4 = inlined_call_operand.hbm [shape: f32[32,128], index: 4, kind: output, shape index: {}]  }
   0x1   :  { %v258_v0 = vld [vmem:[%s378_s1] sm:$0xff]   ;;  %v259_v1 = vld [vmem:[%s378_s1 + $0x8] sm:$0xff]   ;;  %v260_v2 = vld [vmem:[%s378_s1 + $0x10] sm:$0xff]  }
   0x2   :  { %235 = vmatprep.subr.bf16.mxu0 %v258_v0  ;;  %v261_v3 = vld [vmem:[%s378_s1 + $0x18] sm:$0xff]   ;;  %v266_v4 = vld [vmem:[%s377_s0] sm:$0xff]  }
   0x3   :  { %236 = vmatpush3.bf16.msra.mxu0 %v258_v0  ;;  %251 = vmatprep.mubr.bf16.mxu0 %v266_v4 }
   0x4   :  { %237 = vmatprep.subr.bf16.mxu0 %v259_v1 }
   0x7   :  { %238 = vmatpush3.bf16.msra.mxu0 %v259_v1 }
   0x8   :  { %239 = vmatprep.subr.bf16.mxu0 %v260_v2 }
   0x9   :  { %9 = vsyncpa [#allocation4], 0  ;;  %v262_v5 = vld [vmem:[%s378_s1 + $0x20] sm:$0xff]   ;;  %v263_v6 = vld [vmem:[%s378_s1 + $0x28] sm:$0xff]   ;;  %s292_s15 = smov [#allocation3]  }
   0xa   :  { %v264_v7 = vld [vmem:[%s378_s1 + $0x30] sm:$0xff]   ;;  %v265_v8 = vld [vmem:[%s378_s1 + $0x38] sm:$0xff]   ;;  %v267_v9 = vld [vmem:[%s377_s0 + $0x8] sm:$0xff]   ;;  %s203_s16 = sshll.u32 %s292_s15, 4  ;;  %s204_s16 = int_to_ptr.vmem [resolvable:$true] %s203_s16 }
   0xb   :  { %240 = vmatpush3.bf16.msra.mxu0 %v260_v2  ;;  %v224_v10 = vld [vmem:[%s379_s2] ss:$0 sm:$0xff]  ;;  %v188_v12 = vld [vmem:[%s380_s3 + $0x10] sm:$0xff]  ;;  %v189_v18 = vld [vmem:[%s380_s3 + $0x18] sm:$0xff]  ;;  %s268_s18 = scalar_lea.vmem %s204_s16, 512  ;;  %p273_p1 = scmp.lt.s32.totalorder %s204_s16, %s204_s16 }
   0xc   :  { %241 = vmatprep.subr.bf16.mxu0 %v261_v3  ;;  %v186_v15 = vld [vmem:[%s380_s3] sm:$0xff]  ;;  %v187_v22 = vld [vmem:[%s380_s3 + $0x8] sm:$0xff]  ;;  %p269_p0 = scmp.ne.s32.totalorder %s204_s16, %s268_s18  ;;  %p274_p2 = scmp.lt.s32.totalorder %s268_s18, %s268_s18 }
   0xe   :  { %p275_p3 = por %p274_p2, %p273_p1 }
   0xf   :  { %242 = vmatpush3.bf16.msra.mxu0 %v261_v3 }
  0x10   :  { %243 = vmatprep.subr.bf16.mxu0 %v262_v5  ;;  %p276_p4 = pnand %p275_p3, %p269_p0 }
  0x13   :  { %244 = vmatpush3.bf16.msra.mxu0 %v262_v5 }
  0x14   :  { %245 = vmatprep.subr.bf16.mxu0 %v263_v6 }
  0x17   :  { %246 = vmatpush3.bf16.msra.mxu0 %v263_v6 }
  0x18   :  { %247 = vmatprep.subr.bf16.mxu0 %v264_v7 }
  0x1b   :  { %248 = vmatpush3.bf16.msra.mxu0 %v264_v7 }
  0x1c   :  { %249 = vmatprep.subr.bf16.mxu0 %v265_v8 }
  0x1f   :  { %250 = vmatpush3.bf16.msra.mxu0 %v265_v8 }
  0x22   :  { %252 = vmatmul.mubr.bf16.vlgmr.msra.gmra.mrb[0].mxu0 %v267_v9 }
  0xf5   :  { %v253_v11 = vpop.f32.mrb[0].mxu0 }
  0xf6   :  { %v184_v13 = vadd.f32 %v253_v11, %v224_v10  ;;  %v145_v14 = vpop.f32.mrb[1].mxu0 }
  0xf7   :  { %v182_v16 = vadd.f32 %v224_v10, %v145_v14  ;;  %v254_v17 = vpop.f32.mrb[2].mxu0 }
  0xf8   :  { %v192_v19 = vadd.f32 %v188_v12, %v184_v13  ;;  %v185_v20 = vadd.f32 %v254_v17, %v224_v10  ;;  %v148_v21 = vpop.f32.mrb[3].mxu0 }
  0xf9   :  { %v190_v23 = vadd.f32 %v186_v15, %v182_v16  ;;  %v183_v24 = vadd.f32 %v224_v10, %v148_v21 }
  0xfa   :  { %196 = vst [vmem:[#allocation3 + $0x10] sm:$0xff] %v192_v19  ;;  %v193_v25 = vadd.f32 %v189_v18, %v185_v20 }
  0xfb   :  { %194 = vst [vmem:[#allocation3] sm:$0xff] %v190_v23  ;;  %v191_v26 = vadd.f32 %v187_v22, %v183_v24 }
  0xfc   :  { %197 = vst [vmem:[#allocation3 + $0x18] sm:$0xff] %v193_v25 }
  0xfd   :  { %195 = vst [vmem:[#allocation3 + $0x8] sm:$0xff] %v191_v26 }
  0xfe   :  { %279 = shalt.err (!%p276_p4)
}
  0xff   :  { %s280_s3 = scalar_lea.hbm %s381_s4, 512 }
 0x100   :  { %p281_p5 = scmp.ne.s32.totalorder %s381_s4, %s280_s3  ;;  %p284_p6 = scmp.lt.u32.totalorder %s280_s3, %s381_s4 }
 0x102   :  { %p286_p7 = pnand %p284_p6, %p281_p5 }
 0x104   :  { %289 = shalt.err (!%p286_p7)
}
 0x105   :  { %s293_s25 = smov 128   ;;  %s294_s26 = smov 8  }
 0x106   :  { %209 = dma.vmem_to_hbm [thread:$0]  %s204_s16, 512, %s381_s4, [#allocation4], %s293_s25, %s293_s25, %s294_s26  }
 0x107   :  { %290 = dma.done.wait [#allocation4], 512  }
 0x108   :  { %291 = vsyncadd [#allocation4], 4294966784 }
 0x109   :  { %213 = vsyncpa [#allocation4], 1 }

</bundles_post_ra>
